<compile_context>
chip_gen: v5e
topology: v5e:2x2
jax: 0.10.0
libtpu: 0.0.40
codegen_flags: <defaults>
</compile_context>

<pallas_src>
import functools

import jax
import jax.numpy as jnp
from jax.experimental import pallas as pl
from jax.experimental.pallas import tpu as pltpu


def _round_up(x, m):
    return (x + m - 1) // m * m


# --------------------------- fused conv kernel -----------------------------

def _conv_kernel(x_ref, w_ref, b_ref, o_ref, *scratch, KH, KW, Wo, pool):
    """Valid conv (stride 1) + bias + ReLU (+ fused 2x2 max-pool).

    x_ref : (1, H, W, Cin)        full image block (resident across oh steps)
    w_ref : (KH*KW, Cin, Cout)    bf16 tap weights
    b_ref : (1, Cout)             f32 bias
    o_ref : (1, 1, Wo_out, Cout)  one (pooled) output row
    scratch (pool only): VMEM (Wo, Cout) f32 row-max buffer
    """
    oh = pl.program_id(1)
    nrows = 2 if pool else 1
    row0 = oh * nrows
    bias = b_ref[...]                                    # (1, Cout) f32

    rows = []
    for r in range(nrows):
        acc = None
        for i in range(KH):
            for j in range(KW):
                # (Wo, Cin) shifted slab read straight out of the VMEM image
                lhs = x_ref[0, row0 + r + i, pl.ds(j, Wo), :].astype(jnp.bfloat16)
                rhs = w_ref[i * KW + j, :, :]            # (Cin, Cout) bf16
                part = jnp.dot(lhs, rhs, preferred_element_type=jnp.float32)
                acc = part if acc is None else acc + part
        rows.append(jnp.maximum(acc + bias, 0.0))        # relu(conv + b), f32

    if pool:
        rowmax_ref = scratch[0]
        # max over the two conv output rows (H-direction of the 2x2 pool)
        rowmax_ref[...] = jnp.maximum(rows[0], rows[1])
        # W-direction of the pool: stride-2 sublane reads of the row-max
        even = rowmax_ref[pl.ds(0, Wo // 2, stride=2), :]
        odd = rowmax_ref[pl.ds(1, Wo // 2, stride=2), :]
        o_ref[0, 0, :, :] = jnp.maximum(even, odd).astype(o_ref.dtype)
    else:
        o_ref[0, 0, :, :] = rows[0].astype(o_ref.dtype)


def conv2d_relu_pool(x, w, b, *, KH, KW, pool):
    """x: (N,H,W,Cin) NHWC. w: (KH*KW,Cin,Cout) bf16. b: (1,Cout) f32."""
    N, H, W, Cin = x.shape
    taps, _, Cout = w.shape
    assert taps == KH * KW
    Ho, Wo = H - KH + 1, W - KW + 1
    if pool:
        assert Ho % 2 == 0 and Wo % 2 == 0
        Hg, Ho_out, Wo_out = Ho // 2, Ho // 2, Wo // 2
    else:
        Hg, Ho_out, Wo_out = Ho, Ho, Wo

    flops = 2 * N * Ho * Wo * KH * KW * Cin * Cout
    bytes_accessed = int(x.size * x.dtype.itemsize + w.size * 2
                         + N * Ho_out * Wo_out * Cout * 2)

    return pl.pallas_call(
        functools.partial(_conv_kernel, KH=KH, KW=KW, Wo=Wo, pool=pool),
        grid=(N, Hg),
        out_shape=jax.ShapeDtypeStruct((N, Ho_out, Wo_out, Cout), jnp.bfloat16),
        in_specs=[
            pl.BlockSpec((1, H, W, Cin), lambda n, oh: (n, 0, 0, 0)),
            pl.BlockSpec((taps, Cin, Cout), lambda n, oh: (0, 0, 0)),
            pl.BlockSpec((1, Cout), lambda n, oh: (0, 0)),
        ],
        out_specs=pl.BlockSpec((1, 1, Wo_out, Cout), lambda n, oh: (n, oh, 0, 0)),
        scratch_shapes=[pltpu.VMEM((Wo, Cout), jnp.float32)] if pool else [],
        compiler_params=pltpu.CompilerParams(
            dimension_semantics=("parallel", "arbitrary"),
            vmem_limit_bytes=48 * 1024 * 1024,
        ),
        cost_estimate=pl.CostEstimate(
            flops=flops, transcendentals=0, bytes_accessed=bytes_accessed),
    )(x, w, b)


# ------------------------- row-tiled matmul kernel --------------------------

def _matmul_bias_kernel(x_ref, w_ref, b_ref, o_ref, *, relu):
    acc = jnp.dot(x_ref[...].astype(jnp.bfloat16), w_ref[...],
                  preferred_element_type=jnp.float32)
    acc = acc + b_ref[...]                               # (TM,N)+(1,N)
    if relu:
        acc = jnp.maximum(acc, 0.0)
    o_ref[...] = acc.astype(o_ref.dtype)


def matmul_bias_act(x, w, b, relu, tm=512):
    """out = relu?(x @ w + b). x:(M,K) (M multiple of 8), w:(K,N) bf16, b:(1,N)."""
    M, K = x.shape
    Kw, Nf = w.shape
    assert K == Kw and M % 8 == 0
    TM = min(tm, M)          # row tile; TM is a multiple of 8, sized << VMEM
    assert M % TM == 0

    bytes_accessed = int(x.size * x.dtype.itemsize + w.size * 2
                         + b.size * 4 + M * Nf * 4)
    return pl.pallas_call(
        functools.partial(_matmul_bias_kernel, relu=relu),
        grid=(M // TM,),
        out_shape=jax.ShapeDtypeStruct((M, Nf), jnp.float32),
        in_specs=[
            pl.BlockSpec((TM, K), lambda i: (i, 0)),
            pl.BlockSpec((K, Nf), lambda i: (0, 0)),
            pl.BlockSpec((1, Nf), lambda i: (0, 0)),
        ],
        out_specs=pl.BlockSpec((TM, Nf), lambda i: (i, 0)),
        compiler_params=pltpu.CompilerParams(
            dimension_semantics=("parallel",),
            vmem_limit_bytes=48 * 1024 * 1024,
        ),
        cost_estimate=pl.CostEstimate(
            flops=2 * M * K * Nf, transcendentals=0, bytes_accessed=bytes_accessed),
    )(x, w, b)


# ------------------------------ params / glue -------------------------------

def init_params(key, out_dim):
    ks = jax.random.split(key, 10)

    def w(k, shape, fan_in):
        return (jax.random.normal(k, shape, jnp.float32) / jnp.sqrt(fan_in)).astype(jnp.float32)

    return {
        "w1": w(ks[0], (5, 5, 3, 16), 5 * 5 * 3),
        "b1": w(ks[1], (16,), 16),
        "w2": w(ks[2], (5, 5, 16, 32), 5 * 5 * 16),
        "b2": w(ks[3], (32,), 32),
        "w3": w(ks[4], (3, 3, 32, 64), 3 * 3 * 32),
        "b3": w(ks[5], (64,), 64),
        "wl1": w(ks[6], (64 * 3 * 3, 500), 64 * 3 * 3),
        "bl1": w(ks[7], (500,), 500),
        "wl2": w(ks[8], (500, out_dim), 500),
        "bl2": w(ks[9], (out_dim,), out_dim),
    }


def prepare_params(p):
    """One-time preprocessing hoisted out of the forward path:
    conv weights -> (KH*KW, Cin, Cout) bf16; linear weights -> bf16; biases -> (1,N) f32."""
    def conv_w(w):
        KH, KW, Cin, Cout = w.shape
        return w.reshape(KH * KW, Cin, Cout).astype(jnp.bfloat16)

    return {
        "w1": conv_w(p["w1"]), "b1": p["b1"].reshape(1, -1).astype(jnp.float32),
        "w2": conv_w(p["w2"]), "b2": p["b2"].reshape(1, -1).astype(jnp.float32),
        "w3": conv_w(p["w3"]), "b3": p["b3"].reshape(1, -1).astype(jnp.float32),
        "wl1": p["wl1"].astype(jnp.bfloat16), "bl1": p["bl1"].reshape(1, -1).astype(jnp.float32),
        "wl2": p["wl2"].astype(jnp.bfloat16), "bl2": p["bl2"].reshape(1, -1).astype(jnp.float32),
    }


def cnn_forward(x_nchw, params):
    # dropout is identity (inference semantics)
    N = x_nchw.shape[0]
    x = jnp.transpose(x_nchw, (0, 2, 3, 1))                                    # NCHW -> NHWC
    x = conv2d_relu_pool(x, params["w1"], params["b1"], KH=5, KW=5, pool=True)   # (N,14,14,16)
    x = conv2d_relu_pool(x, params["w2"], params["b2"], KH=5, KW=5, pool=True)   # (N, 5, 5,32)
    x = conv2d_relu_pool(x, params["w3"], params["b3"], KH=3, KW=3, pool=False)  # (N, 3, 3,64)
    # PyTorch flattens in NCHW (C,H,W) order
    x = jnp.transpose(x, (0, 3, 1, 2)).reshape(N, -1)                          # (N, 576) bf16
    Mp = max(8, _round_up(N, 8))
    if Mp != N:
        x = jnp.pad(x, ((0, Mp - N), (0, 0)))          # pad rows once, slice once at the end
    x = matmul_bias_act(x, params["wl1"], params["bl1"], relu=True)            # (Mp, 500)
    x = matmul_bias_act(x, params["wl2"], params["bl2"], relu=False)           # (Mp, out_dim)
    return x[:N]


if __name__ == "__main__":
    key = jax.random.PRNGKey(0)
    k_x, k_p = jax.random.split(key)

    out_dim = 10
    # Input 32x32x3 is required so the conv/pool stack yields 64*3*3 = 576 features.
    x = jax.random.normal(k_x, (2, 3, 32, 32), jnp.float32)   # NCHW like PyTorch
    params = prepare_params(init_params(k_p, out_dim))

    forward = jax.jit(cnn_forward)
    y = forward(x, params)
    jax.block_until_ready(y)
    assert y.shape == (2, out_dim), y.shape
    print("KERNEL_OK")
</pallas_src>

<mosaic_0001>
module attributes {stable_mosaic.version = 11 : i64} {
  func.func @_conv_kernel(%arg0: i32, %arg1: i32, %arg2: memref<1x14x14x16xbf16, #tpu.memory_space<vmem>>, %arg3: memref<25x16x32xbf16, #tpu.memory_space<vmem>>, %arg4: memref<1x32xf32, #tpu.memory_space<vmem>>, %arg5: memref<1x1x5x32xbf16, #tpu.memory_space<vmem>>, %arg6: memref<10x32xf32, #tpu.memory_space<vmem>>) attributes {dimension_semantics = [#tpu.dimension_semantics<parallel>, #tpu.dimension_semantics<arbitrary>], iteration_bounds = array<i64: 2, 5>, scalar_prefetch = 0 : i64, scratch_operands = 1 : i64, tpu.core_type = #tpu.core_type<tc>, window_params = [{transform_indices = @transform_0, window_bounds = array<i64: 1, 14, 14, 16>}, {pipeline_mode = #tpu.pipeline_mode<synchronous>, transform_indices = @transform_1, window_bounds = array<i64: 25, 16, 32>}, {pipeline_mode = #tpu.pipeline_mode<synchronous>, transform_indices = @transform_2, window_bounds = array<i64: 1, 32>}, {transform_indices = @transform_3, window_bounds = array<i64: 1, 1, 5, 32>}]} {
    %c2_i32 = arith.constant 2 : i32
    %0 = arith.muli %arg1, %c2_i32 : i32
    %c0 = arith.constant 0 : index
    %c0_0 = arith.constant 0 : index
    %1 = vector.load %arg4[%c0, %c0_0] : memref<1x32xf32, #tpu.memory_space<vmem>>, vector<1x32xf32>
    %c0_i32 = arith.constant 0 : i32
    %2 = arith.addi %0, %c0_i32 : i32
    %c0_i32_1 = arith.constant 0 : i32
    %3 = arith.addi %2, %c0_i32_1 : i32
    %c0_2 = arith.constant 0 : index
    %4 = arith.index_cast %3 : i32 to index
    %c0_3 = arith.constant 0 : index
    %c0_4 = arith.constant 0 : index
    %5 = vector.load %arg2[%c0_2, %4, %c0_3, %c0_4] : memref<1x14x14x16xbf16, #tpu.memory_space<vmem>>, vector<1x1x10x16xbf16>
    %6 = vector.shape_cast %5 : vector<1x1x10x16xbf16> to vector<10x16xbf16>
    %c0_5 = arith.constant 0 : index
    %c0_6 = arith.constant 0 : index
    %c0_7 = arith.constant 0 : index
    %7 = vector.load %arg3[%c0_5, %c0_6, %c0_7] : memref<25x16x32xbf16, #tpu.memory_space<vmem>>, vector<1x16x32xbf16>
    %8 = vector.shape_cast %7 : vector<1x16x32xbf16> to vector<16x32xbf16>
    %cst = arith.constant dense<0.000000e+00> : vector<10x32xf32>
    %9 = tpu.matmul %6, %8, %cst {dimension_numbers = #tpu.dot_dimension_numbers<[1], [0], [0], [1], [0, 0, 1, 1], [], []>} : vector<10x16xbf16>, vector<16x32xbf16>, vector<10x32xf32> -> vector<10x32xf32>
    %c0_i32_8 = arith.constant 0 : i32
    %10 = arith.addi %0, %c0_i32_8 : i32
    %c0_i32_9 = arith.constant 0 : i32
    %11 = arith.addi %10, %c0_i32_9 : i32
    %c0_10 = arith.constant 0 : index
    %12 = arith.index_cast %11 : i32 to index
    %c1 = arith.constant 1 : index
    %c0_11 = arith.constant 0 : index
    %13 = vector.load %arg2[%c0_10, %12, %c1, %c0_11] : memref<1x14x14x16xbf16, #tpu.memory_space<vmem>>, vector<1x1x10x16xbf16>
    %14 = vector.shape_cast %13 : vector<1x1x10x16xbf16> to vector<10x16xbf16>
    %c1_12 = arith.constant 1 : index
    %c0_13 = arith.constant 0 : index
    %c0_14 = arith.constant 0 : index
    %15 = vector.load %arg3[%c1_12, %c0_13, %c0_14] : memref<25x16x32xbf16, #tpu.memory_space<vmem>>, vector<1x16x32xbf16>
    %16 = vector.shape_cast %15 : vector<1x16x32xbf16> to vector<16x32xbf16>
    %cst_15 = arith.constant dense<0.000000e+00> : vector<10x32xf32>
    %17 = tpu.matmul %14, %16, %cst_15 {dimension_numbers = #tpu.dot_dimension_numbers<[1], [0], [0], [1], [0, 0, 1, 1], [], []>} : vector<10x16xbf16>, vector<16x32xbf16>, vector<10x32xf32> -> vector<10x32xf32>
    %18 = arith.addf %9, %17 : vector<10x32xf32>
    %c0_i32_16 = arith.constant 0 : i32
    %19 = arith.addi %0, %c0_i32_16 : i32
    %c0_i32_17 = arith.constant 0 : i32
    %20 = arith.addi %19, %c0_i32_17 : i32
    %c0_18 = arith.constant 0 : index
    %21 = arith.index_cast %20 : i32 to index
    %c2 = arith.constant 2 : index
    %c0_19 = arith.constant 0 : index
    %22 = vector.load %arg2[%c0_18, %21, %c2, %c0_19] : memref<1x14x14x16xbf16, #tpu.memory_space<vmem>>, vector<1x1x10x16xbf16>
    %23 = vector.shape_cast %22 : vector<1x1x10x16xbf16> to vector<10x16xbf16>
    %c2_20 = arith.constant 2 : index
    %c0_21 = arith.constant 0 : index
    %c0_22 = arith.constant 0 : index
    %24 = vector.load %arg3[%c2_20, %c0_21, %c0_22] : memref<25x16x32xbf16, #tpu.memory_space<vmem>>, vector<1x16x32xbf16>
    %25 = vector.shape_cast %24 : vector<1x16x32xbf16> to vector<16x32xbf16>
    %cst_23 = arith.constant dense<0.000000e+00> : vector<10x32xf32>
    %26 = tpu.matmul %23, %25, %cst_23 {dimension_numbers = #tpu.dot_dimension_numbers<[1], [0], [0], [1], [0, 0, 1, 1], [], []>} : vector<10x16xbf16>, vector<16x32xbf16>, vector<10x32xf32> -> vector<10x32xf32>
    %27 = arith.addf %18, %26 : vector<10x32xf32>
    %c0_i32_24 = arith.constant 0 : i32
    %28 = arith.addi %0, %c0_i32_24 : i32
    %c0_i32_25 = arith.constant 0 : i32
    %29 = arith.addi %28, %c0_i32_25 : i32
    %c0_26 = arith.constant 0 : index
    %30 = arith.index_cast %29 : i32 to index
    %c3 = arith.constant 3 : index
    %c0_27 = arith.constant 0 : index
    %31 = vector.load %arg2[%c0_26, %30, %c3, %c0_27] : memref<1x14x14x16xbf16, #tpu.memory_space<vmem>>, vector<1x1x10x16xbf16>
    %32 = vector.shape_cast %31 : vector<1x1x10x16xbf16> to vector<10x16xbf16>
    %c3_28 = arith.constant 3 : index
    %c0_29 = arith.constant 0 : index
    %c0_30 = arith.constant 0 : index
    %33 = vector.load %arg3[%c3_28, %c0_29, %c0_30] : memref<25x16x32xbf16, #tpu.memory_space<vmem>>, vector<1x16x32xbf16>
    %34 = vector.shape_cast %33 : vector<1x16x32xbf16> to vector<16x32xbf16>
    %cst_31 = arith.constant dense<0.000000e+00> : vector<10x32xf32>
    %35 = tpu.matmul %32, %34, %cst_31 {dimension_numbers = #tpu.dot_dimension_numbers<[1], [0], [0], [1], [0, 0, 1, 1], [], []>} : vector<10x16xbf16>, vector<16x32xbf16>, vector<10x32xf32> -> vector<10x32xf32>
    %36 = arith.addf %27, %35 : vector<10x32xf32>
    %c0_i32_32 = arith.constant 0 : i32
    %37 = arith.addi %0, %c0_i32_32 : i32
    %c0_i32_33 = arith.constant 0 : i32
    %38 = arith.addi %37, %c0_i32_33 : i32
    %c0_34 = arith.constant 0 : index
    %39 = arith.index_cast %38 : i32 to index
    %c4 = arith.constant 4 : index
    %c0_35 = arith.constant 0 : index
    %40 = vector.load %arg2[%c0_34, %39, %c4, %c0_35] : memref<1x14x14x16xbf16, #tpu.memory_space<vmem>>, vector<1x1x10x16xbf16>
    %41 = vector.shape_cast %40 : vector<1x1x10x16xbf16> to vector<10x16xbf16>
    %c4_36 = arith.constant 4 : index
    %c0_37 = arith.constant 0 : index
    %c0_38 = arith.constant 0 : index
    %42 = vector.load %arg3[%c4_36, %c0_37, %c0_38] : memref<25x16x32xbf16, #tpu.memory_space<vmem>>, vector<1x16x32xbf16>
    %43 = vector.shape_cast %42 : vector<1x16x32xbf16> to vector<16x32xbf16>
    %cst_39 = arith.constant dense<0.000000e+00> : vector<10x32xf32>
    %44 = tpu.matmul %41, %43, %cst_39 {dimension_numbers = #tpu.dot_dimension_numbers<[1], [0], [0], [1], [0, 0, 1, 1], [], []>} : vector<10x16xbf16>, vector<16x32xbf16>, vector<10x32xf32> -> vector<10x32xf32>
    %45 = arith.addf %36, %44 : vector<10x32xf32>
    %c0_i32_40 = arith.constant 0 : i32
    %46 = arith.addi %0, %c0_i32_40 : i32
    %c1_i32 = arith.constant 1 : i32
    %47 = arith.addi %46, %c1_i32 : i32
    %c0_41 = arith.constant 0 : index
    %48 = arith.index_cast %47 : i32 to index
    %c0_42 = arith.constant 0 : index
    %c0_43 = arith.constant 0 : index
    %49 = vector.load %arg2[%c0_41, %48, %c0_42, %c0_43] : memref<1x14x14x16xbf16, #tpu.memory_space<vmem>>, vector<1x1x10x16xbf16>
    %50 = vector.shape_cast %49 : vector<1x1x10x16xbf16> to vector<10x16xbf16>
    %c5 = arith.constant 5 : index
    %c0_44 = arith.constant 0 : index
    %c0_45 = arith.constant 0 : index
    %51 = vector.load %arg3[%c5, %c0_44, %c0_45] : memref<25x16x32xbf16, #tpu.memory_space<vmem>>, vector<1x16x32xbf16>
    %52 = vector.shape_cast %51 : vector<1x16x32xbf16> to vector<16x32xbf16>
    %cst_46 = arith.constant dense<0.000000e+00> : vector<10x32xf32>
    %53 = tpu.matmul %50, %52, %cst_46 {dimension_numbers = #tpu.dot_dimension_numbers<[1], [0], [0], [1], [0, 0, 1, 1], [], []>} : vector<10x16xbf16>, vector<16x32xbf16>, vector<10x32xf32> -> vector<10x32xf32>
    %54 = arith.addf %45, %53 : vector<10x32xf32>
    %c0_i32_47 = arith.constant 0 : i32
    %55 = arith.addi %0, %c0_i32_47 : i32
    %c1_i32_48 = arith.constant 1 : i32
    %56 = arith.addi %55, %c1_i32_48 : i32
    %c0_49 = arith.constant 0 : index
    %57 = arith.index_cast %56 : i32 to index
    %c1_50 = arith.constant 1 : index
    %c0_51 = arith.constant 0 : index
    %58 = vector.load %arg2[%c0_49, %57, %c1_50, %c0_51] : memref<1x14x14x16xbf16, #tpu.memory_space<vmem>>, vector<1x1x10x16xbf16>
    %59 = vector.shape_cast %58 : vector<1x1x10x16xbf16> to vector<10x16xbf16>
    %c6 = arith.constant 6 : index
    %c0_52 = arith.constant 0 : index
    %c0_53 = arith.constant 0 : index
    %60 = vector.load %arg3[%c6, %c0_52, %c0_53] : memref<25x16x32xbf16, #tpu.memory_space<vmem>>, vector<1x16x32xbf16>
    %61 = vector.shape_cast %60 : vector<1x16x32xbf16> to vector<16x32xbf16>
    %cst_54 = arith.constant dense<0.000000e+00> : vector<10x32xf32>
    %62 = tpu.matmul %59, %61, %cst_54 {dimension_numbers = #tpu.dot_dimension_numbers<[1], [0], [0], [1], [0, 0, 1, 1], [], []>} : vector<10x16xbf16>, vector<16x32xbf16>, vector<10x32xf32> -> vector<10x32xf32>
    %63 = arith.addf %54, %62 : vector<10x32xf32>
    %c0_i32_55 = arith.constant 0 : i32
    %64 = arith.addi %0, %c0_i32_55 : i32
    %c1_i32_56 = arith.constant 1 : i32
    %65 = arith.addi %64, %c1_i32_56 : i32
    %c0_57 = arith.constant 0 : index
    %66 = arith.index_cast %65 : i32 to index
    %c2_58 = arith.constant 2 : index
    %c0_59 = arith.constant 0 : index
    %67 = vector.load %arg2[%c0_57, %66, %c2_58, %c0_59] : memref<1x14x14x16xbf16, #tpu.memory_space<vmem>>, vector<1x1x10x16xbf16>
    %68 = vector.shape_cast %67 : vector<1x1x10x16xbf16> to vector<10x16xbf16>
    %c7 = arith.constant 7 : index
    %c0_60 = arith.constant 0 : index
    %c0_61 = arith.constant 0 : index
    %69 = vector.load %arg3[%c7, %c0_60, %c0_61] : memref<25x16x32xbf16, #tpu.memory_space<vmem>>, vector<1x16x32xbf16>
    %70 = vector.shape_cast %69 : vector<1x16x32xbf16> to vector<16x32xbf16>
    %cst_62 = arith.constant dense<0.000000e+00> : vector<10x32xf32>
    %71 = tpu.matmul %68, %70, %cst_62 {dimension_numbers = #tpu.dot_dimension_numbers<[1], [0], [0], [1], [0, 0, 1, 1], [], []>} : vector<10x16xbf16>, vector<16x32xbf16>, vector<10x32xf32> -> vector<10x32xf32>
    %72 = arith.addf %63, %71 : vector<10x32xf32>
    %c0_i32_63 = arith.constant 0 : i32
    %73 = arith.addi %0, %c0_i32_63 : i32
    %c1_i32_64 = arith.constant 1 : i32
    %74 = arith.addi %73, %c1_i32_64 : i32
    %c0_65 = arith.constant 0 : index
    %75 = arith.index_cast %74 : i32 to index
    %c3_66 = arith.constant 3 : index
    %c0_67 = arith.constant 0 : index
    %76 = vector.load %arg2[%c0_65, %75, %c3_66, %c0_67] : memref<1x14x14x16xbf16, #tpu.memory_space<vmem>>, vector<1x1x10x16xbf16>
    %77 = vector.shape_cast %76 : vector<1x1x10x16xbf16> to vector<10x16xbf16>
    %c8 = arith.constant 8 : index
    %c0_68 = arith.constant 0 : index
    %c0_69 = arith.constant 0 : index
    %78 = vector.load %arg3[%c8, %c0_68, %c0_69] : memref<25x16x32xbf16, #tpu.memory_space<vmem>>, vector<1x16x32xbf16>
    %79 = vector.shape_cast %78 : vector<1x16x32xbf16> to vector<16x32xbf16>
    %cst_70 = arith.constant dense<0.000000e+00> : vector<10x32xf32>
    %80 = tpu.matmul %77, %79, %cst_70 {dimension_numbers = #tpu.dot_dimension_numbers<[1], [0], [0], [1], [0, 0, 1, 1], [], []>} : vector<10x16xbf16>, vector<16x32xbf16>, vector<10x32xf32> -> vector<10x32xf32>
    %81 = arith.addf %72, %80 : vector<10x32xf32>
    %c0_i32_71 = arith.constant 0 : i32
    %82 = arith.addi %0, %c0_i32_71 : i32
    %c1_i32_72 = arith.constant 1 : i32
    %83 = arith.addi %82, %c1_i32_72 : i32
    %c0_73 = arith.constant 0 : index
    %84 = arith.index_cast %83 : i32 to index
    %c4_74 = arith.constant 4 : index
    %c0_75 = arith.constant 0 : index
    %85 = vector.load %arg2[%c0_73, %84, %c4_74, %c0_75] : memref<1x14x14x16xbf16, #tpu.memory_space<vmem>>, vector<1x1x10x16xbf16>
    %86 = vector.shape_cast %85 : vector<1x1x10x16xbf16> to vector<10x16xbf16>
    %c9 = arith.constant 9 : index
    %c0_76 = arith.constant 0 : index
    %c0_77 = arith.constant 0 : index
    %87 = vector.load %arg3[%c9, %c0_76, %c0_77] : memref<25x16x32xbf16, #tpu.memory_space<vmem>>, vector<1x16x32xbf16>
    %88 = vector.shape_cast %87 : vector<1x16x32xbf16> to vector<16x32xbf16>
    %cst_78 = arith.constant dense<0.000000e+00> : vector<10x32xf32>
    %89 = tpu.matmul %86, %88, %cst_78 {dimension_numbers = #tpu.dot_dimension_numbers<[1], [0], [0], [1], [0, 0, 1, 1], [], []>} : vector<10x16xbf16>, vector<16x32xbf16>, vector<10x32xf32> -> vector<10x32xf32>
    %90 = arith.addf %81, %89 : vector<10x32xf32>
    %c0_i32_79 = arith.constant 0 : i32
    %91 = arith.addi %0, %c0_i32_79 : i32
    %c2_i32_80 = arith.constant 2 : i32
    %92 = arith.addi %91, %c2_i32_80 : i32
    %c0_81 = arith.constant 0 : index
    %93 = arith.index_cast %92 : i32 to index
    %c0_82 = arith.constant 0 : index
    %c0_83 = arith.constant 0 : index
    %94 = vector.load %arg2[%c0_81, %93, %c0_82, %c0_83] : memref<1x14x14x16xbf16, #tpu.memory_space<vmem>>, vector<1x1x10x16xbf16>
    %95 = vector.shape_cast %94 : vector<1x1x10x16xbf16> to vector<10x16xbf16>
    %c10 = arith.constant 10 : index
    %c0_84 = arith.constant 0 : index
    %c0_85 = arith.constant 0 : index
    %96 = vector.load %arg3[%c10, %c0_84, %c0_85] : memref<25x16x32xbf16, #tpu.memory_space<vmem>>, vector<1x16x32xbf16>
    %97 = vector.shape_cast %96 : vector<1x16x32xbf16> to vector<16x32xbf16>
    %cst_86 = arith.constant dense<0.000000e+00> : vector<10x32xf32>
    %98 = tpu.matmul %95, %97, %cst_86 {dimension_numbers = #tpu.dot_dimension_numbers<[1], [0], [0], [1], [0, 0, 1, 1], [], []>} : vector<10x16xbf16>, vector<16x32xbf16>, vector<10x32xf32> -> vector<10x32xf32>
    %99 = arith.addf %90, %98 : vector<10x32xf32>
    %c0_i32_87 = arith.constant 0 : i32
    %100 = arith.addi %0, %c0_i32_87 : i32
    %c2_i32_88 = arith.constant 2 : i32
    %101 = arith.addi %100, %c2_i32_88 : i32
    %c0_89 = arith.constant 0 : index
    %102 = arith.index_cast %101 : i32 to index
    %c1_90 = arith.constant 1 : index
    %c0_91 = arith.constant 0 : index
    %103 = vector.load %arg2[%c0_89, %102, %c1_90, %c0_91] : memref<1x14x14x16xbf16, #tpu.memory_space<vmem>>, vector<1x1x10x16xbf16>
    %104 = vector.shape_cast %103 : vector<1x1x10x16xbf16> to vector<10x16xbf16>
    %c11 = arith.constant 11 : index
    %c0_92 = arith.constant 0 : index
    %c0_93 = arith.constant 0 : index
    %105 = vector.load %arg3[%c11, %c0_92, %c0_93] : memref<25x16x32xbf16, #tpu.memory_space<vmem>>, vector<1x16x32xbf16>
    %106 = vector.shape_cast %105 : vector<1x16x32xbf16> to vector<16x32xbf16>
    %cst_94 = arith.constant dense<0.000000e+00> : vector<10x32xf32>
    %107 = tpu.matmul %104, %106, %cst_94 {dimension_numbers = #tpu.dot_dimension_numbers<[1], [0], [0], [1], [0, 0, 1, 1], [], []>} : vector<10x16xbf16>, vector<16x32xbf16>, vector<10x32xf32> -> vector<10x32xf32>
    %108 = arith.addf %99, %107 : vector<10x32xf32>
    %c0_i32_95 = arith.constant 0 : i32
    %109 = arith.addi %0, %c0_i32_95 : i32
    %c2_i32_96 = arith.constant 2 : i32
    %110 = arith.addi %109, %c2_i32_96 : i32
    %c0_97 = arith.constant 0 : index
    %111 = arith.index_cast %110 : i32 to index
    %c2_98 = arith.constant 2 : index
    %c0_99 = arith.constant 0 : index
    %112 = vector.load %arg2[%c0_97, %111, %c2_98, %c0_99] : memref<1x14x14x16xbf16, #tpu.memory_space<vmem>>, vector<1x1x10x16xbf16>
    %113 = vector.shape_cast %112 : vector<1x1x10x16xbf16> to vector<10x16xbf16>
    %c12 = arith.constant 12 : index
    %c0_100 = arith.constant 0 : index
    %c0_101 = arith.constant 0 : index
    %114 = vector.load %arg3[%c12, %c0_100, %c0_101] : memref<25x16x32xbf16, #tpu.memory_space<vmem>>, vector<1x16x32xbf16>
    %115 = vector.shape_cast %114 : vector<1x16x32xbf16> to vector<16x32xbf16>
    %cst_102 = arith.constant dense<0.000000e+00> : vector<10x32xf32>
    %116 = tpu.matmul %113, %115, %cst_102 {dimension_numbers = #tpu.dot_dimension_numbers<[1], [0], [0], [1], [0, 0, 1, 1], [], []>} : vector<10x16xbf16>, vector<16x32xbf16>, vector<10x32xf32> -> vector<10x32xf32>
    %117 = arith.addf %108, %116 : vector<10x32xf32>
    %c0_i32_103 = arith.constant 0 : i32
    %118 = arith.addi %0, %c0_i32_103 : i32
    %c2_i32_104 = arith.constant 2 : i32
    %119 = arith.addi %118, %c2_i32_104 : i32
    %c0_105 = arith.constant 0 : index
    %120 = arith.index_cast %119 : i32 to index
    %c3_106 = arith.constant 3 : index
    %c0_107 = arith.constant 0 : index
    %121 = vector.load %arg2[%c0_105, %120, %c3_106, %c0_107] : memref<1x14x14x16xbf16, #tpu.memory_space<vmem>>, vector<1x1x10x16xbf16>
    %122 = vector.shape_cast %121 : vector<1x1x10x16xbf16> to vector<10x16xbf16>
    %c13 = arith.constant 13 : index
    %c0_108 = arith.constant 0 : index
    %c0_109 = arith.constant 0 : index
    %123 = vector.load %arg3[%c13, %c0_108, %c0_109] : memref<25x16x32xbf16, #tpu.memory_space<vmem>>, vector<1x16x32xbf16>
    %124 = vector.shape_cast %123 : vector<1x16x32xbf16> to vector<16x32xbf16>
    %cst_110 = arith.constant dense<0.000000e+00> : vector<10x32xf32>
    %125 = tpu.matmul %122, %124, %cst_110 {dimension_numbers = #tpu.dot_dimension_numbers<[1], [0], [0], [1], [0, 0, 1, 1], [], []>} : vector<10x16xbf16>, vector<16x32xbf16>, vector<10x32xf32> -> vector<10x32xf32>
    %126 = arith.addf %117, %125 : vector<10x32xf32>
    %c0_i32_111 = arith.constant 0 : i32
    %127 = arith.addi %0, %c0_i32_111 : i32
    %c2_i32_112 = arith.constant 2 : i32
    %128 = arith.addi %127, %c2_i32_112 : i32
    %c0_113 = arith.constant 0 : index
    %129 = arith.index_cast %128 : i32 to index
    %c4_114 = arith.constant 4 : index
    %c0_115 = arith.constant 0 : index
    %130 = vector.load %arg2[%c0_113, %129, %c4_114, %c0_115] : memref<1x14x14x16xbf16, #tpu.memory_space<vmem>>, vector<1x1x10x16xbf16>
    %131 = vector.shape_cast %130 : vector<1x1x10x16xbf16> to vector<10x16xbf16>
    %c14 = arith.constant 14 : index
    %c0_116 = arith.constant 0 : index
    %c0_117 = arith.constant 0 : index
    %132 = vector.load %arg3[%c14, %c0_116, %c0_117] : memref<25x16x32xbf16, #tpu.memory_space<vmem>>, vector<1x16x32xbf16>
    %133 = vector.shape_cast %132 : vector<1x16x32xbf16> to vector<16x32xbf16>
    %cst_118 = arith.constant dense<0.000000e+00> : vector<10x32xf32>
    %134 = tpu.matmul %131, %133, %cst_118 {dimension_numbers = #tpu.dot_dimension_numbers<[1], [0], [0], [1], [0, 0, 1, 1], [], []>} : vector<10x16xbf16>, vector<16x32xbf16>, vector<10x32xf32> -> vector<10x32xf32>
    %135 = arith.addf %126, %134 : vector<10x32xf32>
    %c0_i32_119 = arith.constant 0 : i32
    %136 = arith.addi %0, %c0_i32_119 : i32
    %c3_i32 = arith.constant 3 : i32
    %137 = arith.addi %136, %c3_i32 : i32
    %c0_120 = arith.constant 0 : index
    %138 = arith.index_cast %137 : i32 to index
    %c0_121 = arith.constant 0 : index
    %c0_122 = arith.constant 0 : index
    %139 = vector.load %arg2[%c0_120, %138, %c0_121, %c0_122] : memref<1x14x14x16xbf16, #tpu.memory_space<vmem>>, vector<1x1x10x16xbf16>
    %140 = vector.shape_cast %139 : vector<1x1x10x16xbf16> to vector<10x16xbf16>
    %c15 = arith.constant 15 : index
    %c0_123 = arith.constant 0 : index
    %c0_124 = arith.constant 0 : index
    %141 = vector.load %arg3[%c15, %c0_123, %c0_124] : memref<25x16x32xbf16, #tpu.memory_space<vmem>>, vector<1x16x32xbf16>
    %142 = vector.shape_cast %141 : vector<1x16x32xbf16> to vector<16x32xbf16>
    %cst_125 = arith.constant dense<0.000000e+00> : vector<10x32xf32>
    %143 = tpu.matmul %140, %142, %cst_125 {dimension_numbers = #tpu.dot_dimension_numbers<[1], [0], [0], [1], [0, 0, 1, 1], [], []>} : vector<10x16xbf16>, vector<16x32xbf16>, vector<10x32xf32> -> vector<10x32xf32>
    %144 = arith.addf %135, %143 : vector<10x32xf32>
    %c0_i32_126 = arith.constant 0 : i32
    %145 = arith.addi %0, %c0_i32_126 : i32
    %c3_i32_127 = arith.constant 3 : i32
    %146 = arith.addi %145, %c3_i32_127 : i32
    %c0_128 = arith.constant 0 : index
    %147 = arith.index_cast %146 : i32 to index
    %c1_129 = arith.constant 1 : index
    %c0_130 = arith.constant 0 : index
    %148 = vector.load %arg2[%c0_128, %147, %c1_129, %c0_130] : memref<1x14x14x16xbf16, #tpu.memory_space<vmem>>, vector<1x1x10x16xbf16>
    %149 = vector.shape_cast %148 : vector<1x1x10x16xbf16> to vector<10x16xbf16>
    %c16 = arith.constant 16 : index
    %c0_131 = arith.constant 0 : index
    %c0_132 = arith.constant 0 : index
    %150 = vector.load %arg3[%c16, %c0_131, %c0_132] : memref<25x16x32xbf16, #tpu.memory_space<vmem>>, vector<1x16x32xbf16>
    %151 = vector.shape_cast %150 : vector<1x16x32xbf16> to vector<16x32xbf16>
    %cst_133 = arith.constant dense<0.000000e+00> : vector<10x32xf32>
    %152 = tpu.matmul %149, %151, %cst_133 {dimension_numbers = #tpu.dot_dimension_numbers<[1], [0], [0], [1], [0, 0, 1, 1], [], []>} : vector<10x16xbf16>, vector<16x32xbf16>, vector<10x32xf32> -> vector<10x32xf32>
    %153 = arith.addf %144, %152 : vector<10x32xf32>
    %c0_i32_134 = arith.constant 0 : i32
    %154 = arith.addi %0, %c0_i32_134 : i32
    %c3_i32_135 = arith.constant 3 : i32
    %155 = arith.addi %154, %c3_i32_135 : i32
    %c0_136 = arith.constant 0 : index
    %156 = arith.index_cast %155 : i32 to index
    %c2_137 = arith.constant 2 : index
    %c0_138 = arith.constant 0 : index
    %157 = vector.load %arg2[%c0_136, %156, %c2_137, %c0_138] : memref<1x14x14x16xbf16, #tpu.memory_space<vmem>>, vector<1x1x10x16xbf16>
    %158 = vector.shape_cast %157 : vector<1x1x10x16xbf16> to vector<10x16xbf16>
    %c17 = arith.constant 17 : index
    %c0_139 = arith.constant 0 : index
    %c0_140 = arith.constant 0 : index
    %159 = vector.load %arg3[%c17, %c0_139, %c0_140] : memref<25x16x32xbf16, #tpu.memory_space<vmem>>, vector<1x16x32xbf16>
    %160 = vector.shape_cast %159 : vector<1x16x32xbf16> to vector<16x32xbf16>
    %cst_141 = arith.constant dense<0.000000e+00> : vector<10x32xf32>
    %161 = tpu.matmul %158, %160, %cst_141 {dimension_numbers = #tpu.dot_dimension_numbers<[1], [0], [0], [1], [0, 0, 1, 1], [], []>} : vector<10x16xbf16>, vector<16x32xbf16>, vector<10x32xf32> -> vector<10x32xf32>
    %162 = arith.addf %153, %161 : vector<10x32xf32>
    %c0_i32_142 = arith.constant 0 : i32
    %163 = arith.addi %0, %c0_i32_142 : i32
    %c3_i32_143 = arith.constant 3 : i32
    %164 = arith.addi %163, %c3_i32_143 : i32
    %c0_144 = arith.constant 0 : index
    %165 = arith.index_cast %164 : i32 to index
    %c3_145 = arith.constant 3 : index
    %c0_146 = arith.constant 0 : index
    %166 = vector.load %arg2[%c0_144, %165, %c3_145, %c0_146] : memref<1x14x14x16xbf16, #tpu.memory_space<vmem>>, vector<1x1x10x16xbf16>
    %167 = vector.shape_cast %166 : vector<1x1x10x16xbf16> to vector<10x16xbf16>
    %c18 = arith.constant 18 : index
    %c0_147 = arith.constant 0 : index
    %c0_148 = arith.constant 0 : index
    %168 = vector.load %arg3[%c18, %c0_147, %c0_148] : memref<25x16x32xbf16, #tpu.memory_space<vmem>>, vector<1x16x32xbf16>
    %169 = vector.shape_cast %168 : vector<1x16x32xbf16> to vector<16x32xbf16>
    %cst_149 = arith.constant dense<0.000000e+00> : vector<10x32xf32>
    %170 = tpu.matmul %167, %169, %cst_149 {dimension_numbers = #tpu.dot_dimension_numbers<[1], [0], [0], [1], [0, 0, 1, 1], [], []>} : vector<10x16xbf16>, vector<16x32xbf16>, vector<10x32xf32> -> vector<10x32xf32>
    %171 = arith.addf %162, %170 : vector<10x32xf32>
    %c0_i32_150 = arith.constant 0 : i32
    %172 = arith.addi %0, %c0_i32_150 : i32
    %c3_i32_151 = arith.constant 3 : i32
    %173 = arith.addi %172, %c3_i32_151 : i32
    %c0_152 = arith.constant 0 : index
    %174 = arith.index_cast %173 : i32 to index
    %c4_153 = arith.constant 4 : index
    %c0_154 = arith.constant 0 : index
    %175 = vector.load %arg2[%c0_152, %174, %c4_153, %c0_154] : memref<1x14x14x16xbf16, #tpu.memory_space<vmem>>, vector<1x1x10x16xbf16>
    %176 = vector.shape_cast %175 : vector<1x1x10x16xbf16> to vector<10x16xbf16>
    %c19 = arith.constant 19 : index
    %c0_155 = arith.constant 0 : index
    %c0_156 = arith.constant 0 : index
    %177 = vector.load %arg3[%c19, %c0_155, %c0_156] : memref<25x16x32xbf16, #tpu.memory_space<vmem>>, vector<1x16x32xbf16>
    %178 = vector.shape_cast %177 : vector<1x16x32xbf16> to vector<16x32xbf16>
    %cst_157 = arith.constant dense<0.000000e+00> : vector<10x32xf32>
    %179 = tpu.matmul %176, %178, %cst_157 {dimension_numbers = #tpu.dot_dimension_numbers<[1], [0], [0], [1], [0, 0, 1, 1], [], []>} : vector<10x16xbf16>, vector<16x32xbf16>, vector<10x32xf32> -> vector<10x32xf32>
    %180 = arith.addf %171, %179 : vector<10x32xf32>
    %c0_i32_158 = arith.constant 0 : i32
    %181 = arith.addi %0, %c0_i32_158 : i32
    %c4_i32 = arith.constant 4 : i32
    %182 = arith.addi %181, %c4_i32 : i32
    %c0_159 = arith.constant 0 : index
    %183 = arith.index_cast %182 : i32 to index
    %c0_160 = arith.constant 0 : index
    %c0_161 = arith.constant 0 : index
    %184 = vector.load %arg2[%c0_159, %183, %c0_160, %c0_161] : memref<1x14x14x16xbf16, #tpu.memory_space<vmem>>, vector<1x1x10x16xbf16>
    %185 = vector.shape_cast %184 : vector<1x1x10x16xbf16> to vector<10x16xbf16>
    %c20 = arith.constant 20 : index
    %c0_162 = arith.constant 0 : index
    %c0_163 = arith.constant 0 : index
    %186 = vector.load %arg3[%c20, %c0_162, %c0_163] : memref<25x16x32xbf16, #tpu.memory_space<vmem>>, vector<1x16x32xbf16>
    %187 = vector.shape_cast %186 : vector<1x16x32xbf16> to vector<16x32xbf16>
    %cst_164 = arith.constant dense<0.000000e+00> : vector<10x32xf32>
    %188 = tpu.matmul %185, %187, %cst_164 {dimension_numbers = #tpu.dot_dimension_numbers<[1], [0], [0], [1], [0, 0, 1, 1], [], []>} : vector<10x16xbf16>, vector<16x32xbf16>, vector<10x32xf32> -> vector<10x32xf32>
    %189 = arith.addf %180, %188 : vector<10x32xf32>
    %c0_i32_165 = arith.constant 0 : i32
    %190 = arith.addi %0, %c0_i32_165 : i32
    %c4_i32_166 = arith.constant 4 : i32
    %191 = arith.addi %190, %c4_i32_166 : i32
    %c0_167 = arith.constant 0 : index
    %192 = arith.index_cast %191 : i32 to index
    %c1_168 = arith.constant 1 : index
    %c0_169 = arith.constant 0 : index
    %193 = vector.load %arg2[%c0_167, %192, %c1_168, %c0_169] : memref<1x14x14x16xbf16, #tpu.memory_space<vmem>>, vector<1x1x10x16xbf16>
    %194 = vector.shape_cast %193 : vector<1x1x10x16xbf16> to vector<10x16xbf16>
    %c21 = arith.constant 21 : index
    %c0_170 = arith.constant 0 : index
    %c0_171 = arith.constant 0 : index
    %195 = vector.load %arg3[%c21, %c0_170, %c0_171] : memref<25x16x32xbf16, #tpu.memory_space<vmem>>, vector<1x16x32xbf16>
    %196 = vector.shape_cast %195 : vector<1x16x32xbf16> to vector<16x32xbf16>
    %cst_172 = arith.constant dense<0.000000e+00> : vector<10x32xf32>
    %197 = tpu.matmul %194, %196, %cst_172 {dimension_numbers = #tpu.dot_dimension_numbers<[1], [0], [0], [1], [0, 0, 1, 1], [], []>} : vector<10x16xbf16>, vector<16x32xbf16>, vector<10x32xf32> -> vector<10x32xf32>
    %198 = arith.addf %189, %197 : vector<10x32xf32>
    %c0_i32_173 = arith.constant 0 : i32
    %199 = arith.addi %0, %c0_i32_173 : i32
    %c4_i32_174 = arith.constant 4 : i32
    %200 = arith.addi %199, %c4_i32_174 : i32
    %c0_175 = arith.constant 0 : index
    %201 = arith.index_cast %200 : i32 to index
    %c2_176 = arith.constant 2 : index
    %c0_177 = arith.constant 0 : index
    %202 = vector.load %arg2[%c0_175, %201, %c2_176, %c0_177] : memref<1x14x14x16xbf16, #tpu.memory_space<vmem>>, vector<1x1x10x16xbf16>
    %203 = vector.shape_cast %202 : vector<1x1x10x16xbf16> to vector<10x16xbf16>
    %c22 = arith.constant 22 : index
    %c0_178 = arith.constant 0 : index
    %c0_179 = arith.constant 0 : index
    %204 = vector.load %arg3[%c22, %c0_178, %c0_179] : memref<25x16x32xbf16, #tpu.memory_space<vmem>>, vector<1x16x32xbf16>
    %205 = vector.shape_cast %204 : vector<1x16x32xbf16> to vector<16x32xbf16>
    %cst_180 = arith.constant dense<0.000000e+00> : vector<10x32xf32>
    %206 = tpu.matmul %203, %205, %cst_180 {dimension_numbers = #tpu.dot_dimension_numbers<[1], [0], [0], [1], [0, 0, 1, 1], [], []>} : vector<10x16xbf16>, vector<16x32xbf16>, vector<10x32xf32> -> vector<10x32xf32>
    %207 = arith.addf %198, %206 : vector<10x32xf32>
    %c0_i32_181 = arith.constant 0 : i32
    %208 = arith.addi %0, %c0_i32_181 : i32
    %c4_i32_182 = arith.constant 4 : i32
    %209 = arith.addi %208, %c4_i32_182 : i32
    %c0_183 = arith.constant 0 : index
    %210 = arith.index_cast %209 : i32 to index
    %c3_184 = arith.constant 3 : index
    %c0_185 = arith.constant 0 : index
    %211 = vector.load %arg2[%c0_183, %210, %c3_184, %c0_185] : memref<1x14x14x16xbf16, #tpu.memory_space<vmem>>, vector<1x1x10x16xbf16>
    %212 = vector.shape_cast %211 : vector<1x1x10x16xbf16> to vector<10x16xbf16>
    %c23 = arith.constant 23 : index
    %c0_186 = arith.constant 0 : index
    %c0_187 = arith.constant 0 : index
    %213 = vector.load %arg3[%c23, %c0_186, %c0_187] : memref<25x16x32xbf16, #tpu.memory_space<vmem>>, vector<1x16x32xbf16>
    %214 = vector.shape_cast %213 : vector<1x16x32xbf16> to vector<16x32xbf16>
    %cst_188 = arith.constant dense<0.000000e+00> : vector<10x32xf32>
    %215 = tpu.matmul %212, %214, %cst_188 {dimension_numbers = #tpu.dot_dimension_numbers<[1], [0], [0], [1], [0, 0, 1, 1], [], []>} : vector<10x16xbf16>, vector<16x32xbf16>, vector<10x32xf32> -> vector<10x32xf32>
    %216 = arith.addf %207, %215 : vector<10x32xf32>
    %c0_i32_189 = arith.constant 0 : i32
    %217 = arith.addi %0, %c0_i32_189 : i32
    %c4_i32_190 = arith.constant 4 : i32
    %218 = arith.addi %217, %c4_i32_190 : i32
    %c0_191 = arith.constant 0 : index
    %219 = arith.index_cast %218 : i32 to index
    %c4_192 = arith.constant 4 : index
    %c0_193 = arith.constant 0 : index
    %220 = vector.load %arg2[%c0_191, %219, %c4_192, %c0_193] : memref<1x14x14x16xbf16, #tpu.memory_space<vmem>>, vector<1x1x10x16xbf16>
    %221 = vector.shape_cast %220 : vector<1x1x10x16xbf16> to vector<10x16xbf16>
    %c24 = arith.constant 24 : index
    %c0_194 = arith.constant 0 : index
    %c0_195 = arith.constant 0 : index
    %222 = vector.load %arg3[%c24, %c0_194, %c0_195] : memref<25x16x32xbf16, #tpu.memory_space<vmem>>, vector<1x16x32xbf16>
    %223 = vector.shape_cast %222 : vector<1x16x32xbf16> to vector<16x32xbf16>
    %cst_196 = arith.constant dense<0.000000e+00> : vector<10x32xf32>
    %224 = tpu.matmul %221, %223, %cst_196 {dimension_numbers = #tpu.dot_dimension_numbers<[1], [0], [0], [1], [0, 0, 1, 1], [], []>} : vector<10x16xbf16>, vector<16x32xbf16>, vector<10x32xf32> -> vector<10x32xf32>
    %225 = arith.addf %216, %224 : vector<10x32xf32>
    %226 = vector.broadcast %1 : vector<1x32xf32> to vector<10x32xf32>
    %227 = arith.addf %225, %226 : vector<10x32xf32>
    %cst_197 = arith.constant 0.000000e+00 : f32
    %228 = vector.broadcast %cst_197 : f32 to vector<10x32xf32>
    %229 = arith.maximumf %227, %228 : vector<10x32xf32>
    %c1_i32_198 = arith.constant 1 : i32
    %230 = arith.addi %0, %c1_i32_198 : i32
    %c0_i32_199 = arith.constant 0 : i32
    %231 = arith.addi %230, %c0_i32_199 : i32
    %c0_200 = arith.constant 0 : index
    %232 = arith.index_cast %231 : i32 to index
    %c0_201 = arith.constant 0 : index
    %c0_202 = arith.constant 0 : index
    %233 = vector.load %arg2[%c0_200, %232, %c0_201, %c0_202] : memref<1x14x14x16xbf16, #tpu.memory_space<vmem>>, vector<1x1x10x16xbf16>
    %234 = vector.shape_cast %233 : vector<1x1x10x16xbf16> to vector<10x16xbf16>
    %c0_203 = arith.constant 0 : index
    %c0_204 = arith.constant 0 : index
    %c0_205 = arith.constant 0 : index
    %235 = vector.load %arg3[%c0_203, %c0_204, %c0_205] : memref<25x16x32xbf16, #tpu.memory_space<vmem>>, vector<1x16x32xbf16>
    %236 = vector.shape_cast %235 : vector<1x16x32xbf16> to vector<16x32xbf16>
    %cst_206 = arith.constant dense<0.000000e+00> : vector<10x32xf32>
    %237 = tpu.matmul %234, %236, %cst_206 {dimension_numbers = #tpu.dot_dimension_numbers<[1], [0], [0], [1], [0, 0, 1, 1], [], []>} : vector<10x16xbf16>, vector<16x32xbf16>, vector<10x32xf32> -> vector<10x32xf32>
    %c1_i32_207 = arith.constant 1 : i32
    %238 = arith.addi %0, %c1_i32_207 : i32
    %c0_i32_208 = arith.constant 0 : i32
    %239 = arith.addi %238, %c0_i32_208 : i32
    %c0_209 = arith.constant 0 : index
    %240 = arith.index_cast %239 : i32 to index
    %c1_210 = arith.constant 1 : index
    %c0_211 = arith.constant 0 : index
    %241 = vector.load %arg2[%c0_209, %240, %c1_210, %c0_211] : memref<1x14x14x16xbf16, #tpu.memory_space<vmem>>, vector<1x1x10x16xbf16>
    %242 = vector.shape_cast %241 : vector<1x1x10x16xbf16> to vector<10x16xbf16>
    %c1_212 = arith.constant 1 : index
    %c0_213 = arith.constant 0 : index
    %c0_214 = arith.constant 0 : index
    %243 = vector.load %arg3[%c1_212, %c0_213, %c0_214] : memref<25x16x32xbf16, #tpu.memory_space<vmem>>, vector<1x16x32xbf16>
    %244 = vector.shape_cast %243 : vector<1x16x32xbf16> to vector<16x32xbf16>
    %cst_215 = arith.constant dense<0.000000e+00> : vector<10x32xf32>
    %245 = tpu.matmul %242, %244, %cst_215 {dimension_numbers = #tpu.dot_dimension_numbers<[1], [0], [0], [1], [0, 0, 1, 1], [], []>} : vector<10x16xbf16>, vector<16x32xbf16>, vector<10x32xf32> -> vector<10x32xf32>
    %246 = arith.addf %237, %245 : vector<10x32xf32>
    %c1_i32_216 = arith.constant 1 : i32
    %247 = arith.addi %0, %c1_i32_216 : i32
    %c0_i32_217 = arith.constant 0 : i32
    %248 = arith.addi %247, %c0_i32_217 : i32
    %c0_218 = arith.constant 0 : index
    %249 = arith.index_cast %248 : i32 to index
    %c2_219 = arith.constant 2 : index
    %c0_220 = arith.constant 0 : index
    %250 = vector.load %arg2[%c0_218, %249, %c2_219, %c0_220] : memref<1x14x14x16xbf16, #tpu.memory_space<vmem>>, vector<1x1x10x16xbf16>
    %251 = vector.shape_cast %250 : vector<1x1x10x16xbf16> to vector<10x16xbf16>
    %c2_221 = arith.constant 2 : index
    %c0_222 = arith.constant 0 : index
    %c0_223 = arith.constant 0 : index
    %252 = vector.load %arg3[%c2_221, %c0_222, %c0_223] : memref<25x16x32xbf16, #tpu.memory_space<vmem>>, vector<1x16x32xbf16>
    %253 = vector.shape_cast %252 : vector<1x16x32xbf16> to vector<16x32xbf16>
    %cst_224 = arith.constant dense<0.000000e+00> : vector<10x32xf32>
    %254 = tpu.matmul %251, %253, %cst_224 {dimension_numbers = #tpu.dot_dimension_numbers<[1], [0], [0], [1], [0, 0, 1, 1], [], []>} : vector<10x16xbf16>, vector<16x32xbf16>, vector<10x32xf32> -> vector<10x32xf32>
    %255 = arith.addf %246, %254 : vector<10x32xf32>
    %c1_i32_225 = arith.constant 1 : i32
    %256 = arith.addi %0, %c1_i32_225 : i32
    %c0_i32_226 = arith.constant 0 : i32
    %257 = arith.addi %256, %c0_i32_226 : i32
    %c0_227 = arith.constant 0 : index
    %258 = arith.index_cast %257 : i32 to index
    %c3_228 = arith.constant 3 : index
    %c0_229 = arith.constant 0 : index
    %259 = vector.load %arg2[%c0_227, %258, %c3_228, %c0_229] : memref<1x14x14x16xbf16, #tpu.memory_space<vmem>>, vector<1x1x10x16xbf16>
    %260 = vector.shape_cast %259 : vector<1x1x10x16xbf16> to vector<10x16xbf16>
    %c3_230 = arith.constant 3 : index
    %c0_231 = arith.constant 0 : index
    %c0_232 = arith.constant 0 : index
    %261 = vector.load %arg3[%c3_230, %c0_231, %c0_232] : memref<25x16x32xbf16, #tpu.memory_space<vmem>>, vector<1x16x32xbf16>
    %262 = vector.shape_cast %261 : vector<1x16x32xbf16> to vector<16x32xbf16>
    %cst_233 = arith.constant dense<0.000000e+00> : vector<10x32xf32>
    %263 = tpu.matmul %260, %262, %cst_233 {dimension_numbers = #tpu.dot_dimension_numbers<[1], [0], [0], [1], [0, 0, 1, 1], [], []>} : vector<10x16xbf16>, vector<16x32xbf16>, vector<10x32xf32> -> vector<10x32xf32>
    %264 = arith.addf %255, %263 : vector<10x32xf32>
    %c1_i32_234 = arith.constant 1 : i32
    %265 = arith.addi %0, %c1_i32_234 : i32
    %c0_i32_235 = arith.constant 0 : i32
    %266 = arith.addi %265, %c0_i32_235 : i32
    %c0_236 = arith.constant 0 : index
    %267 = arith.index_cast %266 : i32 to index
    %c4_237 = arith.constant 4 : index
    %c0_238 = arith.constant 0 : index
    %268 = vector.load %arg2[%c0_236, %267, %c4_237, %c0_238] : memref<1x14x14x16xbf16, #tpu.memory_space<vmem>>, vector<1x1x10x16xbf16>
    %269 = vector.shape_cast %268 : vector<1x1x10x16xbf16> to vector<10x16xbf16>
    %c4_239 = arith.constant 4 : index
    %c0_240 = arith.constant 0 : index
    %c0_241 = arith.constant 0 : index
    %270 = vector.load %arg3[%c4_239, %c0_240, %c0_241] : memref<25x16x32xbf16, #tpu.memory_space<vmem>>, vector<1x16x32xbf16>
    %271 = vector.shape_cast %270 : vector<1x16x32xbf16> to vector<16x32xbf16>
    %cst_242 = arith.constant dense<0.000000e+00> : vector<10x32xf32>
    %272 = tpu.matmul %269, %271, %cst_242 {dimension_numbers = #tpu.dot_dimension_numbers<[1], [0], [0], [1], [0, 0, 1, 1], [], []>} : vector<10x16xbf16>, vector<16x32xbf16>, vector<10x32xf32> -> vector<10x32xf32>
    %273 = arith.addf %264, %272 : vector<10x32xf32>
    %c1_i32_243 = arith.constant 1 : i32
    %274 = arith.addi %0, %c1_i32_243 : i32
    %c1_i32_244 = arith.constant 1 : i32
    %275 = arith.addi %274, %c1_i32_244 : i32
    %c0_245 = arith.constant 0 : index
    %276 = arith.index_cast %275 : i32 to index
    %c0_246 = arith.constant 0 : index
    %c0_247 = arith.constant 0 : index
    %277 = vector.load %arg2[%c0_245, %276, %c0_246, %c0_247] : memref<1x14x14x16xbf16, #tpu.memory_space<vmem>>, vector<1x1x10x16xbf16>
    %278 = vector.shape_cast %277 : vector<1x1x10x16xbf16> to vector<10x16xbf16>
    %c5_248 = arith.constant 5 : index
    %c0_249 = arith.constant 0 : index
    %c0_250 = arith.constant 0 : index
    %279 = vector.load %arg3[%c5_248, %c0_249, %c0_250] : memref<25x16x32xbf16, #tpu.memory_space<vmem>>, vector<1x16x32xbf16>
    %280 = vector.shape_cast %279 : vector<1x16x32xbf16> to vector<16x32xbf16>
    %cst_251 = arith.constant dense<0.000000e+00> : vector<10x32xf32>
    %281 = tpu.matmul %278, %280, %cst_251 {dimension_numbers = #tpu.dot_dimension_numbers<[1], [0], [0], [1], [0, 0, 1, 1], [], []>} : vector<10x16xbf16>, vector<16x32xbf16>, vector<10x32xf32> -> vector<10x32xf32>
    %282 = arith.addf %273, %281 : vector<10x32xf32>
    %c1_i32_252 = arith.constant 1 : i32
    %283 = arith.addi %0, %c1_i32_252 : i32
    %c1_i32_253 = arith.constant 1 : i32
    %284 = arith.addi %283, %c1_i32_253 : i32
    %c0_254 = arith.constant 0 : index
    %285 = arith.index_cast %284 : i32 to index
    %c1_255 = arith.constant 1 : index
    %c0_256 = arith.constant 0 : index
    %286 = vector.load %arg2[%c0_254, %285, %c1_255, %c0_256] : memref<1x14x14x16xbf16, #tpu.memory_space<vmem>>, vector<1x1x10x16xbf16>
    %287 = vector.shape_cast %286 : vector<1x1x10x16xbf16> to vector<10x16xbf16>
    %c6_257 = arith.constant 6 : index
    %c0_258 = arith.constant 0 : index
    %c0_259 = arith.constant 0 : index
    %288 = vector.load %arg3[%c6_257, %c0_258, %c0_259] : memref<25x16x32xbf16, #tpu.memory_space<vmem>>, vector<1x16x32xbf16>
    %289 = vector.shape_cast %288 : vector<1x16x32xbf16> to vector<16x32xbf16>
    %cst_260 = arith.constant dense<0.000000e+00> : vector<10x32xf32>
    %290 = tpu.matmul %287, %289, %cst_260 {dimension_numbers = #tpu.dot_dimension_numbers<[1], [0], [0], [1], [0, 0, 1, 1], [], []>} : vector<10x16xbf16>, vector<16x32xbf16>, vector<10x32xf32> -> vector<10x32xf32>
    %291 = arith.addf %282, %290 : vector<10x32xf32>
    %c1_i32_261 = arith.constant 1 : i32
    %292 = arith.addi %0, %c1_i32_261 : i32
    %c1_i32_262 = arith.constant 1 : i32
    %293 = arith.addi %292, %c1_i32_262 : i32
    %c0_263 = arith.constant 0 : index
    %294 = arith.index_cast %293 : i32 to index
    %c2_264 = arith.constant 2 : index
    %c0_265 = arith.constant 0 : index
    %295 = vector.load %arg2[%c0_263, %294, %c2_264, %c0_265] : memref<1x14x14x16xbf16, #tpu.memory_space<vmem>>, vector<1x1x10x16xbf16>
    %296 = vector.shape_cast %295 : vector<1x1x10x16xbf16> to vector<10x16xbf16>
    %c7_266 = arith.constant 7 : index
    %c0_267 = arith.constant 0 : index
    %c0_268 = arith.constant 0 : index
    %297 = vector.load %arg3[%c7_266, %c0_267, %c0_268] : memref<25x16x32xbf16, #tpu.memory_space<vmem>>, vector<1x16x32xbf16>
    %298 = vector.shape_cast %297 : vector<1x16x32xbf16> to vector<16x32xbf16>
    %cst_269 = arith.constant dense<0.000000e+00> : vector<10x32xf32>
    %299 = tpu.matmul %296, %298, %cst_269 {dimension_numbers = #tpu.dot_dimension_numbers<[1], [0], [0], [1], [0, 0, 1, 1], [], []>} : vector<10x16xbf16>, vector<16x32xbf16>, vector<10x32xf32> -> vector<10x32xf32>
    %300 = arith.addf %291, %299 : vector<10x32xf32>
    %c1_i32_270 = arith.constant 1 : i32
    %301 = arith.addi %0, %c1_i32_270 : i32
    %c1_i32_271 = arith.constant 1 : i32
    %302 = arith.addi %301, %c1_i32_271 : i32
    %c0_272 = arith.constant 0 : index
    %303 = arith.index_cast %302 : i32 to index
    %c3_273 = arith.constant 3 : index
    %c0_274 = arith.constant 0 : index
    %304 = vector.load %arg2[%c0_272, %303, %c3_273, %c0_274] : memref<1x14x14x16xbf16, #tpu.memory_space<vmem>>, vector<1x1x10x16xbf16>
    %305 = vector.shape_cast %304 : vector<1x1x10x16xbf16> to vector<10x16xbf16>
    %c8_275 = arith.constant 8 : index
    %c0_276 = arith.constant 0 : index
    %c0_277 = arith.constant 0 : index
    %306 = vector.load %arg3[%c8_275, %c0_276, %c0_277] : memref<25x16x32xbf16, #tpu.memory_space<vmem>>, vector<1x16x32xbf16>
    %307 = vector.shape_cast %306 : vector<1x16x32xbf16> to vector<16x32xbf16>
    %cst_278 = arith.constant dense<0.000000e+00> : vector<10x32xf32>
    %308 = tpu.matmul %305, %307, %cst_278 {dimension_numbers = #tpu.dot_dimension_numbers<[1], [0], [0], [1], [0, 0, 1, 1], [], []>} : vector<10x16xbf16>, vector<16x32xbf16>, vector<10x32xf32> -> vector<10x32xf32>
    %309 = arith.addf %300, %308 : vector<10x32xf32>
    %c1_i32_279 = arith.constant 1 : i32
    %310 = arith.addi %0, %c1_i32_279 : i32
    %c1_i32_280 = arith.constant 1 : i32
    %311 = arith.addi %310, %c1_i32_280 : i32
    %c0_281 = arith.constant 0 : index
    %312 = arith.index_cast %311 : i32 to index
    %c4_282 = arith.constant 4 : index
    %c0_283 = arith.constant 0 : index
    %313 = vector.load %arg2[%c0_281, %312, %c4_282, %c0_283] : memref<1x14x14x16xbf16, #tpu.memory_space<vmem>>, vector<1x1x10x16xbf16>
    %314 = vector.shape_cast %313 : vector<1x1x10x16xbf16> to vector<10x16xbf16>
    %c9_284 = arith.constant 9 : index
    %c0_285 = arith.constant 0 : index
    %c0_286 = arith.constant 0 : index
    %315 = vector.load %arg3[%c9_284, %c0_285, %c0_286] : memref<25x16x32xbf16, #tpu.memory_space<vmem>>, vector<1x16x32xbf16>
    %316 = vector.shape_cast %315 : vector<1x16x32xbf16> to vector<16x32xbf16>
    %cst_287 = arith.constant dense<0.000000e+00> : vector<10x32xf32>
    %317 = tpu.matmul %314, %316, %cst_287 {dimension_numbers = #tpu.dot_dimension_numbers<[1], [0], [0], [1], [0, 0, 1, 1], [], []>} : vector<10x16xbf16>, vector<16x32xbf16>, vector<10x32xf32> -> vector<10x32xf32>
    %318 = arith.addf %309, %317 : vector<10x32xf32>
    %c1_i32_288 = arith.constant 1 : i32
    %319 = arith.addi %0, %c1_i32_288 : i32
    %c2_i32_289 = arith.constant 2 : i32
    %320 = arith.addi %319, %c2_i32_289 : i32
    %c0_290 = arith.constant 0 : index
    %321 = arith.index_cast %320 : i32 to index
    %c0_291 = arith.constant 0 : index
    %c0_292 = arith.constant 0 : index
    %322 = vector.load %arg2[%c0_290, %321, %c0_291, %c0_292] : memref<1x14x14x16xbf16, #tpu.memory_space<vmem>>, vector<1x1x10x16xbf16>
    %323 = vector.shape_cast %322 : vector<1x1x10x16xbf16> to vector<10x16xbf16>
    %c10_293 = arith.constant 10 : index
    %c0_294 = arith.constant 0 : index
    %c0_295 = arith.constant 0 : index
    %324 = vector.load %arg3[%c10_293, %c0_294, %c0_295] : memref<25x16x32xbf16, #tpu.memory_space<vmem>>, vector<1x16x32xbf16>
    %325 = vector.shape_cast %324 : vector<1x16x32xbf16> to vector<16x32xbf16>
    %cst_296 = arith.constant dense<0.000000e+00> : vector<10x32xf32>
    %326 = tpu.matmul %323, %325, %cst_296 {dimension_numbers = #tpu.dot_dimension_numbers<[1], [0], [0], [1], [0, 0, 1, 1], [], []>} : vector<10x16xbf16>, vector<16x32xbf16>, vector<10x32xf32> -> vector<10x32xf32>
    %327 = arith.addf %318, %326 : vector<10x32xf32>
    %c1_i32_297 = arith.constant 1 : i32
    %328 = arith.addi %0, %c1_i32_297 : i32
    %c2_i32_298 = arith.constant 2 : i32
    %329 = arith.addi %328, %c2_i32_298 : i32
    %c0_299 = arith.constant 0 : index
    %330 = arith.index_cast %329 : i32 to index
    %c1_300 = arith.constant 1 : index
    %c0_301 = arith.constant 0 : index
    %331 = vector.load %arg2[%c0_299, %330, %c1_300, %c0_301] : memref<1x14x14x16xbf16, #tpu.memory_space<vmem>>, vector<1x1x10x16xbf16>
    %332 = vector.shape_cast %331 : vector<1x1x10x16xbf16> to vector<10x16xbf16>
    %c11_302 = arith.constant 11 : index
    %c0_303 = arith.constant 0 : index
    %c0_304 = arith.constant 0 : index
    %333 = vector.load %arg3[%c11_302, %c0_303, %c0_304] : memref<25x16x32xbf16, #tpu.memory_space<vmem>>, vector<1x16x32xbf16>
    %334 = vector.shape_cast %333 : vector<1x16x32xbf16> to vector<16x32xbf16>
    %cst_305 = arith.constant dense<0.000000e+00> : vector<10x32xf32>
    %335 = tpu.matmul %332, %334, %cst_305 {dimension_numbers = #tpu.dot_dimension_numbers<[1], [0], [0], [1], [0, 0, 1, 1], [], []>} : vector<10x16xbf16>, vector<16x32xbf16>, vector<10x32xf32> -> vector<10x32xf32>
    %336 = arith.addf %327, %335 : vector<10x32xf32>
    %c1_i32_306 = arith.constant 1 : i32
    %337 = arith.addi %0, %c1_i32_306 : i32
    %c2_i32_307 = arith.constant 2 : i32
    %338 = arith.addi %337, %c2_i32_307 : i32
    %c0_308 = arith.constant 0 : index
    %339 = arith.index_cast %338 : i32 to index
    %c2_309 = arith.constant 2 : index
    %c0_310 = arith.constant 0 : index
    %340 = vector.load %arg2[%c0_308, %339, %c2_309, %c0_310] : memref<1x14x14x16xbf16, #tpu.memory_space<vmem>>, vector<1x1x10x16xbf16>
    %341 = vector.shape_cast %340 : vector<1x1x10x16xbf16> to vector<10x16xbf16>
    %c12_311 = arith.constant 12 : index
    %c0_312 = arith.constant 0 : index
    %c0_313 = arith.constant 0 : index
    %342 = vector.load %arg3[%c12_311, %c0_312, %c0_313] : memref<25x16x32xbf16, #tpu.memory_space<vmem>>, vector<1x16x32xbf16>
    %343 = vector.shape_cast %342 : vector<1x16x32xbf16> to vector<16x32xbf16>
    %cst_314 = arith.constant dense<0.000000e+00> : vector<10x32xf32>
    %344 = tpu.matmul %341, %343, %cst_314 {dimension_numbers = #tpu.dot_dimension_numbers<[1], [0], [0], [1], [0, 0, 1, 1], [], []>} : vector<10x16xbf16>, vector<16x32xbf16>, vector<10x32xf32> -> vector<10x32xf32>
    %345 = arith.addf %336, %344 : vector<10x32xf32>
    %c1_i32_315 = arith.constant 1 : i32
    %346 = arith.addi %0, %c1_i32_315 : i32
    %c2_i32_316 = arith.constant 2 : i32
    %347 = arith.addi %346, %c2_i32_316 : i32
    %c0_317 = arith.constant 0 : index
    %348 = arith.index_cast %347 : i32 to index
    %c3_318 = arith.constant 3 : index
    %c0_319 = arith.constant 0 : index
    %349 = vector.load %arg2[%c0_317, %348, %c3_318, %c0_319] : memref<1x14x14x16xbf16, #tpu.memory_space<vmem>>, vector<1x1x10x16xbf16>
    %350 = vector.shape_cast %349 : vector<1x1x10x16xbf16> to vector<10x16xbf16>
    %c13_320 = arith.constant 13 : index
    %c0_321 = arith.constant 0 : index
    %c0_322 = arith.constant 0 : index
    %351 = vector.load %arg3[%c13_320, %c0_321, %c0_322] : memref<25x16x32xbf16, #tpu.memory_space<vmem>>, vector<1x16x32xbf16>
    %352 = vector.shape_cast %351 : vector<1x16x32xbf16> to vector<16x32xbf16>
    %cst_323 = arith.constant dense<0.000000e+00> : vector<10x32xf32>
    %353 = tpu.matmul %350, %352, %cst_323 {dimension_numbers = #tpu.dot_dimension_numbers<[1], [0], [0], [1], [0, 0, 1, 1], [], []>} : vector<10x16xbf16>, vector<16x32xbf16>, vector<10x32xf32> -> vector<10x32xf32>
    %354 = arith.addf %345, %353 : vector<10x32xf32>
    %c1_i32_324 = arith.constant 1 : i32
    %355 = arith.addi %0, %c1_i32_324 : i32
    %c2_i32_325 = arith.constant 2 : i32
    %356 = arith.addi %355, %c2_i32_325 : i32
    %c0_326 = arith.constant 0 : index
    %357 = arith.index_cast %356 : i32 to index
    %c4_327 = arith.constant 4 : index
    %c0_328 = arith.constant 0 : index
    %358 = vector.load %arg2[%c0_326, %357, %c4_327, %c0_328] : memref<1x14x14x16xbf16, #tpu.memory_space<vmem>>, vector<1x1x10x16xbf16>
    %359 = vector.shape_cast %358 : vector<1x1x10x16xbf16> to vector<10x16xbf16>
    %c14_329 = arith.constant 14 : index
    %c0_330 = arith.constant 0 : index
    %c0_331 = arith.constant 0 : index
    %360 = vector.load %arg3[%c14_329, %c0_330, %c0_331] : memref<25x16x32xbf16, #tpu.memory_space<vmem>>, vector<1x16x32xbf16>
    %361 = vector.shape_cast %360 : vector<1x16x32xbf16> to vector<16x32xbf16>
    %cst_332 = arith.constant dense<0.000000e+00> : vector<10x32xf32>
    %362 = tpu.matmul %359, %361, %cst_332 {dimension_numbers = #tpu.dot_dimension_numbers<[1], [0], [0], [1], [0, 0, 1, 1], [], []>} : vector<10x16xbf16>, vector<16x32xbf16>, vector<10x32xf32> -> vector<10x32xf32>
    %363 = arith.addf %354, %362 : vector<10x32xf32>
    %c1_i32_333 = arith.constant 1 : i32
    %364 = arith.addi %0, %c1_i32_333 : i32
    %c3_i32_334 = arith.constant 3 : i32
    %365 = arith.addi %364, %c3_i32_334 : i32
    %c0_335 = arith.constant 0 : index
    %366 = arith.index_cast %365 : i32 to index
    %c0_336 = arith.constant 0 : index
    %c0_337 = arith.constant 0 : index
    %367 = vector.load %arg2[%c0_335, %366, %c0_336, %c0_337] : memref<1x14x14x16xbf16, #tpu.memory_space<vmem>>, vector<1x1x10x16xbf16>
    %368 = vector.shape_cast %367 : vector<1x1x10x16xbf16> to vector<10x16xbf16>
    %c15_338 = arith.constant 15 : index
    %c0_339 = arith.constant 0 : index
    %c0_340 = arith.constant 0 : index
    %369 = vector.load %arg3[%c15_338, %c0_339, %c0_340] : memref<25x16x32xbf16, #tpu.memory_space<vmem>>, vector<1x16x32xbf16>
    %370 = vector.shape_cast %369 : vector<1x16x32xbf16> to vector<16x32xbf16>
    %cst_341 = arith.constant dense<0.000000e+00> : vector<10x32xf32>
    %371 = tpu.matmul %368, %370, %cst_341 {dimension_numbers = #tpu.dot_dimension_numbers<[1], [0], [0], [1], [0, 0, 1, 1], [], []>} : vector<10x16xbf16>, vector<16x32xbf16>, vector<10x32xf32> -> vector<10x32xf32>
    %372 = arith.addf %363, %371 : vector<10x32xf32>
    %c1_i32_342 = arith.constant 1 : i32
    %373 = arith.addi %0, %c1_i32_342 : i32
    %c3_i32_343 = arith.constant 3 : i32
    %374 = arith.addi %373, %c3_i32_343 : i32
    %c0_344 = arith.constant 0 : index
    %375 = arith.index_cast %374 : i32 to index
    %c1_345 = arith.constant 1 : index
    %c0_346 = arith.constant 0 : index
    %376 = vector.load %arg2[%c0_344, %375, %c1_345, %c0_346] : memref<1x14x14x16xbf16, #tpu.memory_space<vmem>>, vector<1x1x10x16xbf16>
    %377 = vector.shape_cast %376 : vector<1x1x10x16xbf16> to vector<10x16xbf16>
    %c16_347 = arith.constant 16 : index
    %c0_348 = arith.constant 0 : index
    %c0_349 = arith.constant 0 : index
    %378 = vector.load %arg3[%c16_347, %c0_348, %c0_349] : memref<25x16x32xbf16, #tpu.memory_space<vmem>>, vector<1x16x32xbf16>
    %379 = vector.shape_cast %378 : vector<1x16x32xbf16> to vector<16x32xbf16>
    %cst_350 = arith.constant dense<0.000000e+00> : vector<10x32xf32>
    %380 = tpu.matmul %377, %379, %cst_350 {dimension_numbers = #tpu.dot_dimension_numbers<[1], [0], [0], [1], [0, 0, 1, 1], [], []>} : vector<10x16xbf16>, vector<16x32xbf16>, vector<10x32xf32> -> vector<10x32xf32>
    %381 = arith.addf %372, %380 : vector<10x32xf32>
    %c1_i32_351 = arith.constant 1 : i32
    %382 = arith.addi %0, %c1_i32_351 : i32
    %c3_i32_352 = arith.constant 3 : i32
    %383 = arith.addi %382, %c3_i32_352 : i32
    %c0_353 = arith.constant 0 : index
    %384 = arith.index_cast %383 : i32 to index
    %c2_354 = arith.constant 2 : index
    %c0_355 = arith.constant 0 : index
    %385 = vector.load %arg2[%c0_353, %384, %c2_354, %c0_355] : memref<1x14x14x16xbf16, #tpu.memory_space<vmem>>, vector<1x1x10x16xbf16>
    %386 = vector.shape_cast %385 : vector<1x1x10x16xbf16> to vector<10x16xbf16>
    %c17_356 = arith.constant 17 : index
    %c0_357 = arith.constant 0 : index
    %c0_358 = arith.constant 0 : index
    %387 = vector.load %arg3[%c17_356, %c0_357, %c0_358] : memref<25x16x32xbf16, #tpu.memory_space<vmem>>, vector<1x16x32xbf16>
    %388 = vector.shape_cast %387 : vector<1x16x32xbf16> to vector<16x32xbf16>
    %cst_359 = arith.constant dense<0.000000e+00> : vector<10x32xf32>
    %389 = tpu.matmul %386, %388, %cst_359 {dimension_numbers = #tpu.dot_dimension_numbers<[1], [0], [0], [1], [0, 0, 1, 1], [], []>} : vector<10x16xbf16>, vector<16x32xbf16>, vector<10x32xf32> -> vector<10x32xf32>
    %390 = arith.addf %381, %389 : vector<10x32xf32>
    %c1_i32_360 = arith.constant 1 : i32
    %391 = arith.addi %0, %c1_i32_360 : i32
    %c3_i32_361 = arith.constant 3 : i32
    %392 = arith.addi %391, %c3_i32_361 : i32
    %c0_362 = arith.constant 0 : index
    %393 = arith.index_cast %392 : i32 to index
    %c3_363 = arith.constant 3 : index
    %c0_364 = arith.constant 0 : index
    %394 = vector.load %arg2[%c0_362, %393, %c3_363, %c0_364] : memref<1x14x14x16xbf16, #tpu.memory_space<vmem>>, vector<1x1x10x16xbf16>
    %395 = vector.shape_cast %394 : vector<1x1x10x16xbf16> to vector<10x16xbf16>
    %c18_365 = arith.constant 18 : index
    %c0_366 = arith.constant 0 : index
    %c0_367 = arith.constant 0 : index
    %396 = vector.load %arg3[%c18_365, %c0_366, %c0_367] : memref<25x16x32xbf16, #tpu.memory_space<vmem>>, vector<1x16x32xbf16>
    %397 = vector.shape_cast %396 : vector<1x16x32xbf16> to vector<16x32xbf16>
    %cst_368 = arith.constant dense<0.000000e+00> : vector<10x32xf32>
    %398 = tpu.matmul %395, %397, %cst_368 {dimension_numbers = #tpu.dot_dimension_numbers<[1], [0], [0], [1], [0, 0, 1, 1], [], []>} : vector<10x16xbf16>, vector<16x32xbf16>, vector<10x32xf32> -> vector<10x32xf32>
    %399 = arith.addf %390, %398 : vector<10x32xf32>
    %c1_i32_369 = arith.constant 1 : i32
    %400 = arith.addi %0, %c1_i32_369 : i32
    %c3_i32_370 = arith.constant 3 : i32
    %401 = arith.addi %400, %c3_i32_370 : i32
    %c0_371 = arith.constant 0 : index
    %402 = arith.index_cast %401 : i32 to index
    %c4_372 = arith.constant 4 : index
    %c0_373 = arith.constant 0 : index
    %403 = vector.load %arg2[%c0_371, %402, %c4_372, %c0_373] : memref<1x14x14x16xbf16, #tpu.memory_space<vmem>>, vector<1x1x10x16xbf16>
    %404 = vector.shape_cast %403 : vector<1x1x10x16xbf16> to vector<10x16xbf16>
    %c19_374 = arith.constant 19 : index
    %c0_375 = arith.constant 0 : index
    %c0_376 = arith.constant 0 : index
    %405 = vector.load %arg3[%c19_374, %c0_375, %c0_376] : memref<25x16x32xbf16, #tpu.memory_space<vmem>>, vector<1x16x32xbf16>
    %406 = vector.shape_cast %405 : vector<1x16x32xbf16> to vector<16x32xbf16>
    %cst_377 = arith.constant dense<0.000000e+00> : vector<10x32xf32>
    %407 = tpu.matmul %404, %406, %cst_377 {dimension_numbers = #tpu.dot_dimension_numbers<[1], [0], [0], [1], [0, 0, 1, 1], [], []>} : vector<10x16xbf16>, vector<16x32xbf16>, vector<10x32xf32> -> vector<10x32xf32>
    %408 = arith.addf %399, %407 : vector<10x32xf32>
    %c1_i32_378 = arith.constant 1 : i32
    %409 = arith.addi %0, %c1_i32_378 : i32
    %c4_i32_379 = arith.constant 4 : i32
    %410 = arith.addi %409, %c4_i32_379 : i32
    %c0_380 = arith.constant 0 : index
    %411 = arith.index_cast %410 : i32 to index
    %c0_381 = arith.constant 0 : index
    %c0_382 = arith.constant 0 : index
    %412 = vector.load %arg2[%c0_380, %411, %c0_381, %c0_382] : memref<1x14x14x16xbf16, #tpu.memory_space<vmem>>, vector<1x1x10x16xbf16>
    %413 = vector.shape_cast %412 : vector<1x1x10x16xbf16> to vector<10x16xbf16>
    %c20_383 = arith.constant 20 : index
    %c0_384 = arith.constant 0 : index
    %c0_385 = arith.constant 0 : index
    %414 = vector.load %arg3[%c20_383, %c0_384, %c0_385] : memref<25x16x32xbf16, #tpu.memory_space<vmem>>, vector<1x16x32xbf16>
    %415 = vector.shape_cast %414 : vector<1x16x32xbf16> to vector<16x32xbf16>
    %cst_386 = arith.constant dense<0.000000e+00> : vector<10x32xf32>
    %416 = tpu.matmul %413, %415, %cst_386 {dimension_numbers = #tpu.dot_dimension_numbers<[1], [0], [0], [1], [0, 0, 1, 1], [], []>} : vector<10x16xbf16>, vector<16x32xbf16>, vector<10x32xf32> -> vector<10x32xf32>
    %417 = arith.addf %408, %416 : vector<10x32xf32>
    %c1_i32_387 = arith.constant 1 : i32
    %418 = arith.addi %0, %c1_i32_387 : i32
    %c4_i32_388 = arith.constant 4 : i32
    %419 = arith.addi %418, %c4_i32_388 : i32
    %c0_389 = arith.constant 0 : index
    %420 = arith.index_cast %419 : i32 to index
    %c1_390 = arith.constant 1 : index
    %c0_391 = arith.constant 0 : index
    %421 = vector.load %arg2[%c0_389, %420, %c1_390, %c0_391] : memref<1x14x14x16xbf16, #tpu.memory_space<vmem>>, vector<1x1x10x16xbf16>
    %422 = vector.shape_cast %421 : vector<1x1x10x16xbf16> to vector<10x16xbf16>
    %c21_392 = arith.constant 21 : index
    %c0_393 = arith.constant 0 : index
    %c0_394 = arith.constant 0 : index
    %423 = vector.load %arg3[%c21_392, %c0_393, %c0_394] : memref<25x16x32xbf16, #tpu.memory_space<vmem>>, vector<1x16x32xbf16>
    %424 = vector.shape_cast %423 : vector<1x16x32xbf16> to vector<16x32xbf16>
    %cst_395 = arith.constant dense<0.000000e+00> : vector<10x32xf32>
    %425 = tpu.matmul %422, %424, %cst_395 {dimension_numbers = #tpu.dot_dimension_numbers<[1], [0], [0], [1], [0, 0, 1, 1], [], []>} : vector<10x16xbf16>, vector<16x32xbf16>, vector<10x32xf32> -> vector<10x32xf32>
    %426 = arith.addf %417, %425 : vector<10x32xf32>
    %c1_i32_396 = arith.constant 1 : i32
    %427 = arith.addi %0, %c1_i32_396 : i32
    %c4_i32_397 = arith.constant 4 : i32
    %428 = arith.addi %427, %c4_i32_397 : i32
    %c0_398 = arith.constant 0 : index
    %429 = arith.index_cast %428 : i32 to index
    %c2_399 = arith.constant 2 : index
    %c0_400 = arith.constant 0 : index
    %430 = vector.load %arg2[%c0_398, %429, %c2_399, %c0_400] : memref<1x14x14x16xbf16, #tpu.memory_space<vmem>>, vector<1x1x10x16xbf16>
    %431 = vector.shape_cast %430 : vector<1x1x10x16xbf16> to vector<10x16xbf16>
    %c22_401 = arith.constant 22 : index
    %c0_402 = arith.constant 0 : index
    %c0_403 = arith.constant 0 : index
    %432 = vector.load %arg3[%c22_401, %c0_402, %c0_403] : memref<25x16x32xbf16, #tpu.memory_space<vmem>>, vector<1x16x32xbf16>
    %433 = vector.shape_cast %432 : vector<1x16x32xbf16> to vector<16x32xbf16>
    %cst_404 = arith.constant dense<0.000000e+00> : vector<10x32xf32>
    %434 = tpu.matmul %431, %433, %cst_404 {dimension_numbers = #tpu.dot_dimension_numbers<[1], [0], [0], [1], [0, 0, 1, 1], [], []>} : vector<10x16xbf16>, vector<16x32xbf16>, vector<10x32xf32> -> vector<10x32xf32>
    %435 = arith.addf %426, %434 : vector<10x32xf32>
    %c1_i32_405 = arith.constant 1 : i32
    %436 = arith.addi %0, %c1_i32_405 : i32
    %c4_i32_406 = arith.constant 4 : i32
    %437 = arith.addi %436, %c4_i32_406 : i32
    %c0_407 = arith.constant 0 : index
    %438 = arith.index_cast %437 : i32 to index
    %c3_408 = arith.constant 3 : index
    %c0_409 = arith.constant 0 : index
    %439 = vector.load %arg2[%c0_407, %438, %c3_408, %c0_409] : memref<1x14x14x16xbf16, #tpu.memory_space<vmem>>, vector<1x1x10x16xbf16>
    %440 = vector.shape_cast %439 : vector<1x1x10x16xbf16> to vector<10x16xbf16>
    %c23_410 = arith.constant 23 : index
    %c0_411 = arith.constant 0 : index
    %c0_412 = arith.constant 0 : index
    %441 = vector.load %arg3[%c23_410, %c0_411, %c0_412] : memref<25x16x32xbf16, #tpu.memory_space<vmem>>, vector<1x16x32xbf16>
    %442 = vector.shape_cast %441 : vector<1x16x32xbf16> to vector<16x32xbf16>
    %cst_413 = arith.constant dense<0.000000e+00> : vector<10x32xf32>
    %443 = tpu.matmul %440, %442, %cst_413 {dimension_numbers = #tpu.dot_dimension_numbers<[1], [0], [0], [1], [0, 0, 1, 1], [], []>} : vector<10x16xbf16>, vector<16x32xbf16>, vector<10x32xf32> -> vector<10x32xf32>
    %444 = arith.addf %435, %443 : vector<10x32xf32>
    %c1_i32_414 = arith.constant 1 : i32
    %445 = arith.addi %0, %c1_i32_414 : i32
    %c4_i32_415 = arith.constant 4 : i32
    %446 = arith.addi %445, %c4_i32_415 : i32
    %c0_416 = arith.constant 0 : index
    %447 = arith.index_cast %446 : i32 to index
    %c4_417 = arith.constant 4 : index
    %c0_418 = arith.constant 0 : index
    %448 = vector.load %arg2[%c0_416, %447, %c4_417, %c0_418] : memref<1x14x14x16xbf16, #tpu.memory_space<vmem>>, vector<1x1x10x16xbf16>
    %449 = vector.shape_cast %448 : vector<1x1x10x16xbf16> to vector<10x16xbf16>
    %c24_419 = arith.constant 24 : index
    %c0_420 = arith.constant 0 : index
    %c0_421 = arith.constant 0 : index
    %450 = vector.load %arg3[%c24_419, %c0_420, %c0_421] : memref<25x16x32xbf16, #tpu.memory_space<vmem>>, vector<1x16x32xbf16>
    %451 = vector.shape_cast %450 : vector<1x16x32xbf16> to vector<16x32xbf16>
    %cst_422 = arith.constant dense<0.000000e+00> : vector<10x32xf32>
    %452 = tpu.matmul %449, %451, %cst_422 {dimension_numbers = #tpu.dot_dimension_numbers<[1], [0], [0], [1], [0, 0, 1, 1], [], []>} : vector<10x16xbf16>, vector<16x32xbf16>, vector<10x32xf32> -> vector<10x32xf32>
    %453 = arith.addf %444, %452 : vector<10x32xf32>
    %454 = vector.broadcast %1 : vector<1x32xf32> to vector<10x32xf32>
    %455 = arith.addf %453, %454 : vector<10x32xf32>
    %cst_423 = arith.constant 0.000000e+00 : f32
    %456 = vector.broadcast %cst_423 : f32 to vector<10x32xf32>
    %457 = arith.maximumf %455, %456 : vector<10x32xf32>
    %458 = arith.maximumf %229, %457 : vector<10x32xf32>
    %c0_424 = arith.constant 0 : index
    %c0_425 = arith.constant 0 : index
    %459 = vector.load %arg6[%c0_424, %c0_425] : memref<10x32xf32, #tpu.memory_space<vmem>>, vector<10x32xf32>
    tpu.vector_store %arg6[%c0_424, %c0_425], %458 {strides = array<i32>} : memref<10x32xf32, #tpu.memory_space<vmem>>, vector<10x32xf32>,
    %c0_426 = arith.constant 0 : index
    %c0_427 = arith.constant 0 : index
    %460 = tpu.strided_load %arg6[%c0_426, %c0_427] {strides = array<i32: 2, 1>} : memref<10x32xf32, #tpu.memory_space<vmem>>, vector<5x32xf32>
    %c1_428 = arith.constant 1 : index
    %c0_429 = arith.constant 0 : index
    %461 = tpu.strided_load %arg6[%c1_428, %c0_429] {strides = array<i32: 2, 1>} : memref<10x32xf32, #tpu.memory_space<vmem>>, vector<5x32xf32>
    %462 = arith.maximumf %460, %461 : vector<5x32xf32>
    %463 = arith.truncf %462 : vector<5x32xf32> to vector<5x32xbf16>
    %c0_430 = arith.constant 0 : index
    %c0_431 = arith.constant 0 : index
    %c0_432 = arith.constant 0 : index
    %c0_433 = arith.constant 0 : index
    %464 = vector.load %arg5[%c0_430, %c0_431, %c0_432, %c0_433] : memref<1x1x5x32xbf16, #tpu.memory_space<vmem>>, vector<1x1x5x32xbf16>
    %465 = vector.shape_cast %464 : vector<1x1x5x32xbf16> to vector<5x32xbf16>
    %466 = vector.shape_cast %463 : vector<5x32xbf16> to vector<1x1x5x32xbf16>
    tpu.vector_store %arg5[%c0_430, %c0_431, %c0_432, %c0_433], %466 {strides = array<i32>} : memref<1x1x5x32xbf16, #tpu.memory_space<vmem>>, vector<1x1x5x32xbf16>,
    return
  }
  func.func @transform_0(%arg0: i32, %arg1: i32) -> (i32, i32, i32, i32) {
    %c0_i32 = arith.constant 0 : i32
    %c0_i32_0 = arith.constant 0 : i32
    %c0_i32_1 = arith.constant 0 : i32
    %c0_i32_2 = arith.constant 0 : i32
    return %arg0, %c0_i32, %c0_i32_0, %c0_i32_1 : i32, i32, i32, i32
  }
  func.func @transform_1(%arg0: i32, %arg1: i32) -> (i32, i32, i32) {
    %c0_i32 = arith.constant 0 : i32
    %c0_i32_0 = arith.constant 0 : i32
    %c0_i32_1 = arith.constant 0 : i32
    %c0_i32_2 = arith.constant 0 : i32
    return %c0_i32, %c0_i32_0, %c0_i32_1 : i32, i32, i32
  }
  func.func @transform_2(%arg0: i32, %arg1: i32) -> (i32, i32) {
    %c0_i32 = arith.constant 0 : i32
    %c0_i32_0 = arith.constant 0 : i32
    %c0_i32_1 = arith.constant 0 : i32
    return %c0_i32, %c0_i32_0 : i32, i32
  }
  func.func @transform_3(%arg0: i32, %arg1: i32) -> (i32, i32, i32, i32) {
    %c0_i32 = arith.constant 0 : i32
    %c0_i32_0 = arith.constant 0 : i32
    %c0_i32_1 = arith.constant 0 : i32
    return %arg0, %arg1, %c0_i32, %c0_i32_0 : i32, i32, i32, i32
  }
}

module attributes {stable_mosaic.version = 11 : i64} {
  func.func @_conv_kernel(%arg0: i32, %arg1: i32, %arg2: memref<1x5x5x32xbf16, #tpu.memory_space<vmem>>, %arg3: memref<9x32x64xbf16, #tpu.memory_space<vmem>>, %arg4: memref<1x64xf32, #tpu.memory_space<vmem>>, %arg5: memref<1x1x3x64xbf16, #tpu.memory_space<vmem>>) attributes {dimension_semantics = [#tpu.dimension_semantics<parallel>, #tpu.dimension_semantics<arbitrary>], iteration_bounds = array<i64: 2, 3>, scalar_prefetch = 0 : i64, scratch_operands = 0 : i64, tpu.core_type = #tpu.core_type<tc>, window_params = [{transform_indices = @transform_0, window_bounds = array<i64: 1, 5, 5, 32>}, {pipeline_mode = #tpu.pipeline_mode<synchronous>, transform_indices = @transform_1, window_bounds = array<i64: 9, 32, 64>}, {pipeline_mode = #tpu.pipeline_mode<synchronous>, transform_indices = @transform_2, window_bounds = array<i64: 1, 64>}, {transform_indices = @transform_3, window_bounds = array<i64: 1, 1, 3, 64>}]} {
    %c1_i32 = arith.constant 1 : i32
    %0 = arith.muli %arg1, %c1_i32 : i32
    %c0 = arith.constant 0 : index
    %c0_0 = arith.constant 0 : index
    %1 = vector.load %arg4[%c0, %c0_0] : memref<1x64xf32, #tpu.memory_space<vmem>>, vector<1x64xf32>
    %c0_i32 = arith.constant 0 : i32
    %2 = arith.addi %0, %c0_i32 : i32
    %c0_i32_1 = arith.constant 0 : i32
    %3 = arith.addi %2, %c0_i32_1 : i32
    %c0_2 = arith.constant 0 : index
    %4 = arith.index_cast %3 : i32 to index
    %c0_3 = arith.constant 0 : index
    %c0_4 = arith.constant 0 : index
    %5 = vector.load %arg2[%c0_2, %4, %c0_3, %c0_4] : memref<1x5x5x32xbf16, #tpu.memory_space<vmem>>, vector<1x1x3x32xbf16>
    %6 = vector.shape_cast %5 : vector<1x1x3x32xbf16> to vector<3x32xbf16>
    %c0_5 = arith.constant 0 : index
    %c0_6 = arith.constant 0 : index
    %c0_7 = arith.constant 0 : index
    %7 = vector.load %arg3[%c0_5, %c0_6, %c0_7] : memref<9x32x64xbf16, #tpu.memory_space<vmem>>, vector<1x32x64xbf16>
    %8 = vector.shape_cast %7 : vector<1x32x64xbf16> to vector<32x64xbf16>
    %cst = arith.constant dense<0.000000e+00> : vector<3x64xf32>
    %9 = tpu.matmul %6, %8, %cst {dimension_numbers = #tpu.dot_dimension_numbers<[1], [0], [0], [1], [0, 0, 1, 1], [], []>} : vector<3x32xbf16>, vector<32x64xbf16>, vector<3x64xf32> -> vector<3x64xf32>
    %c0_i32_8 = arith.constant 0 : i32
    %10 = arith.addi %0, %c0_i32_8 : i32
    %c0_i32_9 = arith.constant 0 : i32
    %11 = arith.addi %10, %c0_i32_9 : i32
    %c0_10 = arith.constant 0 : index
    %12 = arith.index_cast %11 : i32 to index
    %c1 = arith.constant 1 : index
    %c0_11 = arith.constant 0 : index
    %13 = vector.load %arg2[%c0_10, %12, %c1, %c0_11] : memref<1x5x5x32xbf16, #tpu.memory_space<vmem>>, vector<1x1x3x32xbf16>
    %14 = vector.shape_cast %13 : vector<1x1x3x32xbf16> to vector<3x32xbf16>
    %c1_12 = arith.constant 1 : index
    %c0_13 = arith.constant 0 : index
    %c0_14 = arith.constant 0 : index
    %15 = vector.load %arg3[%c1_12, %c0_13, %c0_14] : memref<9x32x64xbf16, #tpu.memory_space<vmem>>, vector<1x32x64xbf16>
    %16 = vector.shape_cast %15 : vector<1x32x64xbf16> to vector<32x64xbf16>
    %cst_15 = arith.constant dense<0.000000e+00> : vector<3x64xf32>
    %17 = tpu.matmul %14, %16, %cst_15 {dimension_numbers = #tpu.dot_dimension_numbers<[1], [0], [0], [1], [0, 0, 1, 1], [], []>} : vector<3x32xbf16>, vector<32x64xbf16>, vector<3x64xf32> -> vector<3x64xf32>
    %18 = arith.addf %9, %17 : vector<3x64xf32>
    %c0_i32_16 = arith.constant 0 : i32
    %19 = arith.addi %0, %c0_i32_16 : i32
    %c0_i32_17 = arith.constant 0 : i32
    %20 = arith.addi %19, %c0_i32_17 : i32
    %c0_18 = arith.constant 0 : index
    %21 = arith.index_cast %20 : i32 to index
    %c2 = arith.constant 2 : index
    %c0_19 = arith.constant 0 : index
    %22 = vector.load %arg2[%c0_18, %21, %c2, %c0_19] : memref<1x5x5x32xbf16, #tpu.memory_space<vmem>>, vector<1x1x3x32xbf16>
    %23 = vector.shape_cast %22 : vector<1x1x3x32xbf16> to vector<3x32xbf16>
    %c2_20 = arith.constant 2 : index
    %c0_21 = arith.constant 0 : index
    %c0_22 = arith.constant 0 : index
    %24 = vector.load %arg3[%c2_20, %c0_21, %c0_22] : memref<9x32x64xbf16, #tpu.memory_space<vmem>>, vector<1x32x64xbf16>
    %25 = vector.shape_cast %24 : vector<1x32x64xbf16> to vector<32x64xbf16>
    %cst_23 = arith.constant dense<0.000000e+00> : vector<3x64xf32>
    %26 = tpu.matmul %23, %25, %cst_23 {dimension_numbers = #tpu.dot_dimension_numbers<[1], [0], [0], [1], [0, 0, 1, 1], [], []>} : vector<3x32xbf16>, vector<32x64xbf16>, vector<3x64xf32> -> vector<3x64xf32>
    %27 = arith.addf %18, %26 : vector<3x64xf32>
    %c0_i32_24 = arith.constant 0 : i32
    %28 = arith.addi %0, %c0_i32_24 : i32
    %c1_i32_25 = arith.constant 1 : i32
    %29 = arith.addi %28, %c1_i32_25 : i32
    %c0_26 = arith.constant 0 : index
    %30 = arith.index_cast %29 : i32 to index
    %c0_27 = arith.constant 0 : index
    %c0_28 = arith.constant 0 : index
    %31 = vector.load %arg2[%c0_26, %30, %c0_27, %c0_28] : memref<1x5x5x32xbf16, #tpu.memory_space<vmem>>, vector<1x1x3x32xbf16>
    %32 = vector.shape_cast %31 : vector<1x1x3x32xbf16> to vector<3x32xbf16>
    %c3 = arith.constant 3 : index
    %c0_29 = arith.constant 0 : index
    %c0_30 = arith.constant 0 : index
    %33 = vector.load %arg3[%c3, %c0_29, %c0_30] : memref<9x32x64xbf16, #tpu.memory_space<vmem>>, vector<1x32x64xbf16>
    %34 = vector.shape_cast %33 : vector<1x32x64xbf16> to vector<32x64xbf16>
    %cst_31 = arith.constant dense<0.000000e+00> : vector<3x64xf32>
    %35 = tpu.matmul %32, %34, %cst_31 {dimension_numbers = #tpu.dot_dimension_numbers<[1], [0], [0], [1], [0, 0, 1, 1], [], []>} : vector<3x32xbf16>, vector<32x64xbf16>, vector<3x64xf32> -> vector<3x64xf32>
    %36 = arith.addf %27, %35 : vector<3x64xf32>
    %c0_i32_32 = arith.constant 0 : i32
    %37 = arith.addi %0, %c0_i32_32 : i32
    %c1_i32_33 = arith.constant 1 : i32
    %38 = arith.addi %37, %c1_i32_33 : i32
    %c0_34 = arith.constant 0 : index
    %39 = arith.index_cast %38 : i32 to index
    %c1_35 = arith.constant 1 : index
    %c0_36 = arith.constant 0 : index
    %40 = vector.load %arg2[%c0_34, %39, %c1_35, %c0_36] : memref<1x5x5x32xbf16, #tpu.memory_space<vmem>>, vector<1x1x3x32xbf16>
    %41 = vector.shape_cast %40 : vector<1x1x3x32xbf16> to vector<3x32xbf16>
    %c4 = arith.constant 4 : index
    %c0_37 = arith.constant 0 : index
    %c0_38 = arith.constant 0 : index
    %42 = vector.load %arg3[%c4, %c0_37, %c0_38] : memref<9x32x64xbf16, #tpu.memory_space<vmem>>, vector<1x32x64xbf16>
    %43 = vector.shape_cast %42 : vector<1x32x64xbf16> to vector<32x64xbf16>
    %cst_39 = arith.constant dense<0.000000e+00> : vector<3x64xf32>
    %44 = tpu.matmul %41, %43, %cst_39 {dimension_numbers = #tpu.dot_dimension_numbers<[1], [0], [0], [1], [0, 0, 1, 1], [], []>} : vector<3x32xbf16>, vector<32x64xbf16>, vector<3x64xf32> -> vector<3x64xf32>
    %45 = arith.addf %36, %44 : vector<3x64xf32>
    %c0_i32_40 = arith.constant 0 : i32
    %46 = arith.addi %0, %c0_i32_40 : i32
    %c1_i32_41 = arith.constant 1 : i32
    %47 = arith.addi %46, %c1_i32_41 : i32
    %c0_42 = arith.constant 0 : index
    %48 = arith.index_cast %47 : i32 to index
    %c2_43 = arith.constant 2 : index
    %c0_44 = arith.constant 0 : index
    %49 = vector.load %arg2[%c0_42, %48, %c2_43, %c0_44] : memref<1x5x5x32xbf16, #tpu.memory_space<vmem>>, vector<1x1x3x32xbf16>
    %50 = vector.shape_cast %49 : vector<1x1x3x32xbf16> to vector<3x32xbf16>
    %c5 = arith.constant 5 : index
    %c0_45 = arith.constant 0 : index
    %c0_46 = arith.constant 0 : index
    %51 = vector.load %arg3[%c5, %c0_45, %c0_46] : memref<9x32x64xbf16, #tpu.memory_space<vmem>>, vector<1x32x64xbf16>
    %52 = vector.shape_cast %51 : vector<1x32x64xbf16> to vector<32x64xbf16>
    %cst_47 = arith.constant dense<0.000000e+00> : vector<3x64xf32>
    %53 = tpu.matmul %50, %52, %cst_47 {dimension_numbers = #tpu.dot_dimension_numbers<[1], [0], [0], [1], [0, 0, 1, 1], [], []>} : vector<3x32xbf16>, vector<32x64xbf16>, vector<3x64xf32> -> vector<3x64xf32>
    %54 = arith.addf %45, %53 : vector<3x64xf32>
    %c0_i32_48 = arith.constant 0 : i32
    %55 = arith.addi %0, %c0_i32_48 : i32
    %c2_i32 = arith.constant 2 : i32
    %56 = arith.addi %55, %c2_i32 : i32
    %c0_49 = arith.constant 0 : index
    %57 = arith.index_cast %56 : i32 to index
    %c0_50 = arith.constant 0 : index
    %c0_51 = arith.constant 0 : index
    %58 = vector.load %arg2[%c0_49, %57, %c0_50, %c0_51] : memref<1x5x5x32xbf16, #tpu.memory_space<vmem>>, vector<1x1x3x32xbf16>
    %59 = vector.shape_cast %58 : vector<1x1x3x32xbf16> to vector<3x32xbf16>
    %c6 = arith.constant 6 : index
    %c0_52 = arith.constant 0 : index
    %c0_53 = arith.constant 0 : index
    %60 = vector.load %arg3[%c6, %c0_52, %c0_53] : memref<9x32x64xbf16, #tpu.memory_space<vmem>>, vector<1x32x64xbf16>
    %61 = vector.shape_cast %60 : vector<1x32x64xbf16> to vector<32x64xbf16>
    %cst_54 = arith.constant dense<0.000000e+00> : vector<3x64xf32>
    %62 = tpu.matmul %59, %61, %cst_54 {dimension_numbers = #tpu.dot_dimension_numbers<[1], [0], [0], [1], [0, 0, 1, 1], [], []>} : vector<3x32xbf16>, vector<32x64xbf16>, vector<3x64xf32> -> vector<3x64xf32>
    %63 = arith.addf %54, %62 : vector<3x64xf32>
    %c0_i32_55 = arith.constant 0 : i32
    %64 = arith.addi %0, %c0_i32_55 : i32
    %c2_i32_56 = arith.constant 2 : i32
    %65 = arith.addi %64, %c2_i32_56 : i32
    %c0_57 = arith.constant 0 : index
    %66 = arith.index_cast %65 : i32 to index
    %c1_58 = arith.constant 1 : index
    %c0_59 = arith.constant 0 : index
    %67 = vector.load %arg2[%c0_57, %66, %c1_58, %c0_59] : memref<1x5x5x32xbf16, #tpu.memory_space<vmem>>, vector<1x1x3x32xbf16>
    %68 = vector.shape_cast %67 : vector<1x1x3x32xbf16> to vector<3x32xbf16>
    %c7 = arith.constant 7 : index
    %c0_60 = arith.constant 0 : index
    %c0_61 = arith.constant 0 : index
    %69 = vector.load %arg3[%c7, %c0_60, %c0_61] : memref<9x32x64xbf16, #tpu.memory_space<vmem>>, vector<1x32x64xbf16>
    %70 = vector.shape_cast %69 : vector<1x32x64xbf16> to vector<32x64xbf16>
    %cst_62 = arith.constant dense<0.000000e+00> : vector<3x64xf32>
    %71 = tpu.matmul %68, %70, %cst_62 {dimension_numbers = #tpu.dot_dimension_numbers<[1], [0], [0], [1], [0, 0, 1, 1], [], []>} : vector<3x32xbf16>, vector<32x64xbf16>, vector<3x64xf32> -> vector<3x64xf32>
    %72 = arith.addf %63, %71 : vector<3x64xf32>
    %c0_i32_63 = arith.constant 0 : i32
    %73 = arith.addi %0, %c0_i32_63 : i32
    %c2_i32_64 = arith.constant 2 : i32
    %74 = arith.addi %73, %c2_i32_64 : i32
    %c0_65 = arith.constant 0 : index
    %75 = arith.index_cast %74 : i32 to index
    %c2_66 = arith.constant 2 : index
    %c0_67 = arith.constant 0 : index
    %76 = vector.load %arg2[%c0_65, %75, %c2_66, %c0_67] : memref<1x5x5x32xbf16, #tpu.memory_space<vmem>>, vector<1x1x3x32xbf16>
    %77 = vector.shape_cast %76 : vector<1x1x3x32xbf16> to vector<3x32xbf16>
    %c8 = arith.constant 8 : index
    %c0_68 = arith.constant 0 : index
    %c0_69 = arith.constant 0 : index
    %78 = vector.load %arg3[%c8, %c0_68, %c0_69] : memref<9x32x64xbf16, #tpu.memory_space<vmem>>, vector<1x32x64xbf16>
    %79 = vector.shape_cast %78 : vector<1x32x64xbf16> to vector<32x64xbf16>
    %cst_70 = arith.constant dense<0.000000e+00> : vector<3x64xf32>
    %80 = tpu.matmul %77, %79, %cst_70 {dimension_numbers = #tpu.dot_dimension_numbers<[1], [0], [0], [1], [0, 0, 1, 1], [], []>} : vector<3x32xbf16>, vector<32x64xbf16>, vector<3x64xf32> -> vector<3x64xf32>
    %81 = arith.addf %72, %80 : vector<3x64xf32>
    %82 = vector.broadcast %1 : vector<1x64xf32> to vector<3x64xf32>
    %83 = arith.addf %81, %82 : vector<3x64xf32>
    %cst_71 = arith.constant 0.000000e+00 : f32
    %84 = vector.broadcast %cst_71 : f32 to vector<3x64xf32>
    %85 = arith.maximumf %83, %84 : vector<3x64xf32>
    %86 = arith.truncf %85 : vector<3x64xf32> to vector<3x64xbf16>
    %c0_72 = arith.constant 0 : index
    %c0_73 = arith.constant 0 : index
    %c0_74 = arith.constant 0 : index
    %c0_75 = arith.constant 0 : index
    %87 = vector.load %arg5[%c0_72, %c0_73, %c0_74, %c0_75] : memref<1x1x3x64xbf16, #tpu.memory_space<vmem>>, vector<1x1x3x64xbf16>
    %88 = vector.shape_cast %87 : vector<1x1x3x64xbf16> to vector<3x64xbf16>
    %89 = vector.shape_cast %86 : vector<3x64xbf16> to vector<1x1x3x64xbf16>
    tpu.vector_store %arg5[%c0_72, %c0_73, %c0_74, %c0_75], %89 {strides = array<i32>} : memref<1x1x3x64xbf16, #tpu.memory_space<vmem>>, vector<1x1x3x64xbf16>,
    return
  }
  func.func @transform_0(%arg0: i32, %arg1: i32) -> (i32, i32, i32, i32) {
    %c0_i32 = arith.constant 0 : i32
    %c0_i32_0 = arith.constant 0 : i32
    %c0_i32_1 = arith.constant 0 : i32
    %c0_i32_2 = arith.constant 0 : i32
    return %arg0, %c0_i32, %c0_i32_0, %c0_i32_1 : i32, i32, i32, i32
  }
  func.func @transform_1(%arg0: i32, %arg1: i32) -> (i32, i32, i32) {
    %c0_i32 = arith.constant 0 : i32
    %c0_i32_0 = arith.constant 0 : i32
    %c0_i32_1 = arith.constant 0 : i32
    %c0_i32_2 = arith.constant 0 : i32
    return %c0_i32, %c0_i32_0, %c0_i32_1 : i32, i32, i32
  }
  func.func @transform_2(%arg0: i32, %arg1: i32) -> (i32, i32) {
    %c0_i32 = arith.constant 0 : i32
    %c0_i32_0 = arith.constant 0 : i32
    %c0_i32_1 = arith.constant 0 : i32
    return %c0_i32, %c0_i32_0 : i32, i32
  }
  func.func @transform_3(%arg0: i32, %arg1: i32) -> (i32, i32, i32, i32) {
    %c0_i32 = arith.constant 0 : i32
    %c0_i32_0 = arith.constant 0 : i32
    %c0_i32_1 = arith.constant 0 : i32
    return %arg0, %arg1, %c0_i32, %c0_i32_0 : i32, i32, i32, i32
  }
}

module attributes {stable_mosaic.version = 11 : i64} {
  func.func @_conv_kernel(%arg0: i32, %arg1: i32, %arg2: memref<1x32x32x3xf32, #tpu.memory_space<vmem>>, %arg3: memref<25x3x16xbf16, #tpu.memory_space<vmem>>, %arg4: memref<1x16xf32, #tpu.memory_space<vmem>>, %arg5: memref<1x1x14x16xbf16, #tpu.memory_space<vmem>>, %arg6: memref<28x16xf32, #tpu.memory_space<vmem>>) attributes {dimension_semantics = [#tpu.dimension_semantics<parallel>, #tpu.dimension_semantics<arbitrary>], iteration_bounds = array<i64: 2, 14>, scalar_prefetch = 0 : i64, scratch_operands = 1 : i64, tpu.core_type = #tpu.core_type<tc>, window_params = [{transform_indices = @transform_0, window_bounds = array<i64: 1, 32, 32, 3>}, {pipeline_mode = #tpu.pipeline_mode<synchronous>, transform_indices = @transform_1, window_bounds = array<i64: 25, 3, 16>}, {pipeline_mode = #tpu.pipeline_mode<synchronous>, transform_indices = @transform_2, window_bounds = array<i64: 1, 16>}, {transform_indices = @transform_3, window_bounds = array<i64: 1, 1, 14, 16>}]} {
    %c2_i32 = arith.constant 2 : i32
    %0 = arith.muli %arg1, %c2_i32 : i32
    %c0 = arith.constant 0 : index
    %c0_0 = arith.constant 0 : index
    %1 = vector.load %arg4[%c0, %c0_0] : memref<1x16xf32, #tpu.memory_space<vmem>>, vector<1x16xf32>
    %c0_i32 = arith.constant 0 : i32
    %2 = arith.addi %0, %c0_i32 : i32
    %c0_i32_1 = arith.constant 0 : i32
    %3 = arith.addi %2, %c0_i32_1 : i32
    %c0_2 = arith.constant 0 : index
    %4 = arith.index_cast %3 : i32 to index
    %c0_3 = arith.constant 0 : index
    %c0_4 = arith.constant 0 : index
    %5 = vector.load %arg2[%c0_2, %4, %c0_3, %c0_4] : memref<1x32x32x3xf32, #tpu.memory_space<vmem>>, vector<1x1x28x3xf32>
    %6 = vector.shape_cast %5 : vector<1x1x28x3xf32> to vector<28x3xf32>
    %7 = arith.truncf %6 : vector<28x3xf32> to vector<28x3xbf16>
    %c0_5 = arith.constant 0 : index
    %c0_6 = arith.constant 0 : index
    %c0_7 = arith.constant 0 : index
    %8 = vector.load %arg3[%c0_5, %c0_6, %c0_7] : memref<25x3x16xbf16, #tpu.memory_space<vmem>>, vector<1x3x16xbf16>
    %9 = vector.shape_cast %8 : vector<1x3x16xbf16> to vector<3x16xbf16>
    %cst = arith.constant dense<0.000000e+00> : vector<28x16xf32>
    %10 = tpu.matmul %7, %9, %cst {dimension_numbers = #tpu.dot_dimension_numbers<[1], [0], [0], [1], [0, 0, 1, 1], [], []>} : vector<28x3xbf16>, vector<3x16xbf16>, vector<28x16xf32> -> vector<28x16xf32>
    %c0_i32_8 = arith.constant 0 : i32
    %11 = arith.addi %0, %c0_i32_8 : i32
    %c0_i32_9 = arith.constant 0 : i32
    %12 = arith.addi %11, %c0_i32_9 : i32
    %c0_10 = arith.constant 0 : index
    %13 = arith.index_cast %12 : i32 to index
    %c1 = arith.constant 1 : index
    %c0_11 = arith.constant 0 : index
    %14 = vector.load %arg2[%c0_10, %13, %c1, %c0_11] : memref<1x32x32x3xf32, #tpu.memory_space<vmem>>, vector<1x1x28x3xf32>
    %15 = vector.shape_cast %14 : vector<1x1x28x3xf32> to vector<28x3xf32>
    %16 = arith.truncf %15 : vector<28x3xf32> to vector<28x3xbf16>
    %c1_12 = arith.constant 1 : index
    %c0_13 = arith.constant 0 : index
    %c0_14 = arith.constant 0 : index
    %17 = vector.load %arg3[%c1_12, %c0_13, %c0_14] : memref<25x3x16xbf16, #tpu.memory_space<vmem>>, vector<1x3x16xbf16>
    %18 = vector.shape_cast %17 : vector<1x3x16xbf16> to vector<3x16xbf16>
    %cst_15 = arith.constant dense<0.000000e+00> : vector<28x16xf32>
    %19 = tpu.matmul %16, %18, %cst_15 {dimension_numbers = #tpu.dot_dimension_numbers<[1], [0], [0], [1], [0, 0, 1, 1], [], []>} : vector<28x3xbf16>, vector<3x16xbf16>, vector<28x16xf32> -> vector<28x16xf32>
    %20 = arith.addf %10, %19 : vector<28x16xf32>
    %c0_i32_16 = arith.constant 0 : i32
    %21 = arith.addi %0, %c0_i32_16 : i32
    %c0_i32_17 = arith.constant 0 : i32
    %22 = arith.addi %21, %c0_i32_17 : i32
    %c0_18 = arith.constant 0 : index
    %23 = arith.index_cast %22 : i32 to index
    %c2 = arith.constant 2 : index
    %c0_19 = arith.constant 0 : index
    %24 = vector.load %arg2[%c0_18, %23, %c2, %c0_19] : memref<1x32x32x3xf32, #tpu.memory_space<vmem>>, vector<1x1x28x3xf32>
    %25 = vector.shape_cast %24 : vector<1x1x28x3xf32> to vector<28x3xf32>
    %26 = arith.truncf %25 : vector<28x3xf32> to vector<28x3xbf16>
    %c2_20 = arith.constant 2 : index
    %c0_21 = arith.constant 0 : index
    %c0_22 = arith.constant 0 : index
    %27 = vector.load %arg3[%c2_20, %c0_21, %c0_22] : memref<25x3x16xbf16, #tpu.memory_space<vmem>>, vector<1x3x16xbf16>
    %28 = vector.shape_cast %27 : vector<1x3x16xbf16> to vector<3x16xbf16>
    %cst_23 = arith.constant dense<0.000000e+00> : vector<28x16xf32>
    %29 = tpu.matmul %26, %28, %cst_23 {dimension_numbers = #tpu.dot_dimension_numbers<[1], [0], [0], [1], [0, 0, 1, 1], [], []>} : vector<28x3xbf16>, vector<3x16xbf16>, vector<28x16xf32> -> vector<28x16xf32>
    %30 = arith.addf %20, %29 : vector<28x16xf32>
    %c0_i32_24 = arith.constant 0 : i32
    %31 = arith.addi %0, %c0_i32_24 : i32
    %c0_i32_25 = arith.constant 0 : i32
    %32 = arith.addi %31, %c0_i32_25 : i32
    %c0_26 = arith.constant 0 : index
    %33 = arith.index_cast %32 : i32 to index
    %c3 = arith.constant 3 : index
    %c0_27 = arith.constant 0 : index
    %34 = vector.load %arg2[%c0_26, %33, %c3, %c0_27] : memref<1x32x32x3xf32, #tpu.memory_space<vmem>>, vector<1x1x28x3xf32>
    %35 = vector.shape_cast %34 : vector<1x1x28x3xf32> to vector<28x3xf32>
    %36 = arith.truncf %35 : vector<28x3xf32> to vector<28x3xbf16>
    %c3_28 = arith.constant 3 : index
    %c0_29 = arith.constant 0 : index
    %c0_30 = arith.constant 0 : index
    %37 = vector.load %arg3[%c3_28, %c0_29, %c0_30] : memref<25x3x16xbf16, #tpu.memory_space<vmem>>, vector<1x3x16xbf16>
    %38 = vector.shape_cast %37 : vector<1x3x16xbf16> to vector<3x16xbf16>
    %cst_31 = arith.constant dense<0.000000e+00> : vector<28x16xf32>
    %39 = tpu.matmul %36, %38, %cst_31 {dimension_numbers = #tpu.dot_dimension_numbers<[1], [0], [0], [1], [0, 0, 1, 1], [], []>} : vector<28x3xbf16>, vector<3x16xbf16>, vector<28x16xf32> -> vector<28x16xf32>
    %40 = arith.addf %30, %39 : vector<28x16xf32>
    %c0_i32_32 = arith.constant 0 : i32
    %41 = arith.addi %0, %c0_i32_32 : i32
    %c0_i32_33 = arith.constant 0 : i32
    %42 = arith.addi %41, %c0_i32_33 : i32
    %c0_34 = arith.constant 0 : index
    %43 = arith.index_cast %42 : i32 to index
    %c4 = arith.constant 4 : index
    %c0_35 = arith.constant 0 : index
    %44 = vector.load %arg2[%c0_34, %43, %c4, %c0_35] : memref<1x32x32x3xf32, #tpu.memory_space<vmem>>, vector<1x1x28x3xf32>
    %45 = vector.shape_cast %44 : vector<1x1x28x3xf32> to vector<28x3xf32>
    %46 = arith.truncf %45 : vector<28x3xf32> to vector<28x3xbf16>
    %c4_36 = arith.constant 4 : index
    %c0_37 = arith.constant 0 : index
    %c0_38 = arith.constant 0 : index
    %47 = vector.load %arg3[%c4_36, %c0_37, %c0_38] : memref<25x3x16xbf16, #tpu.memory_space<vmem>>, vector<1x3x16xbf16>
    %48 = vector.shape_cast %47 : vector<1x3x16xbf16> to vector<3x16xbf16>
    %cst_39 = arith.constant dense<0.000000e+00> : vector<28x16xf32>
    %49 = tpu.matmul %46, %48, %cst_39 {dimension_numbers = #tpu.dot_dimension_numbers<[1], [0], [0], [1], [0, 0, 1, 1], [], []>} : vector<28x3xbf16>, vector<3x16xbf16>, vector<28x16xf32> -> vector<28x16xf32>
    %50 = arith.addf %40, %49 : vector<28x16xf32>
    %c0_i32_40 = arith.constant 0 : i32
    %51 = arith.addi %0, %c0_i32_40 : i32
    %c1_i32 = arith.constant 1 : i32
    %52 = arith.addi %51, %c1_i32 : i32
    %c0_41 = arith.constant 0 : index
    %53 = arith.index_cast %52 : i32 to index
    %c0_42 = arith.constant 0 : index
    %c0_43 = arith.constant 0 : index
    %54 = vector.load %arg2[%c0_41, %53, %c0_42, %c0_43] : memref<1x32x32x3xf32, #tpu.memory_space<vmem>>, vector<1x1x28x3xf32>
    %55 = vector.shape_cast %54 : vector<1x1x28x3xf32> to vector<28x3xf32>
    %56 = arith.truncf %55 : vector<28x3xf32> to vector<28x3xbf16>
    %c5 = arith.constant 5 : index
    %c0_44 = arith.constant 0 : index
    %c0_45 = arith.constant 0 : index
    %57 = vector.load %arg3[%c5, %c0_44, %c0_45] : memref<25x3x16xbf16, #tpu.memory_space<vmem>>, vector<1x3x16xbf16>
    %58 = vector.shape_cast %57 : vector<1x3x16xbf16> to vector<3x16xbf16>
    %cst_46 = arith.constant dense<0.000000e+00> : vector<28x16xf32>
    %59 = tpu.matmul %56, %58, %cst_46 {dimension_numbers = #tpu.dot_dimension_numbers<[1], [0], [0], [1], [0, 0, 1, 1], [], []>} : vector<28x3xbf16>, vector<3x16xbf16>, vector<28x16xf32> -> vector<28x16xf32>
    %60 = arith.addf %50, %59 : vector<28x16xf32>
    %c0_i32_47 = arith.constant 0 : i32
    %61 = arith.addi %0, %c0_i32_47 : i32
    %c1_i32_48 = arith.constant 1 : i32
    %62 = arith.addi %61, %c1_i32_48 : i32
    %c0_49 = arith.constant 0 : index
    %63 = arith.index_cast %62 : i32 to index
    %c1_50 = arith.constant 1 : index
    %c0_51 = arith.constant 0 : index
    %64 = vector.load %arg2[%c0_49, %63, %c1_50, %c0_51] : memref<1x32x32x3xf32, #tpu.memory_space<vmem>>, vector<1x1x28x3xf32>
    %65 = vector.shape_cast %64 : vector<1x1x28x3xf32> to vector<28x3xf32>
    %66 = arith.truncf %65 : vector<28x3xf32> to vector<28x3xbf16>
    %c6 = arith.constant 6 : index
    %c0_52 = arith.constant 0 : index
    %c0_53 = arith.constant 0 : index
    %67 = vector.load %arg3[%c6, %c0_52, %c0_53] : memref<25x3x16xbf16, #tpu.memory_space<vmem>>, vector<1x3x16xbf16>
    %68 = vector.shape_cast %67 : vector<1x3x16xbf16> to vector<3x16xbf16>
    %cst_54 = arith.constant dense<0.000000e+00> : vector<28x16xf32>
    %69 = tpu.matmul %66, %68, %cst_54 {dimension_numbers = #tpu.dot_dimension_numbers<[1], [0], [0], [1], [0, 0, 1, 1], [], []>} : vector<28x3xbf16>, vector<3x16xbf16>, vector<28x16xf32> -> vector<28x16xf32>
    %70 = arith.addf %60, %69 : vector<28x16xf32>
    %c0_i32_55 = arith.constant 0 : i32
    %71 = arith.addi %0, %c0_i32_55 : i32
    %c1_i32_56 = arith.constant 1 : i32
    %72 = arith.addi %71, %c1_i32_56 : i32
    %c0_57 = arith.constant 0 : index
    %73 = arith.index_cast %72 : i32 to index
    %c2_58 = arith.constant 2 : index
    %c0_59 = arith.constant 0 : index
    %74 = vector.load %arg2[%c0_57, %73, %c2_58, %c0_59] : memref<1x32x32x3xf32, #tpu.memory_space<vmem>>, vector<1x1x28x3xf32>
    %75 = vector.shape_cast %74 : vector<1x1x28x3xf32> to vector<28x3xf32>
    %76 = arith.truncf %75 : vector<28x3xf32> to vector<28x3xbf16>
    %c7 = arith.constant 7 : index
    %c0_60 = arith.constant 0 : index
    %c0_61 = arith.constant 0 : index
    %77 = vector.load %arg3[%c7, %c0_60, %c0_61] : memref<25x3x16xbf16, #tpu.memory_space<vmem>>, vector<1x3x16xbf16>
    %78 = vector.shape_cast %77 : vector<1x3x16xbf16> to vector<3x16xbf16>
    %cst_62 = arith.constant dense<0.000000e+00> : vector<28x16xf32>
    %79 = tpu.matmul %76, %78, %cst_62 {dimension_numbers = #tpu.dot_dimension_numbers<[1], [0], [0], [1], [0, 0, 1, 1], [], []>} : vector<28x3xbf16>, vector<3x16xbf16>, vector<28x16xf32> -> vector<28x16xf32>
    %80 = arith.addf %70, %79 : vector<28x16xf32>
    %c0_i32_63 = arith.constant 0 : i32
    %81 = arith.addi %0, %c0_i32_63 : i32
    %c1_i32_64 = arith.constant 1 : i32
    %82 = arith.addi %81, %c1_i32_64 : i32
    %c0_65 = arith.constant 0 : index
    %83 = arith.index_cast %82 : i32 to index
    %c3_66 = arith.constant 3 : index
    %c0_67 = arith.constant 0 : index
    %84 = vector.load %arg2[%c0_65, %83, %c3_66, %c0_67] : memref<1x32x32x3xf32, #tpu.memory_space<vmem>>, vector<1x1x28x3xf32>
    %85 = vector.shape_cast %84 : vector<1x1x28x3xf32> to vector<28x3xf32>
    %86 = arith.truncf %85 : vector<28x3xf32> to vector<28x3xbf16>
    %c8 = arith.constant 8 : index
    %c0_68 = arith.constant 0 : index
    %c0_69 = arith.constant 0 : index
    %87 = vector.load %arg3[%c8, %c0_68, %c0_69] : memref<25x3x16xbf16, #tpu.memory_space<vmem>>, vector<1x3x16xbf16>
    %88 = vector.shape_cast %87 : vector<1x3x16xbf16> to vector<3x16xbf16>
    %cst_70 = arith.constant dense<0.000000e+00> : vector<28x16xf32>
    %89 = tpu.matmul %86, %88, %cst_70 {dimension_numbers = #tpu.dot_dimension_numbers<[1], [0], [0], [1], [0, 0, 1, 1], [], []>} : vector<28x3xbf16>, vector<3x16xbf16>, vector<28x16xf32> -> vector<28x16xf32>
    %90 = arith.addf %80, %89 : vector<28x16xf32>
    %c0_i32_71 = arith.constant 0 : i32
    %91 = arith.addi %0, %c0_i32_71 : i32
    %c1_i32_72 = arith.constant 1 : i32
    %92 = arith.addi %91, %c1_i32_72 : i32
    %c0_73 = arith.constant 0 : index
    %93 = arith.index_cast %92 : i32 to index
    %c4_74 = arith.constant 4 : index
    %c0_75 = arith.constant 0 : index
    %94 = vector.load %arg2[%c0_73, %93, %c4_74, %c0_75] : memref<1x32x32x3xf32, #tpu.memory_space<vmem>>, vector<1x1x28x3xf32>
    %95 = vector.shape_cast %94 : vector<1x1x28x3xf32> to vector<28x3xf32>
    %96 = arith.truncf %95 : vector<28x3xf32> to vector<28x3xbf16>
    %c9 = arith.constant 9 : index
    %c0_76 = arith.constant 0 : index
    %c0_77 = arith.constant 0 : index
    %97 = vector.load %arg3[%c9, %c0_76, %c0_77] : memref<25x3x16xbf16, #tpu.memory_space<vmem>>, vector<1x3x16xbf16>
    %98 = vector.shape_cast %97 : vector<1x3x16xbf16> to vector<3x16xbf16>
    %cst_78 = arith.constant dense<0.000000e+00> : vector<28x16xf32>
    %99 = tpu.matmul %96, %98, %cst_78 {dimension_numbers = #tpu.dot_dimension_numbers<[1], [0], [0], [1], [0, 0, 1, 1], [], []>} : vector<28x3xbf16>, vector<3x16xbf16>, vector<28x16xf32> -> vector<28x16xf32>
    %100 = arith.addf %90, %99 : vector<28x16xf32>
    %c0_i32_79 = arith.constant 0 : i32
    %101 = arith.addi %0, %c0_i32_79 : i32
    %c2_i32_80 = arith.constant 2 : i32
    %102 = arith.addi %101, %c2_i32_80 : i32
    %c0_81 = arith.constant 0 : index
    %103 = arith.index_cast %102 : i32 to index
    %c0_82 = arith.constant 0 : index
    %c0_83 = arith.constant 0 : index
    %104 = vector.load %arg2[%c0_81, %103, %c0_82, %c0_83] : memref<1x32x32x3xf32, #tpu.memory_space<vmem>>, vector<1x1x28x3xf32>
    %105 = vector.shape_cast %104 : vector<1x1x28x3xf32> to vector<28x3xf32>
    %106 = arith.truncf %105 : vector<28x3xf32> to vector<28x3xbf16>
    %c10 = arith.constant 10 : index
    %c0_84 = arith.constant 0 : index
    %c0_85 = arith.constant 0 : index
    %107 = vector.load %arg3[%c10, %c0_84, %c0_85] : memref<25x3x16xbf16, #tpu.memory_space<vmem>>, vector<1x3x16xbf16>
    %108 = vector.shape_cast %107 : vector<1x3x16xbf16> to vector<3x16xbf16>
    %cst_86 = arith.constant dense<0.000000e+00> : vector<28x16xf32>
    %109 = tpu.matmul %106, %108, %cst_86 {dimension_numbers = #tpu.dot_dimension_numbers<[1], [0], [0], [1], [0, 0, 1, 1], [], []>} : vector<28x3xbf16>, vector<3x16xbf16>, vector<28x16xf32> -> vector<28x16xf32>
    %110 = arith.addf %100, %109 : vector<28x16xf32>
    %c0_i32_87 = arith.constant 0 : i32
    %111 = arith.addi %0, %c0_i32_87 : i32
    %c2_i32_88 = arith.constant 2 : i32
    %112 = arith.addi %111, %c2_i32_88 : i32
    %c0_89 = arith.constant 0 : index
    %113 = arith.index_cast %112 : i32 to index
    %c1_90 = arith.constant 1 : index
    %c0_91 = arith.constant 0 : index
    %114 = vector.load %arg2[%c0_89, %113, %c1_90, %c0_91] : memref<1x32x32x3xf32, #tpu.memory_space<vmem>>, vector<1x1x28x3xf32>
    %115 = vector.shape_cast %114 : vector<1x1x28x3xf32> to vector<28x3xf32>
    %116 = arith.truncf %115 : vector<28x3xf32> to vector<28x3xbf16>
    %c11 = arith.constant 11 : index
    %c0_92 = arith.constant 0 : index
    %c0_93 = arith.constant 0 : index
    %117 = vector.load %arg3[%c11, %c0_92, %c0_93] : memref<25x3x16xbf16, #tpu.memory_space<vmem>>, vector<1x3x16xbf16>
    %118 = vector.shape_cast %117 : vector<1x3x16xbf16> to vector<3x16xbf16>
    %cst_94 = arith.constant dense<0.000000e+00> : vector<28x16xf32>
    %119 = tpu.matmul %116, %118, %cst_94 {dimension_numbers = #tpu.dot_dimension_numbers<[1], [0], [0], [1], [0, 0, 1, 1], [], []>} : vector<28x3xbf16>, vector<3x16xbf16>, vector<28x16xf32> -> vector<28x16xf32>
    %120 = arith.addf %110, %119 : vector<28x16xf32>
    %c0_i32_95 = arith.constant 0 : i32
    %121 = arith.addi %0, %c0_i32_95 : i32
    %c2_i32_96 = arith.constant 2 : i32
    %122 = arith.addi %121, %c2_i32_96 : i32
    %c0_97 = arith.constant 0 : index
    %123 = arith.index_cast %122 : i32 to index
    %c2_98 = arith.constant 2 : index
    %c0_99 = arith.constant 0 : index
    %124 = vector.load %arg2[%c0_97, %123, %c2_98, %c0_99] : memref<1x32x32x3xf32, #tpu.memory_space<vmem>>, vector<1x1x28x3xf32>
    %125 = vector.shape_cast %124 : vector<1x1x28x3xf32> to vector<28x3xf32>
    %126 = arith.truncf %125 : vector<28x3xf32> to vector<28x3xbf16>
    %c12 = arith.constant 12 : index
    %c0_100 = arith.constant 0 : index
    %c0_101 = arith.constant 0 : index
    %127 = vector.load %arg3[%c12, %c0_100, %c0_101] : memref<25x3x16xbf16, #tpu.memory_space<vmem>>, vector<1x3x16xbf16>
    %128 = vector.shape_cast %127 : vector<1x3x16xbf16> to vector<3x16xbf16>
    %cst_102 = arith.constant dense<0.000000e+00> : vector<28x16xf32>
    %129 = tpu.matmul %126, %128, %cst_102 {dimension_numbers = #tpu.dot_dimension_numbers<[1], [0], [0], [1], [0, 0, 1, 1], [], []>} : vector<28x3xbf16>, vector<3x16xbf16>, vector<28x16xf32> -> vector<28x16xf32>
    %130 = arith.addf %120, %129 : vector<28x16xf32>
    %c0_i32_103 = arith.constant 0 : i32
    %131 = arith.addi %0, %c0_i32_103 : i32
    %c2_i32_104 = arith.constant 2 : i32
    %132 = arith.addi %131, %c2_i32_104 : i32
    %c0_105 = arith.constant 0 : index
    %133 = arith.index_cast %132 : i32 to index
    %c3_106 = arith.constant 3 : index
    %c0_107 = arith.constant 0 : index
    %134 = vector.load %arg2[%c0_105, %133, %c3_106, %c0_107] : memref<1x32x32x3xf32, #tpu.memory_space<vmem>>, vector<1x1x28x3xf32>
    %135 = vector.shape_cast %134 : vector<1x1x28x3xf32> to vector<28x3xf32>
    %136 = arith.truncf %135 : vector<28x3xf32> to vector<28x3xbf16>
    %c13 = arith.constant 13 : index
    %c0_108 = arith.constant 0 : index
    %c0_109 = arith.constant 0 : index
    %137 = vector.load %arg3[%c13, %c0_108, %c0_109] : memref<25x3x16xbf16, #tpu.memory_space<vmem>>, vector<1x3x16xbf16>
    %138 = vector.shape_cast %137 : vector<1x3x16xbf16> to vector<3x16xbf16>
    %cst_110 = arith.constant dense<0.000000e+00> : vector<28x16xf32>
    %139 = tpu.matmul %136, %138, %cst_110 {dimension_numbers = #tpu.dot_dimension_numbers<[1], [0], [0], [1], [0, 0, 1, 1], [], []>} : vector<28x3xbf16>, vector<3x16xbf16>, vector<28x16xf32> -> vector<28x16xf32>
    %140 = arith.addf %130, %139 : vector<28x16xf32>
    %c0_i32_111 = arith.constant 0 : i32
    %141 = arith.addi %0, %c0_i32_111 : i32
    %c2_i32_112 = arith.constant 2 : i32
    %142 = arith.addi %141, %c2_i32_112 : i32
    %c0_113 = arith.constant 0 : index
    %143 = arith.index_cast %142 : i32 to index
    %c4_114 = arith.constant 4 : index
    %c0_115 = arith.constant 0 : index
    %144 = vector.load %arg2[%c0_113, %143, %c4_114, %c0_115] : memref<1x32x32x3xf32, #tpu.memory_space<vmem>>, vector<1x1x28x3xf32>
    %145 = vector.shape_cast %144 : vector<1x1x28x3xf32> to vector<28x3xf32>
    %146 = arith.truncf %145 : vector<28x3xf32> to vector<28x3xbf16>
    %c14 = arith.constant 14 : index
    %c0_116 = arith.constant 0 : index
    %c0_117 = arith.constant 0 : index
    %147 = vector.load %arg3[%c14, %c0_116, %c0_117] : memref<25x3x16xbf16, #tpu.memory_space<vmem>>, vector<1x3x16xbf16>
    %148 = vector.shape_cast %147 : vector<1x3x16xbf16> to vector<3x16xbf16>
    %cst_118 = arith.constant dense<0.000000e+00> : vector<28x16xf32>
    %149 = tpu.matmul %146, %148, %cst_118 {dimension_numbers = #tpu.dot_dimension_numbers<[1], [0], [0], [1], [0, 0, 1, 1], [], []>} : vector<28x3xbf16>, vector<3x16xbf16>, vector<28x16xf32> -> vector<28x16xf32>
    %150 = arith.addf %140, %149 : vector<28x16xf32>
    %c0_i32_119 = arith.constant 0 : i32
    %151 = arith.addi %0, %c0_i32_119 : i32
    %c3_i32 = arith.constant 3 : i32
    %152 = arith.addi %151, %c3_i32 : i32
    %c0_120 = arith.constant 0 : index
    %153 = arith.index_cast %152 : i32 to index
    %c0_121 = arith.constant 0 : index
    %c0_122 = arith.constant 0 : index
    %154 = vector.load %arg2[%c0_120, %153, %c0_121, %c0_122] : memref<1x32x32x3xf32, #tpu.memory_space<vmem>>, vector<1x1x28x3xf32>
    %155 = vector.shape_cast %154 : vector<1x1x28x3xf32> to vector<28x3xf32>
    %156 = arith.truncf %155 : vector<28x3xf32> to vector<28x3xbf16>
    %c15 = arith.constant 15 : index
    %c0_123 = arith.constant 0 : index
    %c0_124 = arith.constant 0 : index
    %157 = vector.load %arg3[%c15, %c0_123, %c0_124] : memref<25x3x16xbf16, #tpu.memory_space<vmem>>, vector<1x3x16xbf16>
    %158 = vector.shape_cast %157 : vector<1x3x16xbf16> to vector<3x16xbf16>
    %cst_125 = arith.constant dense<0.000000e+00> : vector<28x16xf32>
    %159 = tpu.matmul %156, %158, %cst_125 {dimension_numbers = #tpu.dot_dimension_numbers<[1], [0], [0], [1], [0, 0, 1, 1], [], []>} : vector<28x3xbf16>, vector<3x16xbf16>, vector<28x16xf32> -> vector<28x16xf32>
    %160 = arith.addf %150, %159 : vector<28x16xf32>
    %c0_i32_126 = arith.constant 0 : i32
    %161 = arith.addi %0, %c0_i32_126 : i32
    %c3_i32_127 = arith.constant 3 : i32
    %162 = arith.addi %161, %c3_i32_127 : i32
    %c0_128 = arith.constant 0 : index
    %163 = arith.index_cast %162 : i32 to index
    %c1_129 = arith.constant 1 : index
    %c0_130 = arith.constant 0 : index
    %164 = vector.load %arg2[%c0_128, %163, %c1_129, %c0_130] : memref<1x32x32x3xf32, #tpu.memory_space<vmem>>, vector<1x1x28x3xf32>
    %165 = vector.shape_cast %164 : vector<1x1x28x3xf32> to vector<28x3xf32>
    %166 = arith.truncf %165 : vector<28x3xf32> to vector<28x3xbf16>
    %c16 = arith.constant 16 : index
    %c0_131 = arith.constant 0 : index
    %c0_132 = arith.constant 0 : index
    %167 = vector.load %arg3[%c16, %c0_131, %c0_132] : memref<25x3x16xbf16, #tpu.memory_space<vmem>>, vector<1x3x16xbf16>
    %168 = vector.shape_cast %167 : vector<1x3x16xbf16> to vector<3x16xbf16>
    %cst_133 = arith.constant dense<0.000000e+00> : vector<28x16xf32>
    %169 = tpu.matmul %166, %168, %cst_133 {dimension_numbers = #tpu.dot_dimension_numbers<[1], [0], [0], [1], [0, 0, 1, 1], [], []>} : vector<28x3xbf16>, vector<3x16xbf16>, vector<28x16xf32> -> vector<28x16xf32>
    %170 = arith.addf %160, %169 : vector<28x16xf32>
    %c0_i32_134 = arith.constant 0 : i32
    %171 = arith.addi %0, %c0_i32_134 : i32
    %c3_i32_135 = arith.constant 3 : i32
    %172 = arith.addi %171, %c3_i32_135 : i32
    %c0_136 = arith.constant 0 : index
    %173 = arith.index_cast %172 : i32 to index
    %c2_137 = arith.constant 2 : index
    %c0_138 = arith.constant 0 : index
    %174 = vector.load %arg2[%c0_136, %173, %c2_137, %c0_138] : memref<1x32x32x3xf32, #tpu.memory_space<vmem>>, vector<1x1x28x3xf32>
    %175 = vector.shape_cast %174 : vector<1x1x28x3xf32> to vector<28x3xf32>
    %176 = arith.truncf %175 : vector<28x3xf32> to vector<28x3xbf16>
    %c17 = arith.constant 17 : index
    %c0_139 = arith.constant 0 : index
    %c0_140 = arith.constant 0 : index
    %177 = vector.load %arg3[%c17, %c0_139, %c0_140] : memref<25x3x16xbf16, #tpu.memory_space<vmem>>, vector<1x3x16xbf16>
    %178 = vector.shape_cast %177 : vector<1x3x16xbf16> to vector<3x16xbf16>
    %cst_141 = arith.constant dense<0.000000e+00> : vector<28x16xf32>
    %179 = tpu.matmul %176, %178, %cst_141 {dimension_numbers = #tpu.dot_dimension_numbers<[1], [0], [0], [1], [0, 0, 1, 1], [], []>} : vector<28x3xbf16>, vector<3x16xbf16>, vector<28x16xf32> -> vector<28x16xf32>
    %180 = arith.addf %170, %179 : vector<28x16xf32>
    %c0_i32_142 = arith.constant 0 : i32
    %181 = arith.addi %0, %c0_i32_142 : i32
    %c3_i32_143 = arith.constant 3 : i32
    %182 = arith.addi %181, %c3_i32_143 : i32
    %c0_144 = arith.constant 0 : index
    %183 = arith.index_cast %182 : i32 to index
    %c3_145 = arith.constant 3 : index
    %c0_146 = arith.constant 0 : index
    %184 = vector.load %arg2[%c0_144, %183, %c3_145, %c0_146] : memref<1x32x32x3xf32, #tpu.memory_space<vmem>>, vector<1x1x28x3xf32>
    %185 = vector.shape_cast %184 : vector<1x1x28x3xf32> to vector<28x3xf32>
    %186 = arith.truncf %185 : vector<28x3xf32> to vector<28x3xbf16>
    %c18 = arith.constant 18 : index
    %c0_147 = arith.constant 0 : index
    %c0_148 = arith.constant 0 : index
    %187 = vector.load %arg3[%c18, %c0_147, %c0_148] : memref<25x3x16xbf16, #tpu.memory_space<vmem>>, vector<1x3x16xbf16>
    %188 = vector.shape_cast %187 : vector<1x3x16xbf16> to vector<3x16xbf16>
    %cst_149 = arith.constant dense<0.000000e+00> : vector<28x16xf32>
    %189 = tpu.matmul %186, %188, %cst_149 {dimension_numbers = #tpu.dot_dimension_numbers<[1], [0], [0], [1], [0, 0, 1, 1], [], []>} : vector<28x3xbf16>, vector<3x16xbf16>, vector<28x16xf32> -> vector<28x16xf32>
    %190 = arith.addf %180, %189 : vector<28x16xf32>
    %c0_i32_150 = arith.constant 0 : i32
    %191 = arith.addi %0, %c0_i32_150 : i32
    %c3_i32_151 = arith.constant 3 : i32
    %192 = arith.addi %191, %c3_i32_151 : i32
    %c0_152 = arith.constant 0 : index
    %193 = arith.index_cast %192 : i32 to index
    %c4_153 = arith.constant 4 : index
    %c0_154 = arith.constant 0 : index
    %194 = vector.load %arg2[%c0_152, %193, %c4_153, %c0_154] : memref<1x32x32x3xf32, #tpu.memory_space<vmem>>, vector<1x1x28x3xf32>
    %195 = vector.shape_cast %194 : vector<1x1x28x3xf32> to vector<28x3xf32>
    %196 = arith.truncf %195 : vector<28x3xf32> to vector<28x3xbf16>
    %c19 = arith.constant 19 : index
    %c0_155 = arith.constant 0 : index
    %c0_156 = arith.constant 0 : index
    %197 = vector.load %arg3[%c19, %c0_155, %c0_156] : memref<25x3x16xbf16, #tpu.memory_space<vmem>>, vector<1x3x16xbf16>
    %198 = vector.shape_cast %197 : vector<1x3x16xbf16> to vector<3x16xbf16>
    %cst_157 = arith.constant dense<0.000000e+00> : vector<28x16xf32>
    %199 = tpu.matmul %196, %198, %cst_157 {dimension_numbers = #tpu.dot_dimension_numbers<[1], [0], [0], [1], [0, 0, 1, 1], [], []>} : vector<28x3xbf16>, vector<3x16xbf16>, vector<28x16xf32> -> vector<28x16xf32>
    %200 = arith.addf %190, %199 : vector<28x16xf32>
    %c0_i32_158 = arith.constant 0 : i32
    %201 = arith.addi %0, %c0_i32_158 : i32
    %c4_i32 = arith.constant 4 : i32
    %202 = arith.addi %201, %c4_i32 : i32
    %c0_159 = arith.constant 0 : index
    %203 = arith.index_cast %202 : i32 to index
    %c0_160 = arith.constant 0 : index
    %c0_161 = arith.constant 0 : index
    %204 = vector.load %arg2[%c0_159, %203, %c0_160, %c0_161] : memref<1x32x32x3xf32, #tpu.memory_space<vmem>>, vector<1x1x28x3xf32>
    %205 = vector.shape_cast %204 : vector<1x1x28x3xf32> to vector<28x3xf32>
    %206 = arith.truncf %205 : vector<28x3xf32> to vector<28x3xbf16>
    %c20 = arith.constant 20 : index
    %c0_162 = arith.constant 0 : index
    %c0_163 = arith.constant 0 : index
    %207 = vector.load %arg3[%c20, %c0_162, %c0_163] : memref<25x3x16xbf16, #tpu.memory_space<vmem>>, vector<1x3x16xbf16>
    %208 = vector.shape_cast %207 : vector<1x3x16xbf16> to vector<3x16xbf16>
    %cst_164 = arith.constant dense<0.000000e+00> : vector<28x16xf32>
    %209 = tpu.matmul %206, %208, %cst_164 {dimension_numbers = #tpu.dot_dimension_numbers<[1], [0], [0], [1], [0, 0, 1, 1], [], []>} : vector<28x3xbf16>, vector<3x16xbf16>, vector<28x16xf32> -> vector<28x16xf32>
    %210 = arith.addf %200, %209 : vector<28x16xf32>
    %c0_i32_165 = arith.constant 0 : i32
    %211 = arith.addi %0, %c0_i32_165 : i32
    %c4_i32_166 = arith.constant 4 : i32
    %212 = arith.addi %211, %c4_i32_166 : i32
    %c0_167 = arith.constant 0 : index
    %213 = arith.index_cast %212 : i32 to index
    %c1_168 = arith.constant 1 : index
    %c0_169 = arith.constant 0 : index
    %214 = vector.load %arg2[%c0_167, %213, %c1_168, %c0_169] : memref<1x32x32x3xf32, #tpu.memory_space<vmem>>, vector<1x1x28x3xf32>
    %215 = vector.shape_cast %214 : vector<1x1x28x3xf32> to vector<28x3xf32>
    %216 = arith.truncf %215 : vector<28x3xf32> to vector<28x3xbf16>
    %c21 = arith.constant 21 : index
    %c0_170 = arith.constant 0 : index
    %c0_171 = arith.constant 0 : index
    %217 = vector.load %arg3[%c21, %c0_170, %c0_171] : memref<25x3x16xbf16, #tpu.memory_space<vmem>>, vector<1x3x16xbf16>
    %218 = vector.shape_cast %217 : vector<1x3x16xbf16> to vector<3x16xbf16>
    %cst_172 = arith.constant dense<0.000000e+00> : vector<28x16xf32>
    %219 = tpu.matmul %216, %218, %cst_172 {dimension_numbers = #tpu.dot_dimension_numbers<[1], [0], [0], [1], [0, 0, 1, 1], [], []>} : vector<28x3xbf16>, vector<3x16xbf16>, vector<28x16xf32> -> vector<28x16xf32>
    %220 = arith.addf %210, %219 : vector<28x16xf32>
    %c0_i32_173 = arith.constant 0 : i32
    %221 = arith.addi %0, %c0_i32_173 : i32
    %c4_i32_174 = arith.constant 4 : i32
    %222 = arith.addi %221, %c4_i32_174 : i32
    %c0_175 = arith.constant 0 : index
    %223 = arith.index_cast %222 : i32 to index
    %c2_176 = arith.constant 2 : index
    %c0_177 = arith.constant 0 : index
    %224 = vector.load %arg2[%c0_175, %223, %c2_176, %c0_177] : memref<1x32x32x3xf32, #tpu.memory_space<vmem>>, vector<1x1x28x3xf32>
    %225 = vector.shape_cast %224 : vector<1x1x28x3xf32> to vector<28x3xf32>
    %226 = arith.truncf %225 : vector<28x3xf32> to vector<28x3xbf16>
    %c22 = arith.constant 22 : index
    %c0_178 = arith.constant 0 : index
    %c0_179 = arith.constant 0 : index
    %227 = vector.load %arg3[%c22, %c0_178, %c0_179] : memref<25x3x16xbf16, #tpu.memory_space<vmem>>, vector<1x3x16xbf16>
    %228 = vector.shape_cast %227 : vector<1x3x16xbf16> to vector<3x16xbf16>
    %cst_180 = arith.constant dense<0.000000e+00> : vector<28x16xf32>
    %229 = tpu.matmul %226, %228, %cst_180 {dimension_numbers = #tpu.dot_dimension_numbers<[1], [0], [0], [1], [0, 0, 1, 1], [], []>} : vector<28x3xbf16>, vector<3x16xbf16>, vector<28x16xf32> -> vector<28x16xf32>
    %230 = arith.addf %220, %229 : vector<28x16xf32>
    %c0_i32_181 = arith.constant 0 : i32
    %231 = arith.addi %0, %c0_i32_181 : i32
    %c4_i32_182 = arith.constant 4 : i32
    %232 = arith.addi %231, %c4_i32_182 : i32
    %c0_183 = arith.constant 0 : index
    %233 = arith.index_cast %232 : i32 to index
    %c3_184 = arith.constant 3 : index
    %c0_185 = arith.constant 0 : index
    %234 = vector.load %arg2[%c0_183, %233, %c3_184, %c0_185] : memref<1x32x32x3xf32, #tpu.memory_space<vmem>>, vector<1x1x28x3xf32>
    %235 = vector.shape_cast %234 : vector<1x1x28x3xf32> to vector<28x3xf32>
    %236 = arith.truncf %235 : vector<28x3xf32> to vector<28x3xbf16>
    %c23 = arith.constant 23 : index
    %c0_186 = arith.constant 0 : index
    %c0_187 = arith.constant 0 : index
    %237 = vector.load %arg3[%c23, %c0_186, %c0_187] : memref<25x3x16xbf16, #tpu.memory_space<vmem>>, vector<1x3x16xbf16>
    %238 = vector.shape_cast %237 : vector<1x3x16xbf16> to vector<3x16xbf16>
    %cst_188 = arith.constant dense<0.000000e+00> : vector<28x16xf32>
    %239 = tpu.matmul %236, %238, %cst_188 {dimension_numbers = #tpu.dot_dimension_numbers<[1], [0], [0], [1], [0, 0, 1, 1], [], []>} : vector<28x3xbf16>, vector<3x16xbf16>, vector<28x16xf32> -> vector<28x16xf32>
    %240 = arith.addf %230, %239 : vector<28x16xf32>
    %c0_i32_189 = arith.constant 0 : i32
    %241 = arith.addi %0, %c0_i32_189 : i32
    %c4_i32_190 = arith.constant 4 : i32
    %242 = arith.addi %241, %c4_i32_190 : i32
    %c0_191 = arith.constant 0 : index
    %243 = arith.index_cast %242 : i32 to index
    %c4_192 = arith.constant 4 : index
    %c0_193 = arith.constant 0 : index
    %244 = vector.load %arg2[%c0_191, %243, %c4_192, %c0_193] : memref<1x32x32x3xf32, #tpu.memory_space<vmem>>, vector<1x1x28x3xf32>
    %245 = vector.shape_cast %244 : vector<1x1x28x3xf32> to vector<28x3xf32>
    %246 = arith.truncf %245 : vector<28x3xf32> to vector<28x3xbf16>
    %c24 = arith.constant 24 : index
    %c0_194 = arith.constant 0 : index
    %c0_195 = arith.constant 0 : index
    %247 = vector.load %arg3[%c24, %c0_194, %c0_195] : memref<25x3x16xbf16, #tpu.memory_space<vmem>>, vector<1x3x16xbf16>
    %248 = vector.shape_cast %247 : vector<1x3x16xbf16> to vector<3x16xbf16>
    %cst_196 = arith.constant dense<0.000000e+00> : vector<28x16xf32>
    %249 = tpu.matmul %246, %248, %cst_196 {dimension_numbers = #tpu.dot_dimension_numbers<[1], [0], [0], [1], [0, 0, 1, 1], [], []>} : vector<28x3xbf16>, vector<3x16xbf16>, vector<28x16xf32> -> vector<28x16xf32>
    %250 = arith.addf %240, %249 : vector<28x16xf32>
    %251 = vector.broadcast %1 : vector<1x16xf32> to vector<28x16xf32>
    %252 = arith.addf %250, %251 : vector<28x16xf32>
    %cst_197 = arith.constant 0.000000e+00 : f32
    %253 = vector.broadcast %cst_197 : f32 to vector<28x16xf32>
    %254 = arith.maximumf %252, %253 : vector<28x16xf32>
    %c1_i32_198 = arith.constant 1 : i32
    %255 = arith.addi %0, %c1_i32_198 : i32
    %c0_i32_199 = arith.constant 0 : i32
    %256 = arith.addi %255, %c0_i32_199 : i32
    %c0_200 = arith.constant 0 : index
    %257 = arith.index_cast %256 : i32 to index
    %c0_201 = arith.constant 0 : index
    %c0_202 = arith.constant 0 : index
    %258 = vector.load %arg2[%c0_200, %257, %c0_201, %c0_202] : memref<1x32x32x3xf32, #tpu.memory_space<vmem>>, vector<1x1x28x3xf32>
    %259 = vector.shape_cast %258 : vector<1x1x28x3xf32> to vector<28x3xf32>
    %260 = arith.truncf %259 : vector<28x3xf32> to vector<28x3xbf16>
    %c0_203 = arith.constant 0 : index
    %c0_204 = arith.constant 0 : index
    %c0_205 = arith.constant 0 : index
    %261 = vector.load %arg3[%c0_203, %c0_204, %c0_205] : memref<25x3x16xbf16, #tpu.memory_space<vmem>>, vector<1x3x16xbf16>
    %262 = vector.shape_cast %261 : vector<1x3x16xbf16> to vector<3x16xbf16>
    %cst_206 = arith.constant dense<0.000000e+00> : vector<28x16xf32>
    %263 = tpu.matmul %260, %262, %cst_206 {dimension_numbers = #tpu.dot_dimension_numbers<[1], [0], [0], [1], [0, 0, 1, 1], [], []>} : vector<28x3xbf16>, vector<3x16xbf16>, vector<28x16xf32> -> vector<28x16xf32>
    %c1_i32_207 = arith.constant 1 : i32
    %264 = arith.addi %0, %c1_i32_207 : i32
    %c0_i32_208 = arith.constant 0 : i32
    %265 = arith.addi %264, %c0_i32_208 : i32
    %c0_209 = arith.constant 0 : index
    %266 = arith.index_cast %265 : i32 to index
    %c1_210 = arith.constant 1 : index
    %c0_211 = arith.constant 0 : index
    %267 = vector.load %arg2[%c0_209, %266, %c1_210, %c0_211] : memref<1x32x32x3xf32, #tpu.memory_space<vmem>>, vector<1x1x28x3xf32>
    %268 = vector.shape_cast %267 : vector<1x1x28x3xf32> to vector<28x3xf32>
    %269 = arith.truncf %268 : vector<28x3xf32> to vector<28x3xbf16>
    %c1_212 = arith.constant 1 : index
    %c0_213 = arith.constant 0 : index
    %c0_214 = arith.constant 0 : index
    %270 = vector.load %arg3[%c1_212, %c0_213, %c0_214] : memref<25x3x16xbf16, #tpu.memory_space<vmem>>, vector<1x3x16xbf16>
    %271 = vector.shape_cast %270 : vector<1x3x16xbf16> to vector<3x16xbf16>
    %cst_215 = arith.constant dense<0.000000e+00> : vector<28x16xf32>
    %272 = tpu.matmul %269, %271, %cst_215 {dimension_numbers = #tpu.dot_dimension_numbers<[1], [0], [0], [1], [0, 0, 1, 1], [], []>} : vector<28x3xbf16>, vector<3x16xbf16>, vector<28x16xf32> -> vector<28x16xf32>
    %273 = arith.addf %263, %272 : vector<28x16xf32>
    %c1_i32_216 = arith.constant 1 : i32
    %274 = arith.addi %0, %c1_i32_216 : i32
    %c0_i32_217 = arith.constant 0 : i32
    %275 = arith.addi %274, %c0_i32_217 : i32
    %c0_218 = arith.constant 0 : index
    %276 = arith.index_cast %275 : i32 to index
    %c2_219 = arith.constant 2 : index
    %c0_220 = arith.constant 0 : index
    %277 = vector.load %arg2[%c0_218, %276, %c2_219, %c0_220] : memref<1x32x32x3xf32, #tpu.memory_space<vmem>>, vector<1x1x28x3xf32>
    %278 = vector.shape_cast %277 : vector<1x1x28x3xf32> to vector<28x3xf32>
    %279 = arith.truncf %278 : vector<28x3xf32> to vector<28x3xbf16>
    %c2_221 = arith.constant 2 : index
    %c0_222 = arith.constant 0 : index
    %c0_223 = arith.constant 0 : index
    %280 = vector.load %arg3[%c2_221, %c0_222, %c0_223] : memref<25x3x16xbf16, #tpu.memory_space<vmem>>, vector<1x3x16xbf16>
    %281 = vector.shape_cast %280 : vector<1x3x16xbf16> to vector<3x16xbf16>
    %cst_224 = arith.constant dense<0.000000e+00> : vector<28x16xf32>
    %282 = tpu.matmul %279, %281, %cst_224 {dimension_numbers = #tpu.dot_dimension_numbers<[1], [0], [0], [1], [0, 0, 1, 1], [], []>} : vector<28x3xbf16>, vector<3x16xbf16>, vector<28x16xf32> -> vector<28x16xf32>
    %283 = arith.addf %273, %282 : vector<28x16xf32>
    %c1_i32_225 = arith.constant 1 : i32
    %284 = arith.addi %0, %c1_i32_225 : i32
    %c0_i32_226 = arith.constant 0 : i32
    %285 = arith.addi %284, %c0_i32_226 : i32
    %c0_227 = arith.constant 0 : index
    %286 = arith.index_cast %285 : i32 to index
    %c3_228 = arith.constant 3 : index
    %c0_229 = arith.constant 0 : index
    %287 = vector.load %arg2[%c0_227, %286, %c3_228, %c0_229] : memref<1x32x32x3xf32, #tpu.memory_space<vmem>>, vector<1x1x28x3xf32>
    %288 = vector.shape_cast %287 : vector<1x1x28x3xf32> to vector<28x3xf32>
    %289 = arith.truncf %288 : vector<28x3xf32> to vector<28x3xbf16>
    %c3_230 = arith.constant 3 : index
    %c0_231 = arith.constant 0 : index
    %c0_232 = arith.constant 0 : index
    %290 = vector.load %arg3[%c3_230, %c0_231, %c0_232] : memref<25x3x16xbf16, #tpu.memory_space<vmem>>, vector<1x3x16xbf16>
    %291 = vector.shape_cast %290 : vector<1x3x16xbf16> to vector<3x16xbf16>
    %cst_233 = arith.constant dense<0.000000e+00> : vector<28x16xf32>
    %292 = tpu.matmul %289, %291, %cst_233 {dimension_numbers = #tpu.dot_dimension_numbers<[1], [0], [0], [1], [0, 0, 1, 1], [], []>} : vector<28x3xbf16>, vector<3x16xbf16>, vector<28x16xf32> -> vector<28x16xf32>
    %293 = arith.addf %283, %292 : vector<28x16xf32>
    %c1_i32_234 = arith.constant 1 : i32
    %294 = arith.addi %0, %c1_i32_234 : i32
    %c0_i32_235 = arith.constant 0 : i32
    %295 = arith.addi %294, %c0_i32_235 : i32
    %c0_236 = arith.constant 0 : index
    %296 = arith.index_cast %295 : i32 to index
    %c4_237 = arith.constant 4 : index
    %c0_238 = arith.constant 0 : index
    %297 = vector.load %arg2[%c0_236, %296, %c4_237, %c0_238] : memref<1x32x32x3xf32, #tpu.memory_space<vmem>>, vector<1x1x28x3xf32>
    %298 = vector.shape_cast %297 : vector<1x1x28x3xf32> to vector<28x3xf32>
    %299 = arith.truncf %298 : vector<28x3xf32> to vector<28x3xbf16>
    %c4_239 = arith.constant 4 : index
    %c0_240 = arith.constant 0 : index
    %c0_241 = arith.constant 0 : index
    %300 = vector.load %arg3[%c4_239, %c0_240, %c0_241] : memref<25x3x16xbf16, #tpu.memory_space<vmem>>, vector<1x3x16xbf16>
    %301 = vector.shape_cast %300 : vector<1x3x16xbf16> to vector<3x16xbf16>
    %cst_242 = arith.constant dense<0.000000e+00> : vector<28x16xf32>
    %302 = tpu.matmul %299, %301, %cst_242 {dimension_numbers = #tpu.dot_dimension_numbers<[1], [0], [0], [1], [0, 0, 1, 1], [], []>} : vector<28x3xbf16>, vector<3x16xbf16>, vector<28x16xf32> -> vector<28x16xf32>
    %303 = arith.addf %293, %302 : vector<28x16xf32>
    %c1_i32_243 = arith.constant 1 : i32
    %304 = arith.addi %0, %c1_i32_243 : i32
    %c1_i32_244 = arith.constant 1 : i32
    %305 = arith.addi %304, %c1_i32_244 : i32
    %c0_245 = arith.constant 0 : index
    %306 = arith.index_cast %305 : i32 to index
    %c0_246 = arith.constant 0 : index
    %c0_247 = arith.constant 0 : index
    %307 = vector.load %arg2[%c0_245, %306, %c0_246, %c0_247] : memref<1x32x32x3xf32, #tpu.memory_space<vmem>>, vector<1x1x28x3xf32>
    %308 = vector.shape_cast %307 : vector<1x1x28x3xf32> to vector<28x3xf32>
    %309 = arith.truncf %308 : vector<28x3xf32> to vector<28x3xbf16>
    %c5_248 = arith.constant 5 : index
    %c0_249 = arith.constant 0 : index
    %c0_250 = arith.constant 0 : index
    %310 = vector.load %arg3[%c5_248, %c0_249, %c0_250] : memref<25x3x16xbf16, #tpu.memory_space<vmem>>, vector<1x3x16xbf16>
    %311 = vector.shape_cast %310 : vector<1x3x16xbf16> to vector<3x16xbf16>
    %cst_251 = arith.constant dense<0.000000e+00> : vector<28x16xf32>
    %312 = tpu.matmul %309, %311, %cst_251 {dimension_numbers = #tpu.dot_dimension_numbers<[1], [0], [0], [1], [0, 0, 1, 1], [], []>} : vector<28x3xbf16>, vector<3x16xbf16>, vector<28x16xf32> -> vector<28x16xf32>
    %313 = arith.addf %303, %312 : vector<28x16xf32>
    %c1_i32_252 = arith.constant 1 : i32
    %314 = arith.addi %0, %c1_i32_252 : i32
    %c1_i32_253 = arith.constant 1 : i32
    %315 = arith.addi %314, %c1_i32_253 : i32
    %c0_254 = arith.constant 0 : index
    %316 = arith.index_cast %315 : i32 to index
    %c1_255 = arith.constant 1 : index
    %c0_256 = arith.constant 0 : index
    %317 = vector.load %arg2[%c0_254, %316, %c1_255, %c0_256] : memref<1x32x32x3xf32, #tpu.memory_space<vmem>>, vector<1x1x28x3xf32>
    %318 = vector.shape_cast %317 : vector<1x1x28x3xf32> to vector<28x3xf32>
    %319 = arith.truncf %318 : vector<28x3xf32> to vector<28x3xbf16>
    %c6_257 = arith.constant 6 : index
    %c0_258 = arith.constant 0 : index
    %c0_259 = arith.constant 0 : index
    %320 = vector.load %arg3[%c6_257, %c0_258, %c0_259] : memref<25x3x16xbf16, #tpu.memory_space<vmem>>, vector<1x3x16xbf16>
    %321 = vector.shape_cast %320 : vector<1x3x16xbf16> to vector<3x16xbf16>
    %cst_260 = arith.constant dense<0.000000e+00> : vector<28x16xf32>
    %322 = tpu.matmul %319, %321, %cst_260 {dimension_numbers = #tpu.dot_dimension_numbers<[1], [0], [0], [1], [0, 0, 1, 1], [], []>} : vector<28x3xbf16>, vector<3x16xbf16>, vector<28x16xf32> -> vector<28x16xf32>
    %323 = arith.addf %313, %322 : vector<28x16xf32>
    %c1_i32_261 = arith.constant 1 : i32
    %324 = arith.addi %0, %c1_i32_261 : i32
    %c1_i32_262 = arith.constant 1 : i32
    %325 = arith.addi %324, %c1_i32_262 : i32
    %c0_263 = arith.constant 0 : index
    %326 = arith.index_cast %325 : i32 to index
    %c2_264 = arith.constant 2 : index
    %c0_265 = arith.constant 0 : index
    %327 = vector.load %arg2[%c0_263, %326, %c2_264, %c0_265] : memref<1x32x32x3xf32, #tpu.memory_space<vmem>>, vector<1x1x28x3xf32>
    %328 = vector.shape_cast %327 : vector<1x1x28x3xf32> to vector<28x3xf32>
    %329 = arith.truncf %328 : vector<28x3xf32> to vector<28x3xbf16>
    %c7_266 = arith.constant 7 : index
    %c0_267 = arith.constant 0 : index
    %c0_268 = arith.constant 0 : index
    %330 = vector.load %arg3[%c7_266, %c0_267, %c0_268] : memref<25x3x16xbf16, #tpu.memory_space<vmem>>, vector<1x3x16xbf16>
    %331 = vector.shape_cast %330 : vector<1x3x16xbf16> to vector<3x16xbf16>
    %cst_269 = arith.constant dense<0.000000e+00> : vector<28x16xf32>
    %332 = tpu.matmul %329, %331, %cst_269 {dimension_numbers = #tpu.dot_dimension_numbers<[1], [0], [0], [1], [0, 0, 1, 1], [], []>} : vector<28x3xbf16>, vector<3x16xbf16>, vector<28x16xf32> -> vector<28x16xf32>
    %333 = arith.addf %323, %332 : vector<28x16xf32>
    %c1_i32_270 = arith.constant 1 : i32
    %334 = arith.addi %0, %c1_i32_270 : i32
    %c1_i32_271 = arith.constant 1 : i32
    %335 = arith.addi %334, %c1_i32_271 : i32
    %c0_272 = arith.constant 0 : index
    %336 = arith.index_cast %335 : i32 to index
    %c3_273 = arith.constant 3 : index
    %c0_274 = arith.constant 0 : index
    %337 = vector.load %arg2[%c0_272, %336, %c3_273, %c0_274] : memref<1x32x32x3xf32, #tpu.memory_space<vmem>>, vector<1x1x28x3xf32>
    %338 = vector.shape_cast %337 : vector<1x1x28x3xf32> to vector<28x3xf32>
    %339 = arith.truncf %338 : vector<28x3xf32> to vector<28x3xbf16>
    %c8_275 = arith.constant 8 : index
    %c0_276 = arith.constant 0 : index
    %c0_277 = arith.constant 0 : index
    %340 = vector.load %arg3[%c8_275, %c0_276, %c0_277] : memref<25x3x16xbf16, #tpu.memory_space<vmem>>, vector<1x3x16xbf16>
    %341 = vector.shape_cast %340 : vector<1x3x16xbf16> to vector<3x16xbf16>
    %cst_278 = arith.constant dense<0.000000e+00> : vector<28x16xf32>
    %342 = tpu.matmul %339, %341, %cst_278 {dimension_numbers = #tpu.dot_dimension_numbers<[1], [0], [0], [1], [0, 0, 1, 1], [], []>} : vector<28x3xbf16>, vector<3x16xbf16>, vector<28x16xf32> -> vector<28x16xf32>
    %343 = arith.addf %333, %342 : vector<28x16xf32>
    %c1_i32_279 = arith.constant 1 : i32
    %344 = arith.addi %0, %c1_i32_279 : i32
    %c1_i32_280 = arith.constant 1 : i32
    %345 = arith.addi %344, %c1_i32_280 : i32
    %c0_281 = arith.constant 0 : index
    %346 = arith.index_cast %345 : i32 to index
    %c4_282 = arith.constant 4 : index
    %c0_283 = arith.constant 0 : index
    %347 = vector.load %arg2[%c0_281, %346, %c4_282, %c0_283] : memref<1x32x32x3xf32, #tpu.memory_space<vmem>>, vector<1x1x28x3xf32>
    %348 = vector.shape_cast %347 : vector<1x1x28x3xf32> to vector<28x3xf32>
    %349 = arith.truncf %348 : vector<28x3xf32> to vector<28x3xbf16>
    %c9_284 = arith.constant 9 : index
    %c0_285 = arith.constant 0 : index
    %c0_286 = arith.constant 0 : index
    %350 = vector.load %arg3[%c9_284, %c0_285, %c0_286] : memref<25x3x16xbf16, #tpu.memory_space<vmem>>, vector<1x3x16xbf16>
    %351 = vector.shape_cast %350 : vector<1x3x16xbf16> to vector<3x16xbf16>
    %cst_287 = arith.constant dense<0.000000e+00> : vector<28x16xf32>
    %352 = tpu.matmul %349, %351, %cst_287 {dimension_numbers = #tpu.dot_dimension_numbers<[1], [0], [0], [1], [0, 0, 1, 1], [], []>} : vector<28x3xbf16>, vector<3x16xbf16>, vector<28x16xf32> -> vector<28x16xf32>
    %353 = arith.addf %343, %352 : vector<28x16xf32>
    %c1_i32_288 = arith.constant 1 : i32
    %354 = arith.addi %0, %c1_i32_288 : i32
    %c2_i32_289 = arith.constant 2 : i32
    %355 = arith.addi %354, %c2_i32_289 : i32
    %c0_290 = arith.constant 0 : index
    %356 = arith.index_cast %355 : i32 to index
    %c0_291 = arith.constant 0 : index
    %c0_292 = arith.constant 0 : index
    %357 = vector.load %arg2[%c0_290, %356, %c0_291, %c0_292] : memref<1x32x32x3xf32, #tpu.memory_space<vmem>>, vector<1x1x28x3xf32>
    %358 = vector.shape_cast %357 : vector<1x1x28x3xf32> to vector<28x3xf32>
    %359 = arith.truncf %358 : vector<28x3xf32> to vector<28x3xbf16>
    %c10_293 = arith.constant 10 : index
    %c0_294 = arith.constant 0 : index
    %c0_295 = arith.constant 0 : index
    %360 = vector.load %arg3[%c10_293, %c0_294, %c0_295] : memref<25x3x16xbf16, #tpu.memory_space<vmem>>, vector<1x3x16xbf16>
    %361 = vector.shape_cast %360 : vector<1x3x16xbf16> to vector<3x16xbf16>
    %cst_296 = arith.constant dense<0.000000e+00> : vector<28x16xf32>
    %362 = tpu.matmul %359, %361, %cst_296 {dimension_numbers = #tpu.dot_dimension_numbers<[1], [0], [0], [1], [0, 0, 1, 1], [], []>} : vector<28x3xbf16>, vector<3x16xbf16>, vector<28x16xf32> -> vector<28x16xf32>
    %363 = arith.addf %353, %362 : vector<28x16xf32>
    %c1_i32_297 = arith.constant 1 : i32
    %364 = arith.addi %0, %c1_i32_297 : i32
    %c2_i32_298 = arith.constant 2 : i32
    %365 = arith.addi %364, %c2_i32_298 : i32
    %c0_299 = arith.constant 0 : index
    %366 = arith.index_cast %365 : i32 to index
    %c1_300 = arith.constant 1 : index
    %c0_301 = arith.constant 0 : index
    %367 = vector.load %arg2[%c0_299, %366, %c1_300, %c0_301] : memref<1x32x32x3xf32, #tpu.memory_space<vmem>>, vector<1x1x28x3xf32>
    %368 = vector.shape_cast %367 : vector<1x1x28x3xf32> to vector<28x3xf32>
    %369 = arith.truncf %368 : vector<28x3xf32> to vector<28x3xbf16>
    %c11_302 = arith.constant 11 : index
    %c0_303 = arith.constant 0 : index
    %c0_304 = arith.constant 0 : index
    %370 = vector.load %arg3[%c11_302, %c0_303, %c0_304] : memref<25x3x16xbf16, #tpu.memory_space<vmem>>, vector<1x3x16xbf16>
    %371 = vector.shape_cast %370 : vector<1x3x16xbf16> to vector<3x16xbf16>
    %cst_305 = arith.constant dense<0.000000e+00> : vector<28x16xf32>
    %372 = tpu.matmul %369, %371, %cst_305 {dimension_numbers = #tpu.dot_dimension_numbers<[1], [0], [0], [1], [0, 0, 1, 1], [], []>} : vector<28x3xbf16>, vector<3x16xbf16>, vector<28x16xf32> -> vector<28x16xf32>
    %373 = arith.addf %363, %372 : vector<28x16xf32>
    %c1_i32_306 = arith.constant 1 : i32
    %374 = arith.addi %0, %c1_i32_306 : i32
    %c2_i32_307 = arith.constant 2 : i32
    %375 = arith.addi %374, %c2_i32_307 : i32
    %c0_308 = arith.constant 0 : index
    %376 = arith.index_cast %375 : i32 to index
    %c2_309 = arith.constant 2 : index
    %c0_310 = arith.constant 0 : index
    %377 = vector.load %arg2[%c0_308, %376, %c2_309, %c0_310] : memref<1x32x32x3xf32, #tpu.memory_space<vmem>>, vector<1x1x28x3xf32>
    %378 = vector.shape_cast %377 : vector<1x1x28x3xf32> to vector<28x3xf32>
    %379 = arith.truncf %378 : vector<28x3xf32> to vector<28x3xbf16>
    %c12_311 = arith.constant 12 : index
    %c0_312 = arith.constant 0 : index
    %c0_313 = arith.constant 0 : index
    %380 = vector.load %arg3[%c12_311, %c0_312, %c0_313] : memref<25x3x16xbf16, #tpu.memory_space<vmem>>, vector<1x3x16xbf16>
    %381 = vector.shape_cast %380 : vector<1x3x16xbf16> to vector<3x16xbf16>
    %cst_314 = arith.constant dense<0.000000e+00> : vector<28x16xf32>
    %382 = tpu.matmul %379, %381, %cst_314 {dimension_numbers = #tpu.dot_dimension_numbers<[1], [0], [0], [1], [0, 0, 1, 1], [], []>} : vector<28x3xbf16>, vector<3x16xbf16>, vector<28x16xf32> -> vector<28x16xf32>
    %383 = arith.addf %373, %382 : vector<28x16xf32>
    %c1_i32_315 = arith.constant 1 : i32
    %384 = arith.addi %0, %c1_i32_315 : i32
    %c2_i32_316 = arith.constant 2 : i32
    %385 = arith.addi %384, %c2_i32_316 : i32
    %c0_317 = arith.constant 0 : index
    %386 = arith.index_cast %385 : i32 to index
    %c3_318 = arith.constant 3 : index
    %c0_319 = arith.constant 0 : index
    %387 = vector.load %arg2[%c0_317, %386, %c3_318, %c0_319] : memref<1x32x32x3xf32, #tpu.memory_space<vmem>>, vector<1x1x28x3xf32>
    %388 = vector.shape_cast %387 : vector<1x1x28x3xf32> to vector<28x3xf32>
    %389 = arith.truncf %388 : vector<28x3xf32> to vector<28x3xbf16>
    %c13_320 = arith.constant 13 : index
    %c0_321 = arith.constant 0 : index
    %c0_322 = arith.constant 0 : index
    %390 = vector.load %arg3[%c13_320, %c0_321, %c0_322] : memref<25x3x16xbf16, #tpu.memory_space<vmem>>, vector<1x3x16xbf16>
    %391 = vector.shape_cast %390 : vector<1x3x16xbf16> to vector<3x16xbf16>
    %cst_323 = arith.constant dense<0.000000e+00> : vector<28x16xf32>
    %392 = tpu.matmul %389, %391, %cst_323 {dimension_numbers = #tpu.dot_dimension_numbers<[1], [0], [0], [1], [0, 0, 1, 1], [], []>} : vector<28x3xbf16>, vector<3x16xbf16>, vector<28x16xf32> -> vector<28x16xf32>
    %393 = arith.addf %383, %392 : vector<28x16xf32>
    %c1_i32_324 = arith.constant 1 : i32
    %394 = arith.addi %0, %c1_i32_324 : i32
    %c2_i32_325 = arith.constant 2 : i32
    %395 = arith.addi %394, %c2_i32_325 : i32
    %c0_326 = arith.constant 0 : index
    %396 = arith.index_cast %395 : i32 to index
    %c4_327 = arith.constant 4 : index
    %c0_328 = arith.constant 0 : index
    %397 = vector.load %arg2[%c0_326, %396, %c4_327, %c0_328] : memref<1x32x32x3xf32, #tpu.memory_space<vmem>>, vector<1x1x28x3xf32>
    %398 = vector.shape_cast %397 : vector<1x1x28x3xf32> to vector<28x3xf32>
    %399 = arith.truncf %398 : vector<28x3xf32> to vector<28x3xbf16>
    %c14_329 = arith.constant 14 : index
    %c0_330 = arith.constant 0 : index
    %c0_331 = arith.constant 0 : index
    %400 = vector.load %arg3[%c14_329, %c0_330, %c0_331] : memref<25x3x16xbf16, #tpu.memory_space<vmem>>, vector<1x3x16xbf16>
    %401 = vector.shape_cast %400 : vector<1x3x16xbf16> to vector<3x16xbf16>
    %cst_332 = arith.constant dense<0.000000e+00> : vector<28x16xf32>
    %402 = tpu.matmul %399, %401, %cst_332 {dimension_numbers = #tpu.dot_dimension_numbers<[1], [0], [0], [1], [0, 0, 1, 1], [], []>} : vector<28x3xbf16>, vector<3x16xbf16>, vector<28x16xf32> -> vector<28x16xf32>
    %403 = arith.addf %393, %402 : vector<28x16xf32>
    %c1_i32_333 = arith.constant 1 : i32
    %404 = arith.addi %0, %c1_i32_333 : i32
    %c3_i32_334 = arith.constant 3 : i32
    %405 = arith.addi %404, %c3_i32_334 : i32
    %c0_335 = arith.constant 0 : index
    %406 = arith.index_cast %405 : i32 to index
    %c0_336 = arith.constant 0 : index
    %c0_337 = arith.constant 0 : index
    %407 = vector.load %arg2[%c0_335, %406, %c0_336, %c0_337] : memref<1x32x32x3xf32, #tpu.memory_space<vmem>>, vector<1x1x28x3xf32>
    %408 = vector.shape_cast %407 : vector<1x1x28x3xf32> to vector<28x3xf32>
    %409 = arith.truncf %408 : vector<28x3xf32> to vector<28x3xbf16>
    %c15_338 = arith.constant 15 : index
    %c0_339 = arith.constant 0 : index
    %c0_340 = arith.constant 0 : index
    %410 = vector.load %arg3[%c15_338, %c0_339, %c0_340] : memref<25x3x16xbf16, #tpu.memory_space<vmem>>, vector<1x3x16xbf16>
    %411 = vector.shape_cast %410 : vector<1x3x16xbf16> to vector<3x16xbf16>
    %cst_341 = arith.constant dense<0.000000e+00> : vector<28x16xf32>
    %412 = tpu.matmul %409, %411, %cst_341 {dimension_numbers = #tpu.dot_dimension_numbers<[1], [0], [0], [1], [0, 0, 1, 1], [], []>} : vector<28x3xbf16>, vector<3x16xbf16>, vector<28x16xf32> -> vector<28x16xf32>
    %413 = arith.addf %403, %412 : vector<28x16xf32>
    %c1_i32_342 = arith.constant 1 : i32
    %414 = arith.addi %0, %c1_i32_342 : i32
    %c3_i32_343 = arith.constant 3 : i32
    %415 = arith.addi %414, %c3_i32_343 : i32
    %c0_344 = arith.constant 0 : index
    %416 = arith.index_cast %415 : i32 to index
    %c1_345 = arith.constant 1 : index
    %c0_346 = arith.constant 0 : index
    %417 = vector.load %arg2[%c0_344, %416, %c1_345, %c0_346] : memref<1x32x32x3xf32, #tpu.memory_space<vmem>>, vector<1x1x28x3xf32>
    %418 = vector.shape_cast %417 : vector<1x1x28x3xf32> to vector<28x3xf32>
    %419 = arith.truncf %418 : vector<28x3xf32> to vector<28x3xbf16>
    %c16_347 = arith.constant 16 : index
    %c0_348 = arith.constant 0 : index
    %c0_349 = arith.constant 0 : index
    %420 = vector.load %arg3[%c16_347, %c0_348, %c0_349] : memref<25x3x16xbf16, #tpu.memory_space<vmem>>, vector<1x3x16xbf16>
    %421 = vector.shape_cast %420 : vector<1x3x16xbf16> to vector<3x16xbf16>
    %cst_350 = arith.constant dense<0.000000e+00> : vector<28x16xf32>
    %422 = tpu.matmul %419, %421, %cst_350 {dimension_numbers = #tpu.dot_dimension_numbers<[1], [0], [0], [1], [0, 0, 1, 1], [], []>} : vector<28x3xbf16>, vector<3x16xbf16>, vector<28x16xf32> -> vector<28x16xf32>
    %423 = arith.addf %413, %422 : vector<28x16xf32>
    %c1_i32_351 = arith.constant 1 : i32
    %424 = arith.addi %0, %c1_i32_351 : i32
    %c3_i32_352 = arith.constant 3 : i32
    %425 = arith.addi %424, %c3_i32_352 : i32
    %c0_353 = arith.constant 0 : index
    %426 = arith.index_cast %425 : i32 to index
    %c2_354 = arith.constant 2 : index
    %c0_355 = arith.constant 0 : index
    %427 = vector.load %arg2[%c0_353, %426, %c2_354, %c0_355] : memref<1x32x32x3xf32, #tpu.memory_space<vmem>>, vector<1x1x28x3xf32>
    %428 = vector.shape_cast %427 : vector<1x1x28x3xf32> to vector<28x3xf32>
    %429 = arith.truncf %428 : vector<28x3xf32> to vector<28x3xbf16>
    %c17_356 = arith.constant 17 : index
    %c0_357 = arith.constant 0 : index
    %c0_358 = arith.constant 0 : index
    %430 = vector.load %arg3[%c17_356, %c0_357, %c0_358] : memref<25x3x16xbf16, #tpu.memory_space<vmem>>, vector<1x3x16xbf16>
    %431 = vector.shape_cast %430 : vector<1x3x16xbf16> to vector<3x16xbf16>
    %cst_359 = arith.constant dense<0.000000e+00> : vector<28x16xf32>
    %432 = tpu.matmul %429, %431, %cst_359 {dimension_numbers = #tpu.dot_dimension_numbers<[1], [0], [0], [1], [0, 0, 1, 1], [], []>} : vector<28x3xbf16>, vector<3x16xbf16>, vector<28x16xf32> -> vector<28x16xf32>
    %433 = arith.addf %423, %432 : vector<28x16xf32>
    %c1_i32_360 = arith.constant 1 : i32
    %434 = arith.addi %0, %c1_i32_360 : i32
    %c3_i32_361 = arith.constant 3 : i32
    %435 = arith.addi %434, %c3_i32_361 : i32
    %c0_362 = arith.constant 0 : index
    %436 = arith.index_cast %435 : i32 to index
    %c3_363 = arith.constant 3 : index
    %c0_364 = arith.constant 0 : index
    %437 = vector.load %arg2[%c0_362, %436, %c3_363, %c0_364] : memref<1x32x32x3xf32, #tpu.memory_space<vmem>>, vector<1x1x28x3xf32>
    %438 = vector.shape_cast %437 : vector<1x1x28x3xf32> to vector<28x3xf32>
    %439 = arith.truncf %438 : vector<28x3xf32> to vector<28x3xbf16>
    %c18_365 = arith.constant 18 : index
    %c0_366 = arith.constant 0 : index
    %c0_367 = arith.constant 0 : index
    %440 = vector.load %arg3[%c18_365, %c0_366, %c0_367] : memref<25x3x16xbf16, #tpu.memory_space<vmem>>, vector<1x3x16xbf16>
    %441 = vector.shape_cast %440 : vector<1x3x16xbf16> to vector<3x16xbf16>
    %cst_368 = arith.constant dense<0.000000e+00> : vector<28x16xf32>
    %442 = tpu.matmul %439, %441, %cst_368 {dimension_numbers = #tpu.dot_dimension_numbers<[1], [0], [0], [1], [0, 0, 1, 1], [], []>} : vector<28x3xbf16>, vector<3x16xbf16>, vector<28x16xf32> -> vector<28x16xf32>
    %443 = arith.addf %433, %442 : vector<28x16xf32>
    %c1_i32_369 = arith.constant 1 : i32
    %444 = arith.addi %0, %c1_i32_369 : i32
    %c3_i32_370 = arith.constant 3 : i32
    %445 = arith.addi %444, %c3_i32_370 : i32
    %c0_371 = arith.constant 0 : index
    %446 = arith.index_cast %445 : i32 to index
    %c4_372 = arith.constant 4 : index
    %c0_373 = arith.constant 0 : index
    %447 = vector.load %arg2[%c0_371, %446, %c4_372, %c0_373] : memref<1x32x32x3xf32, #tpu.memory_space<vmem>>, vector<1x1x28x3xf32>
    %448 = vector.shape_cast %447 : vector<1x1x28x3xf32> to vector<28x3xf32>
    %449 = arith.truncf %448 : vector<28x3xf32> to vector<28x3xbf16>
    %c19_374 = arith.constant 19 : index
    %c0_375 = arith.constant 0 : index
    %c0_376 = arith.constant 0 : index
    %450 = vector.load %arg3[%c19_374, %c0_375, %c0_376] : memref<25x3x16xbf16, #tpu.memory_space<vmem>>, vector<1x3x16xbf16>
    %451 = vector.shape_cast %450 : vector<1x3x16xbf16> to vector<3x16xbf16>
    %cst_377 = arith.constant dense<0.000000e+00> : vector<28x16xf32>
    %452 = tpu.matmul %449, %451, %cst_377 {dimension_numbers = #tpu.dot_dimension_numbers<[1], [0], [0], [1], [0, 0, 1, 1], [], []>} : vector<28x3xbf16>, vector<3x16xbf16>, vector<28x16xf32> -> vector<28x16xf32>
    %453 = arith.addf %443, %452 : vector<28x16xf32>
    %c1_i32_378 = arith.constant 1 : i32
    %454 = arith.addi %0, %c1_i32_378 : i32
    %c4_i32_379 = arith.constant 4 : i32
    %455 = arith.addi %454, %c4_i32_379 : i32
    %c0_380 = arith.constant 0 : index
    %456 = arith.index_cast %455 : i32 to index
    %c0_381 = arith.constant 0 : index
    %c0_382 = arith.constant 0 : index
    %457 = vector.load %arg2[%c0_380, %456, %c0_381, %c0_382] : memref<1x32x32x3xf32, #tpu.memory_space<vmem>>, vector<1x1x28x3xf32>
    %458 = vector.shape_cast %457 : vector<1x1x28x3xf32> to vector<28x3xf32>
    %459 = arith.truncf %458 : vector<28x3xf32> to vector<28x3xbf16>
    %c20_383 = arith.constant 20 : index
    %c0_384 = arith.constant 0 : index
    %c0_385 = arith.constant 0 : index
    %460 = vector.load %arg3[%c20_383, %c0_384, %c0_385] : memref<25x3x16xbf16, #tpu.memory_space<vmem>>, vector<1x3x16xbf16>
    %461 = vector.shape_cast %460 : vector<1x3x16xbf16> to vector<3x16xbf16>
    %cst_386 = arith.constant dense<0.000000e+00> : vector<28x16xf32>
    %462 = tpu.matmul %459, %461, %cst_386 {dimension_numbers = #tpu.dot_dimension_numbers<[1], [0], [0], [1], [0, 0, 1, 1], [], []>} : vector<28x3xbf16>, vector<3x16xbf16>, vector<28x16xf32> -> vector<28x16xf32>
    %463 = arith.addf %453, %462 : vector<28x16xf32>
    %c1_i32_387 = arith.constant 1 : i32
    %464 = arith.addi %0, %c1_i32_387 : i32
    %c4_i32_388 = arith.constant 4 : i32
    %465 = arith.addi %464, %c4_i32_388 : i32
    %c0_389 = arith.constant 0 : index
    %466 = arith.index_cast %465 : i32 to index
    %c1_390 = arith.constant 1 : index
    %c0_391 = arith.constant 0 : index
    %467 = vector.load %arg2[%c0_389, %466, %c1_390, %c0_391] : memref<1x32x32x3xf32, #tpu.memory_space<vmem>>, vector<1x1x28x3xf32>
    %468 = vector.shape_cast %467 : vector<1x1x28x3xf32> to vector<28x3xf32>
    %469 = arith.truncf %468 : vector<28x3xf32> to vector<28x3xbf16>
    %c21_392 = arith.constant 21 : index
    %c0_393 = arith.constant 0 : index
    %c0_394 = arith.constant 0 : index
    %470 = vector.load %arg3[%c21_392, %c0_393, %c0_394] : memref<25x3x16xbf16, #tpu.memory_space<vmem>>, vector<1x3x16xbf16>
    %471 = vector.shape_cast %470 : vector<1x3x16xbf16> to vector<3x16xbf16>
    %cst_395 = arith.constant dense<0.000000e+00> : vector<28x16xf32>
    %472 = tpu.matmul %469, %471, %cst_395 {dimension_numbers = #tpu.dot_dimension_numbers<[1], [0], [0], [1], [0, 0, 1, 1], [], []>} : vector<28x3xbf16>, vector<3x16xbf16>, vector<28x16xf32> -> vector<28x16xf32>
    %473 = arith.addf %463, %472 : vector<28x16xf32>
    %c1_i32_396 = arith.constant 1 : i32
    %474 = arith.addi %0, %c1_i32_396 : i32
    %c4_i32_397 = arith.constant 4 : i32
    %475 = arith.addi %474, %c4_i32_397 : i32
    %c0_398 = arith.constant 0 : index
    %476 = arith.index_cast %475 : i32 to index
    %c2_399 = arith.constant 2 : index
    %c0_400 = arith.constant 0 : index
    %477 = vector.load %arg2[%c0_398, %476, %c2_399, %c0_400] : memref<1x32x32x3xf32, #tpu.memory_space<vmem>>, vector<1x1x28x3xf32>
    %478 = vector.shape_cast %477 : vector<1x1x28x3xf32> to vector<28x3xf32>
    %479 = arith.truncf %478 : vector<28x3xf32> to vector<28x3xbf16>
    %c22_401 = arith.constant 22 : index
    %c0_402 = arith.constant 0 : index
    %c0_403 = arith.constant 0 : index
    %480 = vector.load %arg3[%c22_401, %c0_402, %c0_403] : memref<25x3x16xbf16, #tpu.memory_space<vmem>>, vector<1x3x16xbf16>
    %481 = vector.shape_cast %480 : vector<1x3x16xbf16> to vector<3x16xbf16>
    %cst_404 = arith.constant dense<0.000000e+00> : vector<28x16xf32>
    %482 = tpu.matmul %479, %481, %cst_404 {dimension_numbers = #tpu.dot_dimension_numbers<[1], [0], [0], [1], [0, 0, 1, 1], [], []>} : vector<28x3xbf16>, vector<3x16xbf16>, vector<28x16xf32> -> vector<28x16xf32>
    %483 = arith.addf %473, %482 : vector<28x16xf32>
    %c1_i32_405 = arith.constant 1 : i32
    %484 = arith.addi %0, %c1_i32_405 : i32
    %c4_i32_406 = arith.constant 4 : i32
    %485 = arith.addi %484, %c4_i32_406 : i32
    %c0_407 = arith.constant 0 : index
    %486 = arith.index_cast %485 : i32 to index
    %c3_408 = arith.constant 3 : index
    %c0_409 = arith.constant 0 : index
    %487 = vector.load %arg2[%c0_407, %486, %c3_408, %c0_409] : memref<1x32x32x3xf32, #tpu.memory_space<vmem>>, vector<1x1x28x3xf32>
    %488 = vector.shape_cast %487 : vector<1x1x28x3xf32> to vector<28x3xf32>
    %489 = arith.truncf %488 : vector<28x3xf32> to vector<28x3xbf16>
    %c23_410 = arith.constant 23 : index
    %c0_411 = arith.constant 0 : index
    %c0_412 = arith.constant 0 : index
    %490 = vector.load %arg3[%c23_410, %c0_411, %c0_412] : memref<25x3x16xbf16, #tpu.memory_space<vmem>>, vector<1x3x16xbf16>
    %491 = vector.shape_cast %490 : vector<1x3x16xbf16> to vector<3x16xbf16>
    %cst_413 = arith.constant dense<0.000000e+00> : vector<28x16xf32>
    %492 = tpu.matmul %489, %491, %cst_413 {dimension_numbers = #tpu.dot_dimension_numbers<[1], [0], [0], [1], [0, 0, 1, 1], [], []>} : vector<28x3xbf16>, vector<3x16xbf16>, vector<28x16xf32> -> vector<28x16xf32>
    %493 = arith.addf %483, %492 : vector<28x16xf32>
    %c1_i32_414 = arith.constant 1 : i32
    %494 = arith.addi %0, %c1_i32_414 : i32
    %c4_i32_415 = arith.constant 4 : i32
    %495 = arith.addi %494, %c4_i32_415 : i32
    %c0_416 = arith.constant 0 : index
    %496 = arith.index_cast %495 : i32 to index
    %c4_417 = arith.constant 4 : index
    %c0_418 = arith.constant 0 : index
    %497 = vector.load %arg2[%c0_416, %496, %c4_417, %c0_418] : memref<1x32x32x3xf32, #tpu.memory_space<vmem>>, vector<1x1x28x3xf32>
    %498 = vector.shape_cast %497 : vector<1x1x28x3xf32> to vector<28x3xf32>
    %499 = arith.truncf %498 : vector<28x3xf32> to vector<28x3xbf16>
    %c24_419 = arith.constant 24 : index
    %c0_420 = arith.constant 0 : index
    %c0_421 = arith.constant 0 : index
    %500 = vector.load %arg3[%c24_419, %c0_420, %c0_421] : memref<25x3x16xbf16, #tpu.memory_space<vmem>>, vector<1x3x16xbf16>
    %501 = vector.shape_cast %500 : vector<1x3x16xbf16> to vector<3x16xbf16>
    %cst_422 = arith.constant dense<0.000000e+00> : vector<28x16xf32>
    %502 = tpu.matmul %499, %501, %cst_422 {dimension_numbers = #tpu.dot_dimension_numbers<[1], [0], [0], [1], [0, 0, 1, 1], [], []>} : vector<28x3xbf16>, vector<3x16xbf16>, vector<28x16xf32> -> vector<28x16xf32>
    %503 = arith.addf %493, %502 : vector<28x16xf32>
    %504 = vector.broadcast %1 : vector<1x16xf32> to vector<28x16xf32>
    %505 = arith.addf %503, %504 : vector<28x16xf32>
    %cst_423 = arith.constant 0.000000e+00 : f32
    %506 = vector.broadcast %cst_423 : f32 to vector<28x16xf32>
    %507 = arith.maximumf %505, %506 : vector<28x16xf32>
    %508 = arith.maximumf %254, %507 : vector<28x16xf32>
    %c0_424 = arith.constant 0 : index
    %c0_425 = arith.constant 0 : index
    %509 = vector.load %arg6[%c0_424, %c0_425] : memref<28x16xf32, #tpu.memory_space<vmem>>, vector<28x16xf32>
    tpu.vector_store %arg6[%c0_424, %c0_425], %508 {strides = array<i32>} : memref<28x16xf32, #tpu.memory_space<vmem>>, vector<28x16xf32>,
    %c0_426 = arith.constant 0 : index
    %c0_427 = arith.constant 0 : index
    %510 = tpu.strided_load %arg6[%c0_426, %c0_427] {strides = array<i32: 2, 1>} : memref<28x16xf32, #tpu.memory_space<vmem>>, vector<14x16xf32>
    %c1_428 = arith.constant 1 : index
    %c0_429 = arith.constant 0 : index
    %511 = tpu.strided_load %arg6[%c1_428, %c0_429] {strides = array<i32: 2, 1>} : memref<28x16xf32, #tpu.memory_space<vmem>>, vector<14x16xf32>
    %512 = arith.maximumf %510, %511 : vector<14x16xf32>
    %513 = arith.truncf %512 : vector<14x16xf32> to vector<14x16xbf16>
    %c0_430 = arith.constant 0 : index
    %c0_431 = arith.constant 0 : index
    %c0_432 = arith.constant 0 : index
    %c0_433 = arith.constant 0 : index
    %514 = vector.load %arg5[%c0_430, %c0_431, %c0_432, %c0_433] : memref<1x1x14x16xbf16, #tpu.memory_space<vmem>>, vector<1x1x14x16xbf16>
    %515 = vector.shape_cast %514 : vector<1x1x14x16xbf16> to vector<14x16xbf16>
    %516 = vector.shape_cast %513 : vector<14x16xbf16> to vector<1x1x14x16xbf16>
    tpu.vector_store %arg5[%c0_430, %c0_431, %c0_432, %c0_433], %516 {strides = array<i32>} : memref<1x1x14x16xbf16, #tpu.memory_space<vmem>>, vector<1x1x14x16xbf16>,
    return
  }
  func.func @transform_0(%arg0: i32, %arg1: i32) -> (i32, i32, i32, i32) {
    %c0_i32 = arith.constant 0 : i32
    %c0_i32_0 = arith.constant 0 : i32
    %c0_i32_1 = arith.constant 0 : i32
    %c0_i32_2 = arith.constant 0 : i32
    return %arg0, %c0_i32, %c0_i32_0, %c0_i32_1 : i32, i32, i32, i32
  }
  func.func @transform_1(%arg0: i32, %arg1: i32) -> (i32, i32, i32) {
    %c0_i32 = arith.constant 0 : i32
    %c0_i32_0 = arith.constant 0 : i32
    %c0_i32_1 = arith.constant 0 : i32
    %c0_i32_2 = arith.constant 0 : i32
    return %c0_i32, %c0_i32_0, %c0_i32_1 : i32, i32, i32
  }
  func.func @transform_2(%arg0: i32, %arg1: i32) -> (i32, i32) {
    %c0_i32 = arith.constant 0 : i32
    %c0_i32_0 = arith.constant 0 : i32
    %c0_i32_1 = arith.constant 0 : i32
    return %c0_i32, %c0_i32_0 : i32, i32
  }
  func.func @transform_3(%arg0: i32, %arg1: i32) -> (i32, i32, i32, i32) {
    %c0_i32 = arith.constant 0 : i32
    %c0_i32_0 = arith.constant 0 : i32
    %c0_i32_1 = arith.constant 0 : i32
    return %arg0, %arg1, %c0_i32, %c0_i32_0 : i32, i32, i32, i32
  }
}

module attributes {stable_mosaic.version = 11 : i64} {
  func.func @_matmul_bias_kernel(%arg0: i32, %arg1: memref<8x576xbf16, #tpu.memory_space<vmem>>, %arg2: memref<576x500xbf16, #tpu.memory_space<vmem>>, %arg3: memref<1x500xf32, #tpu.memory_space<vmem>>, %arg4: memref<8x500xf32, #tpu.memory_space<vmem>>) attributes {dimension_semantics = [#tpu.dimension_semantics<parallel>], iteration_bounds = array<i64: 1>, scalar_prefetch = 0 : i64, scratch_operands = 0 : i64, tpu.core_type = #tpu.core_type<tc>, window_params = [{transform_indices = @transform_0, window_bounds = array<i64: 8, 576>}, {pipeline_mode = #tpu.pipeline_mode<synchronous>, transform_indices = @transform_1, window_bounds = array<i64: 576, 500>}, {pipeline_mode = #tpu.pipeline_mode<synchronous>, transform_indices = @transform_2, window_bounds = array<i64: 1, 500>}, {transform_indices = @transform_3, window_bounds = array<i64: 8, 500>}]} {
    %c0 = arith.constant 0 : index
    %c0_0 = arith.constant 0 : index
    %0 = vector.load %arg1[%c0, %c0_0] : memref<8x576xbf16, #tpu.memory_space<vmem>>, vector<8x576xbf16>
    %c0_1 = arith.constant 0 : index
    %c0_2 = arith.constant 0 : index
    %1 = vector.load %arg2[%c0_1, %c0_2] : memref<576x500xbf16, #tpu.memory_space<vmem>>, vector<576x500xbf16>
    %cst = arith.constant dense<0.000000e+00> : vector<8x500xf32>
    %2 = tpu.matmul %0, %1, %cst {dimension_numbers = #tpu.dot_dimension_numbers<[1], [0], [0], [1], [0, 0, 1, 1], [], []>} : vector<8x576xbf16>, vector<576x500xbf16>, vector<8x500xf32> -> vector<8x500xf32>
    %c0_3 = arith.constant 0 : index
    %c0_4 = arith.constant 0 : index
    %3 = vector.load %arg3[%c0_3, %c0_4] : memref<1x500xf32, #tpu.memory_space<vmem>>, vector<1x500xf32>
    %4 = vector.broadcast %3 : vector<1x500xf32> to vector<8x500xf32>
    %5 = arith.addf %2, %4 : vector<8x500xf32>
    %cst_5 = arith.constant 0.000000e+00 : f32
    %6 = vector.broadcast %cst_5 : f32 to vector<8x500xf32>
    %7 = arith.maximumf %5, %6 : vector<8x500xf32>
    %c0_6 = arith.constant 0 : index
    %c0_7 = arith.constant 0 : index
    %8 = vector.load %arg4[%c0_6, %c0_7] : memref<8x500xf32, #tpu.memory_space<vmem>>, vector<8x500xf32>
    tpu.vector_store %arg4[%c0_6, %c0_7], %7 {strides = array<i32>} : memref<8x500xf32, #tpu.memory_space<vmem>>, vector<8x500xf32>,
    return
  }
  func.func @transform_0(%arg0: i32) -> (i32, i32) {
    %c0_i32 = arith.constant 0 : i32
    %c0_i32_0 = arith.constant 0 : i32
    return %arg0, %c0_i32 : i32, i32
  }
  func.func @transform_1(%arg0: i32) -> (i32, i32) {
    %c0_i32 = arith.constant 0 : i32
    %c0_i32_0 = arith.constant 0 : i32
    %c0_i32_1 = arith.constant 0 : i32
    return %c0_i32, %c0_i32_0 : i32, i32
  }
  func.func @transform_2(%arg0: i32) -> (i32, i32) {
    %c0_i32 = arith.constant 0 : i32
    %c0_i32_0 = arith.constant 0 : i32
    %c0_i32_1 = arith.constant 0 : i32
    return %c0_i32, %c0_i32_0 : i32, i32
  }
  func.func @transform_3(%arg0: i32) -> (i32, i32) {
    %c0_i32 = arith.constant 0 : i32
    %c0_i32_0 = arith.constant 0 : i32
    return %arg0, %c0_i32 : i32, i32
  }
}

module attributes {stable_mosaic.version = 11 : i64} {
  func.func @_matmul_bias_kernel(%arg0: i32, %arg1: memref<8x500xf32, #tpu.memory_space<vmem>>, %arg2: memref<500x10xbf16, #tpu.memory_space<vmem>>, %arg3: memref<1x10xf32, #tpu.memory_space<vmem>>, %arg4: memref<8x10xf32, #tpu.memory_space<vmem>>) attributes {dimension_semantics = [#tpu.dimension_semantics<parallel>], iteration_bounds = array<i64: 1>, scalar_prefetch = 0 : i64, scratch_operands = 0 : i64, tpu.core_type = #tpu.core_type<tc>, window_params = [{transform_indices = @transform_0, window_bounds = array<i64: 8, 500>}, {pipeline_mode = #tpu.pipeline_mode<synchronous>, transform_indices = @transform_1, window_bounds = array<i64: 500, 10>}, {pipeline_mode = #tpu.pipeline_mode<synchronous>, transform_indices = @transform_2, window_bounds = array<i64: 1, 10>}, {transform_indices = @transform_3, window_bounds = array<i64: 8, 10>}]} {
    %c0 = arith.constant 0 : index
    %c0_0 = arith.constant 0 : index
    %0 = vector.load %arg1[%c0, %c0_0] : memref<8x500xf32, #tpu.memory_space<vmem>>, vector<8x500xf32>
    %1 = arith.truncf %0 : vector<8x500xf32> to vector<8x500xbf16>
    %c0_1 = arith.constant 0 : index
    %c0_2 = arith.constant 0 : index
    %2 = vector.load %arg2[%c0_1, %c0_2] : memref<500x10xbf16, #tpu.memory_space<vmem>>, vector<500x10xbf16>
    %cst = arith.constant dense<0.000000e+00> : vector<8x10xf32>
    %3 = tpu.matmul %1, %2, %cst {dimension_numbers = #tpu.dot_dimension_numbers<[1], [0], [0], [1], [0, 0, 1, 1], [], []>} : vector<8x500xbf16>, vector<500x10xbf16>, vector<8x10xf32> -> vector<8x10xf32>
    %c0_3 = arith.constant 0 : index
    %c0_4 = arith.constant 0 : index
    %4 = vector.load %arg3[%c0_3, %c0_4] : memref<1x10xf32, #tpu.memory_space<vmem>>, vector<1x10xf32>
    %5 = vector.broadcast %4 : vector<1x10xf32> to vector<8x10xf32>
    %6 = arith.addf %3, %5 : vector<8x10xf32>
    %c0_5 = arith.constant 0 : index
    %c0_6 = arith.constant 0 : index
    %7 = vector.load %arg4[%c0_5, %c0_6] : memref<8x10xf32, #tpu.memory_space<vmem>>, vector<8x10xf32>
    tpu.vector_store %arg4[%c0_5, %c0_6], %6 {strides = array<i32>} : memref<8x10xf32, #tpu.memory_space<vmem>>, vector<8x10xf32>,
    return
  }
  func.func @transform_0(%arg0: i32) -> (i32, i32) {
    %c0_i32 = arith.constant 0 : i32
    %c0_i32_0 = arith.constant 0 : i32
    return %arg0, %c0_i32 : i32, i32
  }
  func.func @transform_1(%arg0: i32) -> (i32, i32) {
    %c0_i32 = arith.constant 0 : i32
    %c0_i32_0 = arith.constant 0 : i32
    %c0_i32_1 = arith.constant 0 : i32
    return %c0_i32, %c0_i32_0 : i32, i32
  }
  func.func @transform_2(%arg0: i32) -> (i32, i32) {
    %c0_i32 = arith.constant 0 : i32
    %c0_i32_0 = arith.constant 0 : i32
    %c0_i32_1 = arith.constant 0 : i32
    return %c0_i32, %c0_i32_0 : i32, i32
  }
  func.func @transform_3(%arg0: i32) -> (i32, i32) {
    %c0_i32 = arith.constant 0 : i32
    %c0_i32_0 = arith.constant 0 : i32
    return %arg0, %c0_i32 : i32, i32
  }
}

</mosaic_0001>

<bundles_post_ra>
// kernel: cnn_forward.7
= control target key start
LH: loop header
LB: loop body
LE: loop exit
PB: predicated region body
PF: predicated region fallthrough
CT: control target
= control target key end

     0   :  { %s903_s12 = smov 0   ;;  %s905_s13 = smov 0   ;;  %s1037_s0 = inlined_call_operand.vmem [shape: bf16[2,5,5,32], index: 0, kind: input, shape index: {}]   ;;  %s1038_s1 = inlined_call_operand.vmem [shape: bf16[9,32,64], index: 1, kind: input, shape index: {}]   ;;  %s1039_s2 = inlined_call_operand.vmem [shape: f32[1,64], index: 2, kind: input, shape index: {}]   ;;  %s1040_s3 = inlined_call_operand.vmem [shape: bf16[2,3,3,64], index: 3, kind: output, shape index: {}]  }
   0x1   :  { %s907_s14 = smov 0   ;;  %s909_s15 = smov 0  }
   0x2   :  { %s911_s16 = smov 0  }
   0x3 LB: > { %s22_s17 = sadd.s32 1, %s873_s14  ;;  %s25_s18 = sadd.s32 1, %s877_s15  ;;  %s881_s16 = sphi %s911_s16, %s13_s16   ;;  %s877_s15 = sphi %s909_s15, %s1044_s15   ;;  %s873_s14 = sphi %s907_s14, %s1043_s14   ;;  %s869_s13 = sphi %s905_s13, %s1042_s13   ;;  %s865_s12 = sphi %s903_s12, %s1041_s12  }
   0x4   : > { %p23_p0 = scmp.ge.s32.totalorder %s22_s17, 3  ;;  %p657_p1 = scmp.ge.s32.totalorder %s881_s16, 1 }
   0x5   : > { %p151_p2 = scmp.lt.s32.totalorder %s881_s16, 7 }
   0x6   : > { %s1046_s17 = smov (%p23_p0, %s22_s17), 0  ;;  %s1048_s18 = smov (!%p23_p0, %s25_s18), %s877_s15 }
   0x7   : > { %p152_p3 = pnand %p657_p1, %p151_p2  ;;  %p27_p4 = scmp.ge.s32.totalorder %s1048_s18, 2 }
   0x8   : > { %p178_p5 = scmp.lt.s32.totalorder (!%p152_p3), %s869_s13, 1  ;;  %s660_s9 = sshll.u32 (!%p152_p3), %s865_s12, 2 }
   0x9   : > { %s1050_s18 = smov (%p27_p4, %s1048_s18), 0  ;;  %155 = sbr.rel (%p152_p3) target bundleno = 199 (0xc7), region = 32 }
   0xa   : > { %p185_p6 = scmp.lt.s32.totalorder (!%p152_p3), %s865_s12, 2 }
   0xe   : > { %v787_v0 = vld [vmem:[%s1038_s1 + $0x28] sm:$0xff]  ;;  %v789_v1 = vld [vmem:[%s1038_s1 + $0x38] sm:$0xff]  ;;  %v786_v4 = vld [vmem:[%s1038_s1 + $0x20] sm:$0xff]  ;;  %s1052_s13 = smov (!%p178_p5, %s869_s13), 1  ;;  %vm227_vm0 = vcmask 261120   ;;  %s1054_s12 = smov (!%p185_p6, %s865_s12), 2 }
   0xf   : > { %v785_v2 = vld [vmem:[%s1038_s1 + $0x18] sm:$0xff]  ;;  %v783_v3 = vld [vmem:[%s1038_s1 + $0x8] sm:$0xff]  ;;  %303 = vmatpush.bf16.msra.mxu2 %v787_v0  ;;  %341 = vmatpush.bf16.msra.mxu3 %v789_v1  ;;  %v788_v5 = vld [vmem:[%s1038_s1 + $0x30] sm:$0xff]  ;;  %s800_s8 = smul.u32 20, %s1052_s13  ;;  %vm559_vm1 = vcmask 517120  }
  0x10   : > { %237 = vmatpush.bf16.msra.mxu0 %v785_v2  ;;  %265 = vmatpush.bf16.msra.mxu1 %v783_v3  ;;  %v784_v6 = vld [vmem:[%s1038_s1 + $0x10] sm:$0xff]  ;;  %v782_v7 = vld [vmem:[%s1038_s1] sm:$0xff]  ;;  %v791_v8 = vld [vmem:[%s1038_s1 + $0x48] sm:$0xff]  ;;  %s801_s21 = smul.u32 3, %s1052_s13  ;;  %vm560_vm2 = vsmask.f32 1280 }
  0x11   : > { %v795_v9 = vld [vmem:[%s1038_s1 + $0x68] sm:$0xff]  ;;  %v793_v10 = vld [vmem:[%s1038_s1 + $0x58] sm:$0xff]  ;;  %s182_s25 = scalar_lea.vmem %s1037_s0, %s800_s8  ;;  %v790_v12 = vld [vmem:[%s1038_s1 + $0x40] sm:$0xff] }
  0x12   : > { %v797_v11 = vld [vmem:[%s1038_s1 + $0x78] sm:$0xff]  ;;  %s978_s28 = scalar_lea.vmem %s182_s25, %s660_s9  ;;  %v794_v13 = vld [vmem:[%s1038_s1 + $0x60] sm:$0xff]  ;;  %v792_v20 = vld [vmem:[%s1038_s1 + $0x50] sm:$0xff]  ;;  %s188_s22 = sadd.s32 %s801_s21, %s1054_s12 }
  0x13   : > { %304 = vmatpush.bf16.msra.mxu2 %v786_v4  ;;  %342 = vmatpush.bf16.msra.mxu3 %v788_v5  ;;  %v272_v14 = vld [vmem:[%s978_s28] sm:$0x6]  ;;  %v697_v15 = vld [vmem:[%s978_s28 + $0x4] sm:$0x3]  ;;  %v739_v19 = vld [vmem:[%s978_s28 + $0x8] sm:$0x3] }
  0x14   : > { %238 = vmatpush.bf16.msra.mxu0 %v784_v6  ;;  %266 = vmatpush.bf16.msra.mxu1 %v782_v7  ;;  %v195_v16 = vld [vmem:[%s978_s28] sm:$0x3]  ;;  %v279_v17 = vunpack.c.l.b16 %v272_v14  ;;  %v796_v21 = vld [vmem:[%s1038_s1 + $0x70] sm:$0xff]  ;;  %v476_v22 = vunpack.c.l.b16 %v739_v19  ;;  %v724_v25 = vld [vmem:[%s978_s28 + $0x4] sm:$0x6]  ;;  %v355_v32 = vunpack.c.l.b16 %v697_v15  ;;  %s659_s25 = sshll.u32 %s188_s22, 1 }
  0x15   : > { %v206_v18 = vunpack.c.l.b16 %v195_v16  ;;  %v400_v31 = vunpack.c.l.b16 %v724_v25  ;;  %v799_v36 = vld [vmem:[%s1038_s1 + $0x88] sm:$0xff]  ;;  %v798_v41 = vld [vmem:[%s1038_s1 + $0x80] sm:$0xff]  ;;  %vm561_vm3 = vmand %vm559_vm1, %vm560_vm2 }
  0x16   : > { %710 = vmatmul.msk.bf16.vlgmr.msra.gmra.mxu3 %vm227_vm0, %v697_v15  ;;  %v280_v23 = vpack.c.b16 %v279_v17, %v279_v17  ;;  %v477_v26 = vpack.c.b16 %v476_v22, %v476_v22  ;;  %v356_v39 = vpack.c.b16 %v355_v32, %v355_v32  ;;  %v766_v47 = vld [vmem:[%s978_s28 + $0x8] sm:$0x6]  ;;  %s190_s28 = scalar_lea.vmem %s1040_s3, %s659_s25 }
  0x17   : > { %462 = vmatpush.bf16.msrb.mxu2 %v795_v9  ;;  %682 = vmatmul.msk.bf16.vlgmr.msra.gmra.mxu1 %vm227_vm0, %v195_v16  ;;  %v207_v24 = vpack.c.b16 %v206_v18, %v206_v18  ;;  %v401_v38 = vpack.c.b16 %v400_v31, %v400_v31  ;;  %v521_v48 = vunpack.c.l.b16 %v766_v47  ;;  %v562_v15 = vld [vmem:[%s190_s28] sm:$0x3] }
  0x18   : > { %385 = vmatpush.bf16.msrb.mxu0 %v791_v8  ;;  %424 = vmatpush.bf16.msrb.mxu1 %v793_v10  ;;  %v281_v27 = vrot.slane %v280_v23, 1  ;;  %v481_v30 = vshll.u32 %v477_v26, 16  ;;  %v479_v34 = vshrl.u32 %v477_v26, 16  ;;  %v360_v43 = vshll.u32 %v356_v39, 16  ;;  %v842_v10 = vld [vmem:[%s1039_s2] ss:$0 sm:$0xff] }
  0x19   : > { %506 = vmatpush.bf16.msrb.mxu3 %v797_v11  ;;  %v209_v28 = vshrl.u32 %v207_v24, 16  ;;  %v211_v29 = vshll.u32 %v207_v24, 16  ;;  %v402_v42 = vrot.slane %v401_v38, 1  ;;  %v358_v44 = vshrl.u32 %v356_v39, 16 }
  0x1a   : > { %695 = vmatmul.msk.bf16.vlgmr.msra.gmra.mxu2 %vm227_vm0, %v281_v27  ;;  %v483_v35 = vrot.slane %v481_v30, 1  ;;  %v362_v45 = vrot.slane %v360_v43, 1  ;;  %v522_v49 = vpack.c.b16 %v521_v48, %v521_v48 }
  0x1b   : > { %463 = vmatpush.bf16.msrb.mxu2 %v794_v13  ;;  %v213_v33 = vrot.slane %v211_v29, 1 }
  0x1c   : > { %386 = vmatpush.bf16.msrb.mxu0 %v790_v12  ;;  %425 = vmatpush.bf16.msrb.mxu1 %v792_v20  ;;  %v484_v40 = vor.u32 %v483_v35, %v479_v34  ;;  %v363_v46 = vor.u32 %v362_v45, %v358_v44  ;;  %v523_v50 = vrot.slane %v522_v49, 1 }
  0x1d   : > { %507 = vmatpush.bf16.msrb.mxu3 %v796_v21  ;;  %v214_v37 = vor.u32 %v213_v33, %v209_v28 }
  0x1f   : > { %673 = vmatmul.msk.bf16.vlgmr.msra.gmra.mxu0 %vm227_vm0, %v214_v37 }
  0x20   : > { %545 = vmatpush.bf16.msra.mxu0 %v799_v36 }
  0x24   : > { %546 = vmatpush.bf16.msra.mxu0 %v798_v41 }
  0x26   : > { %765 = vmatmul.msk.bf16.vlgmr.msrb.gmra.mxu3 %vm227_vm0, %v484_v40 }
  0x27   : > { %737 = vmatmul.msk.bf16.vlgmr.msrb.gmra.mxu1 %vm227_vm0, %v402_v42 }
  0x2a   : > { %752 = vmatmul.msk.bf16.vlgmr.msrb.gmra.mxu2 %vm227_vm0, %v739_v19 }
  0x2f   : > { %723 = vmatmul.msk.bf16.vlgmr.msrb.gmra.mxu0 %vm227_vm0, %v363_v46 }
  0x3f   : > { %779 = vmatmul.msk.bf16.vlgmr.msra.gmra.mxu0 %vm227_vm0, %v523_v50 }
  0x94   : > { %v268_v51 = vpop.f32.mrf.mxu1 }
  0x99   : > { %v344_v52 = vpop.f32.mrf.mxu3 }
  0x9c   : > { %v270_v53 = vpop.f32.mrf.mxu1  ;;  %v240_v54 = vpop.f32.mrf.mxu0 }
  0x9d   : > { %v306_v55 = vpop.f32.mrf.mxu2  ;;  %v269_v59 = vadd.f32 %v268_v51, %v240_v54 }
  0x9f   : > { %v310_v62 = vadd.f32 %v306_v55, %v269_v59 }
  0xa1   : > { %v346_v56 = vpop.f32.mrf.mxu3  ;;  %v348_v1 = vadd.f32 %v344_v52, %v310_v62 }
  0xa4   : > { %v427_v57 = vpop.f32.mrf.mxu1  ;;  %v242_v58 = vpop.f32.mrf.mxu0 }
  0xa5   : > { %v308_v60 = vpop.f32.mrf.mxu2 }
  0xa9   : > { %v509_v61 = vpop.f32.mrf.mxu3 }
  0xac   : > { %v429_v63 = vpop.f32.mrf.mxu1  ;;  %v388_v0 = vpop.f32.mrf.mxu0 }
  0xad   : > { %v465_v2 = vpop.f32.mrf.mxu2  ;;  %v392_v3 = vadd.f32 %v388_v0, %v348_v1 }
  0xaf   : > { %v431_v5 = vadd.f32 %v427_v57, %v392_v3 }
  0xb1   : > { %v511_v4 = vpop.f32.mrf.mxu3  ;;  %v469_v8 = vadd.f32 %v465_v2, %v431_v5 }
  0xb3   : > { %v513_v9 = vadd.f32 %v509_v61, %v469_v8 }
  0xb4   : > { %v390_v6 = vpop.f32.mrf.mxu0 }
  0xb5   : > { %v467_v7 = vpop.f32.mrf.mxu2 }
  0xbc   : > { %v548_v11 = vpop.f32.mrf.mxu0 }
  0xbd   : > { %v552_v12 = vadd.f32 %v548_v11, %v513_v9 }
  0xbf   : > { %v556_v13 = vadd.f32 %v842_v10, %v552_v12 }
  0xc1   : > { %v557_v14 = vmax.f32 %v556_v13, 0.0 }
  0xc3   : > { %v558_v16 = vpack.c.bf16 %v557_v14, %v557_v14 }
  0xc4   : > { %v550_v17 = vpop.f32.mrf.mxu0 }
  0xc5   : > { %v563_v18 = vsel %vm561_vm3, %v558_v16, %v562_v15 }
  0xc6   : > { %564 = vst [vmem:[%s190_s28] sm:$0x3] %v563_v18 }
  0xc7 PF: > { %s13_s16 = sadd.s32 1, %s881_s16   ;;  %s1041_s12 = smov %s873_s14 }
  0xc8   : > { %p10_p7 = scmp.ge.s32.totalorder %s13_s16, 8   ;;  %s1042_s13 = smov %s877_s15 }
  0xc9   : > { %s1043_s14 = smov %s1046_s17  ;;  %s1044_s15 = smov %s1050_s18 }
  0xca   :  { %12 = sbr.rel (!%p10_p7) target bundleno = 3 (0x3), region = 73 }

// kernel: cnn_forward.6
= control target key start
LH: loop header
LB: loop body
LE: loop exit
PB: predicated region body
PF: predicated region fallthrough
CT: control target
= control target key end

     0   :  { %s2079_s12 = smov 0   ;;  %s2081_s13 = smov 0   ;;  %s2518_s0 = inlined_call_operand.vmem [shape: bf16[2,14,14,16], index: 0, kind: input, shape index: {}]   ;;  %s2519_s1 = inlined_call_operand.vmem [shape: bf16[25,16,32], index: 1, kind: input, shape index: {}]   ;;  %s2520_s2 = inlined_call_operand.vmem [shape: f32[1,32], index: 2, kind: input, shape index: {}]   ;;  %s2521_s3 = inlined_call_operand.vmem [shape: bf16[2,5,5,32], index: 3, kind: output, shape index: {}]  }
   0x1   :  { %s2083_s14 = smov 0   ;;  %s2085_s15 = smov 0  }
   0x2   :  { %s2087_s16 = smov 0  }
   0x3 LB: > { %s22_s17 = sadd.s32 1, %s2049_s14  ;;  %s25_s18 = sadd.s32 1, %s2053_s15  ;;  %s2057_s16 = sphi %s2087_s16, %s13_s16   ;;  %s2053_s15 = sphi %s2085_s15, %s2525_s15   ;;  %s2049_s14 = sphi %s2083_s14, %s2524_s14   ;;  %s2045_s13 = sphi %s2081_s13, %s2523_s13   ;;  %s2041_s12 = sphi %s2079_s12, %s2522_s12  }
   0x4   : > { %p23_p0 = scmp.ge.s32.totalorder %s22_s17, 5  ;;  %p1698_p1 = scmp.ge.s32.totalorder %s2057_s16, 1 }
   0x5   : > { %p151_p2 = scmp.lt.s32.totalorder %s2057_s16, 11 }
   0x6   : > { %s2527_s17 = smov (%p23_p0, %s22_s17), 0  ;;  %s2529_s18 = smov (!%p23_p0, %s25_s18), %s2053_s15 }
   0x7   : > { %p152_p3 = pnand %p1698_p1, %p151_p2  ;;  %p27_p4 = scmp.ge.s32.totalorder %s2529_s18, 2 }
   0x8   : > { %p178_p5 = scmp.lt.s32.totalorder (!%p152_p3), %s2045_s13, 1  ;;  %s1945_s9 = sshll.u32 (!%p152_p3), %s2041_s12, 4 }
   0x9   : > { %s2531_s18 = smov (%p27_p4, %s2529_s18), 0  ;;  %155 = sbr.rel (%p152_p3) target bundleno = 381 (0x17d), region = 32 }
   0xa   : > { %p185_p6 = scmp.lt.s32.totalorder (!%p152_p3), %s2041_s12, 4 }
   0xe   : > { %v2114_v0 = vld [vmem:[%s2519_s1] sm:$0xff]  ;;  %v2119_v1 = vld [vmem:[%s2519_s1 + $0x10] sm:$0xff]  ;;  %v2124_v2 = vld [vmem:[%s2519_s1 + $0x8] sm:$0xff]  ;;  %s2533_s13 = smov (!%p178_p5, %s2045_s13), 1  ;;  %vm223_vm0 = vcmask 130048   ;;  %vm1577_vm1 = vcmask 261120  }
   0xf   : > { %v2129_v3 = vld [vmem:[%s2519_s1 + $0x18] sm:$0xff]  ;;  %v2134_v4 = vld [vmem:[%s2519_s1 + $0x20] sm:$0xff]  ;;  %v2139_v5 = vld [vmem:[%s2519_s1 + $0x28] sm:$0xff]  ;;  %260 = vmatpush.bf16.msra.mxu1 %v2114_v0  ;;  %291 = vmatpush.bf16.msra.mxu2 %v2119_v1  ;;  %s1976_s8 = smul.u32 112, %s2533_s13  ;;  %s2535_s12 = smov (!%p185_p6, %s2041_s12), 4  ;;  %vm1579_vm2 = vcmask 254976  }
  0x10   : > { %v2148_v6 = vld [vmem:[%s2519_s1 + $0x30] sm:$0xff]  ;;  %v2153_v7 = vld [vmem:[%s2519_s1 + $0x38] sm:$0xff]  ;;  %234 = vmatpush.bf16.msra.mxu0 %v2124_v2  ;;  %331 = vmatpush.bf16.msra.mxu3 %v2129_v3  ;;  %v2178_v20 = vld [vmem:[%s2519_s1 + $0x48] sm:$0xff]  ;;  %s1977_s10 = smul.u32 5, %s2533_s13  ;;  %vm1586_vm3 = vcmask 256000  }
  0x11   : > { %s182_s19 = scalar_lea.vmem %s2518_s0, %s1976_s8  ;;  %v2184_v29 = vld [vmem:[%s2519_s1 + $0x50] sm:$0xff]  ;;  %v2191_v37 = vld [vmem:[%s2519_s1 + $0x40] sm:$0xff]  ;;  %v2197_v39 = vld [vmem:[%s2519_s1 + $0x58] sm:$0xff]  ;;  %vm1587_vm4 = vsmask.f32 2304 }
  0x12   : > { %s2166_s20 = scalar_lea.vmem %s182_s19, %s1945_s9  ;;  %v2211_v51 = vld [vmem:[%s2519_s1 + $0x68] sm:$0xff]  ;;  %v2226_v57 = vld [vmem:[%s2519_s1 + $0x70] sm:$0xff]  ;;  %s188_s11 = sadd.s32 %s1977_s10, %s2535_s12  ;;  %vm1588_vm5 = vmand %vm1586_vm3, %vm1587_vm4 }
  0x13   : > { %403 = vmatpush.bf16.msrb.mxu1 %v2139_v5  ;;  %442 = vmatpush.bf16.msrb.mxu2 %v2148_v6  ;;  %v197_v8 = vld [vmem:[%s2166_s20] sm:$0xf]  ;;  %v198_v9 = vld [vmem:[%s2166_s20 + $0x4] sm:$0x1]  ;;  %v1739_v16 = vld [vmem:[%s2166_s20 + $0x8] sm:$0xf] }
  0x14   : > { %364 = vmatpush.bf16.msrb.mxu0 %v2134_v4  ;;  %475 = vmatpush.bf16.msrb.mxu3 %v2153_v7  ;;  %v201_v10 = vld [vmem:[%s2166_s20 + $0x4] sm:$0x3]  ;;  %v207_v11 = vunpack.c.l.b16 %v197_v8  ;;  %v242_v12 = vunpack.c.l.b16 %v198_v9  ;;  %v267_v14 = vld [vmem:[%s2166_s20] sm:$0xe]  ;;  %v1748_v19 = vld [vmem:[%s2166_s20 + $0xc] sm:$0x3]  ;;  %v384_v25 = vunpack.c.l.b16 %v1739_v16 }
  0x15   : > { %v208_v13 = vunpack.c.l.b16 %v201_v10  ;;  %v300_v15 = vld [vmem:[%s2166_s20 + $0x4] sm:$0x7]  ;;  %v272_v17 = vunpack.c.l.b16 %v267_v14  ;;  %v417_v26 = vunpack.c.l.b16 %v1748_v19  ;;  %v1740_v41 = vld [vmem:[%s2166_s20 + $0xc] sm:$0x1]  ;;  %v340_v43 = vld [vmem:[%s2166_s20] sm:$0xc] }
  0x16   : > { %v305_v18 = vunpack.c.l.b16 %v300_v15  ;;  %v243_v21 = vpack.c.b16 %v242_v12, %v207_v11  ;;  %v385_v44 = vunpack.c.l.b16 %v1740_v41  ;;  %v1756_v45 = vld [vmem:[%s2166_s20 + $0x8] sm:$0xe]  ;;  %v345_v46 = vunpack.c.l.b16 %v340_v43  ;;  %v1782_v55 = vld [vmem:[%s2166_s20 + $0x10] sm:$0xf]  ;;  %v2221_v56 = vld [vmem:[%s2166_s20 + $0x14] sm:$0x3] }
  0x17   : > { %v209_v22 = vpack.c.b16 %v208_v13, %v207_v11  ;;  %v273_v23 = vpack.c.b16 %v208_v13, %v272_v17  ;;  %v418_v36 = vpack.c.b16 %v417_v26, %v384_v25  ;;  %v456_v49 = vunpack.c.l.b16 %v1756_v45  ;;  %v1764_v58 = vld [vmem:[%s2166_s20 + $0xc] sm:$0x7]  ;;  %v1772_v59 = vld [vmem:[%s2166_s20 + $0x8] sm:$0xc]  ;;  %v2238_v8 = vld [vmem:[%s2519_s1 + $0x60] sm:$0xff]  ;;  %s1700_s19 = sshll.u32 %s188_s11, 2 }
  0x18   : > { %v306_v24 = vpack.c.b16 %v305_v18, %v272_v17  ;;  %1715 = vmatmul.msk.bf16.vlgmr.msra.gmra.mxu1 %vm223_vm0, %v243_v21  ;;  %v2206_v50 = vpack.c.b16 %v385_v44, %v384_v25  ;;  %v346_v52 = vpack.c.b16 %v305_v18, %v345_v46  ;;  %v568_v62 = vunpack.c.l.b16 %v1782_v55  ;;  %v2244_v11 = vld [vmem:[%s2519_s1 + $0x78] sm:$0xff]  ;;  %v1783_v15 = vld [vmem:[%s2166_s20 + $0x14] sm:$0x1]  ;;  %v1799_v16 = vld [vmem:[%s2166_s20 + $0x10] sm:$0xe]  ;;  %s190_s23 = scalar_lea.vmem %s2521_s3, %s1700_s19 }
  0x19   : > { %v211_v27 = vshrl.u32 %v209_v22, 16  ;;  %v213_v28 = vshll.u32 %v209_v22, 16  ;;  %v274_v30 = vrot.slane %v273_v23, 1  ;;  %548 = vmatpush.bf16.msra.mxu1 %v2178_v20  ;;  %v422_v42 = vshll.u32 %v418_v36, 16  ;;  %v1807_v17 = vld [vmem:[%s2166_s20 + $0x14] sm:$0x7] }
  0x1a   : > { %v308_v31 = vshrl.u32 %v306_v24, 16  ;;  %v311_v32 = vshll.u32 %v306_v24, 16  ;;  %v420_v47 = vshrl.u32 %v418_v36, 16  ;;  %v2215_v54 = vpack.c.b16 %v417_v26, %v456_v49  ;;  %v2261_v26 = vld [vmem:[%s2519_s1 + $0x88] sm:$0xff]  ;;  %v2290_v43 = vld [vmem:[%s2519_s1 + $0x98] sm:$0xff] }
  0x1b   : > { %v215_v33 = vrot.slane %v213_v28, 1  ;;  %1722 = vmatmul.msk.bf16.vlgmr.msra.gmra.mxu2 %vm223_vm0, %v274_v30  ;;  %v424_v48 = vrot.slane %v422_v42, 1  ;;  %v347_v60 = vrot.slane %v346_v52, 2  ;;  %v601_v63 = vunpack.c.l.b16 %v2221_v56  ;;  %v1826_v52 = vld [vmem:[%s2166_s20 + $0x1c] sm:$0x1] }
  0x1c   : > { %v310_v34 = vrot.slane %v308_v31, 1  ;;  %v313_v35 = vrot.slane %v311_v32, 2  ;;  %587 = vmatpush.bf16.msra.mxu2 %v2184_v29  ;;  %v458_v61 = vrot.slane %v2215_v54, 1  ;;  %v489_v9 = vunpack.c.l.b16 %v1764_v58  ;;  %v1842_v55 = vld [vmem:[%s2166_s20 + $0x18] sm:$0xe]  ;;  %v2309_v58 = vld [vmem:[%s2519_s1 + $0xa8] sm:$0xff] }
  0x1d   : > { %v216_v38 = vor.u32 %v215_v33, %v211_v27  ;;  %v2213_v53 = vor.u32 %v424_v48, %v420_v47  ;;  %v529_v10 = vunpack.c.l.b16 %v1772_v59  ;;  %v602_v13 = vpack.c.b16 %v601_v63, %v568_v62  ;;  %v1825_v48 = vld [vmem:[%s2166_s20 + $0x18] sm:$0xf]  ;;  %v1850_v56 = vld [vmem:[%s2166_s20 + $0x1c] sm:$0x7] }
  0x1e   : > { %v314_v40 = vor.u32 %v313_v35, %v310_v34  ;;  %v490_v12 = vpack.c.b16 %v489_v9, %v456_v49  ;;  %v569_v21 = vunpack.c.l.b16 %v1783_v15  ;;  %v640_v24 = vunpack.c.l.b16 %v1799_v16  ;;  %v2271_v34 = vld [vmem:[%s2519_s1 + $0x90] sm:$0xff]  ;;  %v1834_v15 = vld [vmem:[%s2166_s20 + $0x1c] sm:$0x3] }
  0x1f   : > { %1710 = vmatmul.msk.bf16.vlgmr.msra.gmra.mxu0 %vm223_vm0, %v216_v38  ;;  %v2251_v14 = vpack.c.b16 %v489_v9, %v529_v10  ;;  %v606_v22 = vshll.u32 %v602_v13, 16  ;;  %v673_v25 = vunpack.c.l.b16 %v1807_v17  ;;  %v604_v31 = vshrl.u32 %v602_v13, 16  ;;  %v1815_v38 = vld [vmem:[%s2166_s20 + $0x10] sm:$0xc] }
  0x20   : > { %1729 = vmatmul.msk.bf16.vlgmr.msra.gmra.mxu3 %vm223_vm0, %v314_v40  ;;  %515 = vmatpush.bf16.msra.mxu0 %v2191_v37  ;;  %v492_v18 = vshrl.u32 %v490_v12, 16  ;;  %v495_v19 = vshll.u32 %v490_v12, 16  ;;  %v2263_v30 = vpack.c.b16 %v569_v21, %v568_v62  ;;  %v2284_v40 = vld [vmem:[%s2519_s1 + $0x80] sm:$0xff]  ;;  %v713_v44 = vunpack.c.l.b16 %v1815_v38  ;;  %v2319_v13 = vld [vmem:[%s2519_s1 + $0xb0] sm:$0xff]  ;;  %v2338_v21 = vld [vmem:[%s2519_s1 + $0xb8] sm:$0xff] }
  0x21   : > { %626 = vmatpush.bf16.msra.mxu3 %v2197_v39  ;;  %v531_v23 = vrot.slane %v2251_v14, 2  ;;  %v608_v32 = vrot.slane %v606_v22, 1  ;;  %v674_v33 = vpack.c.b16 %v673_v25, %v640_v24  ;;  %v752_v62 = vunpack.c.l.b16 %v1825_v48 }
  0x22   : > { %v494_v27 = vrot.slane %v492_v18, 1  ;;  %v497_v28 = vrot.slane %v495_v19, 2  ;;  %v2298_v47 = vpack.c.b16 %v673_v25, %v713_v44  ;;  %v753_v9 = vunpack.c.l.b16 %v1826_v52  ;;  %v2332_v18 = vld [vmem:[%s2519_s1 + $0xa0] sm:$0xff] }
  0x23   : > { %v2278_v36 = vor.u32 %v608_v32, %v604_v31  ;;  %v676_v41 = vshrl.u32 %v674_v33, 16  ;;  %v679_v42 = vshll.u32 %v674_v33, 16  ;;  %v824_v10 = vunpack.c.l.b16 %v1842_v55  ;;  %v1868_v31 = vld [vmem:[%s2166_s20 + $0x20] sm:$0xf]  ;;  %v1877_v32 = vld [vmem:[%s2166_s20 + $0x24] sm:$0x3] }
  0x24   : > { %v2274_v35 = vor.u32 %v497_v28, %v494_v27  ;;  %v715_v59 = vrot.slane %v2298_v47, 2  ;;  %v857_v12 = vunpack.c.l.b16 %v1850_v56  ;;  %v785_v19 = vunpack.c.l.b16 %v1834_v15  ;;  %v1858_v28 = vld [vmem:[%s2166_s20 + $0x18] sm:$0xc] }
  0x25   : > { %v678_v45 = vrot.slane %v676_v41, 1  ;;  %v681_v46 = vrot.slane %v679_v42, 2  ;;  %v897_v42 = vunpack.c.l.b16 %v1858_v28 }
  0x26   : > { %v858_v17 = vpack.c.b16 %v857_v12, %v824_v10  ;;  %v786_v22 = vpack.c.b16 %v785_v19, %v752_v62  ;;  %v2346_v27 = vpack.c.b16 %v785_v19, %v824_v10  ;;  %v1893_v10 = vld [vmem:[%s2166_s20 + $0x24] sm:$0x7] }
  0x27   : > { %v2301_v49 = vor.u32 %v681_v46, %v678_v45  ;;  %v936_v45 = vunpack.c.l.b16 %v1868_v31  ;;  %v969_v46 = vunpack.c.l.b16 %v1877_v32  ;;  %v2355_v56 = vpack.c.b16 %v857_v12, %v897_v42  ;;  %v1869_v32 = vld [vmem:[%s2166_s20 + $0x24] sm:$0x1] }
  0x28   : > { %1747 = vmatmul.msk.bf16.vlgmr.msrb.gmra.mxu1 %vm223_vm0, %v2206_v50  ;;  %v863_v25 = vshll.u32 %v858_v17, 16  ;;  %v790_v33 = vshll.u32 %v786_v22, 16  ;;  %v826_v44 = vrot.slane %v2346_v27, 1  ;;  %v788_v48 = vshrl.u32 %v786_v22, 16  ;;  %v2371_v22 = vld [vmem:[%s2519_s1 + $0xc0] sm:$0xff] }
  0x29   : > { %699 = vmatpush.bf16.msrb.mxu1 %v2211_v51  ;;  %v1041_v12 = vunpack.c.l.b16 %v1893_v10 }
  0x2a   : > { %v865_v41 = vrot.slane %v863_v25, 2  ;;  %v792_v52 = vrot.slane %v790_v33, 1 }
  0x2b   : > { %1755 = vmatmul.msk.bf16.vlgmr.msrb.gmra.mxu2 %vm223_vm0, %v2213_v53 }
  0x2c   : > { %732 = vmatpush.bf16.msrb.mxu2 %v2226_v57  ;;  %v2363_v15 = vor.u32 %v792_v52, %v788_v48 }
  0x2f   : > { %1736 = vmatmul.msk.bf16.vlgmr.msrb.gmra.mxu0 %vm223_vm0, %v347_v60  ;;  %v2312_v60 = vpack.c.b16 %v601_v63, %v640_v24  ;;  %v2327_v63 = vpack.c.b16 %v753_v9, %v752_v62  ;;  %v860_v24 = vshrl.u32 %v858_v17, 16  ;;  %v970_v62 = vpack.c.b16 %v969_v46, %v936_v45  ;;  %v1885_v9 = vld [vmem:[%s2166_s20 + $0x20] sm:$0xe] }
  0x30   : > { %1763 = vmatmul.msk.bf16.vlgmr.msrb.gmra.mxu3 %vm223_vm0, %v458_v61  ;;  %659 = vmatpush.bf16.msrb.mxu0 %v2238_v8  ;;  %v899_v17 = vrot.slane %v2355_v56, 2  ;;  %v1008_v19 = vunpack.c.l.b16 %v1885_v9 }
  0x31   : > { %771 = vmatpush.bf16.msrb.mxu3 %v2244_v11  ;;  %v642_v16 = vrot.slane %v2312_v60, 1  ;;  %v862_v38 = vrot.slane %v860_v24, 1  ;;  %v974_v24 = vshll.u32 %v970_v62, 16  ;;  %v972_v25 = vshrl.u32 %v970_v62, 16 }
  0x32   : > { %v2381_v31 = vpack.c.b16 %v969_v46, %v1008_v19  ;;  %v1901_v46 = vld [vmem:[%s2166_s20 + $0x20] sm:$0xc] }
  0x33   : > { %v2353_v55 = vor.u32 %v865_v41, %v862_v38  ;;  %v976_v28 = vrot.slane %v974_v24, 1  ;;  %v937_v41 = vunpack.c.l.b16 %v1869_v32 }
  0x34   : > { %v1010_v42 = vrot.slane %v2381_v31, 1 }
  0x35   : > { %v2384_v38 = vor.u32 %v976_v28, %v972_v25  ;;  %v2390_v62 = vpack.c.b16 %v937_v41, %v936_v45 }
  0x38   : > { %1779 = vmatmul.msk.bf16.vlgmr.msra.gmra.mxu1 %vm223_vm0, %v531_v23 }
  0x39   : > { %843 = vmatpush.bf16.msra.mxu1 %v2261_v26 }
  0x3b   : > { %1790 = vmatmul.msk.bf16.vlgmr.msra.gmra.mxu2 %vm223_vm0, %v2263_v30 }
  0x3c   : > { %883 = vmatpush.bf16.msra.mxu2 %v2271_v34 }
  0x3f   : > { %1771 = vmatmul.msk.bf16.vlgmr.msra.gmra.mxu0 %vm223_vm0, %v2274_v35 }
  0x40   : > { %1798 = vmatmul.msk.bf16.vlgmr.msra.gmra.mxu3 %vm223_vm0, %v2278_v36  ;;  %810 = vmatpush.bf16.msra.mxu0 %v2284_v40 }
  0x41   : > { %916 = vmatpush.bf16.msra.mxu3 %v2290_v43 }
  0x48   : > { %1814 = vmatmul.msk.bf16.vlgmr.msrb.gmra.mxu1 %vm223_vm0, %v2301_v49 }
  0x49   : > { %994 = vmatpush.bf16.msrb.mxu1 %v2309_v58 }
  0x4b   : > { %1822 = vmatmul.msk.bf16.vlgmr.msrb.gmra.mxu2 %vm223_vm0, %v715_v59 }
  0x4c   : > { %1027 = vmatpush.bf16.msrb.mxu2 %v2319_v13 }
  0x4f   : > { %1806 = vmatmul.msk.bf16.vlgmr.msrb.gmra.mxu0 %vm223_vm0, %v642_v16 }
  0x50   : > { %1833 = vmatmul.msk.bf16.vlgmr.msrb.gmra.mxu3 %vm223_vm0, %v2327_v63  ;;  %955 = vmatpush.bf16.msrb.mxu0 %v2332_v18 }
  0x51   : > { %1067 = vmatpush.bf16.msrb.mxu3 %v2338_v21 }
  0x58   : > { %1849 = vmatmul.msk.bf16.vlgmr.msra.gmra.mxu1 %vm223_vm0, %v826_v44 }
  0x59   : > { %1123 = vmatpush.bf16.msra.mxu1 %v2124_v2  ;;  %v1042_v2 = vpack.c.b16 %v1041_v12, %v1008_v19 }
  0x5b   : > { %1857 = vmatmul.msk.bf16.vlgmr.msra.gmra.mxu2 %vm223_vm0, %v2353_v55  ;;  %v1044_v33 = vshrl.u32 %v1042_v2, 16 }
  0x5c   : > { %1137 = vmatpush.bf16.msra.mxu2 %v2114_v0  ;;  %v1047_v0 = vshll.u32 %v1042_v2, 16  ;;  %v1936_v2 = vld [vmem:[%s2166_s20 + $0x28] sm:$0xe] }
  0x5d   : > { %v1046_v48 = vrot.slane %v1044_v33, 1 }
  0x5e   : > { %v1049_v52 = vrot.slane %v1047_v0, 2  ;;  %v1494_v0 = vunpack.c.l.b16 %v1936_v2 }
  0x5f   : > { %1841 = vmatmul.msk.bf16.vlgmr.msra.gmra.mxu0 %vm223_vm0, %v2363_v15 }
  0x60   : > { %1865 = vmatmul.msk.bf16.vlgmr.msra.gmra.mxu3 %vm223_vm0, %v899_v17  ;;  %1100 = vmatpush.bf16.msra.mxu0 %v2371_v22 }
  0x61   : > { %1151 = vmatpush.bf16.msra.mxu3 %v2119_v1  ;;  %v2395_v1 = vor.u32 %v1049_v52, %v1046_v48 }
  0x68   : > { %1884 = vmatmul.msk.bf16.vlgmr.msrb.gmra.mxu1 %vm223_vm0, %v2384_v38 }
  0x69   : > { %1183 = vmatpush.bf16.msrb.mxu1 %v2134_v4  ;;  %v1081_v4 = vunpack.c.l.b16 %v1901_v46 }
  0x6b   : > { %1892 = vmatmul.msk.bf16.vlgmr.msrb.gmra.mxu2 %vm223_vm0, %v1010_v42  ;;  %v2405_v45 = vpack.c.b16 %v1041_v12, %v1081_v4  ;;  %v1940_v4 = vld [vmem:[%s2166_s20 + $0x28] sm:$0xc] }
  0x6c   : > { %1199 = vmatpush.bf16.msrb.mxu2 %v2139_v5 }
  0x6d   : > { %v1083_v5 = vrot.slane %v2405_v45, 2 }
  0x6f   : > { %1876 = vmatmul.msk.bf16.vlgmr.msrb.gmra.mxu0 %vm223_vm0, %v2390_v62 }
  0x70   : > { %1900 = vmatmul.msk.bf16.vlgmr.msrb.gmra.mxu3 %vm223_vm0, %v2395_v1  ;;  %1167 = vmatpush.bf16.msrb.mxu0 %v2129_v3 }
  0x71   : > { %1215 = vmatpush.bf16.msrb.mxu3 %v2148_v6 }
  0x78   : > { %1909 = vmatmul.msk.bf16.vlgmr.msra.gmra.mxu1 %vm223_vm0, %v2213_v53 }
  0x79   : > { %1247 = vmatpush.bf16.msra.mxu1 %v2191_v37 }
  0x7b   : > { %1910 = vmatmul.msk.bf16.vlgmr.msra.gmra.mxu2 %vm223_vm0, %v2206_v50 }
  0x7c   : > { %1263 = vmatpush.bf16.msra.mxu2 %v2178_v20 }
  0x7f   : > { %1908 = vmatmul.msk.bf16.vlgmr.msra.gmra.mxu0 %vm223_vm0, %v1083_v5 }
  0x80   : > { %1911 = vmatmul.msk.bf16.vlgmr.msra.gmra.mxu3 %vm223_vm0, %v458_v61  ;;  %1231 = vmatpush.bf16.msra.mxu0 %v2153_v7 }
  0x81   : > { %1279 = vmatpush.bf16.msra.mxu3 %v2184_v29 }
  0x88   : > { %1913 = vmatmul.msk.bf16.vlgmr.msrb.gmra.mxu1 %vm223_vm0, %v531_v23 }
  0x89   : > { %1311 = vmatpush.bf16.msrb.mxu1 %v2238_v8 }
  0x8b   : > { %1914 = vmatmul.msk.bf16.vlgmr.msrb.gmra.mxu2 %vm223_vm0, %v2263_v30 }
  0x8c   : > { %1327 = vmatpush.bf16.msrb.mxu2 %v2211_v51 }
  0x8f   : > { %1912 = vmatmul.msk.bf16.vlgmr.msrb.gmra.mxu0 %vm223_vm0, %v2274_v35 }
  0x90   : > { %1915 = vmatmul.msk.bf16.vlgmr.msrb.gmra.mxu3 %vm223_vm0, %v2278_v36  ;;  %1295 = vmatpush.bf16.msrb.mxu0 %v2197_v39 }
  0x91   : > { %1343 = vmatpush.bf16.msrb.mxu3 %v2226_v57 }
  0x95   : > { %v262_v3 = vpop.f32.mrf.mxu1 }
  0x98   : > { %1917 = vmatmul.msk.bf16.vlgmr.msra.gmra.mxu1 %vm223_vm0, %v2301_v49 }
  0x99   : > { %1375 = vmatpush.bf16.msra.mxu1 %v2284_v40 }
  0x9b   : > { %1918 = vmatmul.msk.bf16.vlgmr.msra.gmra.mxu2 %vm223_vm0, %v715_v59  ;;  %v1934_v59 = vld [vmem:[%s2166_s20 + $0x2c] sm:$0x3] }
  0x9c   : > { %v236_v6 = vpop.f32.mrf.mxu0  ;;  %1391 = vmatpush.bf16.msra.mxu2 %v2261_v26  ;;  %v1464_v27 = vunpack.c.l.b16 %v1934_v59 }
  0x9d   : > { %v263_v7 = vadd.f32 %v262_v3, %v236_v6  ;;  %v264_v20 = vpop.f32.mrf.mxu1 }
  0x9e   : > { %v293_v29 = vpop.f32.mrf.mxu2 }
  0x9f   : > { %1916 = vmatmul.msk.bf16.vlgmr.msra.gmra.mxu0 %vm223_vm0, %v642_v16  ;;  %v298_v37 = vadd.f32 %v293_v29, %v263_v7 }
  0xa0   : > { %1919 = vmatmul.msk.bf16.vlgmr.msra.gmra.mxu3 %vm223_vm0, %v2327_v63  ;;  %1359 = vmatpush.bf16.msra.mxu0 %v2244_v11 }
  0xa1   : > { %1407 = vmatpush.bf16.msra.mxu3 %v2271_v34 }
  0xa3   : > { %v333_v39 = vpop.f32.mrf.mxu3 }
  0xa4   : > { %v338_v50 = vadd.f32 %v333_v39, %v298_v37  ;;  %v238_v51 = vpop.f32.mrf.mxu0  ;;  %v1549_v39 = vunpack.c.l.b16 %v1940_v4 }
  0xa5   : > { %v265_v53 = vadd.f32 %v264_v20, %v238_v51  ;;  %v405_v54 = vpop.f32.mrf.mxu1 }
  0xa6   : > { %v295_v57 = vpop.f32.mrf.mxu2 }
  0xa7   : > { %v299_v61 = vadd.f32 %v295_v57, %v265_v53 }
  0xa8   : > { %1921 = vmatmul.msk.bf16.vlgmr.msrb.gmra.mxu1 %vm223_vm0, %v826_v44 }
  0xa9   : > { %1453 = vmatpush.bf16.msrb.mxu1 %v2332_v18 }
  0xab   : > { %v335_v8 = vpop.f32.mrf.mxu3  ;;  %1922 = vmatmul.msk.bf16.vlgmr.msrb.gmra.mxu2 %vm223_vm0, %v2353_v55 }
  0xac   : > { %v339_v14 = vadd.f32 %v335_v8, %v299_v61  ;;  %v366_v23 = vpop.f32.mrf.mxu0  ;;  %1483 = vmatpush.bf16.msrb.mxu2 %v2309_v58  ;;  %v1931_v58 = vld [vmem:[%s2166_s20 + $0x28] sm:$0xf] }
  0xad   : > { %v371_v11 = vadd.f32 %v366_v23, %v338_v50  ;;  %v407_v26 = vpop.f32.mrf.mxu1  ;;  %v1440_v18 = vunpack.c.l.b16 %v1931_v58 }
  0xae   : > { %v444_v34 = vpop.f32.mrf.mxu2 }
  0xaf   : > { %v410_v30 = vadd.f32 %v405_v54, %v371_v11  ;;  %1920 = vmatmul.msk.bf16.vlgmr.msrb.gmra.mxu0 %vm223_vm0, %v2363_v15  ;;  %v1465_v56 = vpack.c.b16 %v1464_v27, %v1440_v18  ;;  %v1932_v15 = vld [vmem:[%s2166_s20 + $0x2c] sm:$0x1] }
  0xb0   : > { %1923 = vmatmul.msk.bf16.vlgmr.msrb.gmra.mxu3 %vm223_vm0, %v899_v17  ;;  %1423 = vmatpush.bf16.msrb.mxu0 %v2290_v43  ;;  %v1441_v24 = vunpack.c.l.b16 %v1932_v15 }
  0xb1   : > { %v449_v35 = vadd.f32 %v444_v34, %v410_v30  ;;  %1507 = vmatpush.bf16.msrb.mxu3 %v2319_v13  ;;  %v1469_v12 = vshll.u32 %v1465_v56, 16  ;;  %v1467_v32 = vshrl.u32 %v1465_v56, 16 }
  0xb2   : > { %v1442_v41 = vpack.c.b16 %v1441_v24, %v1440_v18 }
  0xb3   : > { %v477_v36 = vpop.f32.mrf.mxu3  ;;  %v1471_v33 = vrot.slane %v1469_v12, 1 }
  0xb4   : > { %v482_v40 = vadd.f32 %v477_v36, %v449_v35  ;;  %v368_v47 = vpop.f32.mrf.mxu0 }
  0xb5   : > { %v372_v49 = vadd.f32 %v368_v47, %v339_v14  ;;  %v550_v60 = vpop.f32.mrf.mxu1 }
  0xb6   : > { %v446_v63 = vpop.f32.mrf.mxu2 }
  0xb7   : > { %v411_v16 = vadd.f32 %v407_v26, %v372_v49 }
  0xb8   : > { %1925 = vmatmul.msk.bf16.vlgmr.msra.gmra.mxu1 %vm223_vm0, %v2384_v38 }
  0xb9   : > { %v450_v44 = vadd.f32 %v446_v63, %v411_v16  ;;  %1562 = vmatpush.bf16.msra.mxu1 %v2371_v22 }
  0xbb   : > { %v479_v43 = vpop.f32.mrf.mxu3  ;;  %1926 = vmatmul.msk.bf16.vlgmr.msra.gmra.mxu2 %vm223_vm0, %v1010_v42 }
  0xbc   : > { %v483_v13 = vadd.f32 %v479_v43, %v450_v44  ;;  %v517_v55 = vpop.f32.mrf.mxu0 }
  0xbd   : > { %v522_v9 = vadd.f32 %v517_v55, %v482_v40  ;;  %v552_v10 = vpop.f32.mrf.mxu1 }
  0xbe   : > { %v589_v19 = vpop.f32.mrf.mxu2 }
  0xbf   : > { %v555_v17 = vadd.f32 %v550_v60, %v522_v9  ;;  %1924 = vmatmul.msk.bf16.vlgmr.msra.gmra.mxu0 %vm223_vm0, %v2390_v62  ;;  %v1472_v62 = vor.u32 %v1471_v33, %v1467_v32 }
  0xc0   : > { %1927 = vmatmul.msk.bf16.vlgmr.msra.gmra.mxu3 %vm223_vm0, %v2395_v1  ;;  %1538 = vmatpush.bf16.msra.mxu0 %v2338_v21  ;;  %v1495_v1 = vpack.c.b16 %v1464_v27, %v1494_v0  ;;  %v1938_v21 = vld [vmem:[%s2166_s20 + $0x2c] sm:$0x7] }
  0xc1   : > { %v594_v22 = vadd.f32 %v589_v19, %v555_v17  ;;  %v1518_v37 = vunpack.c.l.b16 %v1938_v21 }
  0xc2   : > { %v1496_v20 = vrot.slane %v1495_v1, 1 }
  0xc3   : > { %v628_v25 = vpop.f32.mrf.mxu3  ;;  %v1519_v54 = vpack.c.b16 %v1518_v37, %v1494_v0  ;;  %v1550_v61 = vpack.c.b16 %v1518_v37, %v1549_v39 }
  0xc4   : > { %v633_v28 = vadd.f32 %v628_v25, %v594_v22  ;;  %v519_v31 = vpop.f32.mrf.mxu0 }
  0xc5   : > { %v523_v38 = vadd.f32 %v519_v31, %v483_v13  ;;  %v701_v42 = vpop.f32.mrf.mxu1  ;;  %v1521_v8 = vshrl.u32 %v1519_v54, 16  ;;  %v1524_v14 = vshll.u32 %v1519_v54, 16  ;;  %v1551_v34 = vrot.slane %v1550_v61, 2 }
  0xc6   : > { %v591_v52 = vpop.f32.mrf.mxu2 }
  0xc7   : > { %v556_v48 = vadd.f32 %v552_v10, %v523_v38  ;;  %v1523_v36 = vrot.slane %v1521_v8, 1  ;;  %v1526_v40 = vrot.slane %v1524_v14, 2 }
  0xc8   : > { %1933 = vmatmul.msk.bf16.vlgmr.msrb.gmra.mxu1 %vm223_vm0, %v1442_v41 }
  0xc9   : > { %v595_v46 = vadd.f32 %v591_v52, %v556_v48  ;;  %v1527_v58 = vor.u32 %v1526_v40, %v1523_v36 }
  0xcb   : > { %v630_v3 = vpop.f32.mrf.mxu3  ;;  %1935 = vmatmul.msk.bf16.vlgmr.msrb.gmra.mxu2 %vm223_vm0, %v1472_v62 }
  0xcc   : > { %v634_v6 = vadd.f32 %v630_v3, %v595_v46  ;;  %v661_v7 = vpop.f32.mrf.mxu0 }
  0xcd   : > { %v666_v29 = vadd.f32 %v661_v7, %v633_v28  ;;  %v703_v50 = vpop.f32.mrf.mxu1 }
  0xce   : > { %v734_v53 = vpop.f32.mrf.mxu2 }
  0xcf   : > { %v706_v51 = vadd.f32 %v701_v42, %v666_v29  ;;  %1928 = vmatmul.msk.bf16.vlgmr.msrb.gmra.mxu0 %vm223_vm0, %v1083_v5 }
  0xd0   : > { %1937 = vmatmul.msk.bf16.vlgmr.msrb.gmra.mxu3 %vm223_vm0, %v1496_v20 }
  0xd1   : > { %v739_v57 = vadd.f32 %v734_v53, %v706_v51 }
  0xd3   : > { %v773_v23 = vpop.f32.mrf.mxu3 }
  0xd4   : > { %v778_v11 = vadd.f32 %v773_v23, %v739_v57  ;;  %v663_v26 = vpop.f32.mrf.mxu0 }
  0xd5   : > { %v667_v30 = vadd.f32 %v663_v26, %v634_v6  ;;  %v845_v35 = vpop.f32.mrf.mxu1 }
  0xd6   : > { %v736_v49 = vpop.f32.mrf.mxu2 }
  0xd7   : > { %v707_v47 = vadd.f32 %v703_v50, %v667_v30 }
  0xd8   : > { %1941 = vmatmul.msk.bf16.vlgmr.msra.gmra.mxu1 %vm223_vm0, %v1551_v34 }
  0xd9   : > { %v740_v45 = vadd.f32 %v736_v49, %v707_v47 }
  0xdb   : > { %v775_v5 = vpop.f32.mrf.mxu3 }
  0xdc   : > { %v779_v59 = vadd.f32 %v775_v5, %v740_v45  ;;  %v812_v60 = vpop.f32.mrf.mxu0 }
  0xdd   : > { %v817_v16 = vadd.f32 %v812_v60, %v778_v11  ;;  %v847_v63 = vpop.f32.mrf.mxu1 }
  0xde   : > { %v885_v27 = vpop.f32.mrf.mxu2 }
  0xdf   : > { %v850_v18 = vadd.f32 %v845_v35, %v817_v16  ;;  %1939 = vmatmul.msk.bf16.vlgmr.msra.gmra.mxu0 %vm223_vm0, %v1527_v58 }
  0xe1   : > { %v890_v44 = vadd.f32 %v885_v27, %v850_v18 }
  0xe3   : > { %v918_v43 = vpop.f32.mrf.mxu3 }
  0xe4   : > { %v923_v13 = vadd.f32 %v918_v43, %v890_v44  ;;  %v814_v55 = vpop.f32.mrf.mxu0 }
  0xe5   : > { %v818_v56 = vadd.f32 %v814_v55, %v779_v59  ;;  %v996_v9 = vpop.f32.mrf.mxu1 }
  0xe6   : > { %v887_v15 = vpop.f32.mrf.mxu2 }
  0xe7   : > { %v851_v10 = vadd.f32 %v847_v63, %v818_v56 }
  0xe9   : > { %v891_v17 = vadd.f32 %v887_v15, %v851_v10 }
  0xeb   : > { %v920_v19 = vpop.f32.mrf.mxu3 }
  0xec   : > { %v924_v12 = vadd.f32 %v920_v19, %v891_v17  ;;  %v957_v22 = vpop.f32.mrf.mxu0 }
  0xed   : > { %v962_v24 = vadd.f32 %v957_v22, %v923_v13  ;;  %v998_v2 = vpop.f32.mrf.mxu1 }
  0xee   : > { %v1029_v28 = vpop.f32.mrf.mxu2 }
  0xef   : > { %v1001_v25 = vadd.f32 %v996_v9, %v962_v24 }
  0xf1   : > { %v1034_v31 = vadd.f32 %v1029_v28, %v1001_v25 }
  0xf3   : > { %v1069_v32 = vpop.f32.mrf.mxu3 }
  0xf4   : > { %v1074_v33 = vadd.f32 %v1069_v32, %v1034_v31  ;;  %v959_v0 = vpop.f32.mrf.mxu0 }
  0xf5   : > { %v963_v38 = vadd.f32 %v959_v0, %v924_v12  ;;  %v1125_v41 = vpop.f32.mrf.mxu1 }
  0xf6   : > { %v1031_v48 = vpop.f32.mrf.mxu2 }
  0xf7   : > { %v1002_v42 = vadd.f32 %v998_v2, %v963_v38 }
  0xf9   : > { %v1035_v52 = vadd.f32 %v1031_v48, %v1002_v42 }
  0xfb   : > { %v1071_v62 = vpop.f32.mrf.mxu3 }
  0xfc   : > { %v1075_v1 = vadd.f32 %v1071_v62, %v1035_v52  ;;  %v1102_v46 = vpop.f32.mrf.mxu0 }
  0xfd   : > { %v2488_v21 = vadd.f32 %v1102_v46, %v1074_v33  ;;  %v1127_v4 = vpop.f32.mrf.mxu1 }
  0xfe   : > { %v1139_v3 = vpop.f32.mrf.mxu2 }
  0xff   : > { %v1140_v54 = vadd.f32 %v1139_v3, %v1125_v41 }
 0x103   : > { %v1153_v6 = vpop.f32.mrf.mxu3 }
 0x104   : > { %v1104_v7 = vpop.f32.mrf.mxu0  ;;  %v1158_v8 = vadd.f32 %v1153_v6, %v1140_v54 }
 0x105   : > { %v2490_v20 = vadd.f32 %v1104_v7, %v1075_v1  ;;  %v1185_v29 = vpop.f32.mrf.mxu1 }
 0x106   : > { %v1141_v37 = vpop.f32.mrf.mxu2 }
 0x107   : > { %v1142_v26 = vadd.f32 %v1141_v37, %v1127_v4 }
 0x10b   : > { %v1155_v39 = vpop.f32.mrf.mxu3 }
 0x10c   : > { %v1169_v50 = vpop.f32.mrf.mxu0  ;;  %v1159_v36 = vadd.f32 %v1155_v39, %v1142_v26 }
 0x10d   : > { %v1187_v51 = vpop.f32.mrf.mxu1  ;;  %v1174_v23 = vadd.f32 %v1169_v50, %v1158_v8 }
 0x10e   : > { %v1201_v53 = vpop.f32.mrf.mxu2 }
 0x10f   : > { %v1190_v30 = vadd.f32 %v1185_v29, %v1174_v23 }
 0x111   : > { %v1206_v47 = vadd.f32 %v1201_v53, %v1190_v30 }
 0x113   : > { %v1217_v57 = vpop.f32.mrf.mxu3 }
 0x114   : > { %v1171_v61 = vpop.f32.mrf.mxu0  ;;  %v1222_v5 = vadd.f32 %v1217_v57, %v1206_v47 }
 0x115   : > { %v1249_v14 = vpop.f32.mrf.mxu1  ;;  %v1175_v49 = vadd.f32 %v1171_v61, %v1159_v36 }
 0x116   : > { %v1203_v11 = vpop.f32.mrf.mxu2 }
 0x117   : > { %v1191_v58 = vadd.f32 %v1187_v51, %v1175_v49 }
 0x119   : > { %v1207_v18 = vadd.f32 %v1203_v11, %v1191_v58 }
 0x11b   : > { %v1219_v34 = vpop.f32.mrf.mxu3 }
 0x11c   : > { %v1233_v35 = vpop.f32.mrf.mxu0  ;;  %v1223_v43 = vadd.f32 %v1219_v34, %v1207_v18 }
 0x11d   : > { %v1251_v40 = vpop.f32.mrf.mxu1  ;;  %v1238_v16 = vadd.f32 %v1233_v35, %v1222_v5 }
 0x11e   : > { %v1265_v45 = vpop.f32.mrf.mxu2 }
 0x11f   : > { %v1254_v44 = vadd.f32 %v1249_v14, %v1238_v16 }
 0x121   : > { %v1270_v56 = vadd.f32 %v1265_v45, %v1254_v44 }
 0x123   : > { %v1281_v59 = vpop.f32.mrf.mxu3 }
 0x124   : > { %v1235_v60 = vpop.f32.mrf.mxu0  ;;  %v1286_v17 = vadd.f32 %v1281_v59, %v1270_v56 }
 0x125   : > { %v1313_v63 = vpop.f32.mrf.mxu1  ;;  %v1239_v9 = vadd.f32 %v1235_v60, %v1223_v43 }
 0x126   : > { %v1267_v27 = vpop.f32.mrf.mxu2 }
 0x127   : > { %v1255_v19 = vadd.f32 %v1251_v40, %v1239_v9  ;;  %v2018_v40 = vld [vmem:[%s2520_s2] ss:$0 sm:$0xff] }
 0x128   : > { %v1112_v60 = vadd.f32 %v2018_v40, %v2488_v21 }
 0x129   : > { %v1271_v2 = vadd.f32 %v1267_v27, %v1255_v19 }
 0x12a   : > { %v1114_v44 = vmax.f32 %v1112_v60, 0.0 }
 0x12b   : > { %v1283_v13 = vpop.f32.mrf.mxu3 }
 0x12c   : > { %v1297_v55 = vpop.f32.mrf.mxu0  ;;  %v1287_v32 = vadd.f32 %v1283_v13, %v1271_v2 }
 0x12d   : > { %v1315_v10 = vpop.f32.mrf.mxu1  ;;  %v1302_v12 = vadd.f32 %v1297_v55, %v1286_v17 }
 0x12e   : > { %v1329_v15 = vpop.f32.mrf.mxu2 }
 0x12f   : > { %v1318_v28 = vadd.f32 %v1313_v63, %v1302_v12 }
 0x131   : > { %v1334_v33 = vadd.f32 %v1329_v15, %v1318_v28  ;;  %v1113_v15 = vadd.f32 %v2018_v40, %v2490_v20 }
 0x133   : > { %v1345_v22 = vpop.f32.mrf.mxu3  ;;  %v1115_v19 = vmax.f32 %v1113_v15, 0.0 }
 0x134   : > { %v1299_v24 = vpop.f32.mrf.mxu0  ;;  %v1350_v48 = vadd.f32 %v1345_v22, %v1334_v33 }
 0x135   : > { %v1377_v25 = vpop.f32.mrf.mxu1  ;;  %v1303_v0 = vadd.f32 %v1299_v24, %v1287_v32 }
 0x136   : > { %v1331_v31 = vpop.f32.mrf.mxu2 }
 0x137   : > { %v1319_v52 = vadd.f32 %v1315_v10, %v1303_v0 }
 0x139   : > { %v1335_v46 = vadd.f32 %v1331_v31, %v1319_v52 }
 0x13b   : > { %v1347_v38 = vpop.f32.mrf.mxu3 }
 0x13c   : > { %v1361_v41 = vpop.f32.mrf.mxu0  ;;  %v1351_v7 = vadd.f32 %v1347_v38, %v1335_v46 }
 0x13d   : > { %v1379_v42 = vpop.f32.mrf.mxu1  ;;  %v1366_v1 = vadd.f32 %v1361_v41, %v1350_v48 }
 0x13e   : > { %v1393_v62 = vpop.f32.mrf.mxu2 }
 0x13f   : > { %v1382_v6 = vadd.f32 %v1377_v25, %v1366_v1  ;;  %v1589_v25 = vld [vmem:[%s190_s23] sm:$0x7] }
 0x141   : > { %v1398_v39 = vadd.f32 %v1393_v62, %v1382_v6 }
 0x143   : > { %v1409_v4 = vpop.f32.mrf.mxu3 }
 0x144   : > { %v1363_v3 = vpop.f32.mrf.mxu0  ;;  %v1414_v54 = vadd.f32 %v1409_v4, %v1398_v39 }
 0x145   : > { %v1455_v29 = vpop.f32.mrf.mxu1  ;;  %v1367_v50 = vadd.f32 %v1363_v3, %v1351_v7 }
 0x146   : > { %v1395_v37 = vpop.f32.mrf.mxu2 }
 0x147   : > { %v1383_v57 = vadd.f32 %v1379_v42, %v1367_v50 }
 0x149   : > { %v1399_v8 = vadd.f32 %v1395_v37, %v1383_v57 }
 0x14b   : > { %v1411_v51 = vpop.f32.mrf.mxu3 }
 0x14c   : > { %v1425_v53 = vpop.f32.mrf.mxu0  ;;  %v1415_v30 = vadd.f32 %v1411_v51, %v1399_v8 }
 0x14d   : > { %v1430_v61 = vadd.f32 %v1425_v53, %v1414_v54  ;;  %v1457_v14 = vpop.f32.mrf.mxu1 }
 0x14e   : > { %v1485_v23 = vpop.f32.mrf.mxu2 }
 0x14f   : > { %v1460_v11 = vadd.f32 %v1455_v29, %v1430_v61 }
 0x151   : > { %v1490_v35 = vadd.f32 %v1485_v23, %v1460_v11 }
 0x153   : > { %v1509_v34 = vpop.f32.mrf.mxu3 }
 0x154   : > { %v1427_v26 = vpop.f32.mrf.mxu0  ;;  %v1514_v47 = vadd.f32 %v1509_v34, %v1490_v35 }
 0x155   : > { %v1431_v36 = vadd.f32 %v1427_v26, %v1415_v30  ;;  %v1564_v49 = vpop.f32.mrf.mxu1 }
 0x156   : > { %v1487_v5 = vpop.f32.mrf.mxu2 }
 0x157   : > { %v1461_v45 = vadd.f32 %v1457_v14, %v1431_v36 }
 0x159   : > { %v1491_v16 = vadd.f32 %v1487_v5, %v1461_v45 }
 0x15b   : > { %v1511_v18 = vpop.f32.mrf.mxu3 }
 0x15c   : > { %v1540_v58 = vpop.f32.mrf.mxu0  ;;  %v1515_v43 = vadd.f32 %v1511_v18, %v1491_v16 }
 0x15d   : > { %v1545_v59 = vadd.f32 %v1540_v58, %v1514_v47  ;;  %v1566_v10 = vpop.f32.mrf.mxu1 }
 0x15f   : > { %v1569_v63 = vadd.f32 %v1564_v49, %v1545_v59 }
 0x161   : > { %v1571_v27 = vadd.f32 %v2018_v40, %v1569_v63 }
 0x163   : > { %v1573_v13 = vmax.f32 %v1571_v27, 0.0 }
 0x164   : > { %v1542_v55 = vpop.f32.mrf.mxu0 }
 0x165   : > { %v1575_v56 = vmax.f32 %v1114_v44, %v1573_v13  ;;  %v1546_v9 = vadd.f32 %v1542_v55, %v1515_v43 }
 0x167   : > { %1578 = vst.msk [vmem:[#allocation2] sm:$0xff] %vm1577_vm1, %v1575_v56  ;;  %v1570_v17 = vadd.f32 %v1566_v10, %v1546_v9 }
 0x169   : > { %v1572_v21 = vadd.f32 %v2018_v40, %v1570_v17 }
 0x16b   : > { %v1574_v12 = vmax.f32 %v1572_v21, 0.0 }
 0x16d   : > { %v1576_v22 = vmax.f32 %v1115_v19, %v1574_v12 }
 0x16f   : > { %1580 = vst.msk [vmem:[#allocation2 + $0x8] sm:$0x3] %vm1579_vm2, %v1576_v22 }
 0x176   : > { %v1581_v20 = vld [vmem:[#allocation2] ss:$2 sm:$0x1f]  ;;  %v1583_v24 = vld [vmem:[#allocation2 + $0x1] ss:$2 sm:$0x1f] }
 0x177   : > { %v1584_v2 = vmax.f32 %v1581_v20, %v1583_v24 }
 0x179   : > { %v1585_v28 = vpack.c.bf16 %v1584_v2, %v1584_v2 }
 0x17b   : > { %v1590_v31 = vsel %vm1588_vm5, %v1585_v28, %v1589_v25 }
 0x17c   : > { %1591 = vst [vmem:[%s190_s23] sm:$0x7] %v1590_v31 }
 0x17d PF: > { %s13_s16 = sadd.s32 1, %s2057_s16   ;;  %s2522_s12 = smov %s2049_s14 }
 0x17e   : > { %p10_p7 = scmp.ge.s32.totalorder %s13_s16, 12   ;;  %s2523_s13 = smov %s2053_s15 }
 0x17f   : > { %s2524_s14 = smov %s2527_s17  ;;  %s2525_s15 = smov %s2531_s18 }
 0x180   :  { %12 = sbr.rel (!%p10_p7) target bundleno = 3 (0x3), region = 93 }

// kernel: cnn_forward.5
= control target key start
LH: loop header
LB: loop body
LE: loop exit
PB: predicated region body
PF: predicated region fallthrough
CT: control target
= control target key end

     0   :  { %s2347_s12 = smov 0   ;;  %s2349_s13 = smov 0   ;;  %s3024_s0 = inlined_call_operand.vmem [shape: f32[2,32,32,3], index: 0, kind: input, shape index: {}]   ;;  %s3025_s1 = inlined_call_operand.vmem [shape: bf16[25,3,16], index: 1, kind: input, shape index: {}]   ;;  %s3026_s2 = inlined_call_operand.vmem [shape: f32[1,16], index: 2, kind: input, shape index: {}]   ;;  %s3027_s3 = inlined_call_operand.vmem [shape: bf16[2,14,14,16], index: 3, kind: output, shape index: {}]  }
   0x1   :  { %s2351_s14 = smov 0   ;;  %s2353_s15 = smov 0  }
   0x2   :  { %s2355_s16 = smov 0  }
   0x3 LB: > { %s22_s17 = sadd.s32 1, %s2316_s14  ;;  %s25_s18 = sadd.s32 1, %s2320_s15  ;;  %s2324_s16 = sphi %s2355_s16, %s13_s16   ;;  %s2320_s15 = sphi %s2353_s15, %s3079_s15   ;;  %s2316_s14 = sphi %s2351_s14, %s3078_s14   ;;  %s2312_s13 = sphi %s2349_s13, %s3077_s13   ;;  %s2308_s12 = sphi %s2347_s12, %s3076_s12  }
   0x4   : > { %p23_p0 = scmp.ge.s32.totalorder %s22_s17, 14  ;;  %p1991_p1 = scmp.ge.s32.totalorder %s2324_s16, 1 }
   0x5   : > { %p151_p2 = scmp.lt.s32.totalorder %s2324_s16, 29 }
   0x6   : > { %s3081_s17 = smov (%p23_p0, %s22_s17), 0  ;;  %s3083_s18 = smov (!%p23_p0, %s25_s18), %s2320_s15 }
   0x7   : > { %p152_p3 = pnand %p1991_p1, %p151_p2  ;;  %p27_p4 = scmp.ge.s32.totalorder %s3083_s18, 2 }
   0x9   : > { %s3085_s18 = smov (%p27_p4, %s3083_s18), 0  ;;  %155 = sbr.rel (%p152_p3) target bundleno = 576 (0x240), region = 32 }
   0xe   : > { %v1998_v0 = vld [vmem:[%s3025_s1 + $0x2] sm:$0x3]  ;;  %vm220_vm0 = vcmask 1040384   ;;  %vm221_vm1 = vcmask 1041408   ;;  %p179_p5 = scmp.lt.s32.totalorder %s2312_s13, 1  ;;  %v2326_v1 = vmov 65535  }
   0xf   : > { %v222_v2 = vsel %vm220_vm0, 4294967295, %v2326_v1  ;;  %v204_v3 = vld [vmem:[%s3025_s1] sm:$0x3]  ;;  %v2003_v5 = vld [vmem:[%s3025_s1 + $0x4] sm:$0x3]  ;;  %s2235_s27 = sshll.u32 %s2308_s12, 6 }
  0x10   : > { %v2385_v4 = vsel %vm221_vm1, %v222_v2, 0  ;;  %s3087_s13 = smov (!%p179_p5, %s2312_s13), 1  ;;  %v2006_v6 = vld [vmem:[%s3025_s1 + $0x6] sm:$0x3]  ;;  %v2009_v11 = vld [vmem:[%s3025_s1 + $0x8] sm:$0x3] }
  0x11   : > { %v2396_v7 = vand.u32 %v1998_v0, %v2385_v4  ;;  %v2399_v8 = vand.u32 %v2385_v4, %v204_v3  ;;  %v2403_v9 = vand.u32 %v2003_v5, %v2385_v4  ;;  %v2406_v10 = vand.u32 %v2006_v6, %v2385_v4  ;;  %v2018_v12 = vld [vmem:[%s3025_s1 + $0xa] sm:$0x3]  ;;  %s2234_s5 = sshll.u32 %s3087_s13, 10  ;;  %v2025_v15 = vld [vmem:[%s3025_s1 + $0xc] sm:$0x3]  ;;  %p186_p6 = scmp.lt.s32.totalorder %s2308_s12, 13 }
  0x12   : > { %v2416_v13 = vand.u32 %v2009_v11, %v2385_v4  ;;  %v2419_v14 = vand.u32 %v2018_v12, %v2385_v4  ;;  %s183_s8 = scalar_lea.vmem %s3024_s0, %s2234_s5  ;;  %v2032_v16 = vld [vmem:[%s3025_s1 + $0xe] sm:$0x3]  ;;  %v2039_v17 = vld [vmem:[%s3025_s1 + $0x10] sm:$0x3]  ;;  %v2046_v18 = vld [vmem:[%s3025_s1 + $0x12] sm:$0x3]  ;;  %v2453_v26 = vand.u32 %v2025_v15, %v2385_v4 }
  0x13   : > { %2241 = vmatpush.bf16.msra.mxu2 %v2396_v7  ;;  %2242 = vmatpush.bf16.msra.mxu3 %v2399_v8  ;;  %s2431_s11 = scalar_lea.vmem %s183_s8, %s2235_s27  ;;  %vm213_vm2 = vcmask 23552   ;;  %v2458_v31 = vand.u32 %v2032_v16, %v2385_v4  ;;  %v2461_v32 = vand.u32 %v2039_v17, %v2385_v4  ;;  %v2465_v34 = vand.u32 %v2046_v18, %v2385_v4  ;;  %v2055_v47 = vld [vmem:[%s3025_s1 + $0x14] sm:$0x3]  ;;  %v2062_v48 = vld [vmem:[%s3025_s1 + $0x16] sm:$0x3]  ;;  %s3089_s12 = smov (!%p186_p6, %s2308_s12), 13 }
  0x14   : > { %234 = vmatpush.bf16.msra.mxu0 %v2396_v7  ;;  %262 = vmatpush.bf16.msra.mxu1 %v2399_v8  ;;  %v207_v19 = vld [vmem:[%s2431_s11 + $0x11] sm:$0xff]  ;;  %v208_v20 = vld [vmem:[%s2431_s11 + $0x19] sm:$0xf]  ;;  %v205_v24 = vld [vmem:[%s2431_s11 + $0x1] sm:$0xff]  ;;  %v2496_v49 = vand.u32 %v2055_v47, %v2385_v4  ;;  %v2499_v50 = vand.u32 %v2062_v48, %v2385_v4  ;;  %vm1859_vm3 = vcmask 130048   ;;  %s2243_s10 = smul.u32 28, %s3087_s13 }
  0x15   : > { %v200_v21 = vld [vmem:[%s2431_s11 + $0x10] sm:$0xff]  ;;  %v210_v22 = vpack.c.bf16 %v208_v20, %v207_v19  ;;  %v201_v23 = vld [vmem:[%s2431_s11 + $0x18] sm:$0xf]  ;;  %v198_v29 = vld [vmem:[%s2431_s11] sm:$0xff]  ;;  %s1994_s19 = sshll.u32 %s3089_s12, 1  ;;  %vm1863_vm4 = vcmask 125952  }
  0x16   : > { %v206_v25 = vld [vmem:[%s2431_s11 + $0x9] sm:$0xff]  ;;  %v203_v27 = vpack.c.bf16 %v201_v23, %v200_v21  ;;  %v2014_v41 = vld [vmem:[%s2431_s11 + $0x20] sm:$0xff]  ;;  %v2069_v51 = vld [vmem:[%s3025_s1 + $0x18] sm:$0x3]  ;;  %s190_s20 = sadd.s32 %s2243_s10, %s1994_s19  ;;  %vm1877_vm5 = vcmask 124928  }
  0x17   : > { %298 = vmatpush.bf16.msrb.mxu2 %v2403_v9  ;;  %338 = vmatpush.bf16.msrb.mxu3 %v2406_v10  ;;  %v209_v28 = vpack.c.bf16 %v206_v25, %v205_v24  ;;  %v199_v30 = vld [vmem:[%s2431_s11 + $0x8] sm:$0xff]  ;;  %v2076_v52 = vld [vmem:[%s3025_s1 + $0x1a] sm:$0x3]  ;;  %v2508_v53 = vand.u32 %v2069_v51, %v2385_v4  ;;  %v276_v55 = vld [vmem:[%s2431_s11 + $0x12] sm:$0xff]  ;;  %s1995_s13 = sshll.u32 %s190_s20, 2 }
  0x18   : > { %378 = vmatpush.bf16.msrb.mxu0 %v2416_v13  ;;  %421 = vmatpush.bf16.msrb.mxu1 %v2419_v14  ;;  %v202_v33 = vpack.c.bf16 %v199_v30, %v198_v29  ;;  %v274_v35 = vld [vmem:[%s2431_s11 + $0x2] sm:$0xff]  ;;  %v275_v36 = vld [vmem:[%s2431_s11 + $0xa] sm:$0xff]  ;;  %v2511_v54 = vand.u32 %v2076_v52, %v2385_v4  ;;  %v277_v56 = vld [vmem:[%s2431_s11 + $0x1a] sm:$0xf]  ;;  %s192_s22 = scalar_lea.vmem %s3027_s3, %s1995_s13 }
  0x19   : > { %2000 = vmatmul.msk.bf16.vlgmr.msra.gmra.mxu2 %vm213_vm2, %v210_v22  ;;  %2002 = vmatmul.msk.bf16.vlgmr.msra.gmra.mxu3 %vm213_vm2, %v203_v27  ;;  %v314_v37 = vld [vmem:[%s2431_s11 + $0x3] sm:$0xff]  ;;  %v315_v38 = vld [vmem:[%s2431_s11 + $0xb] sm:$0xff]  ;;  %v278_v43 = vpack.c.bf16 %v275_v36, %v274_v35  ;;  %v316_v57 = vld [vmem:[%s2431_s11 + $0x13] sm:$0xff]  ;;  %v279_v63 = vpack.c.bf16 %v277_v56, %v276_v55 }
  0x1a   : > { %1999 = vmatmul.msk.bf16.vlgmr.msra.gmra.mxu0 %vm213_vm2, %v209_v28  ;;  %2001 = vmatmul.msk.bf16.vlgmr.msra.gmra.mxu1 %vm213_vm2, %v202_v33  ;;  %v354_v39 = vld [vmem:[%s2431_s11 + $0x4] sm:$0xff]  ;;  %v355_v40 = vld [vmem:[%s2431_s11 + $0xc] sm:$0xff]  ;;  %v318_v44 = vpack.c.bf16 %v315_v38, %v314_v37  ;;  %v317_v58 = vld [vmem:[%s2431_s11 + $0x1b] sm:$0xf] }
  0x1b   : > { %461 = vmatpush.bf16.msra.mxu2 %v2453_v26  ;;  %501 = vmatpush.bf16.msra.mxu3 %v2458_v31  ;;  %v2015_v42 = vld [vmem:[%s2431_s11 + $0x28] sm:$0xff]  ;;  %v358_v45 = vpack.c.bf16 %v355_v40, %v354_v39  ;;  %v356_v59 = vld [vmem:[%s2431_s11 + $0x14] sm:$0xff]  ;;  %v357_v60 = vld [vmem:[%s2431_s11 + $0x1c] sm:$0xf]  ;;  %v319_v0 = vpack.c.bf16 %v317_v58, %v316_v57 }
  0x1c   : > { %541 = vmatpush.bf16.msra.mxu0 %v2461_v32  ;;  %581 = vmatpush.bf16.msra.mxu1 %v2465_v34  ;;  %v2482_v46 = vpack.c.bf16 %v2015_v42, %v2014_v41  ;;  %v2016_v61 = vld [vmem:[%s2431_s11 + $0x30] sm:$0xff]  ;;  %v2017_v62 = vld [vmem:[%s2431_s11 + $0x38] sm:$0xf]  ;;  %v359_v1 = vpack.c.bf16 %v357_v60, %v356_v59  ;;  %v2021_v3 = vld [vmem:[%s2431_s11 + $0x21] sm:$0xff] }
  0x1d   : > { %v2525_v2 = vpack.c.bf16 %v2017_v62, %v2016_v61  ;;  %v2022_v5 = vld [vmem:[%s2431_s11 + $0x29] sm:$0xff]  ;;  %v2083_v22 = vld [vmem:[%s3025_s1 + $0x1c] sm:$0x3]  ;;  %v2092_v23 = vld [vmem:[%s3025_s1 + $0x1e] sm:$0x3] }
  0x1e   : > { %v2028_v6 = vld [vmem:[%s2431_s11 + $0x22] sm:$0xff]  ;;  %v2029_v11 = vld [vmem:[%s2431_s11 + $0x2a] sm:$0xff]  ;;  %v2540_v18 = vpack.c.bf16 %v2022_v5, %v2021_v3  ;;  %v2563_v24 = vand.u32 %v2083_v22, %v2385_v4  ;;  %v2566_v25 = vand.u32 %v2092_v23, %v2385_v4  ;;  %v2099_v27 = vld [vmem:[%s3025_s1 + $0x20] sm:$0x3] }
  0x1f   : > { %v2035_v12 = vld [vmem:[%s2431_s11 + $0x23] sm:$0xff]  ;;  %v2036_v15 = vld [vmem:[%s2431_s11 + $0x2b] sm:$0xff]  ;;  %v2542_v19 = vpack.c.bf16 %v2029_v11, %v2028_v6  ;;  %v2575_v29 = vand.u32 %v2099_v27, %v2385_v4  ;;  %v2024_v35 = vld [vmem:[%s2431_s11 + $0x39] sm:$0xf] }
  0x20   : > { %v2042_v16 = vld [vmem:[%s2431_s11 + $0x24] sm:$0xff]  ;;  %v2043_v17 = vld [vmem:[%s2431_s11 + $0x2c] sm:$0xff]  ;;  %v2544_v20 = vpack.c.bf16 %v2036_v15, %v2035_v12  ;;  %v2106_v28 = vld [vmem:[%s3025_s1 + $0x22] sm:$0x3] }
  0x21   : > { %v2546_v21 = vpack.c.bf16 %v2043_v17, %v2042_v16  ;;  %v2578_v30 = vand.u32 %v2106_v28, %v2385_v4  ;;  %v2023_v33 = vld [vmem:[%s2431_s11 + $0x31] sm:$0xff]  ;;  %v2031_v37 = vld [vmem:[%s2431_s11 + $0x3a] sm:$0xf]  ;;  %v2051_v47 = vld [vmem:[%s2431_s11 + $0x40] sm:$0xff] }
  0x22   : > { %v2030_v36 = vld [vmem:[%s2431_s11 + $0x32] sm:$0xff]  ;;  %v2038_v39 = vld [vmem:[%s2431_s11 + $0x3b] sm:$0xf]  ;;  %v2592_v42 = vpack.c.bf16 %v2024_v35, %v2023_v33  ;;  %v2052_v48 = vld [vmem:[%s2431_s11 + $0x48] sm:$0xff] }
  0x23   : > { %v2037_v38 = vld [vmem:[%s2431_s11 + $0x33] sm:$0xff]  ;;  %v2045_v41 = vld [vmem:[%s2431_s11 + $0x3c] sm:$0xf]  ;;  %v2058_v51 = vld [vmem:[%s2431_s11 + $0x41] sm:$0xff]  ;;  %v2616_v59 = vpack.c.bf16 %v2052_v48, %v2051_v47 }
  0x24   : > { %v2044_v40 = vld [vmem:[%s2431_s11 + $0x34] sm:$0xff]  ;;  %v2059_v52 = vld [vmem:[%s2431_s11 + $0x49] sm:$0xff]  ;;  %v2095_v48 = vld [vmem:[%s2431_s11 + $0x61] sm:$0xff] }
  0x25   : > { %v2065_v55 = vld [vmem:[%s2431_s11 + $0x42] sm:$0xff]  ;;  %v2066_v56 = vld [vmem:[%s2431_s11 + $0x4a] sm:$0xff]  ;;  %v2618_v60 = vpack.c.bf16 %v2059_v52, %v2058_v51  ;;  %v2054_v16 = vld [vmem:[%s2431_s11 + $0x58] sm:$0xf] }
  0x26   : > { %v2072_v57 = vld [vmem:[%s2431_s11 + $0x43] sm:$0xff]  ;;  %v2073_v58 = vld [vmem:[%s2431_s11 + $0x4b] sm:$0xff]  ;;  %v2620_v61 = vpack.c.bf16 %v2066_v56, %v2065_v55  ;;  %v2061_v22 = vld [vmem:[%s2431_s11 + $0x59] sm:$0xf] }
  0x27   : > { %v2622_v62 = vpack.c.bf16 %v2073_v58, %v2072_v57  ;;  %v2129_v5 = vld [vmem:[%s3025_s1 + $0x28] sm:$0x3]  ;;  %v2136_v6 = vld [vmem:[%s3025_s1 + $0x2a] sm:$0x3]  ;;  %v2053_v15 = vld [vmem:[%s2431_s11 + $0x50] sm:$0xff] }
  0x28   : > { %v2651_v11 = vand.u32 %v2129_v5, %v2385_v4  ;;  %v2654_v12 = vand.u32 %v2136_v6, %v2385_v4  ;;  %v2060_v17 = vld [vmem:[%s2431_s11 + $0x51] sm:$0xff]  ;;  %v2068_v27 = vld [vmem:[%s2431_s11 + $0x5a] sm:$0xf]  ;;  %v2668_v35 = vpack.c.bf16 %v2054_v16, %v2053_v15  ;;  %v2089_v47 = vld [vmem:[%s2431_s11 + $0x68] sm:$0xff] }
  0x29   : > { %2004 = vmatmul.msk.bf16.vlgmr.msrb.gmra.mxu2 %vm213_vm2, %v278_v43  ;;  %2007 = vmatmul.msk.bf16.vlgmr.msrb.gmra.mxu3 %vm213_vm2, %v318_v44  ;;  %v2594_v43 = vpack.c.bf16 %v2031_v37, %v2030_v36  ;;  %v2596_v44 = vpack.c.bf16 %v2038_v39, %v2037_v38  ;;  %v2067_v23 = vld [vmem:[%s2431_s11 + $0x52] sm:$0xff]  ;;  %v2075_v33 = vld [vmem:[%s2431_s11 + $0x5b] sm:$0xf]  ;;  %v2670_v36 = vpack.c.bf16 %v2061_v22, %v2060_v17  ;;  %v2079_v39 = vld [vmem:[%s2431_s11 + $0x44] sm:$0xff] }
  0x2a   : > { %2010 = vmatmul.msk.bf16.vlgmr.msrb.gmra.mxu0 %vm213_vm2, %v358_v45  ;;  %2019 = vmatmul.msk.bf16.vlgmr.msrb.gmra.mxu1 %vm213_vm2, %v2482_v46  ;;  %v2598_v45 = vpack.c.bf16 %v2045_v41, %v2044_v40  ;;  %3044 = vst [vmem:[#allocation3_spill] sm:$0xff] %v2651_v11  ;;  %v2074_v28 = vld [vmem:[%s2431_s11 + $0x53] sm:$0xff]  ;;  %v2672_v37 = vpack.c.bf16 %v2068_v27, %v2067_v23  ;;  %v2088_v41 = vld [vmem:[%s2431_s11 + $0x60] sm:$0xff]  ;;  %v2096_v51 = vld [vmem:[%s2431_s11 + $0x69] sm:$0xff] }
  0x2b   : > { %624 = vmatpush.bf16.msrb.mxu2 %v2496_v49  ;;  %664 = vmatpush.bf16.msrb.mxu3 %v2499_v50  ;;  %3045 = vst [vmem:[#allocation4_spill] sm:$0xff] %v2654_v12  ;;  %v2674_v38 = vpack.c.bf16 %v2075_v33, %v2074_v28  ;;  %v2080_v40 = vld [vmem:[%s2431_s11 + $0x4c] sm:$0xff]  ;;  %v2102_v52 = vld [vmem:[%s2431_s11 + $0x62] sm:$0xff]  ;;  %v2694_v57 = vpack.c.bf16 %v2089_v47, %v2088_v41  ;;  %v2081_v17 = vld [vmem:[%s2431_s11 + $0x54] sm:$0xff] }
  0x2c   : > { %704 = vmatpush.bf16.msrb.mxu0 %v2508_v53  ;;  %744 = vmatpush.bf16.msrb.mxu1 %v2511_v54  ;;  %v2103_v55 = vld [vmem:[%s2431_s11 + $0x6a] sm:$0xff]  ;;  %v2692_v56 = vpack.c.bf16 %v2080_v40, %v2079_v39  ;;  %v2696_v58 = vpack.c.bf16 %v2096_v51, %v2095_v48  ;;  %v2082_v22 = vld [vmem:[%s2431_s11 + $0x5c] sm:$0xf]  ;;  %v2091_v28 = vld [vmem:[%s2431_s11 + $0x78] sm:$0xf] }
  0x2d   : > { %v2150_v5 = vld [vmem:[%s3025_s1 + $0x2e] sm:$0x3]  ;;  %v2157_v16 = vld [vmem:[%s3025_s1 + $0x30] sm:$0x3]  ;;  %v2098_v39 = vld [vmem:[%s2431_s11 + $0x79] sm:$0xf] }
  0x2e   : > { %v2718_v15 = vand.u32 %v2150_v5, %v2385_v4  ;;  %v2090_v23 = vld [vmem:[%s2431_s11 + $0x70] sm:$0xff]  ;;  %v2730_v27 = vand.u32 %v2157_v16, %v2385_v4  ;;  %v2105_v41 = vld [vmem:[%s2431_s11 + $0x7a] sm:$0xf] }
  0x2f   : > { %v2097_v33 = vld [vmem:[%s2431_s11 + $0x71] sm:$0xff]  ;;  %v2740_v47 = vpack.c.bf16 %v2091_v28, %v2090_v23  ;;  %v2109_v28 = vld [vmem:[%s2431_s11 + $0x63] sm:$0xff] }
  0x30   : > { %3047 = vst [vmem:[#allocation6_spill] sm:$0xff] %v2718_v15  ;;  %v2104_v40 = vld [vmem:[%s2431_s11 + $0x72] sm:$0xff]  ;;  %v2742_v48 = vpack.c.bf16 %v2098_v39, %v2097_v33  ;;  %v2116_v39 = vld [vmem:[%s2431_s11 + $0x64] sm:$0xff] }
  0x31   : > { %3048 = vst [vmem:[#allocation7_spill] sm:$0xff] %v2730_v27  ;;  %v2110_v33 = vld [vmem:[%s2431_s11 + $0x6b] sm:$0xff] }
  0x32   : > { %3050 = vst [vmem:[#allocation9_spill] sm:$0xff] %v2740_v47 }
  0x33   : > { %3051 = vst [vmem:[#allocation10_spill] sm:$0xff] %v2742_v48 }
  0x39   : > { %2005 = vmatmul.msk.bf16.gmra.mxu2 %vm213_vm2, %v279_v63  ;;  %2008 = vmatmul.msk.bf16.gmra.mxu3 %vm213_vm2, %v319_v0  ;;  %v2113_v63 = vld [vmem:[%s3025_s1 + $0x24] sm:$0x3]  ;;  %v2120_v0 = vld [vmem:[%s3025_s1 + $0x26] sm:$0x3] }
  0x3a   : > { %2011 = vmatmul.msk.bf16.gmra.mxu0 %vm213_vm2, %v359_v1  ;;  %2020 = vmatmul.msk.bf16.gmra.mxu1 %vm213_vm2, %v2525_v2  ;;  %v2639_v1 = vand.u32 %v2113_v63, %v2385_v4  ;;  %v2642_v3 = vand.u32 %v2120_v0, %v2385_v4  ;;  %v2698_v63 = vpack.c.bf16 %v2103_v55, %v2102_v52  ;;  %v2143_v0 = vld [vmem:[%s3025_s1 + $0x2c] sm:$0x3] }
  0x3b   : > { %v2715_v6 = vand.u32 %v2143_v0, %v2385_v4  ;;  %v2744_v52 = vpack.c.bf16 %v2105_v41, %v2104_v40  ;;  %v2117_v40 = vld [vmem:[%s2431_s11 + $0x6c] sm:$0xff]  ;;  %v2125_v41 = vld [vmem:[%s2431_s11 + $0x80] sm:$0xff] }
  0x3d   : > { %3046 = vst [vmem:[#allocation5_spill] sm:$0xff] %v2715_v6 }
  0x3e   : > { %3052 = vst [vmem:[#allocation11_spill] sm:$0xff] %v2744_v52 }
  0x49   : > { %2026 = vmatmul.msk.bf16.vlgmr.msra.gmra.mxu2 %vm213_vm2, %v2540_v18  ;;  %2033 = vmatmul.msk.bf16.vlgmr.msra.gmra.mxu3 %vm213_vm2, %v2542_v19 }
  0x4a   : > { %2040 = vmatmul.msk.bf16.vlgmr.msra.gmra.mxu0 %vm213_vm2, %v2544_v20  ;;  %2047 = vmatmul.msk.bf16.vlgmr.msra.gmra.mxu1 %vm213_vm2, %v2546_v21 }
  0x4b   : > { %784 = vmatpush.bf16.msra.mxu2 %v2563_v24  ;;  %827 = vmatpush.bf16.msra.mxu3 %v2566_v25 }
  0x4c   : > { %867 = vmatpush.bf16.msra.mxu0 %v2575_v29  ;;  %907 = vmatpush.bf16.msra.mxu1 %v2578_v30 }
  0x59   : > { %2027 = vmatmul.msk.bf16.gmra.mxu2 %vm213_vm2, %v2592_v42  ;;  %2034 = vmatmul.msk.bf16.gmra.mxu3 %vm213_vm2, %v2594_v43 }
  0x5a   : > { %2041 = vmatmul.msk.bf16.gmra.mxu0 %vm213_vm2, %v2596_v44  ;;  %2048 = vmatmul.msk.bf16.gmra.mxu1 %vm213_vm2, %v2598_v45 }
  0x69   : > { %2056 = vmatmul.msk.bf16.vlgmr.msrb.gmra.mxu2 %vm213_vm2, %v2616_v59  ;;  %2063 = vmatmul.msk.bf16.vlgmr.msrb.gmra.mxu3 %vm213_vm2, %v2618_v60 }
  0x6a   : > { %2070 = vmatmul.msk.bf16.vlgmr.msrb.gmra.mxu0 %vm213_vm2, %v2620_v61  ;;  %2077 = vmatmul.msk.bf16.vlgmr.msrb.gmra.mxu1 %vm213_vm2, %v2622_v62 }
  0x6b   : > { %947 = vmatpush.bf16.msrb.mxu2 %v2639_v1  ;;  %987 = vmatpush.bf16.msrb.mxu3 %v2642_v3 }
  0x6c   : > { %1030 = vmatpush.bf16.msrb.mxu0 %v2651_v11  ;;  %1070 = vmatpush.bf16.msrb.mxu1 %v2654_v12  ;;  %v2762_v12 = vpack.c.bf16 %v2110_v33, %v2109_v28 }
  0x6e   : > { %3053 = vst [vmem:[#allocation12_spill] sm:$0xff] %v2762_v12 }
  0x79   : > { %2057 = vmatmul.msk.bf16.gmra.mxu2 %vm213_vm2, %v2668_v35  ;;  %2064 = vmatmul.msk.bf16.gmra.mxu3 %vm213_vm2, %v2670_v36 }
  0x7a   : > { %2071 = vmatmul.msk.bf16.gmra.mxu0 %vm213_vm2, %v2672_v37  ;;  %2078 = vmatmul.msk.bf16.gmra.mxu1 %vm213_vm2, %v2674_v38 }
  0x89   : > { %2084 = vmatmul.msk.bf16.vlgmr.msra.gmra.mxu2 %vm213_vm2, %v2692_v56  ;;  %2093 = vmatmul.msk.bf16.vlgmr.msra.gmra.mxu3 %vm213_vm2, %v2694_v57 }
  0x8a   : > { %2100 = vmatmul.msk.bf16.vlgmr.msra.gmra.mxu0 %vm213_vm2, %v2696_v58  ;;  %2107 = vmatmul.msk.bf16.vlgmr.msra.gmra.mxu1 %vm213_vm2, %v2698_v63 }
  0x8b   : > { %1224 = vmatpush.bf16.msra.mxu1 %v2396_v7  ;;  %1110 = vmatpush.bf16.msra.mxu2 %v2715_v6  ;;  %v2738_v7 = vpack.c.bf16 %v2082_v22, %v2081_v17 }
  0x8c   : > { %1150 = vmatpush.bf16.msra.mxu3 %v2718_v15  ;;  %1190 = vmatpush.bf16.msra.mxu0 %v2730_v27  ;;  %v2132_v27 = vld [vmem:[%s2431_s11 + $0x81] sm:$0xff]  ;;  %v2133_v15 = vld [vmem:[%s2431_s11 + $0x89] sm:$0xff] }
  0x8d   : > { %3049 = vst [vmem:[#allocation8_spill] sm:$0xff] %v2738_v7 }
  0x97   : > { %v236_v51 = vpop.f32.mrf.mxu0  ;;  %v264_v4 = vpop.f32.mrf.mxu1 }
  0x98   : > { %v265_v55 = vadd.f32 %v264_v4, %v236_v51  ;;  %v2126_v51 = vld [vmem:[%s2431_s11 + $0x88] sm:$0xff] }
  0x99   : > { %2085 = vmatmul.msk.bf16.gmra.mxu2 %vm213_vm2, %v2738_v7  ;;  %2094 = vmatmul.msk.bf16.gmra.mxu3 %vm213_vm2, %v2740_v47  ;;  %v2766_v47 = vpack.c.bf16 %v2126_v51, %v2125_v41  ;;  %v2112_v41 = vld [vmem:[%s2431_s11 + $0x7b] sm:$0xf] }
  0x9a   : > { %2101 = vmatmul.msk.bf16.gmra.mxu0 %vm213_vm2, %v2742_v48  ;;  %2108 = vmatmul.msk.bf16.gmra.mxu1 %vm213_vm2, %v2744_v52  ;;  %v2764_v52 = vpack.c.bf16 %v2117_v40, %v2116_v39  ;;  %v2111_v40 = vld [vmem:[%s2431_s11 + $0x73] sm:$0xff] }
  0x9b   : > { %3055 = vst [vmem:[#allocation14_spill] sm:$0xff] %v2766_v47  ;;  %v2118_v51 = vld [vmem:[%s2431_s11 + $0x74] sm:$0xff] }
  0x9c   : > { %v241_v0 = vpop.f32.mrf.mxu2  ;;  %v269_v5 = vpop.f32.mrf.mxu3  ;;  %3054 = vst [vmem:[#allocation13_spill] sm:$0xff] %v2764_v52 }
  0x9d   : > { %v270_v16 = vadd.f32 %v269_v5, %v241_v0  ;;  %v2768_v5 = vpack.c.bf16 %v2133_v15, %v2132_v27 }
  0x9f   : > { %v238_v17 = vpop.f32.mrf.mxu0  ;;  %v266_v22 = vpop.f32.mrf.mxu1  ;;  %3056 = vst [vmem:[#allocation15_spill] sm:$0xff] %v2768_v5 }
  0xa0   : > { %v267_v23 = vadd.f32 %v266_v22, %v238_v17 }
  0xa4   : > { %v243_v4 = vpop.f32.mrf.mxu2  ;;  %v271_v6 = vpop.f32.mrf.mxu3 }
  0xa5   : > { %v272_v48 = vadd.f32 %v271_v6, %v243_v4  ;;  %v2127_v4 = vld [vmem:[%s2431_s11 + $0x90] sm:$0xff] }
  0xa7   : > { %v380_v0 = vpop.f32.mrf.mxu0  ;;  %v423_v17 = vpop.f32.mrf.mxu1 }
  0xa9   : > { %2114 = vmatmul.msk.bf16.vlgmr.msrb.gmra.mxu2 %vm213_vm2, %v2762_v12  ;;  %2121 = vmatmul.msk.bf16.vlgmr.msrb.gmra.mxu3 %vm213_vm2, %v2764_v52  ;;  %v2134_v52 = vld [vmem:[%s2431_s11 + $0x91] sm:$0xff] }
  0xaa   : > { %2130 = vmatmul.msk.bf16.vlgmr.msrb.gmra.mxu0 %vm213_vm2, %v2766_v47  ;;  %2137 = vmatmul.msk.bf16.vlgmr.msrb.gmra.mxu1 %vm213_vm2, %v2768_v5  ;;  %v2128_v5 = vld [vmem:[%s2431_s11 + $0x98] sm:$0xf] }
  0xab   : > { %1243 = vmatpush.bf16.msrb.mxu2 %v2399_v8  ;;  %1262 = vmatpush.bf16.msrb.mxu3 %v2403_v9  ;;  %v2119_v8 = vld [vmem:[%s2431_s11 + $0x7c] sm:$0xf] }
  0xac   : > { %v300_v6 = vpop.f32.mrf.mxu2  ;;  %1285 = vmatpush.bf16.msrb.mxu0 %v2406_v10  ;;  %v340_v27 = vpop.f32.mrf.mxu3  ;;  %1308 = vmatpush.bf16.msrb.mxu1 %v2416_v13  ;;  %v2135_v10 = vld [vmem:[%s2431_s11 + $0x99] sm:$0xf]  ;;  %v2792_v7 = vpack.c.bf16 %v2119_v8, %v2118_v51  ;;  %v2794_v13 = vpack.c.bf16 %v2128_v5, %v2127_v4  ;;  %v2139_v51 = vld [vmem:[%s2431_s11 + $0x82] sm:$0xff]  ;;  %v2140_v8 = vld [vmem:[%s2431_s11 + $0x8a] sm:$0xff] }
  0xad   : > { %v310_v15 = vadd.f32 %v300_v6, %v265_v55  ;;  %v2790_v6 = vpack.c.bf16 %v2112_v41, %v2111_v40  ;;  %v2146_v4 = vld [vmem:[%s2431_s11 + $0x83] sm:$0xff]  ;;  %v2812_v11 = vpack.c.bf16 %v2140_v8, %v2139_v51  ;;  %v2149_v51 = vld [vmem:[%s2431_s11 + $0x9b] sm:$0xf] }
  0xae   : > { %3058 = vst [vmem:[#allocation17_spill] sm:$0xff] %v2792_v7  ;;  %v2155_v8 = vld [vmem:[%s2431_s11 + $0x94] sm:$0xff] }
  0xaf   : > { %v350_v22 = vadd.f32 %v340_v27, %v310_v15  ;;  %v382_v28 = vpop.f32.mrf.mxu0  ;;  %v425_v33 = vpop.f32.mrf.mxu1  ;;  %3057 = vst [vmem:[#allocation16_spill] sm:$0xff] %v2790_v6  ;;  %v2796_v27 = vpack.c.bf16 %v2135_v10, %v2134_v52  ;;  %v2153_v10 = vld [vmem:[%s2431_s11 + $0x84] sm:$0xff] }
  0xb0   : > { %3059 = vst [vmem:[#allocation18_spill] sm:$0xff] %v2794_v13 }
  0xb1   : > { %v390_v39 = vadd.f32 %v380_v0, %v350_v22 }
  0xb3   : > { %v433_v47 = vadd.f32 %v423_v17, %v390_v39 }
  0xb4   : > { %v302_v9 = vpop.f32.mrf.mxu2  ;;  %v342_v55 = vpop.f32.mrf.mxu3 }
  0xb5   : > { %v311_v12 = vadd.f32 %v302_v9, %v267_v23  ;;  %v2147_v9 = vld [vmem:[%s2431_s11 + $0x8b] sm:$0xff] }
  0xb7   : > { %v351_v15 = vadd.f32 %v342_v55, %v311_v12  ;;  %v385_v0 = vpop.f32.mrf.mxu0  ;;  %v428_v22 = vpop.f32.mrf.mxu1  ;;  %v2154_v55 = vld [vmem:[%s2431_s11 + $0x8c] sm:$0xff] }
  0xb9   : > { %v391_v17 = vadd.f32 %v382_v28, %v351_v15  ;;  %2115 = vmatmul.msk.bf16.gmra.mxu2 %vm213_vm2, %v2790_v6  ;;  %2122 = vmatmul.msk.bf16.gmra.mxu3 %vm213_vm2, %v2792_v7 }
  0xba   : > { %2131 = vmatmul.msk.bf16.gmra.mxu0 %vm213_vm2, %v2794_v13  ;;  %2138 = vmatmul.msk.bf16.gmra.mxu1 %vm213_vm2, %v2796_v27 }
  0xbb   : > { %v434_v12 = vadd.f32 %v425_v33, %v391_v17  ;;  %v2814_v33 = vpack.c.bf16 %v2147_v9, %v2146_v4 }
  0xbc   : > { %v305_v52 = vpop.f32.mrf.mxu2  ;;  %v345_v5 = vpop.f32.mrf.mxu3 }
  0xbd   : > { %v312_v23 = vadd.f32 %v305_v52, %v270_v16  ;;  %v2816_v16 = vpack.c.bf16 %v2154_v55, %v2153_v10 }
  0xbf   : > { %v352_v28 = vadd.f32 %v345_v5, %v312_v23  ;;  %v387_v39 = vpop.f32.mrf.mxu0  ;;  %v430_v40 = vpop.f32.mrf.mxu1 }
  0xc1   : > { %v392_v41 = vadd.f32 %v385_v0, %v352_v28 }
  0xc3   : > { %v435_v15 = vadd.f32 %v428_v22, %v392_v41  ;;  %v2142_v41 = vld [vmem:[%s2431_s11 + $0x9a] sm:$0xf] }
  0xc4   : > { %v307_v7 = vpop.f32.mrf.mxu2  ;;  %v347_v6 = vpop.f32.mrf.mxu3 }
  0xc5   : > { %v313_v13 = vadd.f32 %v307_v7, %v272_v48 }
  0xc7   : > { %v353_v17 = vadd.f32 %v347_v6, %v313_v13  ;;  %v543_v52 = vpop.f32.mrf.mxu0  ;;  %v583_v23 = vpop.f32.mrf.mxu1 }
  0xc9   : > { %v393_v0 = vadd.f32 %v387_v39, %v353_v17  ;;  %2144 = vmatmul.msk.bf16.vlgmr.msra.gmra.mxu2 %vm213_vm2, %v2812_v11  ;;  %2151 = vmatmul.msk.bf16.vlgmr.msra.gmra.mxu3 %vm213_vm2, %v2814_v33 }
  0xca   : > { %2158 = vmatmul.msk.bf16.vlgmr.msra.gmra.mxu0 %vm213_vm2, %v2816_v16  ;;  %2160 = vmatmul.msk.bf16.vlgmr.msra.gmra.mxu1 %vm213_vm2, %v2540_v18  ;;  %v2141_v18 = vld [vmem:[%s2431_s11 + $0x92] sm:$0xff] }
  0xcb   : > { %v436_v7 = vadd.f32 %v430_v40, %v393_v0  ;;  %1331 = vmatpush.bf16.msra.mxu2 %v2419_v14  ;;  %1354 = vmatpush.bf16.msra.mxu3 %v2453_v26  ;;  %v2148_v40 = vld [vmem:[%s2431_s11 + $0x93] sm:$0xff]  ;;  %v2156_v14 = vld [vmem:[%s2431_s11 + $0x9c] sm:$0xf]  ;;  %v2836_v55 = vpack.c.bf16 %v2142_v41, %v2141_v18 }
  0xcc   : > { %v463_v48 = vpop.f32.mrf.mxu2  ;;  %1377 = vmatpush.bf16.msra.mxu0 %v2458_v31  ;;  %v503_v13 = vpop.f32.mrf.mxu3  ;;  %1400 = vmatpush.bf16.msra.mxu1 %v2461_v32  ;;  %v2838_v31 = vpack.c.bf16 %v2149_v51, %v2148_v40 }
  0xcd   : > { %v473_v6 = vadd.f32 %v463_v48, %v433_v47  ;;  %v2840_v47 = vpack.c.bf16 %v2156_v14, %v2155_v8 }
  0xcf   : > { %v513_v22 = vadd.f32 %v503_v13, %v473_v6  ;;  %v545_v5 = vpop.f32.mrf.mxu0  ;;  %v585_v28 = vpop.f32.mrf.mxu1 }
  0xd1   : > { %v553_v39 = vadd.f32 %v543_v52, %v513_v22 }
  0xd3   : > { %v593_v4 = vadd.f32 %v583_v23, %v553_v39 }
  0xd4   : > { %v465_v9 = vpop.f32.mrf.mxu2  ;;  %v505_v26 = vpop.f32.mrf.mxu3 }
  0xd5   : > { %v474_v10 = vadd.f32 %v465_v9, %v434_v12 }
  0xd7   : > { %v514_v32 = vadd.f32 %v505_v26, %v474_v10  ;;  %v548_v17 = vpop.f32.mrf.mxu0  ;;  %v588_v0 = vpop.f32.mrf.mxu1 }
  0xd9   : > { %v554_v52 = vadd.f32 %v545_v5, %v514_v32  ;;  %2145 = vmatmul.msk.bf16.gmra.mxu2 %vm213_vm2, %v2836_v55  ;;  %2152 = vmatmul.msk.bf16.gmra.mxu3 %vm213_vm2, %v2838_v31 }
  0xda   : > { %2159 = vmatmul.msk.bf16.gmra.mxu0 %vm213_vm2, %v2840_v47  ;;  %2161 = vmatmul.msk.bf16.gmra.mxu1 %vm213_vm2, %v2592_v42 }
  0xdb   : > { %v594_v12 = vadd.f32 %v585_v28, %v554_v52 }
  0xdc   : > { %v468_v23 = vpop.f32.mrf.mxu2  ;;  %v508_v6 = vpop.f32.mrf.mxu3 }
  0xdd   : > { %v475_v48 = vadd.f32 %v468_v23, %v435_v15 }
  0xdf   : > { %v515_v13 = vadd.f32 %v508_v6, %v475_v48  ;;  %v550_v22 = vpop.f32.mrf.mxu0  ;;  %v590_v39 = vpop.f32.mrf.mxu1 }
  0xe1   : > { %v555_v5 = vadd.f32 %v548_v17, %v515_v13 }
  0xe3   : > { %v595_v18 = vadd.f32 %v588_v0, %v555_v5 }
  0xe4   : > { %v470_v41 = vpop.f32.mrf.mxu2  ;;  %v510_v51 = vpop.f32.mrf.mxu3 }
  0xe5   : > { %v476_v40 = vadd.f32 %v470_v41, %v436_v7 }
  0xe7   : > { %v516_v8 = vadd.f32 %v510_v51, %v476_v40  ;;  %v706_v14 = vpop.f32.mrf.mxu0  ;;  %v746_v9 = vpop.f32.mrf.mxu1 }
  0xe9   : > { %v556_v10 = vadd.f32 %v550_v22, %v516_v8  ;;  %2162 = vmatmul.msk.bf16.vlgmr.msrb.gmra.mxu2 %vm213_vm2, %v2482_v46  ;;  %2164 = vmatmul.msk.bf16.vlgmr.msrb.gmra.mxu3 %vm213_vm2, %v2542_v19 }
  0xea   : > { %2166 = vmatmul.msk.bf16.vlgmr.msrb.gmra.mxu0 %vm213_vm2, %v2544_v20  ;;  %2168 = vmatmul.msk.bf16.vlgmr.msrb.gmra.mxu1 %vm213_vm2, %v2546_v21 }
  0xeb   : > { %v596_v42 = vadd.f32 %v590_v39, %v556_v10  ;;  %1423 = vmatpush.bf16.msrb.mxu2 %v2465_v34  ;;  %1446 = vmatpush.bf16.msrb.mxu3 %v2496_v49 }
  0xec   : > { %v626_v15 = vpop.f32.mrf.mxu2  ;;  %1469 = vmatpush.bf16.msrb.mxu0 %v2499_v50  ;;  %v666_v28 = vpop.f32.mrf.mxu3  ;;  %1492 = vmatpush.bf16.msrb.mxu1 %v2508_v53 }
  0xed   : > { %v636_v7 = vadd.f32 %v626_v15, %v593_v4 }
  0xef   : > { %v676_v46 = vadd.f32 %v666_v28, %v636_v7  ;;  %v708_v19 = vpop.f32.mrf.mxu0  ;;  %v748_v26 = vpop.f32.mrf.mxu1 }
  0xf1   : > { %v716_v32 = vadd.f32 %v706_v14, %v676_v46 }
  0xf3   : > { %v756_v20 = vadd.f32 %v746_v9, %v716_v32 }
  0xf4   : > { %v628_v17 = vpop.f32.mrf.mxu2  ;;  %v668_v21 = vpop.f32.mrf.mxu3 }
  0xf5   : > { %v637_v0 = vadd.f32 %v628_v17, %v594_v12 }
  0xf7   : > { %v677_v52 = vadd.f32 %v668_v21, %v637_v0  ;;  %v711_v23 = vpop.f32.mrf.mxu0  ;;  %v751_v34 = vpop.f32.mrf.mxu1 }
  0xf9   : > { %v717_v48 = vadd.f32 %v708_v19, %v677_v52  ;;  %2163 = vmatmul.msk.bf16.gmra.mxu2 %vm213_vm2, %v2525_v2  ;;  %2165 = vmatmul.msk.bf16.gmra.mxu3 %vm213_vm2, %v2594_v43 }
  0xfa   : > { %2167 = vmatmul.msk.bf16.gmra.mxu0 %vm213_vm2, %v2596_v44  ;;  %2169 = vmatmul.msk.bf16.gmra.mxu1 %vm213_vm2, %v2598_v45 }
  0xfb   : > { %v757_v49 = vadd.f32 %v748_v26, %v717_v48 }
  0xfc   : > { %v631_v50 = vpop.f32.mrf.mxu2  ;;  %v671_v4 = vpop.f32.mrf.mxu3 }
  0xfd   : > { %v638_v53 = vadd.f32 %v631_v50, %v595_v18 }
  0xff   : > { %v678_v12 = vadd.f32 %v671_v4, %v638_v53  ;;  %v713_v6 = vpop.f32.mrf.mxu0  ;;  %v753_v13 = vpop.f32.mrf.mxu1 }
 0x101   : > { %v718_v22 = vadd.f32 %v711_v23, %v678_v12 }
 0x103   : > { %v758_v39 = vadd.f32 %v751_v34, %v718_v22 }
 0x104   : > { %v633_v5 = vpop.f32.mrf.mxu2  ;;  %v673_v41 = vpop.f32.mrf.mxu3 }
 0x105   : > { %v639_v2 = vadd.f32 %v633_v5, %v596_v42 }
 0x107   : > { %v679_v40 = vadd.f32 %v673_v41, %v639_v2  ;;  %v869_v43 = vpop.f32.mrf.mxu0  ;;  %v909_v51 = vpop.f32.mrf.mxu1  ;;  %v3061_v2 = vld [vmem:[#allocation8_spill] sm:$0xff]  ;;  %v3064_v41 = vld [vmem:[#allocation11_spill] sm:$0xff] }
 0x109   : > { %v719_v8 = vadd.f32 %v713_v6, %v679_v40  ;;  %2170 = vmatmul.msk.bf16.vlgmr.msra.gmra.mxu2 %vm213_vm2, %v2616_v59  ;;  %2172 = vmatmul.msk.bf16.vlgmr.msra.gmra.mxu3 %vm213_vm2, %v2618_v60 }
 0x10a   : > { %2174 = vmatmul.msk.bf16.vlgmr.msra.gmra.mxu0 %vm213_vm2, %v2620_v61  ;;  %2176 = vmatmul.msk.bf16.vlgmr.msra.gmra.mxu1 %vm213_vm2, %v2622_v62 }
 0x10b   : > { %v759_v44 = vadd.f32 %v753_v13, %v719_v8  ;;  %1515 = vmatpush.bf16.msra.mxu2 %v2511_v54  ;;  %1538 = vmatpush.bf16.msra.mxu3 %v2563_v24 }
 0x10c   : > { %v786_v45 = vpop.f32.mrf.mxu2  ;;  %1561 = vmatpush.bf16.msra.mxu0 %v2566_v25  ;;  %v829_v14 = vpop.f32.mrf.mxu3  ;;  %1584 = vmatpush.bf16.msra.mxu1 %v2575_v29 }
 0x10d   : > { %v796_v18 = vadd.f32 %v786_v45, %v756_v20 }
 0x10f   : > { %v839_v59 = vadd.f32 %v829_v14, %v796_v18  ;;  %v871_v60 = vpop.f32.mrf.mxu0  ;;  %v911_v9 = vpop.f32.mrf.mxu1 }
 0x111   : > { %v879_v10 = vadd.f32 %v869_v43, %v839_v59 }
 0x113   : > { %v919_v61 = vadd.f32 %v909_v51, %v879_v10 }
 0x114   : > { %v788_v42 = vpop.f32.mrf.mxu2  ;;  %v831_v62 = vpop.f32.mrf.mxu3 }
 0x115   : > { %v797_v15 = vadd.f32 %v788_v42, %v757_v49 }
 0x117   : > { %v840_v7 = vadd.f32 %v831_v62, %v797_v15  ;;  %v874_v28 = vpop.f32.mrf.mxu0  ;;  %v914_v54 = vpop.f32.mrf.mxu1 }
 0x119   : > { %v880_v46 = vadd.f32 %v871_v60, %v840_v7  ;;  %2171 = vmatmul.msk.bf16.gmra.mxu2 %vm213_vm2, %v2668_v35  ;;  %2173 = vmatmul.msk.bf16.gmra.mxu3 %vm213_vm2, %v2670_v36  ;;  %v3065_v7 = vld [vmem:[#allocation12_spill] sm:$0xff] }
 0x11a   : > { %2175 = vmatmul.msk.bf16.gmra.mxu0 %vm213_vm2, %v2672_v37  ;;  %2177 = vmatmul.msk.bf16.gmra.mxu1 %vm213_vm2, %v2674_v38 }
 0x11b   : > { %v920_v24 = vadd.f32 %v911_v9, %v880_v46  ;;  %v3068_v46 = vld [vmem:[#allocation15_spill] sm:$0xff] }
 0x11c   : > { %v791_v25 = vpop.f32.mrf.mxu2  ;;  %v834_v19 = vpop.f32.mrf.mxu3 }
 0x11d   : > { %v798_v29 = vadd.f32 %v791_v25, %v758_v39  ;;  %v3069_v25 = vld [vmem:[#allocation4_spill] sm:$0xff] }
 0x11f   : > { %v841_v26 = vadd.f32 %v834_v19, %v798_v29  ;;  %v876_v32 = vpop.f32.mrf.mxu0  ;;  %v916_v20 = vpop.f32.mrf.mxu1  ;;  %v3070_v19 = vld [vmem:[#allocation5_spill] sm:$0xff] }
 0x121   : > { %v881_v17 = vadd.f32 %v874_v28, %v841_v26  ;;  %v3066_v28 = vld [vmem:[#allocation13_spill] sm:$0xff]  ;;  %v3071_v26 = vld [vmem:[#allocation6_spill] sm:$0xff] }
 0x123   : > { %v921_v0 = vadd.f32 %v914_v54, %v881_v17  ;;  %v3067_v54 = vld [vmem:[#allocation14_spill] sm:$0xff]  ;;  %v3072_v17 = vld [vmem:[#allocation7_spill] sm:$0xff] }
 0x124   : > { %v793_v21 = vpop.f32.mrf.mxu2  ;;  %v836_v52 = vpop.f32.mrf.mxu3 }
 0x125   : > { %v799_v35 = vadd.f32 %v793_v21, %v759_v44 }
 0x127   : > { %v842_v23 = vadd.f32 %v836_v52, %v799_v35  ;;  %v1032_v36 = vpop.f32.mrf.mxu0  ;;  %v1072_v34 = vpop.f32.mrf.mxu1 }
 0x129   : > { %v882_v48 = vadd.f32 %v876_v32, %v842_v23  ;;  %2178 = vmatmul.msk.bf16.vlgmr.msrb.gmra.mxu2 %vm213_vm2, %v2692_v56  ;;  %2180 = vmatmul.msk.bf16.vlgmr.msrb.gmra.mxu3 %vm213_vm2, %v2694_v57  ;;  %v3060_v56 = vld [vmem:[#allocation3_spill] sm:$0xff] }
 0x12a   : > { %2182 = vmatmul.msk.bf16.vlgmr.msrb.gmra.mxu0 %vm213_vm2, %v2696_v58  ;;  %2184 = vmatmul.msk.bf16.vlgmr.msrb.gmra.mxu1 %vm213_vm2, %v2698_v63 }
 0x12b   : > { %v922_v37 = vadd.f32 %v916_v20, %v882_v48  ;;  %1607 = vmatpush.bf16.msrb.mxu2 %v2578_v30  ;;  %1630 = vmatpush.bf16.msrb.mxu3 %v2639_v1  ;;  %v3062_v1 = vld [vmem:[#allocation9_spill] sm:$0xff] }
 0x12c   : > { %v949_v38 = vpop.f32.mrf.mxu2  ;;  %1653 = vmatpush.bf16.msrb.mxu0 %v2642_v3  ;;  %v989_v50 = vpop.f32.mrf.mxu3  ;;  %1691 = vmatpush.bf16.msrb.mxu1 %v3060_v56  ;;  %v3063_v3 = vld [vmem:[#allocation10_spill] sm:$0xff]  ;;  %v3074_v56 = vld [vmem:[#allocation17_spill] sm:$0xff] }
 0x12d   : > { %v959_v49 = vadd.f32 %v949_v38, %v919_v61 }
 0x12f   : > { %v999_v53 = vadd.f32 %v989_v50, %v959_v49  ;;  %v1034_v57 = vpop.f32.mrf.mxu0  ;;  %v1074_v4 = vpop.f32.mrf.mxu1  ;;  %v3073_v50 = vld [vmem:[#allocation16_spill] sm:$0xff] }
 0x131   : > { %v1042_v12 = vadd.f32 %v1032_v36, %v999_v53  ;;  %v3075_v53 = vld [vmem:[#allocation18_spill] sm:$0xff] }
 0x133   : > { %v1082_v58 = vadd.f32 %v1072_v34, %v1042_v12 }
 0x134   : > { %v951_v6 = vpop.f32.mrf.mxu2  ;;  %v991_v63 = vpop.f32.mrf.mxu3 }
 0x135   : > { %v960_v13 = vadd.f32 %v951_v6, %v920_v24 }
 0x137   : > { %v1000_v22 = vadd.f32 %v991_v63, %v960_v13  ;;  %v1037_v39 = vpop.f32.mrf.mxu0  ;;  %v1077_v30 = vpop.f32.mrf.mxu1 }
 0x139   : > { %v1043_v5 = vadd.f32 %v1034_v57, %v1000_v22  ;;  %2179 = vmatmul.msk.bf16.gmra.mxu2 %vm213_vm2, %v3061_v2  ;;  %2181 = vmatmul.msk.bf16.gmra.mxu3 %vm213_vm2, %v3062_v1 }
 0x13a   : > { %2183 = vmatmul.msk.bf16.gmra.mxu0 %vm213_vm2, %v3063_v3  ;;  %2185 = vmatmul.msk.bf16.gmra.mxu1 %vm213_vm2, %v3064_v41 }
 0x13b   : > { %v1083_v40 = vadd.f32 %v1074_v4, %v1043_v5 }
 0x13c   : > { %v954_v43 = vpop.f32.mrf.mxu2  ;;  %v994_v8 = vpop.f32.mrf.mxu3 }
 0x13d   : > { %v961_v51 = vadd.f32 %v954_v43, %v921_v0 }
 0x13f   : > { %v1001_v44 = vadd.f32 %v994_v8, %v961_v51  ;;  %v1039_v45 = vpop.f32.mrf.mxu0  ;;  %v1079_v18 = vpop.f32.mrf.mxu1 }
 0x141   : > { %v1044_v14 = vadd.f32 %v1037_v39, %v1001_v44  ;;  %v2202_v39 = vld [vmem:[%s2431_s11 + $0xa0] sm:$0xff] }
 0x143   : > { %v1084_v59 = vadd.f32 %v1077_v30, %v1044_v14  ;;  %v2203_v30 = vld [vmem:[%s2431_s11 + $0xa8] sm:$0xff] }
 0x144   : > { %v956_v60 = vpop.f32.mrf.mxu2  ;;  %v996_v10 = vpop.f32.mrf.mxu3  ;;  %v1676_v41 = vpack.c.bf16 %v2203_v30, %v2202_v39 }
 0x145   : > { %v962_v9 = vadd.f32 %v956_v60, %v922_v37 }
 0x147   : > { %v1002_v61 = vadd.f32 %v996_v10, %v962_v9  ;;  %v1192_v42 = vpop.f32.mrf.mxu0  ;;  %v1226_v15 = vpop.f32.mrf.mxu1  ;;  %v2204_v9 = vld [vmem:[%s2431_s11 + $0xb0] sm:$0xff]  ;;  %v2205_v10 = vld [vmem:[%s2431_s11 + $0xb8] sm:$0xf] }
 0x149   : > { %v1045_v62 = vadd.f32 %v1039_v45, %v1002_v61  ;;  %2186 = vmatmul.msk.bf16.vlgmr.msra.gmra.mxu2 %vm213_vm2, %v3065_v7  ;;  %2188 = vmatmul.msk.bf16.vlgmr.msra.gmra.mxu3 %vm213_vm2, %v3066_v28 }
 0x14a   : > { %2190 = vmatmul.msk.bf16.vlgmr.msra.gmra.mxu0 %vm213_vm2, %v3067_v54  ;;  %2192 = vmatmul.msk.bf16.vlgmr.msra.gmra.mxu1 %vm213_vm2, %v3068_v46 }
 0x14b   : > { %v1085_v24 = vadd.f32 %v1079_v18, %v1045_v62  ;;  %1726 = vmatpush.bf16.msra.mxu2 %v3069_v25  ;;  %1761 = vmatpush.bf16.msra.mxu3 %v3070_v19  ;;  %v1677_v62 = vpack.c.bf16 %v2205_v10, %v2204_v9  ;;  %v2208_v19 = vld [vmem:[%s2431_s11 + $0xa1] sm:$0xff] }
 0x14c   : > { %v1112_v29 = vpop.f32.mrf.mxu2  ;;  %1796 = vmatpush.bf16.msra.mxu0 %v3071_v26  ;;  %v1152_v20 = vpop.f32.mrf.mxu3  ;;  %1831 = vmatpush.bf16.msra.mxu1 %v3072_v17  ;;  %v2209_v26 = vld [vmem:[%s2431_s11 + $0xa9] sm:$0xff] }
 0x14d   : > { %v1122_v32 = vadd.f32 %v1112_v29, %v1082_v58  ;;  %v2221_v17 = vld [vmem:[%s2431_s11 + $0xab] sm:$0xff] }
 0x14f   : > { %v1162_v0 = vadd.f32 %v1152_v20, %v1122_v32  ;;  %v1194_v21 = vpop.f32.mrf.mxu0  ;;  %v1228_v35 = vpop.f32.mrf.mxu1  ;;  %v2214_v32 = vld [vmem:[%s2431_s11 + $0xa2] sm:$0xff] }
 0x150   : > { %v2220_v20 = vld [vmem:[%s2431_s11 + $0xa3] sm:$0xff] }
 0x151   : > { %v2922_v52 = vadd.f32 %v1192_v42, %v1162_v0 }
 0x154   : > { %v1114_v23 = vpop.f32.mrf.mxu2  ;;  %v1154_v34 = vpop.f32.mrf.mxu3 }
 0x155   : > { %v1123_v36 = vadd.f32 %v1114_v23, %v1083_v40 }
 0x157   : > { %v1163_v48 = vadd.f32 %v1154_v34, %v1123_v36  ;;  %v1197_v37 = vpop.f32.mrf.mxu0  ;;  %v1231_v38 = vpop.f32.mrf.mxu1  ;;  %v1711_v34 = vpack.c.bf16 %v2209_v26, %v2208_v19 }
 0x159   : > { %v2924_v49 = vadd.f32 %v1194_v21, %v1163_v48  ;;  %2187 = vmatmul.msk.bf16.gmra.mxu2 %vm213_vm2, %v3073_v50  ;;  %2189 = vmatmul.msk.bf16.gmra.mxu3 %vm213_vm2, %v3074_v56  ;;  %v2226_v21 = vld [vmem:[%s2431_s11 + $0xa4] sm:$0xff] }
 0x15a   : > { %2191 = vmatmul.msk.bf16.gmra.mxu0 %vm213_vm2, %v3075_v53  ;;  %2193 = vmatmul.msk.bf16.gmra.mxu1 %vm213_vm2, %v2796_v27 }
 0x15c   : > { %v1117_v57 = vpop.f32.mrf.mxu2  ;;  %v1157_v12 = vpop.f32.mrf.mxu3 }
 0x15d   : > { %v1124_v4 = vadd.f32 %v1117_v57, %v1084_v59 }
 0x15f   : > { %v1164_v58 = vadd.f32 %v1157_v12, %v1124_v4  ;;  %v1199_v6 = vpop.f32.mrf.mxu0  ;;  %v1233_v13 = vpop.f32.mrf.mxu1 }
 0x161   : > { %v2934_v63 = vadd.f32 %v1197_v37, %v1164_v58  ;;  %v1781_v37 = vpack.c.bf16 %v2221_v17, %v2220_v20 }
 0x164   : > { %v1119_v22 = vpop.f32.mrf.mxu2  ;;  %v1159_v2 = vpop.f32.mrf.mxu3 }
 0x165   : > { %v1125_v5 = vadd.f32 %v1119_v22, %v1085_v24 }
 0x167   : > { %v1165_v1 = vadd.f32 %v1159_v2, %v1125_v5  ;;  %v1287_v3 = vpop.f32.mrf.mxu0  ;;  %v1310_v40 = vpop.f32.mrf.mxu1  ;;  %v2210_v5 = vld [vmem:[%s2431_s11 + $0xb1] sm:$0xff]  ;;  %v2211_v2 = vld [vmem:[%s2431_s11 + $0xb9] sm:$0xf] }
 0x169   : > { %v2938_v27 = vadd.f32 %v1199_v6, %v1165_v1  ;;  %2194 = vmatmul.msk.bf16.vlgmr.msrb.gmra.mxu2 %vm213_vm2, %v2812_v11  ;;  %2196 = vmatmul.msk.bf16.vlgmr.msrb.gmra.mxu3 %vm213_vm2, %v2814_v33  ;;  %v2216_v1 = vld [vmem:[%s2431_s11 + $0xb2] sm:$0xff] }
 0x16a   : > { %2198 = vmatmul.msk.bf16.vlgmr.msrb.gmra.mxu0 %vm213_vm2, %v2816_v16  ;;  %2206 = vmatmul.msk.bf16.vlgmr.msrb.gmra.mxu1 %vm213_vm2, %v1676_v41  ;;  %v2222_v41 = vld [vmem:[%s2431_s11 + $0xb3] sm:$0xff] }
 0x16c   : > { %v1245_v43 = vpop.f32.mrf.mxu2  ;;  %v1264_v8 = vpop.f32.mrf.mxu3 }
 0x16d   : > { %v1246_v51 = vadd.f32 %v1245_v43, %v1226_v15 }
 0x16f   : > { %v1274_v44 = vadd.f32 %v1264_v8, %v1246_v51  ;;  %v1289_v45 = vpop.f32.mrf.mxu0  ;;  %v1312_v18 = vpop.f32.mrf.mxu1  ;;  %v2228_v8 = vld [vmem:[%s2431_s11 + $0xb4] sm:$0xff] }
 0x171   : > { %v1297_v14 = vadd.f32 %v1287_v3, %v1274_v44  ;;  %v2217_v3 = vld [vmem:[%s2431_s11 + $0xba] sm:$0xf] }
 0x172   : > { %v2229_v44 = vld [vmem:[%s2431_s11 + $0xbc] sm:$0xf] }
 0x173   : > { %v1320_v59 = vadd.f32 %v1310_v40, %v1297_v14  ;;  %v2223_v40 = vld [vmem:[%s2431_s11 + $0xbb] sm:$0xf]  ;;  %v1712_v14 = vpack.c.bf16 %v2211_v2, %v2210_v5 }
 0x174   : > { %v1247_v60 = vpop.f32.mrf.mxu2  ;;  %v1266_v61 = vpop.f32.mrf.mxu3 }
 0x175   : > { %v1248_v11 = vadd.f32 %v1247_v60, %v1228_v35  ;;  %v2227_v35 = vld [vmem:[%s2431_s11 + $0xac] sm:$0xff]  ;;  %v1747_v60 = vpack.c.bf16 %v2217_v3, %v2216_v1 }
 0x176   : > { %v1816_v56 = vpack.c.bf16 %v2227_v35, %v2226_v21 }
 0x177   : > { %v1275_v42 = vadd.f32 %v1266_v61, %v1248_v11  ;;  %v1292_v33 = vpop.f32.mrf.mxu0  ;;  %v1315_v16 = vpop.f32.mrf.mxu1  ;;  %v1817_v11 = vpack.c.bf16 %v2229_v44, %v2228_v8 }
 0x179   : > { %v1298_v7 = vadd.f32 %v1289_v45, %v1275_v42  ;;  %2195 = vmatmul.msk.bf16.gmra.mxu2 %vm213_vm2, %v2836_v55  ;;  %2197 = vmatmul.msk.bf16.gmra.mxu3 %vm213_vm2, %v2838_v31  ;;  %v2215_v31 = vld [vmem:[%s2431_s11 + $0xaa] sm:$0xff] }
 0x17a   : > { %2199 = vmatmul.msk.bf16.gmra.mxu0 %vm213_vm2, %v2840_v47  ;;  %2207 = vmatmul.msk.bf16.gmra.mxu1 %vm213_vm2, %v1677_v62  ;;  %v1746_v48 = vpack.c.bf16 %v2215_v31, %v2214_v32 }
 0x17b   : > { %v1321_v15 = vadd.f32 %v1312_v18, %v1298_v7 }
 0x17c   : > { %v1250_v28 = vpop.f32.mrf.mxu2  ;;  %v1269_v46 = vpop.f32.mrf.mxu3 }
 0x17d   : > { %v1251_v54 = vadd.f32 %v1250_v28, %v1231_v38 }
 0x17f   : > { %v1276_v24 = vadd.f32 %v1269_v46, %v1251_v54  ;;  %v1294_v25 = vpop.f32.mrf.mxu0  ;;  %v1317_v29 = vpop.f32.mrf.mxu1 }
 0x181   : > { %v1299_v55 = vadd.f32 %v1292_v33, %v1276_v24 }
 0x183   : > { %v1322_v0 = vadd.f32 %v1315_v16, %v1299_v55 }
 0x184   : > { %v1252_v47 = vpop.f32.mrf.mxu2  ;;  %v1271_v36 = vpop.f32.mrf.mxu3 }
 0x185   : > { %v1253_v23 = vadd.f32 %v1252_v47, %v1233_v13 }
 0x187   : > { %v1277_v38 = vadd.f32 %v1271_v36, %v1253_v23  ;;  %v1379_v50 = vpop.f32.mrf.mxu0  ;;  %v1402_v53 = vpop.f32.mrf.mxu1 }
 0x189   : > { %v1300_v57 = vadd.f32 %v1294_v25, %v1277_v38  ;;  %2212 = vmatmul.msk.bf16.vlgmr.msra.gmra.mxu2 %vm213_vm2, %v1711_v34  ;;  %2218 = vmatmul.msk.bf16.vlgmr.msra.gmra.mxu3 %vm213_vm2, %v1746_v48 }
 0x18a   : > { %2224 = vmatmul.msk.bf16.vlgmr.msra.gmra.mxu0 %vm213_vm2, %v1781_v37  ;;  %2230 = vmatmul.msk.bf16.vlgmr.msra.gmra.mxu1 %vm213_vm2, %v1816_v56 }
 0x18b   : > { %v1323_v4 = vadd.f32 %v1317_v29, %v1300_v57 }
 0x18c   : > { %v1333_v12 = vpop.f32.mrf.mxu2  ;;  %v1356_v6 = vpop.f32.mrf.mxu3 }
 0x18d   : > { %v1343_v58 = vadd.f32 %v1333_v12, %v1320_v59  ;;  %v1782_v59 = vpack.c.bf16 %v2223_v40, %v2222_v41 }
 0x18f   : > { %v1366_v13 = vadd.f32 %v1356_v6, %v1343_v58  ;;  %v1381_v22 = vpop.f32.mrf.mxu0  ;;  %v1404_v39 = vpop.f32.mrf.mxu1 }
 0x191   : > { %v1389_v30 = vadd.f32 %v1379_v50, %v1366_v13 }
 0x193   : > { %v1412_v43 = vadd.f32 %v1402_v53, %v1389_v30 }
 0x194   : > { %v1335_v51 = vpop.f32.mrf.mxu2  ;;  %v1358_v18 = vpop.f32.mrf.mxu3 }
 0x195   : > { %v1344_v45 = vadd.f32 %v1335_v51, %v1321_v15 }
 0x197   : > { %v1367_v9 = vadd.f32 %v1358_v18, %v1344_v45  ;;  %v1384_v10 = vpop.f32.mrf.mxu0  ;;  %v1407_v61 = vpop.f32.mrf.mxu1 }
 0x199   : > { %v1390_v42 = vadd.f32 %v1381_v22, %v1367_v9  ;;  %2213 = vmatmul.msk.bf16.gmra.mxu2 %vm213_vm2, %v1712_v14  ;;  %2219 = vmatmul.msk.bf16.gmra.mxu3 %vm213_vm2, %v1747_v60 }
 0x19a   : > { %2225 = vmatmul.msk.bf16.gmra.mxu0 %vm213_vm2, %v1782_v59  ;;  %2231 = vmatmul.msk.bf16.gmra.mxu1 %vm213_vm2, %v1817_v11 }
 0x19b   : > { %v1413_v33 = vadd.f32 %v1404_v39, %v1390_v42 }
 0x19c   : > { %v1338_v62 = vpop.f32.mrf.mxu2  ;;  %v1361_v7 = vpop.f32.mrf.mxu3 }
 0x19d   : > { %v1345_v16 = vadd.f32 %v1338_v62, %v1322_v0 }
 0x19f   : > { %v1368_v15 = vadd.f32 %v1361_v7, %v1345_v16  ;;  %v1386_v28 = vpop.f32.mrf.mxu0  ;;  %v1409_v54 = vpop.f32.mrf.mxu1 }
 0x1a1   : > { %v1391_v46 = vadd.f32 %v1384_v10, %v1368_v15 }
 0x1a3   : > { %v1414_v24 = vadd.f32 %v1407_v61, %v1391_v46 }
 0x1a4   : > { %v1340_v25 = vpop.f32.mrf.mxu2  ;;  %v1363_v55 = vpop.f32.mrf.mxu3 }
 0x1a5   : > { %v1346_v29 = vadd.f32 %v1340_v25, %v1323_v4 }
 0x1a7   : > { %v1369_v19 = vadd.f32 %v1363_v55, %v1346_v29  ;;  %v1471_v26 = vpop.f32.mrf.mxu0  ;;  %v1494_v32 = vpop.f32.mrf.mxu1 }
 0x1a9   : > { %v1392_v31 = vadd.f32 %v1386_v28, %v1369_v19 }
 0x1ab   : > { %v1415_v20 = vadd.f32 %v1409_v54, %v1392_v31 }
 0x1ac   : > { %v1425_v17 = vpop.f32.mrf.mxu2  ;;  %v1448_v21 = vpop.f32.mrf.mxu3 }
 0x1ad   : > { %v1435_v47 = vadd.f32 %v1425_v17, %v1412_v43 }
 0x1af   : > { %v1458_v35 = vadd.f32 %v1448_v21, %v1435_v47  ;;  %v1473_v23 = vpop.f32.mrf.mxu0  ;;  %v1496_v0 = vpop.f32.mrf.mxu1 }
 0x1b1   : > { %v1481_v36 = vadd.f32 %v1471_v26, %v1458_v35 }
 0x1b3   : > { %v1504_v34 = vadd.f32 %v1494_v32, %v1481_v36 }
 0x1b4   : > { %v1427_v48 = vpop.f32.mrf.mxu2  ;;  %v1450_v38 = vpop.f32.mrf.mxu3 }
 0x1b5   : > { %v1436_v37 = vadd.f32 %v1427_v48, %v1413_v33 }
 0x1b7   : > { %v1459_v50 = vadd.f32 %v1450_v38, %v1436_v37  ;;  %v1476_v56 = vpop.f32.mrf.mxu0  ;;  %v1499_v53 = vpop.f32.mrf.mxu1 }
 0x1b9   : > { %v1482_v57 = vadd.f32 %v1473_v23, %v1459_v50 }
 0x1bb   : > { %v1505_v4 = vadd.f32 %v1496_v0, %v1482_v57 }
 0x1bc   : > { %v1430_v12 = vpop.f32.mrf.mxu2  ;;  %v1453_v6 = vpop.f32.mrf.mxu3 }
 0x1bd   : > { %v1437_v58 = vadd.f32 %v1430_v12, %v1414_v24 }
 0x1bf   : > { %v1460_v13 = vadd.f32 %v1453_v6, %v1437_v58  ;;  %v1478_v22 = vpop.f32.mrf.mxu0  ;;  %v1501_v39 = vpop.f32.mrf.mxu1 }
 0x1c1   : > { %v1483_v30 = vadd.f32 %v1476_v56, %v1460_v13 }
 0x1c3   : > { %v1506_v5 = vadd.f32 %v1499_v53, %v1483_v30 }
 0x1c4   : > { %v1432_v2 = vpop.f32.mrf.mxu2  ;;  %v1455_v3 = vpop.f32.mrf.mxu3 }
 0x1c5   : > { %v1438_v1 = vadd.f32 %v1432_v2, %v1415_v20 }
 0x1c7   : > { %v1461_v41 = vadd.f32 %v1455_v3, %v1438_v1  ;;  %v1563_v40 = vpop.f32.mrf.mxu0  ;;  %v1586_v43 = vpop.f32.mrf.mxu1 }
 0x1c9   : > { %v1484_v51 = vadd.f32 %v1478_v22, %v1461_v41  ;;  %v2985_v41 = vld [vmem:[%s3026_s2] ss:$0 sm:$0xff] }
 0x1cb   : > { %v1507_v8 = vadd.f32 %v1501_v39, %v1484_v51 }
 0x1cc   : > { %v1517_v44 = vpop.f32.mrf.mxu2  ;;  %v1540_v45 = vpop.f32.mrf.mxu3 }
 0x1cd   : > { %v1527_v25 = vadd.f32 %v1517_v44, %v1504_v34 }
 0x1cf   : > { %v1565_v18 = vpop.f32.mrf.mxu0  ;;  %v1588_v14 = vpop.f32.mrf.mxu1  ;;  %v1550_v55 = vadd.f32 %v1540_v45, %v1527_v25 }
 0x1d1   : > { %v1573_v31 = vadd.f32 %v1563_v40, %v1550_v55 }
 0x1d3   : > { %v1596_v21 = vadd.f32 %v1586_v43, %v1573_v31 }
 0x1d4   : > { %v1519_v60 = vpop.f32.mrf.mxu2  ;;  %v1542_v59 = vpop.f32.mrf.mxu3 }
 0x1d5   : > { %v1528_v20 = vadd.f32 %v1519_v60, %v1505_v4 }
 0x1d7   : > { %v1568_v9 = vpop.f32.mrf.mxu0  ;;  %v1591_v10 = vpop.f32.mrf.mxu1  ;;  %v1551_v47 = vadd.f32 %v1542_v59, %v1528_v20 }
 0x1d9   : > { %v1574_v36 = vadd.f32 %v1565_v18, %v1551_v47 }
 0x1db   : > { %v1597_v56 = vadd.f32 %v1588_v14, %v1574_v36 }
 0x1dc   : > { %v1522_v11 = vpop.f32.mrf.mxu2  ;;  %v1545_v61 = vpop.f32.mrf.mxu3 }
 0x1dd   : > { %v1529_v48 = vadd.f32 %v1522_v11, %v1506_v5 }
 0x1df   : > { %v1570_v42 = vpop.f32.mrf.mxu0  ;;  %v1593_v33 = vpop.f32.mrf.mxu1  ;;  %v1552_v34 = vadd.f32 %v1545_v61, %v1529_v48  ;;  %v1211_v48 = vadd.f32 %v2985_v41, %v2934_v63 }
 0x1e1   : > { %v1575_v58 = vadd.f32 %v1568_v9, %v1552_v34 }
 0x1e3   : > { %v1598_v1 = vadd.f32 %v1591_v10, %v1575_v58 }
 0x1e4   : > { %v1524_v62 = vpop.f32.mrf.mxu2  ;;  %v1547_v16 = vpop.f32.mrf.mxu3 }
 0x1e5   : > { %v1530_v6 = vadd.f32 %v1524_v62, %v1507_v8  ;;  %v1209_v8 = vadd.f32 %v2985_v41, %v2922_v52 }
 0x1e7   : > { %v1655_v7 = vpop.f32.mrf.mxu0  ;;  %v1693_v15 = vpop.f32.mrf.mxu1  ;;  %v1553_v2 = vadd.f32 %v1547_v16, %v1530_v6  ;;  %v1213_v16 = vmax.f32 %v1209_v8, 0.0 }
 0x1e9   : > { %v1576_v44 = vadd.f32 %v1570_v42, %v1553_v2 }
 0x1eb   : > { %v1599_v10 = vadd.f32 %v1593_v33, %v1576_v44 }
 0x1ec   : > { %v1609_v28 = vpop.f32.mrf.mxu2  ;;  %v1632_v54 = vpop.f32.mrf.mxu3 }
 0x1ed   : > { %v1619_v23 = vadd.f32 %v1609_v28, %v1596_v21 }
 0x1ef   : > { %v1657_v46 = vpop.f32.mrf.mxu0  ;;  %v1695_v24 = vpop.f32.mrf.mxu1  ;;  %v1642_v38 = vadd.f32 %v1632_v54, %v1619_v23 }
 0x1f1   : > { %v1665_v57 = vadd.f32 %v1655_v7, %v1642_v38 }
 0x1f3   : > { %v1703_v22 = vadd.f32 %v1693_v15, %v1665_v57 }
 0x1f4   : > { %v1611_v29 = vpop.f32.mrf.mxu2  ;;  %v1634_v19 = vpop.f32.mrf.mxu3 }
 0x1f5   : > { %v1620_v12 = vadd.f32 %v1611_v29, %v1597_v56 }
 0x1f7   : > { %v1660_v26 = vpop.f32.mrf.mxu0  ;;  %v1698_v32 = vpop.f32.mrf.mxu1  ;;  %v1643_v13 = vadd.f32 %v1634_v19, %v1620_v12 }
 0x1f9   : > { %v1666_v40 = vadd.f32 %v1657_v46, %v1643_v13 }
 0x1fb   : > { %v1704_v60 = vadd.f32 %v1695_v24, %v1666_v40  ;;  %v1210_v24 = vadd.f32 %v2985_v41, %v2924_v49 }
 0x1fc   : > { %v1614_v17 = vpop.f32.mrf.mxu2  ;;  %v1637_v35 = vpop.f32.mrf.mxu3 }
 0x1fd   : > { %v1621_v43 = vadd.f32 %v1614_v17, %v1598_v1  ;;  %v1214_v17 = vmax.f32 %v1210_v24, 0.0 }
 0x1ff   : > { %v1662_v0 = vpop.f32.mrf.mxu0  ;;  %v2980_v37 = vpop.f32.mrf.mxu1  ;;  %v1644_v18 = vadd.f32 %v1637_v35, %v1621_v43 }
 0x201   : > { %v1667_v15 = vadd.f32 %v1660_v26, %v1644_v18 }
 0x203   : > { %v1705_v29 = vadd.f32 %v1698_v32, %v1667_v15 }
 0x204   : > { %v1616_v50 = vpop.f32.mrf.mxu2  ;;  %v1639_v53 = vpop.f32.mrf.mxu3 }
 0x205   : > { %v1622_v28 = vadd.f32 %v1616_v50, %v1599_v10 }
 0x207   : > { %v1798_v4 = vpop.f32.mrf.mxu0  ;;  %v1833_v39 = vpop.f32.mrf.mxu1  ;;  %v1645_v25 = vadd.f32 %v1639_v53, %v1622_v28  ;;  %v1215_v53 = vmax.f32 %v1211_v48, 0.0 }
 0x209   : > { %v1668_v47 = vadd.f32 %v1662_v0, %v1645_v25 }
 0x20b   : > { %v1706_v38 = vadd.f32 %v2980_v37, %v1668_v47  ;;  %v1212_v37 = vadd.f32 %v2985_v41, %v2938_v27 }
 0x20c   : > { %v1728_v30 = vpop.f32.mrf.mxu2  ;;  %v1763_v5 = vpop.f32.mrf.mxu3 }
 0x20d   : > { %v1738_v3 = vadd.f32 %v1728_v30, %v1703_v22 }
 0x20f   : > { %v1773_v51 = vadd.f32 %v1763_v5, %v1738_v3  ;;  %v1800_v59 = vpop.f32.mrf.mxu0  ;;  %v1835_v7 = vpop.f32.mrf.mxu1  ;;  %v1216_v3 = vmax.f32 %v1212_v37, 0.0 }
 0x211   : > { %v1808_v45 = vadd.f32 %v1798_v4, %v1773_v51 }
 0x213   : > { %v1843_v14 = vadd.f32 %v1833_v39, %v1808_v45 }
 0x214   : > { %v1730_v9 = vpop.f32.mrf.mxu2  ;;  %v1765_v62 = vpop.f32.mrf.mxu3 }
 0x215   : > { %v1847_v11 = vadd.f32 %v2985_v41, %v1843_v14  ;;  %v1739_v61 = vadd.f32 %v1730_v9, %v1704_v60 }
 0x217   : > { %v1851_v42 = vmax.f32 %v1847_v11, 0.0  ;;  %v1774_v54 = vadd.f32 %v1765_v62, %v1739_v61  ;;  %v1803_v20 = vpop.f32.mrf.mxu0  ;;  %v1838_v23 = vpop.f32.mrf.mxu1 }
 0x219   : > { %v1855_v46 = vmax.f32 %v1213_v16, %v1851_v42  ;;  %v1809_v52 = vadd.f32 %v1800_v59, %v1774_v54 }
 0x21b   : > { %1860 = vst.msk [vmem:[#allocation2] sm:$0xff] %vm1859_vm3, %v1855_v46  ;;  %v1844_v33 = vadd.f32 %v1835_v7, %v1809_v52 }
 0x21c   : > { %v1733_v55 = vpop.f32.mrf.mxu2  ;;  %v1768_v31 = vpop.f32.mrf.mxu3 }
 0x21d   : > { %v1848_v19 = vadd.f32 %v2985_v41, %v1844_v33  ;;  %v1740_v26 = vadd.f32 %v1733_v55, %v1705_v29 }
 0x21f   : > { %v1852_v21 = vmax.f32 %v1848_v19, 0.0  ;;  %v1775_v35 = vadd.f32 %v1768_v31, %v1740_v26  ;;  %v1805_v58 = vpop.f32.mrf.mxu0  ;;  %v1840_v63 = vpop.f32.mrf.mxu1 }
 0x221   : > { %v1856_v49 = vmax.f32 %v1214_v17, %v1852_v21  ;;  %v1810_v36 = vadd.f32 %v1803_v20, %v1775_v35 }
 0x223   : > { %1861 = vst.msk [vmem:[#allocation2 + $0x8] sm:$0xff] %vm1859_vm3, %v1856_v49  ;;  %v1845_v32 = vadd.f32 %v1838_v23, %v1810_v36 }
 0x224   : > { %v1735_v50 = vpop.f32.mrf.mxu2  ;;  %v1770_v56 = vpop.f32.mrf.mxu3 }
 0x225   : > { %v1849_v34 = vadd.f32 %v2985_v41, %v1845_v32  ;;  %v1741_v0 = vadd.f32 %v1735_v50, %v1706_v38 }
 0x227   : > { %v1853_v57 = vmax.f32 %v1849_v34, 0.0  ;;  %v1776_v12 = vadd.f32 %v1770_v56, %v1741_v0 }
 0x229   : > { %v1857_v6 = vmax.f32 %v1215_v53, %v1853_v57  ;;  %v1811_v4 = vadd.f32 %v1805_v58, %v1776_v12 }
 0x22a   : > { %v1865_v13 = vld [vmem:[#allocation2] ss:$2 sm:$0xff]  ;;  %v1869_v22 = vld [vmem:[#allocation2 + $0x1] ss:$2 sm:$0xff] }
 0x22b   : > { %1862 = vst.msk [vmem:[#allocation2 + $0x10] sm:$0xff] %vm1859_vm3, %v1857_v6  ;;  %v1846_v39 = vadd.f32 %v1840_v63, %v1811_v4  ;;  %v1872_v30 = vmax.f32 %v1865_v13, %v1869_v22 }
 0x22d   : > { %v1850_v2 = vadd.f32 %v2985_v41, %v1846_v39  ;;  %v1874_v1 = vpack.c.bf16 %v1872_v30, %v1872_v30 }
 0x22f   : > { %v1854_v5 = vmax.f32 %v1850_v2, 0.0  ;;  %1876 = vst.msk [vmem:[%s192_s22] sm:$0xf] %vm1863_vm4, %v1874_v1 }
 0x231   : > { %v1858_v40 = vmax.f32 %v1216_v3, %v1854_v5 }
 0x233   : > { %1864 = vst.msk [vmem:[#allocation2 + $0x18] sm:$0xf] %vm1863_vm4, %v1858_v40 }
 0x23a   : > { %v1867_v43 = vld [vmem:[#allocation2 + $0x10] ss:$2 sm:$0x3f]  ;;  %v1871_v51 = vld [vmem:[#allocation2 + $0x11] ss:$2 sm:$0x3f] }
 0x23b   : > { %v1873_v27 = vmax.f32 %v1867_v43, %v1871_v51 }
 0x23d   : > { %v1875_v44 = vpack.c.bf16 %v1873_v27, %v1873_v27 }
 0x23f   : > { %1878 = vst.msk [vmem:[%s192_s22 + $0x4] sm:$0x7] %vm1877_vm5, %v1875_v44 }
 0x240 PF: > { %s13_s16 = sadd.s32 1, %s2324_s16   ;;  %s3076_s12 = smov %s2316_s14 }
 0x241   : > { %p10_p7 = scmp.ge.s32.totalorder %s13_s16, 30   ;;  %s3077_s13 = smov %s2320_s15 }
 0x242   : > { %s3078_s14 = smov %s3081_s17  ;;  %s3079_s15 = smov %s3085_s18 }
 0x243   :  { %12 = sbr.rel (!%p10_p7) target bundleno = 3 (0x3), region = 95 }

// kernel: cnn_forward.8
= control target key start
LH: loop header
LB: loop body
LE: loop exit
PB: predicated region body
PF: predicated region fallthrough
CT: control target
= control target key end

     0   :  { %vm909_vm0 = vcmask 523264   ;;  %vm1180_vm1 = vcmask 949248   ;;  %s2852_s1 = inlined_call_operand.vmem [shape: bf16[576,500], index: 1, kind: input, shape index: {}]   ;;  %s2853_s0 = inlined_call_operand.vmem [shape: bf16[8,576], index: 0, kind: input, shape index: {}]   ;;  %s2854_s2 = inlined_call_operand.vmem [shape: f32[1,500], index: 2, kind: input, shape index: {}]   ;;  %s2855_s3 = inlined_call_operand.vmem [shape: f32[8,500], index: 3, kind: output, shape index: {}]  }
   0x1   :  { %v1300_v0 = vld [vmem:[%s2852_s1 + $0xe0] sm:$0xf]  ;;  %v1796_v1 = vld [vmem:[%s2852_s1 + $0xec] sm:$0xf0] }
   0x2   :  { %v1428_v2 = vld [vmem:[%s2852_s1 + $0x1e0] sm:$0xf]  ;;  %v1301_v3 = vor.u32 %v1796_v1, %v1300_v0  ;;  %v1828_v4 = vld [vmem:[%s2852_s1 + $0x1ec] sm:$0xf0] }
   0x3   :  { %v1556_v5 = vld [vmem:[%s2852_s1 + $0x2e0] sm:$0xf]  ;;  %v1860_v6 = vld [vmem:[%s2852_s1 + $0x2ec] sm:$0xf0]  ;;  %v1429_v7 = vor.u32 %v1828_v4, %v1428_v2 }
   0x4   :  { %v1557_v8 = vor.u32 %v1860_v6, %v1556_v5  ;;  %v1684_v9 = vld [vmem:[%s2852_s1 + $0x3e0] sm:$0xf]  ;;  %v1892_v10 = vld [vmem:[%s2852_s1 + $0x3ec] sm:$0xf0]  ;;  %913 = vmatpush.bf16.msra.mxu0 %v1301_v3 }
   0x5   :  { %v1284_v11 = vld [vmem:[%s2852_s1 + $0xc0] sm:$0xf]  ;;  %v1685_v12 = vor.u32 %v1892_v10, %v1684_v9  ;;  %v1792_v13 = vld [vmem:[%s2852_s1 + $0xcc] sm:$0xf0]  ;;  %926 = vmatpush.bf16.msra.mxu1 %v1429_v7 }
   0x6   :  { %v1412_v14 = vld [vmem:[%s2852_s1 + $0x1c0] sm:$0xf]  ;;  %v1824_v15 = vld [vmem:[%s2852_s1 + $0x1cc] sm:$0xf0]  ;;  %939 = vmatpush.bf16.msra.mxu2 %v1557_v8  ;;  %v1285_v16 = vor.u32 %v1792_v13, %v1284_v11 }
   0x7   :  { %v1413_v17 = vor.u32 %v1824_v15, %v1412_v14  ;;  %v1540_v18 = vld [vmem:[%s2852_s1 + $0x2c0] sm:$0xf]  ;;  %v1856_v19 = vld [vmem:[%s2852_s1 + $0x2cc] sm:$0xf0]  ;;  %952 = vmatpush.bf16.msra.mxu3 %v1685_v12 }
   0x8   :  { %v1668_v20 = vld [vmem:[%s2852_s1 + $0x3c0] sm:$0xf]  ;;  %v1541_v21 = vor.u32 %v1856_v19, %v1540_v18  ;;  %v1888_v22 = vld [vmem:[%s2852_s1 + $0x3cc] sm:$0xf0]  ;;  %914 = vmatpush.bf16.msra.mxu0 %v1285_v16 }
   0x9   :  { %v1268_v23 = vld [vmem:[%s2852_s1 + $0xa0] sm:$0xf]  ;;  %v1788_v24 = vld [vmem:[%s2852_s1 + $0xac] sm:$0xf0]  ;;  %v1669_v25 = vor.u32 %v1888_v22, %v1668_v20  ;;  %927 = vmatpush.bf16.msra.mxu1 %v1413_v17 }
   0xa   :  { %v1396_v26 = vld [vmem:[%s2852_s1 + $0x1a0] sm:$0xf]  ;;  %v1820_v27 = vld [vmem:[%s2852_s1 + $0x1ac] sm:$0xf0]  ;;  %v1269_v29 = vor.u32 %v1788_v24, %v1268_v23  ;;  %940 = vmatpush.bf16.msra.mxu2 %v1541_v21 }
   0xb   :  { %v1524_v28 = vld [vmem:[%s2852_s1 + $0x2a0] sm:$0xf]  ;;  %v1852_v30 = vld [vmem:[%s2852_s1 + $0x2ac] sm:$0xf0]  ;;  %v1397_v33 = vor.u32 %v1820_v27, %v1396_v26  ;;  %953 = vmatpush.bf16.msra.mxu3 %v1669_v25 }
   0xc   :  { %v1652_v31 = vld [vmem:[%s2852_s1 + $0x3a0] sm:$0xf]  ;;  %v1884_v32 = vld [vmem:[%s2852_s1 + $0x3ac] sm:$0xf0]  ;;  %v1525_v34 = vor.u32 %v1852_v30, %v1524_v28  ;;  %915 = vmatpush.bf16.msra.mxu0 %v1269_v29  ;;  %v1794_v30 = vld [vmem:[%s2852_s1 + $0xe4] sm:$0xf] }
   0xd   :  { %v1252_v35 = vld [vmem:[%s2852_s1 + $0x80] sm:$0xf]  ;;  %v1784_v36 = vld [vmem:[%s2852_s1 + $0x8c] sm:$0xf0]  ;;  %v1653_v38 = vor.u32 %v1884_v32, %v1652_v31  ;;  %928 = vmatpush.bf16.msra.mxu1 %v1397_v33  ;;  %v1302_v32 = vld [vmem:[%s2852_s1 + $0xf0] sm:$0xf0] }
   0xe   :  { %v1380_v37 = vld [vmem:[%s2852_s1 + $0x180] sm:$0xf]  ;;  %v1816_v39 = vld [vmem:[%s2852_s1 + $0x18c] sm:$0xf0]  ;;  %v1253_v44 = vor.u32 %v1784_v36, %v1252_v35  ;;  %941 = vmatpush.bf16.msra.mxu2 %v1525_v34  ;;  %v1826_v33 = vld [vmem:[%s2852_s1 + $0x1e4] sm:$0xf] }
   0xf   :  { %v1508_v40 = vld [vmem:[%s2852_s1 + $0x280] sm:$0xf]  ;;  %v1848_v41 = vld [vmem:[%s2852_s1 + $0x28c] sm:$0xf0]  ;;  %v1381_v45 = vor.u32 %v1816_v39, %v1380_v37  ;;  %954 = vmatpush.bf16.msra.mxu3 %v1653_v38  ;;  %v1430_v34 = vld [vmem:[%s2852_s1 + $0x1f0] sm:$0xf0] }
  0x10   :  { %v1636_v42 = vld [vmem:[%s2852_s1 + $0x380] sm:$0xf]  ;;  %v1880_v43 = vld [vmem:[%s2852_s1 + $0x38c] sm:$0xf0]  ;;  %v1509_v46 = vor.u32 %v1848_v41, %v1508_v40  ;;  %916 = vmatpush.bf16.msra.mxu0 %v1253_v44  ;;  %v1858_v37 = vld [vmem:[%s2852_s1 + $0x2e4] sm:$0xf] }
  0x11   :  { %v1236_v47 = vld [vmem:[%s2852_s1 + $0x60] sm:$0xf]  ;;  %v1780_v48 = vld [vmem:[%s2852_s1 + $0x6c] sm:$0xf0]  ;;  %v1637_v50 = vor.u32 %v1880_v43, %v1636_v42  ;;  %929 = vmatpush.bf16.msra.mxu1 %v1381_v45  ;;  %v1558_v38 = vld [vmem:[%s2852_s1 + $0x2f0] sm:$0xf0]  ;;  %v1305_v42 = vor.u32 %v1794_v30, %v1302_v32  ;;  %v1433_v43 = vor.u32 %v1826_v33, %v1430_v34 }
  0x12   :  { %v1364_v49 = vld [vmem:[%s2852_s1 + $0x160] sm:$0xf]  ;;  %v1812_v51 = vld [vmem:[%s2852_s1 + $0x16c] sm:$0xf0]  ;;  %v1237_v56 = vor.u32 %v1780_v48, %v1236_v47  ;;  %942 = vmatpush.bf16.msra.mxu2 %v1509_v46  ;;  %v1790_v46 = vld [vmem:[%s2852_s1 + $0xc4] sm:$0xf] }
  0x13   :  { %v1492_v52 = vld [vmem:[%s2852_s1 + $0x260] sm:$0xf]  ;;  %v1844_v53 = vld [vmem:[%s2852_s1 + $0x26c] sm:$0xf0]  ;;  %v1365_v57 = vor.u32 %v1812_v51, %v1364_v49  ;;  %955 = vmatpush.bf16.msra.mxu3 %v1637_v50  ;;  %v1561_v49 = vor.u32 %v1858_v37, %v1558_v38  ;;  %v1286_v50 = vld [vmem:[%s2852_s1 + $0xd0] sm:$0xf0] }
  0x14   :  { %v1620_v54 = vld [vmem:[%s2852_s1 + $0x360] sm:$0xf]  ;;  %v1876_v55 = vld [vmem:[%s2852_s1 + $0x36c] sm:$0xf0]  ;;  %v1493_v58 = vor.u32 %v1844_v53, %v1492_v52  ;;  %917 = vmatpush.bf16.msra.mxu0 %v1237_v56  ;;  %v1822_v51 = vld [vmem:[%s2852_s1 + $0x1c4] sm:$0xf] }
  0x15   :  { %v1220_v59 = vld [vmem:[%s2852_s1 + $0x40] sm:$0xf]  ;;  %v1776_v60 = vld [vmem:[%s2852_s1 + $0x4c] sm:$0xf0]  ;;  %v1621_v62 = vor.u32 %v1876_v55, %v1620_v54  ;;  %930 = vmatpush.bf16.msra.mxu1 %v1365_v57  ;;  %v1414_v52 = vld [vmem:[%s2852_s1 + $0x1d0] sm:$0xf0] }
  0x16   :  { %v1348_v61 = vld [vmem:[%s2852_s1 + $0x140] sm:$0xf]  ;;  %v1808_v63 = vld [vmem:[%s2852_s1 + $0x14c] sm:$0xf0]  ;;  %v1221_v4 = vor.u32 %v1776_v60, %v1220_v59  ;;  %943 = vmatpush.bf16.msra.mxu2 %v1493_v58  ;;  %v1854_v53 = vld [vmem:[%s2852_s1 + $0x2c4] sm:$0xf]  ;;  %v1289_v59 = vor.u32 %v1790_v46, %v1286_v50  ;;  %v1417_v60 = vor.u32 %v1822_v51, %v1414_v52 }
  0x17   :  { %v1476_v0 = vld [vmem:[%s2852_s1 + $0x240] sm:$0xf]  ;;  %v1840_v1 = vld [vmem:[%s2852_s1 + $0x24c] sm:$0xf0]  ;;  %v1349_v5 = vor.u32 %v1808_v63, %v1348_v61  ;;  %956 = vmatpush.bf16.msra.mxu3 %v1621_v62  ;;  %v1542_v54 = vld [vmem:[%s2852_s1 + $0x2d0] sm:$0xf0] }
  0x18   :  { %v1604_v2 = vld [vmem:[%s2852_s1 + $0x340] sm:$0xf]  ;;  %v1872_v3 = vld [vmem:[%s2852_s1 + $0x34c] sm:$0xf0]  ;;  %v1477_v6 = vor.u32 %v1840_v1, %v1476_v0  ;;  %918 = vmatpush.bf16.msra.mxu0 %v1221_v4  ;;  %v1786_v62 = vld [vmem:[%s2852_s1 + $0xa4] sm:$0xf]  ;;  %v1545_v0 = vor.u32 %v1854_v53, %v1542_v54 }
  0x19   :  { %v1204_v7 = vld [vmem:[%s2852_s1 + $0x20] sm:$0xf]  ;;  %v1772_v8 = vld [vmem:[%s2852_s1 + $0x2c] sm:$0xf0]  ;;  %v1605_v10 = vor.u32 %v1872_v3, %v1604_v2  ;;  %931 = vmatpush.bf16.msra.mxu1 %v1349_v5  ;;  %v1270_v63 = vld [vmem:[%s2852_s1 + $0xb0] sm:$0xf0] }
  0x1a   :  { %v1332_v9 = vld [vmem:[%s2852_s1 + $0x120] sm:$0xf]  ;;  %v1804_v11 = vld [vmem:[%s2852_s1 + $0x12c] sm:$0xf0]  ;;  %v1205_v16 = vor.u32 %v1772_v8, %v1204_v7  ;;  %944 = vmatpush.bf16.msra.mxu2 %v1477_v6  ;;  %v1818_v1 = vld [vmem:[%s2852_s1 + $0x1a4] sm:$0xf] }
  0x1b   :  { %v1460_v12 = vld [vmem:[%s2852_s1 + $0x220] sm:$0xf]  ;;  %v1836_v13 = vld [vmem:[%s2852_s1 + $0x22c] sm:$0xf0]  ;;  %v1333_v19 = vor.u32 %v1804_v11, %v1332_v9  ;;  %957 = vmatpush.bf16.msra.mxu3 %v1605_v10  ;;  %v1398_v2 = vld [vmem:[%s2852_s1 + $0x1b0] sm:$0xf0]  ;;  %v1273_v9 = vor.u32 %v1786_v62, %v1270_v63 }
  0x1c   :  { %v1588_v14 = vld [vmem:[%s2852_s1 + $0x320] sm:$0xf]  ;;  %v1868_v15 = vld [vmem:[%s2852_s1 + $0x32c] sm:$0xf0]  ;;  %v1461_v20 = vor.u32 %v1836_v13, %v1460_v12  ;;  %919 = vmatpush.bf16.msra.mxu0 %v1205_v16  ;;  %v16_v3 = vld [vmem:[%s2853_s0 + $0x8] sm:$0xff]  ;;  %v1401_v11 = vor.u32 %v1818_v1, %v1398_v2 }
  0x1d   :  { %v1188_v17 = vld [vmem:[%s2852_s1] sm:$0xf]  ;;  %v1768_v18 = vld [vmem:[%s2852_s1 + $0xc] sm:$0xf0]  ;;  %v1589_v24 = vor.u32 %v1868_v15, %v1588_v14  ;;  %932 = vmatpush.bf16.msra.mxu1 %v1333_v19  ;;  %v1850_v4 = vld [vmem:[%s2852_s1 + $0x2a4] sm:$0xf]  ;;  %v177_v6 = vunpack.c.l.b16 %v16_v3  ;;  %v178_v7 = vunpack.c.h.b16 %v16_v3 }
  0x1e   :  { %v1316_v21 = vld [vmem:[%s2852_s1 + $0x100] sm:$0xf]  ;;  %v1800_v22 = vld [vmem:[%s2852_s1 + $0x10c] sm:$0xf0]  ;;  %v1189_v31 = vor.u32 %v1768_v18, %v1188_v17  ;;  %945 = vmatpush.bf16.msra.mxu2 %v1461_v20  ;;  %v1526_v5 = vld [vmem:[%s2852_s1 + $0x2b0] sm:$0xf0] }
  0x1f   :  { %v1444_v23 = vld [vmem:[%s2852_s1 + $0x200] sm:$0xf]  ;;  %v1832_v25 = vld [vmem:[%s2852_s1 + $0x20c] sm:$0xf0]  ;;  %v1317_v35 = vor.u32 %v1800_v22, %v1316_v21  ;;  %958 = vmatpush.bf16.msra.mxu3 %v1589_v24  ;;  %v1782_v13 = vld [vmem:[%s2852_s1 + $0x84] sm:$0xf]  ;;  %v2218_v15 = vpack.c.b16 %v177_v6, %v177_v6  ;;  %v2220_v16 = vpack.c.b16 %v178_v7, %v178_v7  ;;  %v1529_v17 = vor.u32 %v1850_v4, %v1526_v5 }
  0x20   :  { %v1572_v26 = vld [vmem:[%s2852_s1 + $0x300] sm:$0xf]  ;;  %v1864_v27 = vld [vmem:[%s2852_s1 + $0x30c] sm:$0xf0]  ;;  %v1445_v36 = vor.u32 %v1832_v25, %v1444_v23  ;;  %920 = vmatpush.bf16.msra.mxu0 %v1189_v31  ;;  %v1254_v14 = vld [vmem:[%s2852_s1 + $0x90] sm:$0xf0] }
  0x21   :  { %v1748_v28 = vld [vmem:[%s2852_s1 + $0x460] sm:$0xf]  ;;  %v1908_v29 = vld [vmem:[%s2852_s1 + $0x46c] sm:$0xf0]  ;;  %v1573_v39 = vor.u32 %v1864_v27, %v1572_v26  ;;  %933 = vmatpush.bf16.msra.mxu1 %v1317_v35  ;;  %v1814_v18 = vld [vmem:[%s2852_s1 + $0x184] sm:$0xf]  ;;  %v1257_v26 = vor.u32 %v1782_v13, %v1254_v14 }
  0x22   :  { %v1749_v40 = vor.u32 %v1908_v29, %v1748_v28  ;;  %v15_v41 = vld [vmem:[%s2853_s0] sm:$0xff]  ;;  %v1904_v45 = vld [vmem:[%s2852_s1 + $0x44c] sm:$0xf0]  ;;  %946 = vmatpush.bf16.msra.mxu2 %v1445_v36  ;;  %v1382_v19 = vld [vmem:[%s2852_s1 + $0x190] sm:$0xf0] }
  0x23   :  { %v1732_v44 = vld [vmem:[%s2852_s1 + $0x440] sm:$0xf]  ;;  %v175_v47 = vunpack.c.l.b16 %v15_v41  ;;  %v176_v48 = vunpack.c.h.b16 %v15_v41  ;;  %959 = vmatpush.bf16.msra.mxu3 %v1573_v39  ;;  %v1900_v61 = vld [vmem:[%s2852_s1 + $0x42c] sm:$0xf0]  ;;  %v1846_v20 = vld [vmem:[%s2852_s1 + $0x284] sm:$0xf]  ;;  %v1385_v27 = vor.u32 %v1814_v18, %v1382_v19 }
  0x24   :  { %969 = vmatpush.bf16.msrb.mxu0 %v1749_v40  ;;  %v1733_v57 = vor.u32 %v1904_v45, %v1732_v44  ;;  %v1716_v58 = vld [vmem:[%s2852_s1 + $0x420] sm:$0xf]  ;;  %v1896_v12 = vld [vmem:[%s2852_s1 + $0x40c] sm:$0xf0]  ;;  %v1510_v21 = vld [vmem:[%s2852_s1 + $0x290] sm:$0xf0] }
  0x25   :  { %v2173_v55 = vpack.c.b16 %v175_v47, %v175_v47  ;;  %v2175_v56 = vpack.c.b16 %v176_v48, %v176_v48  ;;  %978 = vmatpush.bf16.msrb.mxu1 %v1305_v42  ;;  %v1717_v8 = vor.u32 %v1900_v61, %v1716_v58  ;;  %v1700_v10 = vld [vmem:[%s2852_s1 + $0x400] sm:$0xf]  ;;  %v1890_v22 = vld [vmem:[%s2852_s1 + $0x3e4] sm:$0xf]  ;;  %v1686_v23 = vld [vmem:[%s2852_s1 + $0x3f0] sm:$0xf0]  ;;  %947 = vmatmul.bf16.vlgmr.msra.gmra.mxu2 %v2218_v15 }
  0x26   :  { %991 = vmatpush.bf16.msrb.mxu2 %v1433_v43  ;;  %960 = vmatmul.bf16.vlgmr.msra.gmra.mxu3 %v2220_v16  ;;  %v1701_v24 = vor.u32 %v1896_v12, %v1700_v10  ;;  %v17_v25 = vld [vmem:[%s2853_s0 + $0x10] sm:$0xf]  ;;  %v1778_v28 = vld [vmem:[%s2852_s1 + $0x64] sm:$0xf]  ;;  %v1238_v29 = vld [vmem:[%s2852_s1 + $0x70] sm:$0xf0]  ;;  %v1513_v30 = vor.u32 %v1846_v20, %v1510_v21  ;;  %v1689_v31 = vor.u32 %v1890_v22, %v1686_v23 }
  0x27   :  { %1004 = vmatpush.bf16.msrb.mxu3 %v1561_v49  ;;  %921 = vmatmul.bf16.vlgmr.msra.gmra.mxu0 %v2173_v55  ;;  %v1810_v32 = vld [vmem:[%s2852_s1 + $0x164] sm:$0xf]  ;;  %v1366_v33 = vld [vmem:[%s2852_s1 + $0x170] sm:$0xf0]  ;;  %v179_v38 = vunpack.c.l.b16 %v17_v25  ;;  %v1241_v39 = vor.u32 %v1778_v28, %v1238_v29  ;;  %v1308_v18 = vld [vmem:[%s2852_s1 + $0xe8] sm:$0xf] }
  0x28   :  { %934 = vmatmul.bf16.vlgmr.msra.gmra.mxu1 %v2175_v56  ;;  %970 = vmatpush.bf16.msrb.mxu0 %v1733_v57  ;;  %v1842_v34 = vld [vmem:[%s2852_s1 + $0x264] sm:$0xf]  ;;  %v1494_v35 = vld [vmem:[%s2852_s1 + $0x270] sm:$0xf0]  ;;  %v1369_v40 = vor.u32 %v1810_v32, %v1366_v33  ;;  %v1797_v19 = vld [vmem:[%s2852_s1 + $0xf4] sm:$0xf0] }
  0x29   :  { %979 = vmatpush.bf16.msrb.mxu1 %v1289_v59  ;;  %v1886_v36 = vld [vmem:[%s2852_s1 + $0x3c4] sm:$0xf]  ;;  %v1670_v37 = vld [vmem:[%s2852_s1 + $0x3d0] sm:$0xf0]  ;;  %v1497_v43 = vor.u32 %v1842_v34, %v1494_v35  ;;  %v2293_v51 = vpack.c.b16 %v179_v38, %v179_v38  ;;  %v1436_v22 = vld [vmem:[%s2852_s1 + $0x1e8] sm:$0xf] }
  0x2a   :  { %992 = vmatpush.bf16.msrb.mxu2 %v1417_v60  ;;  %v1774_v41 = vld [vmem:[%s2852_s1 + $0x44] sm:$0xf]  ;;  %v1222_v42 = vld [vmem:[%s2852_s1 + $0x50] sm:$0xf0]  ;;  %v1673_v44 = vor.u32 %v1886_v36, %v1670_v37  ;;  %v1829_v23 = vld [vmem:[%s2852_s1 + $0x1f4] sm:$0xf0] }
  0x2b   :  { %1005 = vmatpush.bf16.msrb.mxu3 %v1545_v0  ;;  %v1806_v45 = vld [vmem:[%s2852_s1 + $0x144] sm:$0xf]  ;;  %v1350_v46 = vld [vmem:[%s2852_s1 + $0x150] sm:$0xf0]  ;;  %v1225_v52 = vor.u32 %v1774_v41, %v1222_v42  ;;  %v1292_v33 = vld [vmem:[%s2852_s1 + $0xc8] sm:$0xf] }
  0x2c   :  { %971 = vmatpush.bf16.msrb.mxu0 %v1717_v8  ;;  %v1838_v47 = vld [vmem:[%s2852_s1 + $0x244] sm:$0xf]  ;;  %v1478_v48 = vld [vmem:[%s2852_s1 + $0x250] sm:$0xf0]  ;;  %v1353_v53 = vor.u32 %v1806_v45, %v1350_v46  ;;  %v1793_v34 = vld [vmem:[%s2852_s1 + $0xd4] sm:$0xf0] }
  0x2d   :  { %980 = vmatpush.bf16.msrb.mxu1 %v1273_v9  ;;  %v1882_v49 = vld [vmem:[%s2852_s1 + $0x3a4] sm:$0xf]  ;;  %v1654_v50 = vld [vmem:[%s2852_s1 + $0x3b0] sm:$0xf0]  ;;  %v1481_v58 = vor.u32 %v1838_v47, %v1478_v48  ;;  %v1420_v35 = vld [vmem:[%s2852_s1 + $0x1c8] sm:$0xf] }
  0x2e   :  { %993 = vmatpush.bf16.msrb.mxu2 %v1401_v11  ;;  %v1770_v54 = vld [vmem:[%s2852_s1 + $0x24] sm:$0xf]  ;;  %v1206_v57 = vld [vmem:[%s2852_s1 + $0x30] sm:$0xf0]  ;;  %v1657_v59 = vor.u32 %v1882_v49, %v1654_v50  ;;  %v1825_v36 = vld [vmem:[%s2852_s1 + $0x1d4] sm:$0xf0] }
  0x2f   :  { %1006 = vmatpush.bf16.msrb.mxu3 %v1529_v17  ;;  %v1802_v60 = vld [vmem:[%s2852_s1 + $0x124] sm:$0xf]  ;;  %v1334_v61 = vld [vmem:[%s2852_s1 + $0x130] sm:$0xf0]  ;;  %v1209_v2 = vor.u32 %v1770_v54, %v1206_v57  ;;  %v1276_v45 = vld [vmem:[%s2852_s1 + $0xa8] sm:$0xf] }
  0x30   :  { %972 = vmatpush.bf16.msrb.mxu0 %v1701_v24  ;;  %v1834_v62 = vld [vmem:[%s2852_s1 + $0x224] sm:$0xf]  ;;  %v1462_v63 = vld [vmem:[%s2852_s1 + $0x230] sm:$0xf0]  ;;  %v1337_v3 = vor.u32 %v1802_v60, %v1334_v61  ;;  %v1789_v46 = vld [vmem:[%s2852_s1 + $0xb4] sm:$0xf0] }
  0x31   :  { %981 = vmatpush.bf16.msrb.mxu1 %v1257_v26  ;;  %v1878_v0 = vld [vmem:[%s2852_s1 + $0x384] sm:$0xf]  ;;  %v1638_v1 = vld [vmem:[%s2852_s1 + $0x390] sm:$0xf0]  ;;  %v1465_v7 = vor.u32 %v1834_v62, %v1462_v63  ;;  %v1404_v47 = vld [vmem:[%s2852_s1 + $0x1a8] sm:$0xf] }
  0x32   :  { %994 = vmatpush.bf16.msrb.mxu2 %v1385_v27  ;;  %v1766_v4 = vld [vmem:[%s2852_s1 + $0x4] sm:$0xf]  ;;  %v1190_v5 = vld [vmem:[%s2852_s1 + $0x10] sm:$0xf0]  ;;  %v1641_v8 = vor.u32 %v1878_v0, %v1638_v1  ;;  %v1309_v27 = vor.u32 %v1797_v19, %v1308_v18  ;;  %v1821_v48 = vld [vmem:[%s2852_s1 + $0x1b4] sm:$0xf0] }
  0x33   :  { %1007 = vmatpush.bf16.msrb.mxu3 %v1513_v30  ;;  %v1798_v6 = vld [vmem:[%s2852_s1 + $0x104] sm:$0xf]  ;;  %v1318_v9 = vld [vmem:[%s2852_s1 + $0x110] sm:$0xf0]  ;;  %v1193_v20 = vor.u32 %v1766_v4, %v1190_v5  ;;  %v1260_v60 = vld [vmem:[%s2852_s1 + $0x88] sm:$0xf] }
  0x34   :  { %1017 = vmatpush.bf16.msra.mxu0 %v1689_v31  ;;  %v1830_v10 = vld [vmem:[%s2852_s1 + $0x204] sm:$0xf]  ;;  %v1446_v11 = vld [vmem:[%s2852_s1 + $0x210] sm:$0xf0]  ;;  %v1321_v21 = vor.u32 %v1798_v6, %v1318_v9  ;;  %v1437_v31 = vor.u32 %v1829_v23, %v1436_v22  ;;  %v1785_v61 = vld [vmem:[%s2852_s1 + $0x94] sm:$0xf0] }
  0x35   :  { %982 = vmatpush.bf16.msrb.mxu1 %v1241_v39  ;;  %v1874_v12 = vld [vmem:[%s2852_s1 + $0x364] sm:$0xf]  ;;  %v1622_v13 = vld [vmem:[%s2852_s1 + $0x370] sm:$0xf0]  ;;  %v1449_v24 = vor.u32 %v1830_v10, %v1446_v11  ;;  %v1293_v39 = vor.u32 %v1793_v34, %v1292_v33  ;;  %v1388_v62 = vld [vmem:[%s2852_s1 + $0x188] sm:$0xf]  ;;  %v1261_v6 = vor.u32 %v1785_v61, %v1260_v60 }
  0x36   :  { %995 = vmatpush.bf16.msrb.mxu2 %v1369_v40  ;;  %v1906_v14 = vld [vmem:[%s2852_s1 + $0x464] sm:$0xf]  ;;  %v1750_v17 = vld [vmem:[%s2852_s1 + $0x470] sm:$0xf0]  ;;  %v1625_v25 = vor.u32 %v1874_v12, %v1622_v13  ;;  %v1817_v63 = vld [vmem:[%s2852_s1 + $0x194] sm:$0xf0] }
  0x37   :  { %1008 = vmatpush.bf16.msrb.mxu3 %v1497_v43  ;;  %1762 = vmatmul.msk.bf16.vlgmr.msrb.gmra.mxu0 %vm909_vm0, %v2293_v51  ;;  %v1753_v26 = vor.u32 %v1906_v14, %v1750_v17  ;;  %v1870_v28 = vld [vmem:[%s2852_s1 + $0x344] sm:$0xf]  ;;  %v1606_v29 = vld [vmem:[%s2852_s1 + $0x350] sm:$0xf0]  ;;  %v1421_v43 = vor.u32 %v1825_v36, %v1420_v35  ;;  %v1564_v0 = vld [vmem:[%s2852_s1 + $0x2e8] sm:$0xf] }
  0x38   :  { %1018 = vmatpush.bf16.msra.mxu0 %v1673_v44  ;;  %v1902_v30 = vld [vmem:[%s2852_s1 + $0x444] sm:$0xf]  ;;  %v1734_v32 = vld [vmem:[%s2852_s1 + $0x450] sm:$0xf0]  ;;  %v1609_v37 = vor.u32 %v1870_v28, %v1606_v29  ;;  %v1861_v1 = vld [vmem:[%s2852_s1 + $0x2f4] sm:$0xf0] }
  0x39   :  { %983 = vmatpush.bf16.msrb.mxu1 %v1225_v52  ;;  %v1737_v38 = vor.u32 %v1902_v30, %v1734_v32  ;;  %v1866_v40 = vld [vmem:[%s2852_s1 + $0x324] sm:$0xf]  ;;  %v1590_v41 = vld [vmem:[%s2852_s1 + $0x330] sm:$0xf0]  ;;  %v1893_v4 = vld [vmem:[%s2852_s1 + $0x3f4] sm:$0xf0] }
  0x3a   :  { %996 = vmatpush.bf16.msrb.mxu2 %v1353_v53  ;;  %v1898_v42 = vld [vmem:[%s2852_s1 + $0x424] sm:$0xf]  ;;  %v1718_v44 = vld [vmem:[%s2852_s1 + $0x430] sm:$0xf0]  ;;  %v1593_v49 = vor.u32 %v1866_v40, %v1590_v41  ;;  %v1277_v53 = vor.u32 %v1789_v46, %v1276_v45  ;;  %v1244_v9 = vld [vmem:[%s2852_s1 + $0x68] sm:$0xf] }
  0x3b   :  { %1009 = vmatpush.bf16.msrb.mxu3 %v1481_v58  ;;  %v1862_v50 = vld [vmem:[%s2852_s1 + $0x304] sm:$0xf]  ;;  %v1721_v52 = vor.u32 %v1898_v42, %v1718_v44  ;;  %v1574_v54 = vld [vmem:[%s2852_s1 + $0x310] sm:$0xf0]  ;;  %v1781_v10 = vld [vmem:[%s2852_s1 + $0x74] sm:$0xf0] }
  0x3c   :  { %1019 = vmatpush.bf16.msra.mxu0 %v1657_v59  ;;  %v1894_v57 = vld [vmem:[%s2852_s1 + $0x404] sm:$0xf]  ;;  %v1702_v58 = vld [vmem:[%s2852_s1 + $0x410] sm:$0xf0]  ;;  %v1405_v59 = vor.u32 %v1821_v48, %v1404_v47  ;;  %v1372_v11 = vld [vmem:[%s2852_s1 + $0x168] sm:$0xf] }
  0x3d   :  { %984 = vmatpush.bf16.msrb.mxu1 %v1209_v2  ;;  %v1577_v2 = vor.u32 %v1862_v50, %v1574_v54  ;;  %v1705_v5 = vor.u32 %v1894_v57, %v1702_v58  ;;  %v1813_v13 = vld [vmem:[%s2852_s1 + $0x174] sm:$0xf0]  ;;  %v1548_v14 = vld [vmem:[%s2852_s1 + $0x2c8] sm:$0xf] }
  0x3e   :  { %997 = vmatpush.bf16.msrb.mxu2 %v1337_v3  ;;  %v1692_v3 = vld [vmem:[%s2852_s1 + $0x3e8] sm:$0xf]  ;;  %v1857_v17 = vld [vmem:[%s2852_s1 + $0x2d4] sm:$0xf0] }
  0x3f   :  { %1010 = vmatpush.bf16.msrb.mxu3 %v1465_v7  ;;  %v1389_v7 = vor.u32 %v1817_v63, %v1388_v62  ;;  %v1693_v12 = vor.u32 %v1893_v4, %v1692_v3  ;;  %v1676_v18 = vld [vmem:[%s2852_s1 + $0x3c8] sm:$0xf]  ;;  %v1889_v19 = vld [vmem:[%s2852_s1 + $0x3d4] sm:$0xf0]  ;;  %v1549_v22 = vor.u32 %v1857_v17, %v1548_v14  ;;  %v1795_v62 = vld [vmem:[%s2852_s1 + $0xec] sm:$0xf] }
  0x40   :  { %1020 = vmatpush.bf16.msra.mxu0 %v1641_v8  ;;  %v1565_v8 = vor.u32 %v1861_v1, %v1564_v0  ;;  %v1228_v23 = vld [vmem:[%s2852_s1 + $0x48] sm:$0xf]  ;;  %v1853_v29 = vld [vmem:[%s2852_s1 + $0x2b4] sm:$0xf0]  ;;  %v1310_v63 = vld [vmem:[%s2852_s1 + $0xf8] sm:$0xf0] }
  0x41   :  { %985 = vmatpush.bf16.msrb.mxu1 %v1193_v20  ;;  %v1245_v20 = vor.u32 %v1781_v10, %v1244_v9  ;;  %v1532_v28 = vld [vmem:[%s2852_s1 + $0x2a8] sm:$0xf]  ;;  %v1773_v36 = vld [vmem:[%s2852_s1 + $0x34] sm:$0xf0] }
  0x42   :  { %998 = vmatpush.bf16.msrb.mxu2 %v1321_v21  ;;  %v1373_v21 = vor.u32 %v1813_v13, %v1372_v11  ;;  %v1660_v30 = vld [vmem:[%s2852_s1 + $0x3a8] sm:$0xf]  ;;  %v1533_v34 = vor.u32 %v1853_v29, %v1532_v28  ;;  %v1849_v41 = vld [vmem:[%s2852_s1 + $0x294] sm:$0xf0]  ;;  %v1791_v11 = vld [vmem:[%s2852_s1 + $0xcc] sm:$0xf] }
  0x43   :  { %1011 = vmatpush.bf16.msrb.mxu3 %v1449_v24  ;;  %v1777_v24 = vld [vmem:[%s2852_s1 + $0x54] sm:$0xf0]  ;;  %v1212_v35 = vld [vmem:[%s2852_s1 + $0x28] sm:$0xf] }
  0x44   :  { %1021 = vmatpush.bf16.msra.mxu0 %v1625_v25  ;;  %986 = vmatmul.bf16.vlgmr.msrb.gmra.mxu1 %v2173_v55  ;;  %v1356_v25 = vld [vmem:[%s2852_s1 + $0x148] sm:$0xf]  ;;  %v1229_v32 = vor.u32 %v1777_v24, %v1228_v23  ;;  %v1213_v44 = vor.u32 %v1773_v36, %v1212_v35  ;;  %v1769_v48 = vld [vmem:[%s2852_s1 + $0x14] sm:$0xf0] }
  0x45   :  { %1034 = vmatpush.bf16.msra.mxu1 %v1753_v26  ;;  %999 = vmatmul.bf16.vlgmr.msrb.gmra.mxu2 %v2175_v56  ;;  %v1677_v26 = vor.u32 %v1889_v19, %v1676_v18  ;;  %v1516_v40 = vld [vmem:[%s2852_s1 + $0x288] sm:$0xf]  ;;  %v1801_v50 = vld [vmem:[%s2852_s1 + $0x114] sm:$0xf0] }
  0x46   :  { %1043 = vmatpush.bf16.msra.mxu2 %v1309_v27  ;;  %1012 = vmatmul.bf16.vlgmr.msrb.gmra.mxu3 %v2218_v15  ;;  %v1809_v27 = vld [vmem:[%s2852_s1 + $0x154] sm:$0xf0]  ;;  %v1644_v42 = vld [vmem:[%s2852_s1 + $0x388] sm:$0xf]  ;;  %v1517_v47 = vor.u32 %v1849_v41, %v1516_v40  ;;  %v1438_v40 = vld [vmem:[%s2852_s1 + $0x1f8] sm:$0xf0] }
  0x47   :  { %1056 = vmatpush.bf16.msra.mxu3 %v1437_v31  ;;  %v1885_v31 = vld [vmem:[%s2852_s1 + $0x3b4] sm:$0xf0]  ;;  %v1357_v33 = vor.u32 %v1809_v27, %v1356_v25  ;;  %v1196_v45 = vld [vmem:[%s2852_s1 + $0x8] sm:$0xf]  ;;  %v1787_v25 = vld [vmem:[%s2852_s1 + $0xac] sm:$0xf] }
  0x48   :  { %1022 = vmatpush.bf16.msra.mxu0 %v1609_v37  ;;  %v1340_v37 = vld [vmem:[%s2852_s1 + $0x128] sm:$0xf]  ;;  %v1845_v54 = vld [vmem:[%s2852_s1 + $0x274] sm:$0xf0]  ;;  %v1197_v61 = vor.u32 %v1769_v48, %v1196_v45  ;;  %v1859_v41 = vld [vmem:[%s2852_s1 + $0x2ec] sm:$0xf] }
  0x49   :  { %1035 = vmatpush.bf16.msra.mxu1 %v1737_v38  ;;  %v1661_v38 = vor.u32 %v1885_v31, %v1660_v30  ;;  %v1628_v57 = vld [vmem:[%s2852_s1 + $0x368] sm:$0xf]  ;;  %v1877_v58 = vld [vmem:[%s2852_s1 + $0x374] sm:$0xf0]  ;;  %v1694_v45 = vld [vmem:[%s2852_s1 + $0x3f8] sm:$0xf0] }
  0x4a   :  { %1044 = vmatpush.bf16.msra.mxu2 %v1293_v39  ;;  %v1805_v39 = vld [vmem:[%s2852_s1 + $0x134] sm:$0xf0]  ;;  %v1484_v4 = vld [vmem:[%s2852_s1 + $0x248] sm:$0xf] }
  0x4b   :  { %1057 = vmatpush.bf16.msra.mxu3 %v1421_v43  ;;  %v1881_v43 = vld [vmem:[%s2852_s1 + $0x394] sm:$0xf0]  ;;  %v1341_v46 = vor.u32 %v1805_v39, %v1340_v37  ;;  %v1740_v9 = vld [vmem:[%s2852_s1 + $0x448] sm:$0xf]  ;;  %v1783_v37 = vld [vmem:[%s2852_s1 + $0x8c] sm:$0xf] }
  0x4c   :  { %1023 = vmatpush.bf16.msra.mxu0 %v1593_v49  ;;  %v1324_v49 = vld [vmem:[%s2852_s1 + $0x108] sm:$0xf]  ;;  %v1909_v60 = vld [vmem:[%s2852_s1 + $0x474] sm:$0xf0]  ;;  %v1827_v39 = vld [vmem:[%s2852_s1 + $0x1ec] sm:$0xf] }
  0x4d   :  { %1036 = vmatpush.bf16.msra.mxu1 %v1721_v52  ;;  %v1645_v52 = vor.u32 %v1881_v43, %v1644_v42  ;;  %v1325_v0 = vor.u32 %v1801_v50, %v1324_v49  ;;  %v1905_v10 = vld [vmem:[%s2852_s1 + $0x454] sm:$0xf0]  ;;  %v1468_v18 = vld [vmem:[%s2852_s1 + $0x228] sm:$0xf]  ;;  %v1566_v43 = vld [vmem:[%s2852_s1 + $0x2f8] sm:$0xf0]  ;;  %v1441_v49 = vor.u32 %v1827_v39, %v1438_v40 }
  0x4e   :  { %1045 = vmatpush.bf16.msra.mxu2 %v1277_v53  ;;  %v1500_v53 = vld [vmem:[%s2852_s1 + $0x268] sm:$0xf]  ;;  %v1741_v17 = vor.u32 %v1905_v10, %v1740_v9  ;;  %v1837_v19 = vld [vmem:[%s2852_s1 + $0x234] sm:$0xf0]  ;;  %v1779_v50 = vld [vmem:[%s2852_s1 + $0x6c] sm:$0xf] }
  0x4f   :  { %1058 = vmatpush.bf16.msra.mxu3 %v1405_v59  ;;  %v1756_v59 = vld [vmem:[%s2852_s1 + $0x468] sm:$0xf]  ;;  %v1501_v1 = vor.u32 %v1845_v54, %v1500_v53  ;;  %v1901_v24 = vld [vmem:[%s2852_s1 + $0x434] sm:$0xf0]  ;;  %v1469_v27 = vor.u32 %v1837_v19, %v1468_v18  ;;  %v1569_v53 = vor.u32 %v1859_v41, %v1566_v43  ;;  %v1883_v9 = vld [vmem:[%s2852_s1 + $0x3ac] sm:$0xf] }
  0x50   :  { %1024 = vmatpush.bf16.msra.mxu0 %v1577_v2  ;;  %v1629_v2 = vor.u32 %v1877_v58, %v1628_v57  ;;  %v1757_v3 = vor.u32 %v1909_v60, %v1756_v59  ;;  %v1724_v23 = vld [vmem:[%s2852_s1 + $0x428] sm:$0xf]  ;;  %v1833_v29 = vld [vmem:[%s2852_s1 + $0x214] sm:$0xf0]  ;;  %v1823_v57 = vld [vmem:[%s2852_s1 + $0x1cc] sm:$0xf] }
  0x51   :  { %1037 = vmatpush.bf16.msra.mxu1 %v1705_v5  ;;  %v1841_v5 = vld [vmem:[%s2852_s1 + $0x254] sm:$0xf0]  ;;  %v1452_v28 = vld [vmem:[%s2852_s1 + $0x208] sm:$0xf]  ;;  %v1725_v31 = vor.u32 %v1901_v24, %v1724_v23  ;;  %v1422_v58 = vld [vmem:[%s2852_s1 + $0x1d8] sm:$0xf0] }
  0x52   :  { %1046 = vmatpush.bf16.msra.mxu2 %v1261_v6  ;;  %v1612_v6 = vld [vmem:[%s2852_s1 + $0x348] sm:$0xf]  ;;  %v1485_v13 = vor.u32 %v1841_v5, %v1484_v4  ;;  %v1897_v36 = vld [vmem:[%s2852_s1 + $0x414] sm:$0xf0]  ;;  %v1453_v42 = vor.u32 %v1833_v29, %v1452_v28  ;;  %v1855_v59 = vld [vmem:[%s2852_s1 + $0x2cc] sm:$0xf] }
  0x53   :  { %1059 = vmatpush.bf16.msra.mxu3 %v1389_v7  ;;  %1025 = vmatmul.bf16.vlgmr.msra.gmra.mxu0 %v2220_v16  ;;  %v1313_v7 = vor.u32 %v1795_v62, %v1310_v63  ;;  %v1550_v60 = vld [vmem:[%s2852_s1 + $0x2d8] sm:$0xf0]  ;;  %v1819_v5 = vld [vmem:[%s2852_s1 + $0x1ac] sm:$0xf] }
  0x54   :  { %1069 = vmatpush.bf16.msrb.mxu0 %v1565_v8  ;;  %1763 = vmatmul.msk.bf16.vlgmr.msra.gmra.mxu1 %vm909_vm0, %v2293_v51  ;;  %v1873_v8 = vld [vmem:[%s2852_s1 + $0x354] sm:$0xf0]  ;;  %v1678_v62 = vld [vmem:[%s2852_s1 + $0x3d8] sm:$0xf0]  ;;  %v1815_v19 = vld [vmem:[%s2852_s1 + $0x18c] sm:$0xf] }
  0x55   :  { %1082 = vmatpush.bf16.msrb.mxu1 %v1693_v12  ;;  %v1294_v12 = vld [vmem:[%s2852_s1 + $0xd8] sm:$0xf0]  ;;  %v1613_v14 = vor.u32 %v1873_v8, %v1612_v6  ;;  %v1879_v23 = vld [vmem:[%s2852_s1 + $0x38c] sm:$0xf] }
  0x56   :  { %1047 = vmatpush.bf16.msra.mxu2 %v1245_v20  ;;  %v1596_v20 = vld [vmem:[%s2852_s1 + $0x328] sm:$0xf]  ;;  %v1406_v6 = vld [vmem:[%s2852_s1 + $0x1b8] sm:$0xf0]  ;;  %v1807_v43 = vld [vmem:[%s2852_s1 + $0x14c] sm:$0xf] }
  0x57   :  { %1060 = vmatpush.bf16.msra.mxu3 %v1373_v21  ;;  %v1297_v21 = vor.u32 %v1791_v11, %v1294_v12  ;;  %v1534_v8 = vld [vmem:[%s2852_s1 + $0x2b8] sm:$0xf0]  ;;  %v1409_v12 = vor.u32 %v1819_v5, %v1406_v6  ;;  %v1799_v6 = vld [vmem:[%s2852_s1 + $0x10c] sm:$0xf] }
  0x58   :  { %1070 = vmatpush.bf16.msrb.mxu0 %v1549_v22  ;;  %v1869_v22 = vld [vmem:[%s2852_s1 + $0x334] sm:$0xf0]  ;;  %v1662_v10 = vld [vmem:[%s2852_s1 + $0x3b8] sm:$0xf0] }
  0x59   :  { %1083 = vmatpush.bf16.msrb.mxu1 %v1677_v26  ;;  %v1278_v26 = vld [vmem:[%s2852_s1 + $0xb8] sm:$0xf0]  ;;  %v1597_v30 = vor.u32 %v1869_v22, %v1596_v20  ;;  %v1665_v18 = vor.u32 %v1883_v9, %v1662_v10  ;;  %v1863_v10 = vld [vmem:[%s2852_s1 + $0x30c] sm:$0xf] }
  0x5a   :  { %1048 = vmatpush.bf16.msra.mxu2 %v1229_v32  ;;  %v1580_v32 = vld [vmem:[%s2852_s1 + $0x308] sm:$0xf]  ;;  %v1281_v35 = vor.u32 %v1787_v25, %v1278_v26  ;;  %v1390_v20 = vld [vmem:[%s2852_s1 + $0x198] sm:$0xf0] }
  0x5b   :  { %1061 = vmatpush.bf16.msra.mxu3 %v1357_v33  ;;  %v1865_v33 = vld [vmem:[%s2852_s1 + $0x314] sm:$0xf0]  ;;  %v1518_v22 = vld [vmem:[%s2852_s1 + $0x298] sm:$0xf0]  ;;  %v1393_v26 = vor.u32 %v1815_v19, %v1390_v20  ;;  %v162_v20 = vld [vmem:[%s2854_s2] sm:$0xf] }
  0x5c   :  { %1071 = vmatpush.bf16.msrb.mxu0 %v1533_v34  ;;  %v1708_v34 = vld [vmem:[%s2852_s1 + $0x408] sm:$0xf]  ;;  %v1646_v24 = vld [vmem:[%s2852_s1 + $0x398] sm:$0xf0] }
  0x5d   :  { %1084 = vmatpush.bf16.msrb.mxu1 %v1661_v38  ;;  %v1262_v38 = vld [vmem:[%s2852_s1 + $0x98] sm:$0xf0] }
  0x5e   :  { %1049 = vmatpush.bf16.msra.mxu2 %v1213_v44  ;;  %v1891_v44 = vld [vmem:[%s2852_s1 + $0x3ec] sm:$0xf]  ;;  %v1265_v48 = vor.u32 %v1783_v37, %v1262_v38  ;;  %v1198_v28 = vld [vmem:[%s2852_s1 + $0x18] sm:$0xf0] }
  0x5f   :  { %1062 = vmatpush.bf16.msra.mxu3 %v1341_v46  ;;  %v1581_v46 = vor.u32 %v1865_v33, %v1580_v32  ;;  %v1697_v54 = vor.u32 %v1891_v44, %v1694_v45  ;;  %v1374_v32 = vld [vmem:[%s2852_s1 + $0x178] sm:$0xf0]  ;;  %v1843_v33 = vld [vmem:[%s2852_s1 + $0x26c] sm:$0xf] }
  0x60   :  { %1072 = vmatpush.bf16.msrb.mxu0 %v1517_v47  ;;  %v1709_v47 = vor.u32 %v1897_v36, %v1708_v34  ;;  %v1502_v34 = vld [vmem:[%s2852_s1 + $0x278] sm:$0xf0]  ;;  %v1907_v37 = vld [vmem:[%s2852_s1 + $0x46c] sm:$0xf] }
  0x61   :  { %1085 = vmatpush.bf16.msrb.mxu1 %v1645_v52  ;;  %v1246_v52 = vld [vmem:[%s2852_s1 + $0x78] sm:$0xf0]  ;;  %v1505_v41 = vor.u32 %v1843_v33, %v1502_v34  ;;  %v1839_v45 = vld [vmem:[%s2852_s1 + $0x24c] sm:$0xf]  ;;  %v165_v34 = vperm.slane %v162_v20, 1 }
  0x62   :  { %1050 = vmatpush.bf16.msra.mxu2 %v1197_v61  ;;  %v1887_v61 = vld [vmem:[%s2852_s1 + $0x3cc] sm:$0xf]  ;;  %v1249_v63 = vor.u32 %v1779_v50, %v1246_v52  ;;  %v1630_v36 = vld [vmem:[%s2852_s1 + $0x378] sm:$0xf0] }
  0x63   :  { %1063 = vmatpush.bf16.msra.mxu3 %v1325_v0  ;;  %v1425_v0 = vor.u32 %v1823_v57, %v1422_v58  ;;  %v1681_v4 = vor.u32 %v1887_v61, %v1678_v62  ;;  %v1758_v38 = vld [vmem:[%s2852_s1 + $0x478] sm:$0xf0]  ;;  %v1903_v50 = vld [vmem:[%s2852_s1 + $0x44c] sm:$0xf] }
  0x64   :  { %1073 = vmatpush.bf16.msrb.mxu0 %v1501_v1  ;;  %v1775_v1 = vld [vmem:[%s2852_s1 + $0x4c] sm:$0xf]  ;;  %v1358_v44 = vld [vmem:[%s2852_s1 + $0x158] sm:$0xf0] }
  0x65   :  { %1086 = vmatpush.bf16.msrb.mxu1 %v1629_v2  ;;  %1051 = vmatmul.bf16.vlgmr.msra.gmra.mxu2 %v2173_v55  ;;  %v1230_v2 = vld [vmem:[%s2852_s1 + $0x58] sm:$0xf0]  ;;  %v1803_v58 = vld [vmem:[%s2852_s1 + $0x12c] sm:$0xf] }
  0x66   :  { %1099 = vmatpush.bf16.msrb.mxu2 %v1757_v3  ;;  %1064 = vmatmul.bf16.vlgmr.msra.gmra.mxu3 %v2175_v56  ;;  %v1553_v3 = vor.u32 %v1855_v59, %v1550_v60  ;;  %v1233_v11 = vor.u32 %v1775_v1, %v1230_v2  ;;  %v1742_v52 = vld [vmem:[%s2852_s1 + $0x458] sm:$0xf0]  ;;  %v1835_v60 = vld [vmem:[%s2852_s1 + $0x22c] sm:$0xf] }
  0x67   :  { %1108 = vmatpush.bf16.msrb.mxu3 %v1313_v7  ;;  %v1851_v7 = vld [vmem:[%s2852_s1 + $0x2ac] sm:$0xf]  ;;  %v1342_v59 = vld [vmem:[%s2852_s1 + $0x138] sm:$0xf0]  ;;  %v1745_v61 = vor.u32 %v1903_v50, %v1742_v52  ;;  %v166_v52 = vperm.slane %v162_v20, 2 }
  0x68   :  { %1074 = vmatpush.bf16.msrb.mxu0 %v1485_v13  ;;  %v1771_v13 = vld [vmem:[%s2852_s1 + $0x2c] sm:$0xf]  ;;  %v1470_v62 = vld [vmem:[%s2852_s1 + $0x238] sm:$0xf0] }
  0x69   :  { %1087 = vmatpush.bf16.msrb.mxu1 %v1613_v14  ;;  %v1214_v14 = vld [vmem:[%s2852_s1 + $0x38] sm:$0xf0]  ;;  %v1899_v1 = vld [vmem:[%s2852_s1 + $0x42c] sm:$0xf] }
  0x6a   :  { %1100 = vmatpush.bf16.msrb.mxu2 %v1741_v17  ;;  %v1537_v17 = vor.u32 %v1851_v7, %v1534_v8  ;;  %v1217_v25 = vor.u32 %v1771_v13, %v1214_v14  ;;  %v1726_v2 = vld [vmem:[%s2852_s1 + $0x438] sm:$0xf0]  ;;  %v1831_v7 = vld [vmem:[%s2852_s1 + $0x20c] sm:$0xf] }
  0x6b   :  { %1109 = vmatpush.bf16.msrb.mxu3 %v1297_v21  ;;  %v1847_v21 = vld [vmem:[%s2852_s1 + $0x28c] sm:$0xf]  ;;  %v1729_v8 = vor.u32 %v1899_v1, %v1726_v2  ;;  %v1454_v9 = vld [vmem:[%s2852_s1 + $0x218] sm:$0xf0] }
  0x6c   :  { %1075 = vmatpush.bf16.msrb.mxu0 %v1469_v27  ;;  %v1767_v27 = vld [vmem:[%s2852_s1 + $0xc] sm:$0xf]  ;;  %v1521_v29 = vor.u32 %v1847_v21, %v1518_v22  ;;  %v1710_v13 = vld [vmem:[%s2852_s1 + $0x418] sm:$0xf0]  ;;  %v164_v21 = vperm.slane %v162_v20, 0 }
  0x6d   :  { %1088 = vmatpush.bf16.msrb.mxu1 %v1597_v30  ;;  %v1649_v30 = vor.u32 %v1879_v23, %v1646_v24  ;;  %v1201_v39 = vor.u32 %v1767_v27, %v1198_v28 }
  0x6e   :  { %1101 = vmatpush.bf16.msrb.mxu2 %v1725_v31  ;;  %v1811_v31 = vld [vmem:[%s2852_s1 + $0x16c] sm:$0xf] }
  0x6f   :  { %1110 = vmatpush.bf16.msrb.mxu3 %v1281_v35  ;;  %v1875_v35 = vld [vmem:[%s2852_s1 + $0x36c] sm:$0xf]  ;;  %v1377_v40 = vor.u32 %v1811_v31, %v1374_v32 }
  0x70   :  { %1076 = vmatpush.bf16.msrb.mxu0 %v1453_v42  ;;  %v1633_v42 = vor.u32 %v1875_v35, %v1630_v36 }
  0x71   :  { %1089 = vmatpush.bf16.msrb.mxu1 %v1581_v46  ;;  %v1761_v46 = vor.u32 %v1907_v37, %v1758_v38 }
  0x72   :  { %1102 = vmatpush.bf16.msrb.mxu2 %v1709_v47  ;;  %v1486_v47 = vld [vmem:[%s2852_s1 + $0x258] sm:$0xf0] }
  0x73   :  { %1111 = vmatpush.bf16.msrb.mxu3 %v1265_v48  ;;  %1077 = vmatmul.bf16.vlgmr.msrb.gmra.mxu0 %v2218_v15  ;;  %v1871_v48 = vld [vmem:[%s2852_s1 + $0x34c] sm:$0xf] }
  0x74   :  { %1121 = vmatpush.bf16.msra.mxu0 %v1441_v49  ;;  %1090 = vmatmul.bf16.vlgmr.msrb.gmra.mxu1 %v2220_v16  ;;  %v1614_v49 = vld [vmem:[%s2852_s1 + $0x358] sm:$0xf0] }
  0x75   :  { %1134 = vmatpush.bf16.msra.mxu1 %v1569_v53  ;;  %1764 = vmatmul.msk.bf16.vlgmr.msrb.gmra.mxu2 %vm909_vm0, %v2293_v51  ;;  %v1361_v53 = vor.u32 %v1807_v43, %v1358_v44  ;;  %v1617_v57 = vor.u32 %v1871_v48, %v1614_v49 }
  0x76   :  { %1147 = vmatpush.bf16.msra.mxu2 %v1697_v54  ;;  %v1489_v54 = vor.u32 %v1839_v45, %v1486_v47 }
  0x77   :  { %1112 = vmatpush.bf16.msrb.mxu3 %v1249_v63  ;;  %v1867_v63 = vld [vmem:[%s2852_s1 + $0x32c] sm:$0xf] }
  0x78   :  { %1122 = vmatpush.bf16.msra.mxu0 %v1425_v0  ;;  %v1598_v0 = vld [vmem:[%s2852_s1 + $0x338] sm:$0xf0] }
  0x79   :  { %1135 = vmatpush.bf16.msra.mxu1 %v1553_v3  ;;  %v1345_v3 = vor.u32 %v1803_v58, %v1342_v59  ;;  %v1601_v5 = vor.u32 %v1867_v63, %v1598_v0 }
  0x7a   :  { %1148 = vmatpush.bf16.msra.mxu2 %v1681_v4  ;;  %v1473_v4 = vor.u32 %v1835_v60, %v1470_v62 }
  0x7b   :  { %1113 = vmatpush.bf16.msrb.mxu3 %v1233_v11  ;;  %v1582_v11 = vld [vmem:[%s2852_s1 + $0x318] sm:$0xf0] }
  0x7c   :  { %1123 = vmatpush.bf16.msra.mxu0 %v1409_v12  ;;  %v1895_v12 = vld [vmem:[%s2852_s1 + $0x40c] sm:$0xf] }
  0x7d   :  { %1136 = vmatpush.bf16.msra.mxu1 %v1537_v17  ;;  %v1457_v17 = vor.u32 %v1831_v7, %v1454_v9  ;;  %v1713_v19 = vor.u32 %v1895_v12, %v1710_v13  ;;  %v167_v7 = vperm.slane %v162_v20, 3 }
  0x7e   :  { %1149 = vmatpush.bf16.msra.mxu2 %v1665_v18  ;;  %v1585_v18 = vor.u32 %v1863_v10, %v1582_v11 }
  0x7f   :  { %1114 = vmatpush.bf16.msrb.mxu3 %v1217_v25 }
  0x80   :  { %1124 = vmatpush.bf16.msra.mxu0 %v1393_v26 }
  0x81   :  { %1137 = vmatpush.bf16.msra.mxu1 %v1521_v29 }
  0x82   :  { %1150 = vmatpush.bf16.msra.mxu2 %v1649_v30 }
  0x83   :  { %1115 = vmatpush.bf16.msrb.mxu3 %v1201_v39 }
  0x84   :  { %1125 = vmatpush.bf16.msra.mxu0 %v1377_v40 }
  0x85   :  { %1138 = vmatpush.bf16.msra.mxu1 %v1505_v41 }
  0x86   :  { %1151 = vmatpush.bf16.msra.mxu2 %v1633_v42  ;;  %1116 = vmatmul.bf16.vlgmr.msrb.gmra.mxu3 %v2173_v55  ;;  %v1326_v55 = vld [vmem:[%s2852_s1 + $0x118] sm:$0xf0] }
  0x87   :  { %1164 = vmatpush.bf16.msra.mxu3 %v1761_v46  ;;  %v1329_v14 = vor.u32 %v1799_v6, %v1326_v55 }
  0x88   :  { %1126 = vmatpush.bf16.msra.mxu0 %v1361_v53 }
  0x89   :  { %1139 = vmatpush.bf16.msra.mxu1 %v1489_v54 }
  0x8a   :  { %1152 = vmatpush.bf16.msra.mxu2 %v1617_v57 }
  0x8b   :  { %1165 = vmatpush.bf16.msra.mxu3 %v1745_v61 }
  0x8c   :  { %1127 = vmatpush.bf16.msra.mxu0 %v1345_v3 }
  0x8d   :  { %1140 = vmatpush.bf16.msra.mxu1 %v1473_v4 }
  0x8e   :  { %1153 = vmatpush.bf16.msra.mxu2 %v1601_v5 }
  0x8f   :  { %1166 = vmatpush.bf16.msra.mxu3 %v1729_v8 }
  0x90   :  { %1128 = vmatpush.bf16.msra.mxu0 %v1329_v14 }
  0x91   :  { %1141 = vmatpush.bf16.msra.mxu1 %v1457_v17 }
  0x92   :  { %1154 = vmatpush.bf16.msra.mxu2 %v1585_v18 }
  0x93   :  { %1167 = vmatpush.bf16.msra.mxu3 %v1713_v19  ;;  %1129 = vmatmul.bf16.vlgmr.msra.gmra.mxu0 %v2175_v56 }
  0x94   :  { %1142 = vmatmul.bf16.vlgmr.msra.gmra.mxu1 %v2218_v15 }
  0x95   :  { %1155 = vmatmul.bf16.vlgmr.msra.gmra.mxu2 %v2220_v16 }
  0x96   :  { %1765 = vmatmul.msk.bf16.vlgmr.msra.gmra.mxu3 %vm909_vm0, %v2293_v51 }
  0xa4   :  { %v922_v22 = vpop.f32.mrf.mxu0 }
  0xa5   :  { %v935_v23 = vpop.f32.mrf.mxu1  ;;  %v923_v24 = vadd.f32 %v922_v22, %v164_v21 }
  0xa7   :  { %v936_v26 = vadd.f32 %v935_v23, %v923_v24 }
  0xa8   :  { %v948_v28 = vpop.f32.mrf.mxu2 }
  0xa9   :  { %v961_v56 = vpop.f32.mrf.mxu3  ;;  %v949_v29 = vadd.f32 %v948_v28, %v936_v26 }
  0xab   :  { %v962_v15 = vadd.f32 %v961_v56, %v949_v29 }
  0xac   :  { %v924_v25 = vpop.f32.mrf.mxu0 }
  0xad   :  { %v937_v27 = vpop.f32.mrf.mxu1 }
  0xb0   :  { %v950_v32 = vpop.f32.mrf.mxu2 }
  0xb1   :  { %v963_v31 = vpop.f32.mrf.mxu3 }
  0xb4   :  { %v974_v30 = vpop.f32.mrf.mxu0 }
  0xb5   :  { %v975_v16 = vadd.f32 %v974_v30, %v962_v15 }
  0xb7   :  { %v1173_v51 = vmax.f32 %v975_v16, 0.0 }
  0xb9   :  { %1177 = vst [vmem:[%s2855_s3] sm:$0xff] %v1173_v51 }
  0xbc   :  { %v976_v33 = vpop.f32.mrf.mxu0 }
  0xc1   :  { %v987_v35 = vpop.f32.mrf.mxu1 }
  0xc2   :  { %v988_v36 = vadd.f32 %v987_v35, %v165_v34 }
  0xc8   :  { %v1000_v37 = vpop.f32.mrf.mxu2 }
  0xc9   :  { %v1013_v38 = vpop.f32.mrf.mxu3  ;;  %v989_v39 = vpop.f32.mrf.mxu1  ;;  %v1001_v40 = vadd.f32 %v1000_v37, %v988_v36 }
  0xcb   :  { %v1014_v41 = vadd.f32 %v1013_v38, %v1001_v40 }
  0xd0   :  { %v1026_v42 = vpop.f32.mrf.mxu0  ;;  %v1002_v44 = vpop.f32.mrf.mxu2 }
  0xd1   :  { %v1027_v43 = vadd.f32 %v1026_v42, %v1014_v41  ;;  %v1015_v45 = vpop.f32.mrf.mxu3  ;;  %v1039_v46 = vpop.f32.mrf.mxu1 }
  0xd3   :  { %v1040_v47 = vadd.f32 %v1039_v46, %v1027_v43 }
  0xd5   :  { %v1174_v48 = vmax.f32 %v1040_v47, 0.0 }
  0xd7   :  { %1178 = vst [vmem:[%s2855_s3 + $0x8] sm:$0xff] %v1174_v48 }
  0xd8   :  { %v1028_v49 = vpop.f32.mrf.mxu0 }
  0xd9   :  { %v1041_v50 = vpop.f32.mrf.mxu1 }
  0xe8   :  { %v1052_v53 = vpop.f32.mrf.mxu2 }
  0xe9   :  { %v1065_v54 = vpop.f32.mrf.mxu3  ;;  %v1053_v57 = vadd.f32 %v1052_v53, %v166_v52 }
  0xeb   :  { %v1066_v58 = vadd.f32 %v1065_v54, %v1053_v57 }
  0xf0   :  { %v1054_v59 = vpop.f32.mrf.mxu2  ;;  %v1078_v60 = vpop.f32.mrf.mxu0 }
  0xf1   :  { %v1067_v61 = vpop.f32.mrf.mxu3  ;;  %v1091_v62 = vpop.f32.mrf.mxu1  ;;  %v1079_v63 = vadd.f32 %v1078_v60, %v1066_v58 }
  0xf3   :  { %v1092_v0 = vadd.f32 %v1091_v62, %v1079_v63 }
  0xf8   :  { %v1080_v1 = vpop.f32.mrf.mxu0  ;;  %v1104_v3 = vpop.f32.mrf.mxu2 }
  0xf9   :  { %v1093_v2 = vpop.f32.mrf.mxu1  ;;  %v1105_v4 = vadd.f32 %v1104_v3, %v1092_v0 }
  0xfb   :  { %v1175_v5 = vmax.f32 %v1105_v4, 0.0 }
  0xfd   :  { %1179 = vst [vmem:[%s2855_s3 + $0x10] sm:$0xff] %v1175_v5 }
 0x100   :  { %v1106_v6 = vpop.f32.mrf.mxu2 }
 0x109   :  { %v1117_v55 = vpop.f32.mrf.mxu3 }
 0x10a   :  { %v1118_v8 = vadd.f32 %v1117_v55, %v167_v7 }
 0x110   :  { %v1130_v9 = vpop.f32.mrf.mxu0 }
 0x111   :  { %v1143_v10 = vpop.f32.mrf.mxu1  ;;  %v1131_v11 = vadd.f32 %v1130_v9, %v1118_v8  ;;  %v1119_v12 = vpop.f32.mrf.mxu3 }
 0x113   :  { %v1144_v13 = vadd.f32 %v1143_v10, %v1131_v11 }
 0x118   :  { %v1156_v14 = vpop.f32.mrf.mxu2  ;;  %v1132_v18 = vpop.f32.mrf.mxu0 }
 0x119   :  { %v1157_v17 = vadd.f32 %v1156_v14, %v1144_v13  ;;  %v1145_v19 = vpop.f32.mrf.mxu1  ;;  %v1169_v21 = vpop.f32.mrf.mxu3 }
 0x11b   :  { %v1170_v22 = vadd.f32 %v1169_v21, %v1157_v17 }
 0x11d   :  { %v1176_v23 = vmax.f32 %v1170_v22, 0.0 }
 0x11f   :  { %1181 = vst.msk [vmem:[%s2855_s3 + $0x18] sm:$0xff] %vm1180_vm1, %v1176_v23 }
 0x120   :  { %v1158_v24 = vpop.f32.mrf.mxu2 }
 0x121   :  { %v1171_v20 = vpop.f32.mrf.mxu3 }

// kernel: cnn_forward.9
= control target key start
LH: loop header
LB: loop body
LE: loop exit
PB: predicated region body
PF: predicated region fallthrough
CT: control target
= control target key end

     0   :  { %vm282_vm0 = vcmask 1041408   ;;  %vm278_vm1 = vcmask 949248   ;;  %vm338_vm2 = vcmask 80896   ;;  %s635_s1 = inlined_call_operand.vmem [shape: bf16[500,10], index: 1, kind: input, shape index: {}]   ;;  %s636_s2 = inlined_call_operand.vmem [shape: f32[1,10], index: 2, kind: input, shape index: {}]   ;;  %s637_s0 = inlined_call_operand.vmem [shape: f32[8,500], index: 0, kind: input, shape index: {}]   ;;  %s638_s3 = inlined_call_operand.vmem [shape: f32[8,10], index: 3, kind: output, shape index: {}]  }
   0x1   :  { %v476_v0 = vld [vmem:[%s635_s1 + $0x38] sm:$0xff]  ;;  %v475_v5 = vld [vmem:[%s635_s1 + $0x30] sm:$0xff]  ;;  %v474_v10 = vld [vmem:[%s635_s1 + $0x28] sm:$0xff] }
   0x2   :  { %v492_v1 = vld [vmem:[%s635_s1 + $0xb8] sm:$0xff]  ;;  %286 = vmatpush.bf16.msra.mxu0 %v476_v0  ;;  %v491_v6 = vld [vmem:[%s635_s1 + $0xb0] sm:$0xff]  ;;  %v490_v11 = vld [vmem:[%s635_s1 + $0xa8] sm:$0xff] }
   0x3   :  { %v484_v2 = vld [vmem:[%s635_s1 + $0x78] sm:$0xff]  ;;  %312 = vmatpush.bf16.msra.mxu2 %v492_v1  ;;  %v483_v7 = vld [vmem:[%s635_s1 + $0x70] sm:$0xff]  ;;  %v482_v13 = vld [vmem:[%s635_s1 + $0x68] sm:$0xff] }
   0x4   :  { %v84_v3 = vld [vmem:[%s635_s1 + $0xf8] sm:$0x3]  ;;  %299 = vmatpush.bf16.msra.mxu1 %v484_v2  ;;  %v499_v12 = vld [vmem:[%s635_s1 + $0xf0] sm:$0xff]  ;;  %v473_v14 = vld [vmem:[%s635_s1 + $0x20] sm:$0xff] }
   0x5   :  { %v214_v4 = vunpack.c.l.b16 %v84_v3  ;;  %v489_v15 = vld [vmem:[%s635_s1 + $0xa0] sm:$0xff]  ;;  %v498_v16 = vld [vmem:[%s635_s1 + $0xe8] sm:$0xff]  ;;  %v472_v18 = vld [vmem:[%s635_s1 + $0x18] sm:$0xff] }
   0x6   :  { %287 = vmatpush.bf16.msra.mxu0 %v475_v5  ;;  %v481_v17 = vld [vmem:[%s635_s1 + $0x60] sm:$0xff]  ;;  %v488_v19 = vld [vmem:[%s635_s1 + $0x98] sm:$0xff]  ;;  %v471_v22 = vld [vmem:[%s635_s1 + $0x10] sm:$0xff] }
   0x7   :  { %v246_v8 = vpack.c.b16 %v214_v4, %v214_v4  ;;  %313 = vmatpush.bf16.msra.mxu2 %v491_v6  ;;  %v497_v20 = vld [vmem:[%s635_s1 + $0xe0] sm:$0xff]  ;;  %v480_v21 = vld [vmem:[%s635_s1 + $0x58] sm:$0xff]  ;;  %v487_v23 = vld [vmem:[%s635_s1 + $0x90] sm:$0xff] }
   0x8   :  { %300 = vmatpush.bf16.msra.mxu1 %v483_v7  ;;  %v496_v24 = vld [vmem:[%s635_s1 + $0xd8] sm:$0xff]  ;;  %v479_v25 = vld [vmem:[%s635_s1 + $0x50] sm:$0xff]  ;;  %v470_v26 = vld [vmem:[%s635_s1 + $0x8] sm:$0xff] }
   0x9   :  { %v284_v9 = vsel %vm282_vm0, %v246_v8, 0  ;;  %v486_v27 = vld [vmem:[%s635_s1 + $0x88] sm:$0xff]  ;;  %v495_v28 = vld [vmem:[%s635_s1 + $0xd0] sm:$0xff]  ;;  %v469_v30 = vld [vmem:[%s635_s1] sm:$0xff] }
   0xa   :  { %325 = vmatpush.bf16.msra.mxu3 %v284_v9  ;;  %288 = vmatpush.bf16.msra.mxu0 %v474_v10  ;;  %v478_v29 = vld [vmem:[%s635_s1 + $0x48] sm:$0xff]  ;;  %v485_v31 = vld [vmem:[%s635_s1 + $0x80] sm:$0xff]  ;;  %v16_v33 = vld [vmem:[%s637_s0 + $0x10] sm:$0xff] }
   0xb   :  { %314 = vmatpush.bf16.msra.mxu2 %v490_v11  ;;  %v14_v32 = vld [vmem:[%s637_s0] sm:$0xff]  ;;  %v494_v34 = vld [vmem:[%s635_s1 + $0xc8] sm:$0xff]  ;;  %v20_v38 = vpack.c.bf16 %v16_v33, %v16_v33  ;;  %v17_v41 = vld [vmem:[%s637_s0 + $0x18] sm:$0xff] }
   0xc   :  { %301 = vmatpush.bf16.msra.mxu1 %v482_v13  ;;  %v477_v35 = vld [vmem:[%s635_s1 + $0x40] sm:$0xff]  ;;  %v15_v36 = vld [vmem:[%s637_s0 + $0x8] sm:$0xff]  ;;  %v18_v37 = vpack.c.bf16 %v14_v32, %v14_v32  ;;  %v21_v42 = vpack.c.bf16 %v17_v41, %v17_v41 }
   0xd   :  { %v19_v39 = vpack.c.bf16 %v15_v36, %v15_v36  ;;  %v493_v40 = vld [vmem:[%s635_s1 + $0xc0] sm:$0xff] }
   0xe   :  { %326 = vmatpush.bf16.msra.mxu3 %v499_v12  ;;  %289 = vmatpush.bf16.msra.mxu0 %v473_v14  ;;  %v500_v43 = vld [vmem:[%s636_s2] ss:$0 sm:$0xff] }
   0xf   :  { %315 = vmatpush.bf16.msra.mxu2 %v489_v15 }
  0x10   :  { %302 = vmatpush.bf16.msra.mxu1 %v481_v17 }
  0x12   :  { %327 = vmatpush.bf16.msra.mxu3 %v498_v16  ;;  %290 = vmatpush.bf16.msra.mxu0 %v472_v18 }
  0x13   :  { %316 = vmatpush.bf16.msra.mxu2 %v488_v19 }
  0x14   :  { %303 = vmatpush.bf16.msra.mxu1 %v480_v21 }
  0x16   :  { %328 = vmatpush.bf16.msra.mxu3 %v497_v20  ;;  %291 = vmatpush.bf16.msra.mxu0 %v471_v22 }
  0x17   :  { %317 = vmatpush.bf16.msra.mxu2 %v487_v23 }
  0x18   :  { %304 = vmatpush.bf16.msra.mxu1 %v479_v25 }
  0x1a   :  { %329 = vmatpush.bf16.msra.mxu3 %v496_v24  ;;  %292 = vmatpush.bf16.msra.mxu0 %v470_v26 }
  0x1b   :  { %318 = vmatpush.bf16.msra.mxu2 %v486_v27 }
  0x1c   :  { %305 = vmatpush.bf16.msra.mxu1 %v478_v29 }
  0x1e   :  { %330 = vmatpush.bf16.msra.mxu3 %v495_v28  ;;  %293 = vmatpush.bf16.msra.mxu0 %v469_v30 }
  0x1f   :  { %319 = vmatpush.bf16.msra.mxu2 %v485_v31 }
  0x20   :  { %306 = vmatpush.bf16.msra.mxu1 %v477_v35 }
  0x21   :  { %294 = vmatmul.bf16.vlgmr.msra.gmra.mxu0 %v18_v37 }
  0x22   :  { %331 = vmatpush.bf16.msra.mxu3 %v494_v34  ;;  %320 = vmatmul.bf16.vlgmr.msra.gmra.mxu2 %v20_v38 }
  0x23   :  { %307 = vmatmul.bf16.vlgmr.msra.gmra.mxu1 %v19_v39 }
  0x26   :  { %332 = vmatpush.bf16.msra.mxu3 %v493_v40 }
  0x29   :  { %468 = vmatmul.msk.bf16.vlgmr.msra.gmra.mxu3 %vm278_vm1, %v21_v42 }
  0x9e   :  { %v295_v44 = vpop.f32.mrf.mxu0 }
  0x9f   :  { %v296_v45 = vadd.f32 %v500_v43, %v295_v44 }
  0xa0   :  { %v308_v46 = vpop.f32.mrf.mxu1 }
  0xa1   :  { %v309_v47 = vadd.f32 %v308_v46, %v296_v45 }
  0xa5   :  { %v321_v48 = vpop.f32.mrf.mxu2 }
  0xa6   :  { %v322_v49 = vadd.f32 %v321_v48, %v309_v47  ;;  %v297_v50 = vpop.f32.mrf.mxu0 }
  0xa8   :  { %v310_v51 = vpop.f32.mrf.mxu1 }
  0xac   :  { %v334_v52 = vpop.f32.mrf.mxu3 }
  0xad   :  { %v335_v53 = vadd.f32 %v334_v52, %v322_v49  ;;  %v323_v54 = vpop.f32.mrf.mxu2 }
  0xaf   :  { %339 = vst.msk [vmem:[%s638_s3] sm:$0xff] %vm338_vm2, %v335_v53 }
  0xb4   :  { %v336_v55 = vpop.f32.mrf.mxu3 }

</bundles_post_ra>
